<compile_context>
chip_gen: v7x
topology: tpu7x:2x2x1
jax: 0.10.0
libtpu: 0.0.40
codegen_flags: <defaults>
</compile_context>

<pallas_src>
import jax
import jax.numpy as jnp
from jax import lax
from jax.experimental import pallas as pl
from jax.experimental.pallas import tpu as pltpu


def _make_bilstm_call(B, T, H, W, hid, k, mxu_dtype):
    """Fused bidirectional ConvLSTM recurrence.

    grid = (direction, time).  The direction axis is "parallel" (v7x: one
    TensorCore per direction); the time axis is "arbitrary" (sequential), with
    the h/c state carried across steps in VMEM scratch.
    """
    p = k // 2
    N = B * H * W
    KKH = k * k * hid

    def kernel(gx_ref, wh_ref, out_ref, c_ref, hcol_ref):
        t = pl.program_id(1)

        # (Re)initialise the recurrent state at the first step of each
        # direction.
        @pl.when(t == 0)
        def _():
            c_ref[...] = jnp.zeros_like(c_ref)       # f32 cell state
            hcol_ref[...] = jnp.zeros_like(hcol_ref)  # bf16 im2col h state

        # gates = gx_t (precomputed conv(x_t, W_x) + bias, h-independent)
        #       + conv(h_{t-1}, W_h) as ONE fused MXU matmul: hcol already
        #         holds h_{t-1} in bf16 im2col form, so K = k*k*hid (288).
        hcol = hcol_ref[...].reshape(N, KKH)          # bf16, no cast needed
        gates = gx_ref[...].reshape(N, 4 * hid) + jnp.dot(
            hcol, wh_ref[...], preferred_element_type=jnp.float32)

        # Gate columns were reordered wrapper-side to [i, f, o, g]:
        # one contiguous 96-lane sigmoid + one 32-lane tanh.
        # TODO(synk): if the bundle dump shows the (N,128) f32 intermediates
        # spilling, process this epilogue in M-row chunks.
        sig = jax.nn.sigmoid(gates[:, :3 * hid])
        g_g = jnp.tanh(gates[:, 3 * hid:])
        i_g = sig[:, 0:hid]
        f_g = sig[:, hid:2 * hid]
        o_g = sig[:, 2 * hid:3 * hid]

        c_next = f_g * c_ref[...] + i_g * g_g
        h_next = o_g * jnp.tanh(c_next)
        c_ref[...] = c_next

        h4 = h_next.reshape(B, H, W, hid)
        # TODO(synk): a transpose-free / lane-dense output layout would save
        # the wrapper's final permute; kept as the proven (B,T,2,H,W,hid)
        # layout for robust lowering (fix after the recurrent path).
        out_ref[...] = h4.astype(out_ref.dtype)

        # ---- Fused im2col state update for step t+1: build the full
        # (B, H, W, k*k*hid) slab of zero-padded shifted copies of h_t in
        # registers (cheap sublane / outer-dim concats) and write it with ONE
        # dense store, instead of 9 lane-misaligned masked scatter writes.
        h4b = h4.astype(hcol_ref.dtype)               # single (N, hid) cast
        zcol = lambda w_: jnp.zeros((B, H, w_, hid), hcol_ref.dtype)
        zrow = lambda h_: jnp.zeros((B, h_, W, k * hid), hcol_ref.dtype)

        # x-shifted copies: tap dx reads h[..., x + dx - p] (zero outside).
        xs = []
        for dx in range(k):
            off = dx - p
            if off < 0:
                xs.append(jnp.concatenate(
                    [zcol(-off), h4b[:, :, :W + off, :]], axis=2))
            elif off > 0:
                xs.append(jnp.concatenate(
                    [h4b[:, :, off:, :], zcol(off)], axis=2))
            else:
                xs.append(h4b)
        row_slab = jnp.concatenate(xs, axis=-1)       # (B, H, W, k*hid)

        # y-shifted copies: tap dy reads h[y + dy - p, ...] (zero outside).
        ys = []
        for dy in range(k):
            off = dy - p
            if off < 0:
                ys.append(jnp.concatenate(
                    [zrow(-off), row_slab[:, :H + off]], axis=1))
            elif off > 0:
                ys.append(jnp.concatenate(
                    [row_slab[:, off:], zrow(off)], axis=1))
            else:
                ys.append(row_slab)
        hcol_ref[...] = jnp.concatenate(ys, axis=-1)  # (B, H, W, k*k*hid)

    def time_index(d, t):
        # forward direction (d == 0) walks t; backward (d == 1) walks T-1-t.
        return t + d * (T - 1 - 2 * t)

    gx_spec = pl.BlockSpec((B, None, H, W, 4 * hid),
                           lambda d, t: (0, time_index(d, t), 0, 0, d))
    wh_spec = pl.BlockSpec((None, KKH, 4 * hid), lambda d, t: (d, 0, 0))
    out_spec = pl.BlockSpec((B, None, None, H, W, hid),
                            lambda d, t: (0, time_index(d, t), d, 0, 0, 0))

    return pl.pallas_call(
        kernel,
        out_shape=jax.ShapeDtypeStruct((B, T, 2, H, W, hid), jnp.float32),
        grid_spec=pltpu.PrefetchScalarGridSpec(
            num_scalar_prefetch=0,
            grid=(2, T),
            in_specs=[gx_spec, wh_spec],
            out_specs=out_spec,
            scratch_shapes=[
                pltpu.VMEM((N, hid), jnp.float32),      # c state (f32)
                pltpu.VMEM((B, H, W, KKH), mxu_dtype),  # h state, bf16 im2col
            ],
        ),
        # v7x: the two directions can land on the two TensorCores; time stays
        # sequential with carried scratch (reinit at t == 0 of each direction).
        # NOTE: when scaling B/H/W, add a batch-block grid axis and set
        # vmem_limit_bytes explicitly (v7x has 64 MiB of VMEM); at this size
        # the default scoped limit is ample (~1 MiB used).
        compiler_params=pltpu.CompilerParams(
            dimension_semantics=("parallel", "arbitrary")),
    )


def _reorder_ifgo_to_ifog(w, b, hid):
    """torch Conv2d gate order [i, f, g, o] -> kernel order [i, f, o, g]."""
    wi, wf, wg, wo = jnp.split(w, 4, axis=0)
    bi, bf, bg, bo = jnp.split(b, 4, axis=0)
    return (jnp.concatenate([wi, wf, wo, wg], axis=0),
            jnp.concatenate([bi, bf, bo, bg], axis=0))


def conv_bilstm(x, w_f, b_f, w_b, b_b, hidden_channels, kernel_size,
                mxu_dtype=jnp.bfloat16):
    """Pallas ConvBiLSTM.forward.

    x: [B, T, H, W, C] float32.
    w_*: torch Conv2d weight layout (4*hid, C+hid, k, k); b_*: (4*hid,).
    """
    B, T, H, W, C = x.shape
    hid, k = hidden_channels, kernel_size
    xf = x.astype(jnp.float32)

    # Reorder gate columns to [i, f, o, g] (pure wrapper-side permutation).
    w_f_r, b_f_r = _reorder_ifgo_to_ifog(w_f, b_f, hid)
    w_b_r, b_b_r = _reorder_ifgo_to_ifog(w_b, b_b, hid)

    # ---- Hoisted, h-independent half of the gate conv: conv(x, W_x) + bias,
    # both directions fused into one 256-wide-output conv over all (B, T)
    # (one big parallel GEMM; bias folded in here).  Kept in f32 to preserve
    # gate-preactivation precision. ----
    w_all = jnp.concatenate([w_f_r, w_b_r], axis=0)             # (8*hid, C+hid, k, k)
    wx_all = jnp.transpose(w_all[:, :C], (2, 3, 1, 0))          # HWIO (k, k, C, 8*hid)
    b_all = jnp.concatenate([b_f_r, b_b_r], axis=0)             # (8*hid,)
    gx = lax.conv_general_dilated(
        xf.reshape(B * T, H, W, C), wx_all.astype(jnp.float32),
        window_strides=(1, 1), padding="SAME",
        dimension_numbers=("NHWC", "HWIO", "NHWC"))
    gx = (gx + b_all[None, None, None, :].astype(jnp.float32)
          ).reshape(B, T, H, W, 8 * hid)

    # ---- h-part of the conv weights, flattened to (k*k*hid, 4*hid) for the
    # fused per-step matmul; cast to bf16 for the MXU (f32 accumulate). ----
    def wh_flat(w):
        w_hwio = jnp.transpose(w[:, C:], (2, 3, 1, 0))          # (k, k, hid, 4*hid)
        return w_hwio.reshape(k * k * hid, 4 * hid)

    wh = jnp.stack([wh_flat(w_f_r), wh_flat(w_b_r)], axis=0).astype(mxu_dtype)

    out = _make_bilstm_call(B, T, H, W, hid, k, mxu_dtype)(gx, wh)
    # (B, T, 2, H, W, hid) -> concat(fwd, bwd) on the channel axis.
    return out.transpose(0, 1, 3, 4, 2, 5).reshape(B, T, H, W, 2 * hid)


# --------------------- pure-JAX reference (for validation) ---------------------
def ref_conv_bilstm(x, w_f, b_f, w_b, b_b, hid, k, mxu_dtype=jnp.bfloat16):
    """Mirrors the kernel's numerics policy: h-conv MXU operands in bf16,
    f32 accumulation, everything else f32.  Uses torch's [i, f, g, o] order."""
    B, T, H, W, C = x.shape
    p = k // 2

    def direction(w, b, reverse):
        w_hwio = jnp.transpose(w, (2, 3, 1, 0)).astype(jnp.float32)  # (k,k,C+hid,4h)
        wx = w_hwio[:, :, :C, :]
        wh = w_hwio[:, :, C:, :].astype(mxu_dtype)
        h = jnp.zeros((B, H, W, hid), jnp.float32)
        c = jnp.zeros((B, H, W, hid), jnp.float32)
        outs = {}
        order = range(T - 1, -1, -1) if reverse else range(T)
        for t in order:
            px = jnp.pad(x[:, t].astype(jnp.float32),
                         ((0, 0), (p, p), (p, p), (0, 0)))
            ph = jnp.pad(h, ((0, 0), (p, p), (p, p), (0, 0))).astype(mxu_dtype)
            gates = jnp.broadcast_to(b.reshape(1, 1, 1, 4 * hid),
                                     (B, H, W, 4 * hid)).astype(jnp.float32)
            for dy in range(k):
                for dx in range(k):
                    gates = gates + jnp.einsum(
                        'bhwc,co->bhwo', px[:, dy:dy + H, dx:dx + W, :], wx[dy, dx],
                        preferred_element_type=jnp.float32)
                    gates = gates + jnp.einsum(
                        'bhwc,co->bhwo', ph[:, dy:dy + H, dx:dx + W, :], wh[dy, dx],
                        preferred_element_type=jnp.float32)
            i_g = jax.nn.sigmoid(gates[..., :hid])
            f_g = jax.nn.sigmoid(gates[..., hid:2 * hid])
            g_g = jnp.tanh(gates[..., 2 * hid:3 * hid])
            o_g = jax.nn.sigmoid(gates[..., 3 * hid:])
            c = f_g * c + i_g * g_g
            h = o_g * jnp.tanh(c)
            outs[t] = h
        return jnp.stack([outs[t] for t in range(T)], axis=1)

    hf = direction(w_f, b_f, reverse=False)
    hb = direction(w_b, b_b, reverse=True)
    return jnp.concatenate([hf, hb], axis=-1)


if __name__ == "__main__":
    key = jax.random.PRNGKey(0)
    B, T, H, W, C = 2, 8, 16, 16, 4
    hid, k = 32, 3

    ks = jax.random.split(key, 5)
    x = jax.random.normal(ks[0], (B, T, H, W, C), jnp.float32)
    # torch Conv2d parameter layout: weight (4*hid, C+hid, k, k), bias (4*hid,)
    w_f = 0.1 * jax.random.normal(ks[1], (4 * hid, C + hid, k, k), jnp.float32)
    b_f = 0.1 * jax.random.normal(ks[2], (4 * hid,), jnp.float32)
    w_b = 0.1 * jax.random.normal(ks[3], (4 * hid, C + hid, k, k), jnp.float32)
    b_b = 0.1 * jax.random.normal(ks[4], (4 * hid,), jnp.float32)

    out = conv_bilstm(x, w_f, b_f, w_b, b_b, hid, k)
    out = jax.block_until_ready(out)
    assert out.shape == (B, T, H, W, 2 * hid), out.shape

    ref = ref_conv_bilstm(x, w_f, b_f, w_b, b_b, hid, k)
    err = float(jnp.max(jnp.abs(out - ref)))
    if err > 5e-3:
        raise AssertionError(f"kernel/reference mismatch: max abs err = {err}")
    print("KERNEL_OK")
</pallas_src>

<mosaic_0001>
module attributes {stable_mosaic.version = 11 : i64} {
  func.func @kernel(%arg0: i32, %arg1: i32, %arg2: memref<2x1x16x16x128xf32, #tpu.memory_space<vmem>>, %arg3: memref<1x288x128xbf16, #tpu.memory_space<vmem>>, %arg4: memref<2x1x1x16x16x32xf32, #tpu.memory_space<vmem>>, %arg5: memref<512x32xf32, #tpu.memory_space<vmem>>, %arg6: memref<2x16x16x288xbf16, #tpu.memory_space<vmem>>) attributes {dimension_semantics = [#tpu.dimension_semantics<parallel>, #tpu.dimension_semantics<arbitrary>], iteration_bounds = array<i64: 2, 8>, scalar_prefetch = 0 : i64, scratch_operands = 2 : i64, tpu.core_type = #tpu.core_type<tc>, window_params = [{transform_indices = @transform_0, window_bounds = array<i64: 2, 1, 16, 16, 128>}, {transform_indices = @transform_1, window_bounds = array<i64: 1, 288, 128>}, {transform_indices = @transform_2, window_bounds = array<i64: 2, 1, 1, 16, 16, 32>}]} {
    %c0_i32 = arith.constant 0 : i32
    %0 = arith.cmpi eq, %arg1, %c0_i32 : i32
    %1 = arith.extui %0 : i1 to i32
    %c0_i32_0 = arith.constant 0 : i32
    %2 = arith.cmpi ne, %1, %c0_i32_0 : i32
    scf.if %2 {
      %cst_31 = arith.constant 0.000000e+00 : f32
      %50 = vector.broadcast %cst_31 : f32 to vector<512x32xf32>
      %c0_32 = arith.constant 0 : index
      %c0_33 = arith.constant 0 : index
      %51 = vector.load %arg5[%c0_32, %c0_33] : memref<512x32xf32, #tpu.memory_space<vmem>>, vector<512x32xf32>
      tpu.vector_store %arg5[%c0_32, %c0_33], %50 {strides = array<i32>} : memref<512x32xf32, #tpu.memory_space<vmem>>, vector<512x32xf32>,
      %cst_34 = arith.constant 0.000000e+00 : bf16
      %52 = vector.broadcast %cst_34 : bf16 to vector<2x16x16x288xbf16>
      %c0_35 = arith.constant 0 : index
      %c0_36 = arith.constant 0 : index
      %c0_37 = arith.constant 0 : index
      %c0_38 = arith.constant 0 : index
      %53 = vector.load %arg6[%c0_35, %c0_36, %c0_37, %c0_38] : memref<2x16x16x288xbf16, #tpu.memory_space<vmem>>, vector<2x16x16x288xbf16>
      tpu.vector_store %arg6[%c0_35, %c0_36, %c0_37, %c0_38], %52 {strides = array<i32>} : memref<2x16x16x288xbf16, #tpu.memory_space<vmem>>, vector<2x16x16x288xbf16>,
    } else {
    }
    %c0 = arith.constant 0 : index
    %c0_1 = arith.constant 0 : index
    %c0_2 = arith.constant 0 : index
    %c0_3 = arith.constant 0 : index
    %3 = vector.load %arg6[%c0, %c0_1, %c0_2, %c0_3] : memref<2x16x16x288xbf16, #tpu.memory_space<vmem>>, vector<2x16x16x288xbf16>
    %4 = vector.shape_cast %3 : vector<2x16x16x288xbf16> to vector<512x288xbf16>
    %c0_4 = arith.constant 0 : index
    %c0_5 = arith.constant 0 : index
    %c0_6 = arith.constant 0 : index
    %c0_7 = arith.constant 0 : index
    %c0_8 = arith.constant 0 : index
    %5 = vector.load %arg2[%c0_4, %c0_5, %c0_6, %c0_7, %c0_8] : memref<2x1x16x16x128xf32, #tpu.memory_space<vmem>>, vector<2x1x16x16x128xf32>
    %6 = vector.shape_cast %5 : vector<2x1x16x16x128xf32> to vector<2x16x16x128xf32>
    %7 = vector.shape_cast %6 : vector<2x16x16x128xf32> to vector<512x128xf32>
    %c0_9 = arith.constant 0 : index
    %c0_10 = arith.constant 0 : index
    %c0_11 = arith.constant 0 : index
    %8 = vector.load %arg3[%c0_9, %c0_10, %c0_11] : memref<1x288x128xbf16, #tpu.memory_space<vmem>>, vector<1x288x128xbf16>
    %9 = vector.shape_cast %8 : vector<1x288x128xbf16> to vector<288x128xbf16>
    %cst = arith.constant dense<0.000000e+00> : vector<512x128xf32>
    %10 = tpu.matmul %4, %9, %cst {dimension_numbers = #tpu.dot_dimension_numbers<[1], [0], [0], [1], [0, 0, 1, 1], [], []>} : vector<512x288xbf16>, vector<288x128xbf16>, vector<512x128xf32> -> vector<512x128xf32>
    %11 = arith.addf %7, %10 : vector<512x128xf32>
    %12 = vector.extract_strided_slice %11 {offsets = [0, 0], sizes = [512, 96], strides = [1, 1]} : vector<512x128xf32> to vector<512x96xf32>
    %13 = arith.negf %12 : vector<512x96xf32>
    %14 = math.exp %13 : vector<512x96xf32>
    %cst_12 = arith.constant 1.000000e+00 : f32
    %15 = vector.broadcast %cst_12 : f32 to vector<512x96xf32>
    %16 = arith.addf %15, %14 : vector<512x96xf32>
    %17 = arith.divf %15, %16 : vector<512x96xf32>
    %18 = vector.extract_strided_slice %11 {offsets = [0, 96], sizes = [512, 32], strides = [1, 1]} : vector<512x128xf32> to vector<512x32xf32>
    %19 = math.tanh %18 : vector<512x32xf32>
    %20 = vector.extract_strided_slice %17 {offsets = [0, 0], sizes = [512, 32], strides = [1, 1]} : vector<512x96xf32> to vector<512x32xf32>
    %21 = vector.extract_strided_slice %17 {offsets = [0, 32], sizes = [512, 32], strides = [1, 1]} : vector<512x96xf32> to vector<512x32xf32>
    %22 = vector.extract_strided_slice %17 {offsets = [0, 64], sizes = [512, 32], strides = [1, 1]} : vector<512x96xf32> to vector<512x32xf32>
    %c0_13 = arith.constant 0 : index
    %c0_14 = arith.constant 0 : index
    %23 = vector.load %arg5[%c0_13, %c0_14] : memref<512x32xf32, #tpu.memory_space<vmem>>, vector<512x32xf32>
    %24 = arith.mulf %21, %23 : vector<512x32xf32>
    %25 = arith.mulf %20, %19 : vector<512x32xf32>
    %26 = arith.addf %24, %25 : vector<512x32xf32>
    %27 = math.tanh %26 : vector<512x32xf32>
    %28 = arith.mulf %22, %27 : vector<512x32xf32>
    %c0_15 = arith.constant 0 : index
    %c0_16 = arith.constant 0 : index
    %29 = vector.load %arg5[%c0_15, %c0_16] : memref<512x32xf32, #tpu.memory_space<vmem>>, vector<512x32xf32>
    tpu.vector_store %arg5[%c0_15, %c0_16], %26 {strides = array<i32>} : memref<512x32xf32, #tpu.memory_space<vmem>>, vector<512x32xf32>,
    %30 = vector.shape_cast %28 : vector<512x32xf32> to vector<2x16x16x32xf32>
    %c0_17 = arith.constant 0 : index
    %c0_18 = arith.constant 0 : index
    %c0_19 = arith.constant 0 : index
    %c0_20 = arith.constant 0 : index
    %c0_21 = arith.constant 0 : index
    %c0_22 = arith.constant 0 : index
    %31 = vector.load %arg4[%c0_17, %c0_18, %c0_19, %c0_20, %c0_21, %c0_22] : memref<2x1x1x16x16x32xf32, #tpu.memory_space<vmem>>, vector<2x1x1x16x16x32xf32>
    %32 = vector.shape_cast %31 : vector<2x1x1x16x16x32xf32> to vector<2x16x16x32xf32>
    %33 = vector.shape_cast %30 : vector<2x16x16x32xf32> to vector<2x1x1x16x16x32xf32>
    tpu.vector_store %arg4[%c0_17, %c0_18, %c0_19, %c0_20, %c0_21, %c0_22], %33 {strides = array<i32>} : memref<2x1x1x16x16x32xf32, #tpu.memory_space<vmem>>, vector<2x1x1x16x16x32xf32>,
    %34 = arith.truncf %30 : vector<2x16x16x32xf32> to vector<2x16x16x32xbf16>
    %cst_23 = arith.constant 0.000000e+00 : bf16
    %35 = vector.broadcast %cst_23 : bf16 to vector<2x16x1x32xbf16>
    %36 = vector.extract_strided_slice %34 {offsets = [0, 0, 0, 0], sizes = [2, 16, 15, 32], strides = [1, 1, 1, 1]} : vector<2x16x16x32xbf16> to vector<2x16x15x32xbf16>
    %37 = tpu.concatenate %35, %36 in 2 : vector<2x16x1x32xbf16>, vector<2x16x15x32xbf16> -> vector<2x16x16x32xbf16>
    %38 = vector.extract_strided_slice %34 {offsets = [0, 0, 1, 0], sizes = [2, 16, 15, 32], strides = [1, 1, 1, 1]} : vector<2x16x16x32xbf16> to vector<2x16x15x32xbf16>
    %cst_24 = arith.constant 0.000000e+00 : bf16
    %39 = vector.broadcast %cst_24 : bf16 to vector<2x16x1x32xbf16>
    %40 = tpu.concatenate %38, %39 in 2 : vector<2x16x15x32xbf16>, vector<2x16x1x32xbf16> -> vector<2x16x16x32xbf16>
    %41 = tpu.concatenate %37, %34, %40 in 3 : vector<2x16x16x32xbf16>, vector<2x16x16x32xbf16>, vector<2x16x16x32xbf16> -> vector<2x16x16x96xbf16>
    %cst_25 = arith.constant 0.000000e+00 : bf16
    %42 = vector.broadcast %cst_25 : bf16 to vector<2x1x16x96xbf16>
    %43 = vector.extract_strided_slice %41 {offsets = [0, 0, 0, 0], sizes = [2, 15, 16, 96], strides = [1, 1, 1, 1]} : vector<2x16x16x96xbf16> to vector<2x15x16x96xbf16>
    %44 = tpu.concatenate %42, %43 in 1 : vector<2x1x16x96xbf16>, vector<2x15x16x96xbf16> -> vector<2x16x16x96xbf16>
    %45 = vector.extract_strided_slice %41 {offsets = [0, 1, 0, 0], sizes = [2, 15, 16, 96], strides = [1, 1, 1, 1]} : vector<2x16x16x96xbf16> to vector<2x15x16x96xbf16>
    %cst_26 = arith.constant 0.000000e+00 : bf16
    %46 = vector.broadcast %cst_26 : bf16 to vector<2x1x16x96xbf16>
    %47 = tpu.concatenate %45, %46 in 1 : vector<2x15x16x96xbf16>, vector<2x1x16x96xbf16> -> vector<2x16x16x96xbf16>
    %48 = tpu.concatenate %44, %41, %47 in 3 : vector<2x16x16x96xbf16>, vector<2x16x16x96xbf16>, vector<2x16x16x96xbf16> -> vector<2x16x16x288xbf16>
    %c0_27 = arith.constant 0 : index
    %c0_28 = arith.constant 0 : index
    %c0_29 = arith.constant 0 : index
    %c0_30 = arith.constant 0 : index
    %49 = vector.load %arg6[%c0_27, %c0_28, %c0_29, %c0_30] : memref<2x16x16x288xbf16, #tpu.memory_space<vmem>>, vector<2x16x16x288xbf16>
    tpu.vector_store %arg6[%c0_27, %c0_28, %c0_29, %c0_30], %48 {strides = array<i32>} : memref<2x16x16x288xbf16, #tpu.memory_space<vmem>>, vector<2x16x16x288xbf16>,
    return
  }
  func.func @transform_0(%arg0: i32, %arg1: i32) -> (i32, i32, i32, i32, i32) {
    %c2_i32 = arith.constant 2 : i32
    %0 = arith.muli %c2_i32, %arg1 : i32
    %c7_i32 = arith.constant 7 : i32
    %1 = arith.subi %c7_i32, %0 : i32
    %2 = arith.muli %arg0, %1 : i32
    %3 = arith.addi %arg1, %2 : i32
    %c0_i32 = arith.constant 0 : i32
    %c0_i32_0 = arith.constant 0 : i32
    %c0_i32_1 = arith.constant 0 : i32
    %c0_i32_2 = arith.constant 0 : i32
    return %c0_i32, %3, %c0_i32_0, %c0_i32_1, %arg0 : i32, i32, i32, i32, i32
  }
  func.func @transform_1(%arg0: i32, %arg1: i32) -> (i32, i32, i32) {
    %c0_i32 = arith.constant 0 : i32
    %c0_i32_0 = arith.constant 0 : i32
    %c0_i32_1 = arith.constant 0 : i32
    return %arg0, %c0_i32, %c0_i32_0 : i32, i32, i32
  }
  func.func @transform_2(%arg0: i32, %arg1: i32) -> (i32, i32, i32, i32, i32, i32) {
    %c2_i32 = arith.constant 2 : i32
    %0 = arith.muli %c2_i32, %arg1 : i32
    %c7_i32 = arith.constant 7 : i32
    %1 = arith.subi %c7_i32, %0 : i32
    %2 = arith.muli %arg0, %1 : i32
    %3 = arith.addi %arg1, %2 : i32
    %c0_i32 = arith.constant 0 : i32
    %c0_i32_0 = arith.constant 0 : i32
    %c0_i32_1 = arith.constant 0 : i32
    %c0_i32_2 = arith.constant 0 : i32
    %c0_i32_3 = arith.constant 0 : i32
    return %c0_i32, %3, %arg0, %c0_i32_0, %c0_i32_1, %c0_i32_2 : i32, i32, i32, i32, i32, i32
  }
}

</mosaic_0001>

<bundles_post_ra>
// kernel: tpu_custom_call.1
= control target key start
LH: loop header
LB: loop body
LE: loop exit
PB: predicated region body
PF: predicated region fallthrough
CT: control target
= control target key end

     0   :  { %s10751_s0 = inlined_call_operand.hbm [shape: f32[2,8,16,16,256], index: 0, kind: input, shape index: {}]   ;;  %s10752_s1 = inlined_call_operand.hbm [shape: bf16[2,288,128], index: 1, kind: input, shape index: {}]   ;;  %s10753_s2 = inlined_call_operand.hbm [shape: f32[2,8,2,16,16,32], index: 2, kind: output, shape index: {}]  }
   0x1   :  { %10932 = sst [smem:[#allocation134_spill]] %s10751_s0 }
   0x2   :  { %7 = vsyncpa [#allocation5], 0 }
   0x3   :  { %9 = vsyncpa [#allocation5 + $0x1], 0 }
   0x4   :  { %10 = vsyncpa [#allocation8], 0 }
   0x5   :  { %12 = vsyncpa [#allocation8 + $0x1], 0 }
   0x6   :  { %13 = vsyncpa [#allocation6], 0 }
   0x7   :  { %15 = vsyncpa [#allocation6 + $0x1], 0  ;;  %s6501_s9 = smov 0   ;;  %s6503_s10 = smov 0  }
   0x8   :  { %s6505_s11 = smov 0   ;;  %s6507_s12 = smov 0  }
   0x9   :  { %s6509_s13 = smov 0   ;;  %s6511_s14 = smov 0  }
   0xa   :  { %s6513_s15 = smov 0   ;;  %s6515_s16 = smov 0  }
   0xb   :  { %s6517_s17 = smov 0   ;;  %s6519_s18 = smov 0  }
   0xc   :  { %s6521_s19 = smov 0  }
   0xd LB: > { %10933 = sst [smem:[#allocation18_spill]] %s6441_s14  ;;  %s5394_s20 = sadd.s32 4294967295, %s6461_s19   ;;  %s6461_s19 = sphi %s6521_s19, %s21_s19   ;;  %s6457_s18 = sphi %s6519_s18, %s11399_s18   ;;  %s6453_s17 = sphi %s6517_s17, %s11391_s17   ;;  %s6449_s16 = sphi %s6515_s16, %s11398_s16   ;;  %s6445_s15 = sphi %s6513_s15, %s11390_s15   ;;  %s6441_s14 = sphi %s6511_s14, %s11389_s14   ;;  %s6437_s13 = sphi %s6509_s13, %s11397_s13   ;;  %s6433_s12 = sphi %s6507_s12, %s11396_s12   ;;  %s6429_s11 = sphi %s6505_s11, %s11395_s11   ;;  %s6425_s10 = sphi %s6503_s10, %s11394_s10   ;;  %s6421_s9 = sphi %s6501_s9, %s11393_s9  }
   0xe   : > { %10934 = sst [smem:[#allocation19_spill]] %s6453_s17  ;;  %s5395_s21 = sadd.s32 4294967294, %s6461_s19  }
   0xf   : > { %s30_s22 = sadd.s32 1, %s6453_s17  ;;  %s33_s23 = sadd.s32 1, %s6457_s18 }
  0x10   : > { %p31_p0 = scmp.ge.s32.totalorder %s30_s22, 8  ;;  %s5396_s24 = sshll.u32 %s6453_s17, 1 }
  0x11   : > { %s38_s25 = ssub.s32 7, %s5396_s24  ;;  %s50_s26 = sadd.s32 1, %s6441_s14 }
  0x12   : > { %s11401_s22 = smov (%p31_p0, %s30_s22), 0  ;;  %s11403_s23 = smov (!%p31_p0, %s33_s23), %s6457_s18 }
  0x13   : > { %10935 = sst [smem:[#allocation20_spill]] %s11401_s22  ;;  %s39_s27 = smul.u32 %s6457_s18, %s38_s25 }
  0x14   : > { %s5397_s28 = sshll.u32 %s11401_s22, 1  ;;  %p35_p1 = scmp.ge.s32.totalorder %s11403_s23, 2 }
  0x15   : > { %s42_s29 = ssub.s32 7, %s5397_s28  ;;  %s6568_s30 = sadd.s32 %s6453_s17, %s39_s27 }
  0x16   : > { %p57_p2 = scmp.ne.s32.totalorder %s6441_s14, %s6437_s13  ;;  %s11405_s23 = smov (%p35_p1, %s11403_s23), 0 }
  0x17   : > { %10936 = sst [smem:[#allocation21_spill]] %s11405_s23  ;;  %p58_p3 = scmp.eq.s32.totalorder %s6461_s19, 0 }
  0x18   : > { %p63_p4 = scmp.ne.s32.totalorder %s6437_s13, %s6433_s12  ;;  %s43_s3 = smul.u32 %s42_s29, %s11405_s23 }
  0x19   : > { %s46_s4 = ssub.s32 %s6457_s18, %s11405_s23  ;;  %p6585_p5 = por %p58_p3, %p57_p2 }
  0x1a   : > { %p6591_p6 = scmp.eq.s32.totalorder %s5394_s20, 0  ;;  %s44_s7 = sadd.s32 %s43_s3, %s11401_s22 }
  0x1b   : > { %p74_p7 = scmp.eq.s32.totalorder %s46_s4, 0  ;;  %s45_s8 = ssub.s32 %s6568_s30, %s44_s7 }
  0x1c   : > { %p6602_p8 = por %p6591_p6, %p63_p4  ;;  %s47_s25 = sor.u32 %s46_s4, %s45_s8 }
  0x1d   : > { %s76_s27 = sadd.s32 1, %s6429_s11  ;;  %p48_p9 = scmp.eq.s32.totalorder %s47_s25, 0 }
  0x1e   : > { %p83_p10 = scmp.ne.s32.totalorder %s6429_s11, %s6425_s10  ;;  %p89_p12 = scmp.ne.s32.totalorder %s6425_s10, %s6421_s9 }
  0x1f   : > { %s6610_s28 = scalar_select %p74_p7, %s6429_s11, %s76_s27  }
  0x20   : > { %s6613_s29 = scalar_select %p48_p9, %s6441_s14, %s50_s26  }
  0x21   : > { %10940 = sst [smem:[#allocation22_spill]] %s6610_s28  ;;  %p6617_p11 = por %p83_p10, %p58_p3 }
  0x22   : > { %10941 = sst [smem:[#allocation23_spill]] %s6613_s29  ;;  %p123_p13 = scmp.eq.s32.totalorder %s5394_s20, 15 }
  0x23   : > { %p129_p0 = scmp.eq.s32.totalorder %s5395_s21, 15  ;;  %p6629_p1 = por %p89_p12, %p6591_p6 }
  0x24   : > { %p6636_p7 = por %p123_p13, %p57_p2  ;;  %p5401_p9 = scmp.ge.s32.totalorder %s6461_s19, 16 }
  0x25   : > { %s10943_s4 = scalar_select %p6629_p1, 1, 0 }
  0x26   : > { %s10944_s7 = scalar_select %p6636_p7, 1, 0 }
  0x27   : > { %p6643_p3 = por %p129_p0, %p63_p4  ;;  %145 = sbr.rel (%p5401_p9) target bundleno = 87 (0x57), region = 16 }
  0x29   : > { %s10945_s26 = scalar_select %p6643_p3, 1, 0 }
  0x2b   : > { %10946 = sst [smem:[#allocation24_spill]] %s10945_s26 }
  0x2e   : > { %s149_s9 = sand.u32 1, %s6441_s14   ;;  %s5404_s20 = sshll.u32 %s6568_s30, 6 }
  0x2f   : > { %s5402_s21 = sshll.u32 %s149_s9, 9  ;;  %s162_s6 = sadd.s32 %s6457_s18, %s5404_s20 }
  0x30   : > { %s5405_s8 = sshll.u32 %s162_s6, 7  ;;  %s153_s25 = scalar_lea.vmem [#allocation4], %s5402_s21 }
  0x31   : > { %s177_s27 = sshll.u32 %s153_s25, 4  ;;  %s10947_s0 = sld [smem:[#allocation134_spill]]  ;;  %s178_s27 = int_to_ptr.vmem [resolvable:$true] %s177_s27 }
  0x32   : > { %s5671_s29 = scalar_select %p6585_p5, [#allocation0], [#allocation14] }
  0x33   : > { %s6463_s26 = smov 65536   ;;  %s6464_s30 = smov 4096  }
  0x34   : > { %s169_s28 = sld [smem:[%s5671_s29]]   ;;  %s6465_s20 = smov 32  }
  0x35   : > { %5672 = sst [smem:[#allocation11]] (%p6585_p5), %s6463_s26  ;;  %s6466_s21 = smov 256  }
  0x36   : > { %5673 = sst [smem:[#allocation11 + $0x1]] (%p6585_p5), %s6464_s30  ;;  %s6467_s22 = smov 128  }
  0x37   : > { %s164_s17 = scalar_lea.hbm %s10947_s0, %s5405_s8  ;;  %5674 = sst [smem:[#allocation11 + $0x2]] (%p6585_p5), %s6465_s20 }
  0x38   : > { %5675 = sst [smem:[#allocation11 + $0x3]] (%p6585_p5), %s6466_s21  ;;  %s6468_s23 = smov 8  }
  0x39   : > { %5676 = sst [smem:[#allocation11 + $0x4]] (%p6585_p5), %s6467_s22  ;;  %s150_s8 = scalar_lea.sflag [#allocation5], %s149_s9 }
  0x3a   : > { %5677 = sst [smem:[#allocation11 + $0x5]] (%p6585_p5), %s6468_s23  ;;  %s5406_s29 = sshll.u32 %s169_s28, 26 }
  0x3b   : > { %s5407_s6 = sadd.s32 134217728, %s5406_s29  ;;  %s6469_s25 = smov [#allocation10]  }
  0x3c   : > { %5678 = dma.general (%p6585_p5), %s164_s17, 8192, %s178_s27, %s150_s8, %s6469_s25, [#allocation11], %s5407_s6, 0  }
  0x3d   : > { %s200_s26 = sand.u32 1, %s6429_s11   ;;  %s5669_s30 = smul.u32 2304, %s6457_s18 }
  0x3e   : > { %s5668_s20 = smul.u32 144, %s200_s26  ;;  %s6679_s17 = scalar_lea.sflag [#allocation8], %s200_s26 }
  0x3f   : > { %s6675_s14 = scalar_lea.hbm %s10752_s1, %s5669_s30  ;;  %s6339_s0 = scalar_lea.hbm %s10752_s1, 4608 }
  0x40   : > { %s204_s28 = scalar_lea.vmem [#allocation7], %s5668_s20  ;;  %s6335_s5 = scalar_lea.hbm %s6675_s14, 2304 }
  0x41   : > { %s211_s9 = sshll.u32 %s204_s28, 4  ;;  %p6336_p2 = scmp.ne.s32.totalorder %s6675_s14, %s6335_s5  ;;  %s6677_s9 = int_to_ptr.vmem [resolvable:$true] %s211_s9 }
  0x42   : > { %p6340_p6 = scmp.lt.u32.totalorder %s6675_s14, %s10752_s1  ;;  %p6341_p10 = scmp.lt.u32.totalorder %s6339_s0, %s6335_s5 }
  0x43   : > { %p6337_p4 = pnand %p6336_p2, %p6617_p11  ;;  %p6343_p13 = scmp.lt.u32.totalorder %s6335_s5, %s6675_s14 }
  0x44   : > { %p6342_p12 = por %p6341_p10, %p6340_p6 }
  0x45   : > { %p6338_p5 = pneg %p6337_p4 }
  0x46   : > { %p6344_p0 = por %p6343_p13, %p6342_p12 }
  0x48   : > { %p6345_p9 = pnand %p6344_p0, %p6338_p5 }
  0x4a   : > { %6348 = shalt.err (!%p6345_p9)
}
  0x4b   : > { %s6349_s6 = scalar_lea.vmem %s6677_s9, 2304  ;;  %s6470_s8 = smov [#allocation7]  }
  0x4c   : > { %p6350_p2 = scmp.ne.s32.totalorder %s6677_s9, %s6349_s6  ;;  %s6353_s25 = sshll.u32 %s6470_s8, 4  ;;  %s6354_s25 = int_to_ptr.vmem [resolvable:$false] %s6353_s25 }
  0x4d   : > { %s6355_s26 = scalar_lea.vmem %s6354_s25, 4608  ;;  %p6356_p7 = scmp.lt.s32.totalorder %s6677_s9, %s6354_s25 }
  0x4e   : > { %p6351_p4 = pnand %p6350_p2, %p6617_p11  ;;  %p6357_p1 = scmp.lt.s32.totalorder %s6355_s26, %s6349_s6 }
  0x50   : > { %p6352_p3 = pneg %p6351_p4  ;;  %p6358_p6 = por %p6357_p1, %p6356_p7 }
  0x52   : > { %p6359_p10 = pnand %p6358_p6, %p6352_p3 }
  0x54   : > { %6362 = shalt.err (!%p6359_p10)
}
  0x55   : > { %s6471_s30 = smov 64   ;;  %s6472_s20 = smov 4  }
  0x56   : > { %5679 = dma.hbm_to_vmem [thread:$0]  (%p6617_p11), %s6675_s14, 2304, %s6677_s9, %s6679_s17, %s6471_s30, %s6471_s30, %s6472_s20  }
  0x57 PF: > { %p5409_p5 = scmp.ge.s32.totalorder %s6461_s19, 1  ;;  %p219_p12 = scmp.lt.s32.totalorder %s6461_s19, 17 }
  0x59   : > { %p220_p13 = pnand %p5409_p5, %p219_p12 }
  0x5b   : > { %223 = sbr.rel (%p220_p13) target bundleno = 1664 (0x680), region = 28 }
  0x62   : > { %s6706_s21 = sand.u32 1, %s6437_s13  }
  0x63   : > { %s5410_s28 = sshll.u32 %s6706_s21, 9  ;;  %s226_s5 = scalar_lea.sflag [#allocation5], %s6706_s21 }
  0x64   : > { %s6710_s27 = scalar_lea.vmem [#allocation4], %s5410_s28 }
  0x65   : > { %6408 = dma.done.wait (%p6602_p8), %s226_s5, 8192  }
  0x66   : > { %6410 = vsyncadd (%p6602_p8), %s226_s5, 4294959104  ;;  %s234_s14 = sand.u32 1, %s6425_s10   ;;  %p10948_p11 = scmp.ne.s32.totalorder %s10943_s4, 0 }
  0x67   : > { %s5670_s3 = smul.u32 144, %s234_s14  ;;  %s235_s9 = scalar_lea.sflag [#allocation8], %s234_s14 }
  0x69   : > { %s6717_s17 = scalar_lea.vmem [#allocation7], %s5670_s3 }
  0x6a   : > { %6412 = dma.done.wait (%p10948_p11), %s235_s9, 2304  }
  0x6b   : > { %6414 = vsyncadd (%p10948_p11), %s235_s9, 4294964992  ;;  %s6723_s22 = scalar_lea.vmem [#allocation9], %s5410_s28  ;;  %p5412_p1 = scmp.ne.s32.totalorder %s6445_s15, 0 }
  0x6c   : > { %vm277_vm0 = vcmask (!%p5412_p1), 261120   ;;  %v6473_v0 = vmov (!%p5412_p1), 0.0   ;;  %v6474_v1 = vmov (!%p5412_p1), 0  }
  0x6d   : > { %276 = sbr.rel (%p5412_p1) target bundleno = 189 (0xbd), region = 40  ;;  %278 = vst.msk [vmem:[#allocation2] sm:$0xff] (!%p5412_p1), %vm277_vm0, %v6473_v0  ;;  %279 = vst.msk [vmem:[#allocation2 + $0x8] sm:$0xff] (!%p5412_p1), %vm277_vm0, %v6473_v0 }
  0x6e   : > { %280 = vst.msk [vmem:[#allocation2 + $0x10] sm:$0xff] (!%p5412_p1), %vm277_vm0, %v6473_v0  ;;  %281 = vst.msk [vmem:[#allocation2 + $0x18] sm:$0xff] (!%p5412_p1), %vm277_vm0, %v6473_v0 }
  0x6f   : > { %282 = vst.msk [vmem:[#allocation2 + $0x20] sm:$0xff] (!%p5412_p1), %vm277_vm0, %v6473_v0  ;;  %283 = vst.msk [vmem:[#allocation2 + $0x28] sm:$0xff] (!%p5412_p1), %vm277_vm0, %v6473_v0 }
  0x70   : > { %284 = vst.msk [vmem:[#allocation2 + $0x30] sm:$0xff] (!%p5412_p1), %vm277_vm0, %v6473_v0  ;;  %285 = vst.msk [vmem:[#allocation2 + $0x38] sm:$0xff] (!%p5412_p1), %vm277_vm0, %v6473_v0 }
  0x71   : > { %286 = vst.msk [vmem:[#allocation2 + $0x40] sm:$0xff] (!%p5412_p1), %vm277_vm0, %v6473_v0  ;;  %287 = vst.msk [vmem:[#allocation2 + $0x48] sm:$0xff] (!%p5412_p1), %vm277_vm0, %v6473_v0 }
  0x72   : > { %288 = vst.msk [vmem:[#allocation2 + $0x50] sm:$0xff] (!%p5412_p1), %vm277_vm0, %v6473_v0  ;;  %289 = vst.msk [vmem:[#allocation2 + $0x58] sm:$0xff] (!%p5412_p1), %vm277_vm0, %v6473_v0 }
  0x73   : > { %290 = vst.msk [vmem:[#allocation2 + $0x60] sm:$0xff] (!%p5412_p1), %vm277_vm0, %v6473_v0  ;;  %291 = vst.msk [vmem:[#allocation2 + $0x68] sm:$0xff] (!%p5412_p1), %vm277_vm0, %v6473_v0 }
  0x74   : > { %292 = vst.msk [vmem:[#allocation2 + $0x70] sm:$0xff] %vm277_vm0, %v6473_v0  ;;  %293 = vst.msk [vmem:[#allocation2 + $0x78] sm:$0xff] %vm277_vm0, %v6473_v0 }
  0x75   : > { %294 = vst.msk [vmem:[#allocation2 + $0x80] sm:$0xff] %vm277_vm0, %v6473_v0  ;;  %295 = vst.msk [vmem:[#allocation2 + $0x88] sm:$0xff] %vm277_vm0, %v6473_v0 }
  0x76   : > { %296 = vst.msk [vmem:[#allocation2 + $0x90] sm:$0xff] %vm277_vm0, %v6473_v0  ;;  %297 = vst.msk [vmem:[#allocation2 + $0x98] sm:$0xff] %vm277_vm0, %v6473_v0 }
  0x77   : > { %298 = vst.msk [vmem:[#allocation2 + $0xa0] sm:$0xff] %vm277_vm0, %v6473_v0  ;;  %299 = vst.msk [vmem:[#allocation2 + $0xa8] sm:$0xff] %vm277_vm0, %v6473_v0 }
  0x78   : > { %300 = vst.msk [vmem:[#allocation2 + $0xb0] sm:$0xff] %vm277_vm0, %v6473_v0  ;;  %301 = vst.msk [vmem:[#allocation2 + $0xb8] sm:$0xff] %vm277_vm0, %v6473_v0 }
  0x79   : > { %302 = vst.msk [vmem:[#allocation2 + $0xc0] sm:$0xff] %vm277_vm0, %v6473_v0  ;;  %303 = vst.msk [vmem:[#allocation2 + $0xc8] sm:$0xff] %vm277_vm0, %v6473_v0 }
  0x7a   : > { %304 = vst.msk [vmem:[#allocation2 + $0xd0] sm:$0xff] %vm277_vm0, %v6473_v0  ;;  %305 = vst.msk [vmem:[#allocation2 + $0xd8] sm:$0xff] %vm277_vm0, %v6473_v0 }
  0x7b   : > { %306 = vst.msk [vmem:[#allocation2 + $0xe0] sm:$0xff] %vm277_vm0, %v6473_v0  ;;  %307 = vst.msk [vmem:[#allocation2 + $0xe8] sm:$0xff] %vm277_vm0, %v6473_v0 }
  0x7c   : > { %308 = vst.msk [vmem:[#allocation2 + $0xf0] sm:$0xff] %vm277_vm0, %v6473_v0  ;;  %309 = vst.msk [vmem:[#allocation2 + $0xf8] sm:$0xff] %vm277_vm0, %v6473_v0 }
  0x7d   : > { %310 = vst.msk [vmem:[#allocation2 + $0x100] sm:$0xff] %vm277_vm0, %v6473_v0  ;;  %311 = vst.msk [vmem:[#allocation2 + $0x108] sm:$0xff] %vm277_vm0, %v6473_v0 }
  0x7e   : > { %312 = vst.msk [vmem:[#allocation2 + $0x110] sm:$0xff] %vm277_vm0, %v6473_v0  ;;  %313 = vst.msk [vmem:[#allocation2 + $0x118] sm:$0xff] %vm277_vm0, %v6473_v0 }
  0x7f   : > { %314 = vst.msk [vmem:[#allocation2 + $0x120] sm:$0xff] %vm277_vm0, %v6473_v0  ;;  %315 = vst.msk [vmem:[#allocation2 + $0x128] sm:$0xff] %vm277_vm0, %v6473_v0 }
  0x80   : > { %316 = vst.msk [vmem:[#allocation2 + $0x130] sm:$0xff] %vm277_vm0, %v6473_v0  ;;  %317 = vst.msk [vmem:[#allocation2 + $0x138] sm:$0xff] %vm277_vm0, %v6473_v0 }
  0x81   : > { %318 = vst.msk [vmem:[#allocation2 + $0x140] sm:$0xff] %vm277_vm0, %v6473_v0  ;;  %319 = vst.msk [vmem:[#allocation2 + $0x148] sm:$0xff] %vm277_vm0, %v6473_v0 }
  0x82   : > { %320 = vst.msk [vmem:[#allocation2 + $0x150] sm:$0xff] %vm277_vm0, %v6473_v0  ;;  %321 = vst.msk [vmem:[#allocation2 + $0x158] sm:$0xff] %vm277_vm0, %v6473_v0 }
  0x83   : > { %322 = vst.msk [vmem:[#allocation2 + $0x160] sm:$0xff] %vm277_vm0, %v6473_v0  ;;  %323 = vst.msk [vmem:[#allocation2 + $0x168] sm:$0xff] %vm277_vm0, %v6473_v0 }
  0x84   : > { %324 = vst.msk [vmem:[#allocation2 + $0x170] sm:$0xff] %vm277_vm0, %v6473_v0  ;;  %325 = vst.msk [vmem:[#allocation2 + $0x178] sm:$0xff] %vm277_vm0, %v6473_v0 }
  0x85   : > { %326 = vst.msk [vmem:[#allocation2 + $0x180] sm:$0xff] %vm277_vm0, %v6473_v0  ;;  %327 = vst.msk [vmem:[#allocation2 + $0x188] sm:$0xff] %vm277_vm0, %v6473_v0 }
  0x86   : > { %328 = vst.msk [vmem:[#allocation2 + $0x190] sm:$0xff] %vm277_vm0, %v6473_v0  ;;  %329 = vst.msk [vmem:[#allocation2 + $0x198] sm:$0xff] %vm277_vm0, %v6473_v0 }
  0x87   : > { %330 = vst.msk [vmem:[#allocation2 + $0x1a0] sm:$0xff] %vm277_vm0, %v6473_v0  ;;  %331 = vst.msk [vmem:[#allocation2 + $0x1a8] sm:$0xff] %vm277_vm0, %v6473_v0 }
  0x88   : > { %332 = vst.msk [vmem:[#allocation2 + $0x1b0] sm:$0xff] %vm277_vm0, %v6473_v0  ;;  %333 = vst.msk [vmem:[#allocation2 + $0x1b8] sm:$0xff] %vm277_vm0, %v6473_v0 }
  0x89   : > { %334 = vst.msk [vmem:[#allocation2 + $0x1c0] sm:$0xff] %vm277_vm0, %v6473_v0  ;;  %335 = vst.msk [vmem:[#allocation2 + $0x1c8] sm:$0xff] %vm277_vm0, %v6473_v0 }
  0x8a   : > { %336 = vst.msk [vmem:[#allocation2 + $0x1d0] sm:$0xff] %vm277_vm0, %v6473_v0  ;;  %337 = vst.msk [vmem:[#allocation2 + $0x1d8] sm:$0xff] %vm277_vm0, %v6473_v0 }
  0x8b   : > { %338 = vst.msk [vmem:[#allocation2 + $0x1e0] sm:$0xff] %vm277_vm0, %v6473_v0  ;;  %339 = vst.msk [vmem:[#allocation2 + $0x1e8] sm:$0xff] %vm277_vm0, %v6473_v0 }
  0x8c   : > { %340 = vst.msk [vmem:[#allocation2 + $0x1f0] sm:$0xff] %vm277_vm0, %v6473_v0  ;;  %341 = vst.msk [vmem:[#allocation2 + $0x1f8] sm:$0xff] %vm277_vm0, %v6473_v0 }
  0x8d   : > { %342 = vst [vmem:[#allocation3] sm:$0xff] %v6474_v1  ;;  %343 = vst [vmem:[#allocation3 + $0x8] sm:$0xff] %v6474_v1 }
  0x8e   : > { %344 = vst.msk [vmem:[#allocation3 + $0x10] sm:$0xff] %vm277_vm0, %v6474_v1  ;;  %345 = vst [vmem:[#allocation3 + $0x18] sm:$0xff] %v6474_v1 }
  0x8f   : > { %346 = vst [vmem:[#allocation3 + $0x20] sm:$0xff] %v6474_v1  ;;  %347 = vst.msk [vmem:[#allocation3 + $0x28] sm:$0xff] %vm277_vm0, %v6474_v1 }
  0x90   : > { %348 = vst [vmem:[#allocation3 + $0x30] sm:$0xff] %v6474_v1  ;;  %349 = vst [vmem:[#allocation3 + $0x38] sm:$0xff] %v6474_v1 }
  0x91   : > { %350 = vst.msk [vmem:[#allocation3 + $0x40] sm:$0xff] %vm277_vm0, %v6474_v1  ;;  %351 = vst [vmem:[#allocation3 + $0x48] sm:$0xff] %v6474_v1 }
  0x92   : > { %352 = vst [vmem:[#allocation3 + $0x50] sm:$0xff] %v6474_v1  ;;  %353 = vst.msk [vmem:[#allocation3 + $0x58] sm:$0xff] %vm277_vm0, %v6474_v1 }
  0x93   : > { %354 = vst [vmem:[#allocation3 + $0x60] sm:$0xff] %v6474_v1  ;;  %355 = vst [vmem:[#allocation3 + $0x68] sm:$0xff] %v6474_v1 }
  0x94   : > { %356 = vst.msk [vmem:[#allocation3 + $0x70] sm:$0xff] %vm277_vm0, %v6474_v1  ;;  %357 = vst [vmem:[#allocation3 + $0x78] sm:$0xff] %v6474_v1 }
  0x95   : > { %358 = vst [vmem:[#allocation3 + $0x80] sm:$0xff] %v6474_v1  ;;  %359 = vst.msk [vmem:[#allocation3 + $0x88] sm:$0xff] %vm277_vm0, %v6474_v1 }
  0x96   : > { %360 = vst [vmem:[#allocation3 + $0x90] sm:$0xff] %v6474_v1  ;;  %361 = vst [vmem:[#allocation3 + $0x98] sm:$0xff] %v6474_v1 }
  0x97   : > { %362 = vst.msk [vmem:[#allocation3 + $0xa0] sm:$0xff] %vm277_vm0, %v6474_v1  ;;  %363 = vst [vmem:[#allocation3 + $0xa8] sm:$0xff] %v6474_v1 }
  0x98   : > { %364 = vst [vmem:[#allocation3 + $0xb0] sm:$0xff] %v6474_v1  ;;  %365 = vst.msk [vmem:[#allocation3 + $0xb8] sm:$0xff] %vm277_vm0, %v6474_v1 }
  0x99   : > { %366 = vst [vmem:[#allocation3 + $0xc0] sm:$0xff] %v6474_v1  ;;  %367 = vst [vmem:[#allocation3 + $0xc8] sm:$0xff] %v6474_v1 }
  0x9a   : > { %368 = vst.msk [vmem:[#allocation3 + $0xd0] sm:$0xff] %vm277_vm0, %v6474_v1  ;;  %369 = vst [vmem:[#allocation3 + $0xd8] sm:$0xff] %v6474_v1 }
  0x9b   : > { %370 = vst [vmem:[#allocation3 + $0xe0] sm:$0xff] %v6474_v1  ;;  %371 = vst.msk [vmem:[#allocation3 + $0xe8] sm:$0xff] %vm277_vm0, %v6474_v1 }
  0x9c   : > { %372 = vst [vmem:[#allocation3 + $0xf0] sm:$0xff] %v6474_v1  ;;  %373 = vst [vmem:[#allocation3 + $0xf8] sm:$0xff] %v6474_v1 }
  0x9d   : > { %374 = vst.msk [vmem:[#allocation3 + $0x100] sm:$0xff] %vm277_vm0, %v6474_v1  ;;  %375 = vst [vmem:[#allocation3 + $0x108] sm:$0xff] %v6474_v1 }
  0x9e   : > { %376 = vst [vmem:[#allocation3 + $0x110] sm:$0xff] %v6474_v1  ;;  %377 = vst.msk [vmem:[#allocation3 + $0x118] sm:$0xff] %vm277_vm0, %v6474_v1 }
  0x9f   : > { %378 = vst [vmem:[#allocation3 + $0x120] sm:$0xff] %v6474_v1  ;;  %379 = vst [vmem:[#allocation3 + $0x128] sm:$0xff] %v6474_v1 }
  0xa0   : > { %380 = vst.msk [vmem:[#allocation3 + $0x130] sm:$0xff] %vm277_vm0, %v6474_v1  ;;  %381 = vst [vmem:[#allocation3 + $0x138] sm:$0xff] %v6474_v1 }
  0xa1   : > { %382 = vst [vmem:[#allocation3 + $0x140] sm:$0xff] %v6474_v1  ;;  %383 = vst.msk [vmem:[#allocation3 + $0x148] sm:$0xff] %vm277_vm0, %v6474_v1 }
  0xa2   : > { %384 = vst [vmem:[#allocation3 + $0x150] sm:$0xff] %v6474_v1  ;;  %385 = vst [vmem:[#allocation3 + $0x158] sm:$0xff] %v6474_v1 }
  0xa3   : > { %386 = vst.msk [vmem:[#allocation3 + $0x160] sm:$0xff] %vm277_vm0, %v6474_v1  ;;  %387 = vst [vmem:[#allocation3 + $0x168] sm:$0xff] %v6474_v1 }
  0xa4   : > { %388 = vst [vmem:[#allocation3 + $0x170] sm:$0xff] %v6474_v1  ;;  %389 = vst.msk [vmem:[#allocation3 + $0x178] sm:$0xff] %vm277_vm0, %v6474_v1 }
  0xa5   : > { %390 = vst [vmem:[#allocation3 + $0x180] sm:$0xff] %v6474_v1  ;;  %391 = vst [vmem:[#allocation3 + $0x188] sm:$0xff] %v6474_v1 }
  0xa6   : > { %392 = vst.msk [vmem:[#allocation3 + $0x190] sm:$0xff] %vm277_vm0, %v6474_v1  ;;  %393 = vst [vmem:[#allocation3 + $0x198] sm:$0xff] %v6474_v1 }
  0xa7   : > { %394 = vst [vmem:[#allocation3 + $0x1a0] sm:$0xff] %v6474_v1  ;;  %395 = vst.msk [vmem:[#allocation3 + $0x1a8] sm:$0xff] %vm277_vm0, %v6474_v1 }
  0xa8   : > { %396 = vst [vmem:[#allocation3 + $0x1b0] sm:$0xff] %v6474_v1  ;;  %397 = vst [vmem:[#allocation3 + $0x1b8] sm:$0xff] %v6474_v1 }
  0xa9   : > { %398 = vst.msk [vmem:[#allocation3 + $0x1c0] sm:$0xff] %vm277_vm0, %v6474_v1  ;;  %399 = vst [vmem:[#allocation3 + $0x1c8] sm:$0xff] %v6474_v1 }
  0xaa   : > { %400 = vst [vmem:[#allocation3 + $0x1d0] sm:$0xff] %v6474_v1  ;;  %401 = vst.msk [vmem:[#allocation3 + $0x1d8] sm:$0xff] %vm277_vm0, %v6474_v1 }
  0xab   : > { %402 = vst [vmem:[#allocation3 + $0x1e0] sm:$0xff] %v6474_v1  ;;  %403 = vst [vmem:[#allocation3 + $0x1e8] sm:$0xff] %v6474_v1 }
  0xac   : > { %404 = vst.msk [vmem:[#allocation3 + $0x1f0] sm:$0xff] %vm277_vm0, %v6474_v1  ;;  %405 = vst [vmem:[#allocation3 + $0x1f8] sm:$0xff] %v6474_v1 }
  0xad   : > { %406 = vst [vmem:[#allocation3 + $0x200] sm:$0xff] %v6474_v1  ;;  %407 = vst.msk [vmem:[#allocation3 + $0x208] sm:$0xff] %vm277_vm0, %v6474_v1 }
  0xae   : > { %408 = vst [vmem:[#allocation3 + $0x210] sm:$0xff] %v6474_v1  ;;  %409 = vst [vmem:[#allocation3 + $0x218] sm:$0xff] %v6474_v1 }
  0xaf   : > { %410 = vst.msk [vmem:[#allocation3 + $0x220] sm:$0xff] %vm277_vm0, %v6474_v1  ;;  %411 = vst [vmem:[#allocation3 + $0x228] sm:$0xff] %v6474_v1 }
  0xb0   : > { %412 = vst [vmem:[#allocation3 + $0x230] sm:$0xff] %v6474_v1  ;;  %413 = vst.msk [vmem:[#allocation3 + $0x238] sm:$0xff] %vm277_vm0, %v6474_v1 }
  0xb1   : > { %414 = vst [vmem:[#allocation3 + $0x240] sm:$0xff] %v6474_v1  ;;  %415 = vst [vmem:[#allocation3 + $0x248] sm:$0xff] %v6474_v1 }
  0xb2   : > { %416 = vst.msk [vmem:[#allocation3 + $0x250] sm:$0xff] %vm277_vm0, %v6474_v1  ;;  %417 = vst [vmem:[#allocation3 + $0x258] sm:$0xff] %v6474_v1 }
  0xb3   : > { %418 = vst [vmem:[#allocation3 + $0x260] sm:$0xff] %v6474_v1  ;;  %419 = vst.msk [vmem:[#allocation3 + $0x268] sm:$0xff] %vm277_vm0, %v6474_v1 }
  0xb4   : > { %420 = vst [vmem:[#allocation3 + $0x270] sm:$0xff] %v6474_v1  ;;  %421 = vst [vmem:[#allocation3 + $0x278] sm:$0xff] %v6474_v1 }
  0xb5   : > { %422 = vst.msk [vmem:[#allocation3 + $0x280] sm:$0xff] %vm277_vm0, %v6474_v1  ;;  %423 = vst [vmem:[#allocation3 + $0x288] sm:$0xff] %v6474_v1 }
  0xb6   : > { %424 = vst [vmem:[#allocation3 + $0x290] sm:$0xff] %v6474_v1  ;;  %425 = vst.msk [vmem:[#allocation3 + $0x298] sm:$0xff] %vm277_vm0, %v6474_v1 }
  0xb7   : > { %426 = vst [vmem:[#allocation3 + $0x2a0] sm:$0xff] %v6474_v1  ;;  %427 = vst [vmem:[#allocation3 + $0x2a8] sm:$0xff] %v6474_v1 }
  0xb8   : > { %428 = vst.msk [vmem:[#allocation3 + $0x2b0] sm:$0xff] %vm277_vm0, %v6474_v1  ;;  %429 = vst [vmem:[#allocation3 + $0x2b8] sm:$0xff] %v6474_v1 }
  0xb9   : > { %430 = vst [vmem:[#allocation3 + $0x2c0] sm:$0xff] %v6474_v1  ;;  %431 = vst.msk [vmem:[#allocation3 + $0x2c8] sm:$0xff] %vm277_vm0, %v6474_v1 }
  0xba   : > { %432 = vst [vmem:[#allocation3 + $0x2d0] sm:$0xff] %v6474_v1  ;;  %433 = vst [vmem:[#allocation3 + $0x2d8] sm:$0xff] %v6474_v1 }
  0xbb   : > { %434 = vst.msk [vmem:[#allocation3 + $0x2e0] sm:$0xff] %vm277_vm0, %v6474_v1  ;;  %435 = vst [vmem:[#allocation3 + $0x2e8] sm:$0xff] %v6474_v1 }
  0xbc   : > { %436 = vst [vmem:[#allocation3 + $0x2f0] sm:$0xff] %v6474_v1  ;;  %437 = vst.msk [vmem:[#allocation3 + $0x2f8] sm:$0xff] %vm277_vm0, %v6474_v1 }
  0xbd PF: > { %v5805_v2 = vld [vmem:[%s6717_s17] sm:$0xff]   ;;  %v10761_v3 = vmov 0   ;;  %v5806_v4 = vld [vmem:[%s6717_s17 + $0x8] sm:$0xff]   ;;  %v5807_v5 = vld [vmem:[%s6717_s17 + $0x10] sm:$0xff]   ;;  %s6476_s24 = smov 32   ;;  %vm742_vm1 = vcmask 261120  }
  0xbe   : > { %839 = vmatprep.subr.bf16.mxu0 %v10761_v3  ;;  %5636 = vmatprep.subr.bf16.mxu1 %v10761_v3  ;;  %v5808_v6 = vld [vmem:[%s6717_s17 + $0x18] sm:$0xff]   ;;  %v5809_v7 = vld [vmem:[%s6717_s17 + $0x20] sm:$0xff]   ;;  %v5810_v10 = vld [vmem:[%s6717_s17 + $0x28] sm:$0xff]   ;;  %s6477_s4 = smov 96   ;;  %s6478_s0 = smov 64   ;;  %vm4329_vm2 = vcmask 1040384  }
  0xbf   : > { %840 = vmatpush1.bf16.msra.mxu0 %v5805_v2  ;;  %5652 = vmatpush1.bf16.msra.mxu1 %v5805_v2  ;;  %v439_v8 = vld [vmem:[#allocation3 + $0x8] sm:$0xff]  ;;  %v5811_v11 = vld [vmem:[%s6717_s17 + $0x30] sm:$0xff]   ;;  %v5813_v13 = vld [vmem:[%s6717_s17 + $0x40] sm:$0xff]   ;;  %vm4330_vm3 = vsmask.f32 256  ;;  %vm4460_vm5 = vcmask 1047552  }
  0xc0   : > { %841 = vmatprep.subr.bf16.mxu0 %v10761_v3  ;;  %5637 = vmatprep.subr.bf16.mxu1 %v10761_v3  ;;  %v511_v9 = vld [vmem:[#allocation3 + $0x248] sm:$0xff]  ;;  %v5815_v15 = vld [vmem:[%s6717_s17 + $0x50] sm:$0xff]   ;;  %v5817_v17 = vld [vmem:[%s6717_s17 + $0x60] sm:$0xff]   ;;  %vm4461_vm6 = vsmask.f32 7424  ;;  %vm4687_vm8 = vcmask 523264  }
  0xc1   : > { %871 = vmatprep.mubr.bf16.mxu0 %v439_v8  ;;  %1063 = vmatprep.mubr.bf16.mxu1 %v511_v9  ;;  %v5812_v12 = vld [vmem:[%s6717_s17 + $0x38] sm:$0xff]   ;;  %v5814_v14 = vld [vmem:[%s6717_s17 + $0x48] sm:$0xff]   ;;  %v5819_v19 = vld [vmem:[%s6717_s17 + $0x70] sm:$0xff]   ;;  %vm4942_vm9 = vcmask 785408   ;;  %s5232_s23 = scalar_lea.sflag [#allocation6], %s6706_s21 }
  0xc2   : > { %v5816_v16 = vld [vmem:[%s6717_s17 + $0x58] sm:$0xff]   ;;  %v5818_v18 = vld [vmem:[%s6717_s17 + $0x68] sm:$0xff]   ;;  %v5821_v21 = vld [vmem:[%s6717_s17 + $0x80] sm:$0xff]  }
  0xc3   : > { %842 = vmatpush1.bf16.msra.mxu0 %v5806_v4  ;;  %5653 = vmatpush1.bf16.msra.mxu1 %v5806_v4  ;;  %v5820_v20 = vld [vmem:[%s6717_s17 + $0x78] sm:$0xff]   ;;  %v438_v22 = vld [vmem:[#allocation3] sm:$0xff]  ;;  %v5822_v25 = vld [vmem:[%s6717_s17 + $0x88] sm:$0xff]  }
  0xc4   : > { %843 = vmatprep.subr.bf16.mxu0 %v10761_v3  ;;  %5638 = vmatprep.subr.bf16.mxu1 %v10761_v3  ;;  %v510_v23 = vld [vmem:[#allocation3 + $0x240] sm:$0xff]  ;;  %v441_v27 = vld [vmem:[#allocation3 + $0x18] sm:$0xff]  ;;  %v444_v31 = vld [vmem:[#allocation3 + $0x30] sm:$0xff] }
  0xc5   : > { %v442_v24 = vld [vmem:[#allocation3 + $0x20] sm:$0xff]  ;;  %v513_v28 = vld [vmem:[#allocation3 + $0x258] sm:$0xff]  ;;  %v516_v32 = vld [vmem:[#allocation3 + $0x270] sm:$0xff] }
  0xc6   : > { %v514_v26 = vld [vmem:[#allocation3 + $0x260] sm:$0xff]  ;;  %v445_v29 = vld [vmem:[#allocation3 + $0x38] sm:$0xff]  ;;  %v448_v33 = vld [vmem:[#allocation3 + $0x50] sm:$0xff] }
  0xc7   : > { %844 = vmatpush1.bf16.msra.mxu0 %v5807_v5  ;;  %5654 = vmatpush1.bf16.msra.mxu1 %v5807_v5  ;;  %v517_v30 = vld [vmem:[#allocation3 + $0x278] sm:$0xff]  ;;  %v520_v34 = vld [vmem:[#allocation3 + $0x290] sm:$0xff]  ;;  %v447_v35 = vld [vmem:[#allocation3 + $0x48] sm:$0xff] }
  0xc8   : > { %845 = vmatprep.subr.bf16.mxu0 %v10761_v3  ;;  %5639 = vmatprep.subr.bf16.mxu1 %v10761_v3  ;;  %v519_v36 = vld [vmem:[#allocation3 + $0x288] sm:$0xff]  ;;  %v450_v39 = vld [vmem:[#allocation3 + $0x60] sm:$0xff]  ;;  %v1931_v44 = vld [vmem:[#allocation2 + $0x10] sm:$0xff] }
  0xc9   : > { %v451_v37 = vld [vmem:[#allocation3 + $0x68] sm:$0xff]  ;;  %v522_v40 = vld [vmem:[#allocation3 + $0x2a0] sm:$0xff]  ;;  %2061 = vrot.lane.b32.xlu1 %v1931_v44, %s6476_s24  ;;  %v453_v46 = vld [vmem:[#allocation3 + $0x78] sm:$0xff] }
  0xca   : > { %v523_v38 = vld [vmem:[#allocation3 + $0x2a8] sm:$0xff]  ;;  %v454_v41 = vld [vmem:[#allocation3 + $0x80] sm:$0xff]  ;;  %v525_v47 = vld [vmem:[#allocation3 + $0x2b8] sm:$0xff] }
  0xcb   : > { %846 = vmatpush1.bf16.msra.mxu0 %v5808_v6  ;;  %5655 = vmatpush1.bf16.msra.mxu1 %v5808_v6  ;;  %v526_v42 = vld [vmem:[#allocation3 + $0x2c0] sm:$0xff]  ;;  %v1930_v45 = vld [vmem:[#allocation2 + $0x8] sm:$0xff]  ;;  %v457_v48 = vld [vmem:[#allocation3 + $0x98] sm:$0xff] }
  0xcc   : > { %847 = vmatprep.subr.bf16.mxu0 %v10761_v3  ;;  %5640 = vmatprep.subr.bf16.mxu1 %v10761_v3  ;;  %v1929_v43 = vld [vmem:[#allocation2] sm:$0xff]  ;;  %v529_v49 = vld [vmem:[#allocation3 + $0x2d8] sm:$0xff]  ;;  %v1934_v52 = vld [vmem:[#allocation2 + $0x28] sm:$0xff] }
  0xcd   : > { %2057 = vrot.lane.b32.xlu0 %v1929_v43, %s6476_s24  ;;  %v1932_v50 = vld [vmem:[#allocation2 + $0x18] sm:$0xff]  ;;  %v1933_v51 = vld [vmem:[#allocation2 + $0x20] sm:$0xff]  ;;  %v1935_v53 = vld [vmem:[#allocation2 + $0x30] sm:$0xff] }
  0xce   : > { %2063 = vrot.lane.b32.xlu1 %v1932_v50, %s6476_s24  ;;  %v456_v54 = vld [vmem:[#allocation3 + $0x90] sm:$0xff]  ;;  %v1936_v58 = vld [vmem:[#allocation2 + $0x38] sm:$0xff]  ;;  %v1937_v59 = vld [vmem:[#allocation2 + $0x40] sm:$0xff] }
  0xcf   : > { %848 = vmatpush1.bf16.msra.mxu0 %v5809_v7  ;;  %5656 = vmatpush1.bf16.msra.mxu1 %v5809_v7  ;;  %v528_v55 = vld [vmem:[#allocation3 + $0x2d0] sm:$0xff]  ;;  %v1938_v60 = vld [vmem:[#allocation2 + $0x48] sm:$0xff]  ;;  %v1940_v2 = vld [vmem:[#allocation2 + $0x58] sm:$0xff] }
  0xd0   : > { %849 = vmatprep.subr.bf16.mxu0 %v10761_v3  ;;  %5641 = vmatprep.subr.bf16.mxu1 %v10761_v3  ;;  %v460_v56 = vld [vmem:[#allocation3 + $0xb0] sm:$0xff]  ;;  %v459_v62 = vld [vmem:[#allocation3 + $0xa8] sm:$0xff]  ;;  %v1941_v4 = vld [vmem:[#allocation2 + $0x60] sm:$0xff] }
  0xd1   : > { %2059 = vrot.lane.b32.xlu0 %v1930_v45, %s6476_s24  ;;  %v532_v57 = vld [vmem:[#allocation3 + $0x2f0] sm:$0xff]  ;;  %v531_v63 = vld [vmem:[#allocation3 + $0x2e8] sm:$0xff]  ;;  %v462_v7 = vld [vmem:[#allocation3 + $0xc0] sm:$0xff] }
  0xd2   : > { %2067 = vrot.lane.b32.xlu1 %v1934_v52, %s6476_s24  ;;  %v1939_v61 = vld [vmem:[#allocation2 + $0x50] sm:$0xff]  ;;  %v463_v0 = vld [vmem:[#allocation3 + $0xc8] sm:$0xff]  ;;  %v466_v9 = vld [vmem:[#allocation3 + $0xe0] sm:$0xff] }
  0xd3   : > { %850 = vmatpush1.bf16.msra.mxu0 %v5810_v10  ;;  %5657 = vmatpush1.bf16.msra.mxu1 %v5810_v10  ;;  %v440_v1 = vld [vmem:[#allocation3 + $0x10] sm:$0xff]  ;;  %v1942_v5 = vld [vmem:[#allocation2 + $0x68] sm:$0xff]  ;;  %v446_v10 = vld [vmem:[#allocation3 + $0x40] sm:$0xff] }
  0xd4   : > { %851 = vmatprep.subr.bf16.mxu0 %v10761_v3  ;;  %5642 = vmatprep.subr.bf16.mxu1 %v10761_v3  ;;  %v1943_v6 = vld [vmem:[#allocation2 + $0x70] sm:$0xff]  ;;  %v443_v8 = vld [vmem:[#allocation3 + $0x28] sm:$0xff]  ;;  %v1960_v43 = vld [vmem:[#allocation2 + $0xf8] sm:$0xff] }
  0xd5   : > { %2065 = vrot.lane.b32.xlu0 %v1933_v51, %s6476_s24  ;;  %v1961_v44 = vld [vmem:[#allocation2 + $0x100] sm:$0xff]  ;;  %v1962_v45 = vld [vmem:[#allocation2 + $0x108] sm:$0xff]  ;;  %v1963_v50 = vld [vmem:[#allocation2 + $0x110] sm:$0xff] }
  0xd6   : > { %2071 = vrot.lane.b32.xlu1 %v1936_v58, %s6476_s24  ;;  %v1964_v51 = vld [vmem:[#allocation2 + $0x118] sm:$0xff]  ;;  %v1965_v52 = vld [vmem:[#allocation2 + $0x120] sm:$0xff]  ;;  %v1967_v58 = vld [vmem:[#allocation2 + $0x130] sm:$0xff] }
  0xd7   : > { %852 = vmatpush1.bf16.msra.mxu0 %v5811_v11  ;;  %5658 = vmatpush1.bf16.msra.mxu1 %v5811_v11  ;;  %v1944_v11 = vld [vmem:[#allocation2 + $0x78] sm:$0xff]  ;;  %vm9892_vm4 = vmand %vm4329_vm2, %vm4330_vm3 }
  0xd8   : > { %853 = vmatprep.subr.bf16.mxu0 %v10761_v3  ;;  %5643 = vmatprep.subr.bf16.mxu1 %v10761_v3  ;;  %vm9916_vm7 = vmand %vm4460_vm5, %vm4461_vm6 }
  0xd9   : > { %2069 = vrot.lane.b32.xlu0 %v1935_v53, %s6476_s24  ;;  %v1966_v53 = vld [vmem:[#allocation2 + $0x128] sm:$0xff] }
  0xda   : > { %2075 = vrot.lane.b32.xlu1 %v1938_v60, %s6476_s24  ;;  %v1969_v60 = vld [vmem:[#allocation2 + $0x140] sm:$0xff] }
  0xdb   : > { %854 = vmatpush1.bf16.msra.mxu0 %v5812_v12  ;;  %5659 = vmatpush1.bf16.msra.mxu1 %v5812_v12  ;;  %v1945_v12 = vld [vmem:[#allocation2 + $0x80] sm:$0xff] }
  0xdc   : > { %855 = vmatprep.subr.bf16.mxu0 %v10761_v3  ;;  %5644 = vmatprep.subr.bf16.mxu1 %v10761_v3 }
  0xdd   : > { %2073 = vrot.lane.b32.xlu0 %v1937_v59, %s6476_s24  ;;  %v1968_v59 = vld [vmem:[#allocation2 + $0x138] sm:$0xff] }
  0xde   : > { %2079 = vrot.lane.b32.xlu1 %v1940_v2, %s6476_s24  ;;  %v1971_v2 = vld [vmem:[#allocation2 + $0x150] sm:$0xff] }
  0xdf   : > { %856 = vmatpush1.bf16.msra.mxu0 %v5813_v13  ;;  %5660 = vmatpush1.bf16.msra.mxu1 %v5813_v13  ;;  %v1946_v13 = vld [vmem:[#allocation2 + $0x88] sm:$0xff] }
  0xe0   : > { %857 = vmatprep.subr.bf16.mxu0 %v10761_v3  ;;  %5645 = vmatprep.subr.bf16.mxu1 %v10761_v3 }
  0xe1   : > { %2077 = vrot.lane.b32.xlu0 %v1939_v61, %s6476_s24  ;;  %v1970_v61 = vld [vmem:[#allocation2 + $0x148] sm:$0xff] }
  0xe2   : > { %2083 = vrot.lane.b32.xlu1 %v1942_v5, %s6476_s24  ;;  %v1973_v5 = vld [vmem:[#allocation2 + $0x160] sm:$0xff] }
  0xe3   : > { %858 = vmatpush1.bf16.msra.mxu0 %v5814_v14  ;;  %5661 = vmatpush1.bf16.msra.mxu1 %v5814_v14  ;;  %v1947_v14 = vld [vmem:[#allocation2 + $0x90] sm:$0xff] }
  0xe4   : > { %859 = vmatprep.subr.bf16.mxu0 %v10761_v3  ;;  %5646 = vmatprep.subr.bf16.mxu1 %v10761_v3 }
  0xe5   : > { %2081 = vrot.lane.b32.xlu0 %v1941_v4, %s6476_s24  ;;  %v1972_v4 = vld [vmem:[#allocation2 + $0x158] sm:$0xff] }
  0xe6   : > { %2087 = vrot.lane.b32.xlu1 %v1944_v11, %s6476_s24  ;;  %v1975_v11 = vld [vmem:[#allocation2 + $0x170] sm:$0xff] }
  0xe7   : > { %860 = vmatpush1.bf16.msra.mxu0 %v5815_v15  ;;  %5662 = vmatpush1.bf16.msra.mxu1 %v5815_v15  ;;  %v465_v15 = vld [vmem:[#allocation3 + $0xd8] sm:$0xff] }
  0xe8   : > { %861 = vmatprep.subr.bf16.mxu0 %v10761_v3  ;;  %5647 = vmatprep.subr.bf16.mxu1 %v10761_v3 }
  0xe9   : > { %2085 = vrot.lane.b32.xlu0 %v1943_v6, %s6476_s24  ;;  %v1974_v6 = vld [vmem:[#allocation2 + $0x168] sm:$0xff] }
  0xea   : > { %2091 = vrot.lane.b32.xlu1 %v1946_v13, %s6476_s24  ;;  %v1977_v13 = vld [vmem:[#allocation2 + $0x180] sm:$0xff] }
  0xeb   : > { %862 = vmatpush1.bf16.msra.mxu0 %v5816_v16  ;;  %5663 = vmatpush1.bf16.msra.mxu1 %v5816_v16  ;;  %v449_v16 = vld [vmem:[#allocation3 + $0x58] sm:$0xff] }
  0xec   : > { %863 = vmatprep.subr.bf16.mxu0 %v10761_v3  ;;  %5648 = vmatprep.subr.bf16.mxu1 %v10761_v3 }
  0xed   : > { %2089 = vrot.lane.b32.xlu0 %v1945_v12, %s6476_s24  ;;  %v1976_v12 = vld [vmem:[#allocation2 + $0x178] sm:$0xff] }
  0xef   : > { %864 = vmatpush1.bf16.msra.mxu0 %v5817_v17  ;;  %5664 = vmatpush1.bf16.msra.mxu1 %v5817_v17  ;;  %v469_v17 = vld [vmem:[#allocation3 + $0xf8] sm:$0xff] }
  0xf0   : > { %865 = vmatprep.subr.bf16.mxu0 %v10761_v3  ;;  %5649 = vmatprep.subr.bf16.mxu1 %v10761_v3 }
  0xf1   : > { %2093 = vrot.lane.b32.xlu0 %v1947_v14, %s6476_s24  ;;  %v1978_v14 = vld [vmem:[#allocation2 + $0x188] sm:$0xff] }
  0xf3   : > { %866 = vmatpush1.bf16.msra.mxu0 %v5818_v18  ;;  %5665 = vmatpush1.bf16.msra.mxu1 %v5818_v18  ;;  %v452_v18 = vld [vmem:[#allocation3 + $0x70] sm:$0xff] }
  0xf4   : > { %867 = vmatprep.subr.bf16.mxu0 %v10761_v3  ;;  %5650 = vmatprep.subr.bf16.mxu1 %v10761_v3 }
  0xf7   : > { %868 = vmatpush1.bf16.msra.mxu0 %v5819_v19  ;;  %5666 = vmatpush1.bf16.msra.mxu1 %v5819_v19  ;;  %v1948_v19 = vld [vmem:[#allocation2 + $0x98] sm:$0xff] }
  0xf8   : > { %869 = vmatprep.subr.bf16.mxu0 %v10761_v3  ;;  %5651 = vmatprep.subr.bf16.mxu1 %v10761_v3 }
  0xf9   : > { %2095 = vrot.lane.b32.xlu1 %v1948_v19, %s6476_s24  ;;  %v1979_v19 = vld [vmem:[#allocation2 + $0x190] sm:$0xff] }
  0xfb   : > { %870 = vmatpush1.bf16.msra.mxu0 %v5820_v20  ;;  %5667 = vmatpush1.bf16.msra.mxu1 %v5820_v20  ;;  %v1949_v20 = vld [vmem:[#allocation2 + $0xa0] sm:$0xff] }
  0xfc   : > { %5568 = vmatprep.subr.bf16.mxu1 %v5821_v21  ;;  %2097 = vrot.lane.b32.xlu0 %v1949_v20, %s6476_s24  ;;  %v1980_v20 = vld [vmem:[#allocation2 + $0x198] sm:$0xff] }
  0xfe   : > { %872 = vmatmul.mubr.bf16.vlgmr.msra.gmra.mrb[0].mxu0 %v438_v22  ;;  %1064 = vmatmul.mubr.bf16.vlgmr.msra.gmra.mrb[0].mxu1 %v510_v23  ;;  %v1951_v22 = vld [vmem:[#allocation2 + $0xb0] sm:$0xff] }
  0xff   : > { %5569 = vmatpush3.bf16.msra.mxu1 %v5821_v21  ;;  %879 = vmatprep.mubr.bf16.mxu0 %v442_v24  ;;  %v1950_v21 = vld [vmem:[#allocation2 + $0xa8] sm:$0xff]  ;;  %v468_v23 = vld [vmem:[#allocation3 + $0xf0] sm:$0xff] }
 0x100   : > { %1071 = vmatprep.mubr.bf16.mxu1 %v514_v26  ;;  %5570 = vmatprep.subr.bf16.mxu1 %v5822_v25  ;;  %v455_v24 = vld [vmem:[#allocation3 + $0x88] sm:$0xff]  ;;  %v458_v26 = vld [vmem:[#allocation3 + $0xa0] sm:$0xff] }
 0x101   : > { %2099 = vrot.lane.b32.xlu1 %v1950_v21, %s6476_s24  ;;  %2101 = vrot.lane.b32.xlu0 %v1951_v22, %s6476_s24  ;;  %v1981_v21 = vld [vmem:[#allocation2 + $0x1a0] sm:$0xff]  ;;  %v1982_v22 = vld [vmem:[#allocation2 + $0x1a8] sm:$0xff] }
 0x103   : > { %5571 = vmatpush3.bf16.msra.mxu1 %v5822_v25  ;;  %v472_v25 = vld [vmem:[#allocation3 + $0x110] sm:$0xff] }
 0x106   : > { %880 = vmatmul.mubr.bf16.gmra.mrb[4].mxu0 %v441_v27  ;;  %1072 = vmatmul.mubr.bf16.gmra.mrb[4].mxu1 %v513_v28  ;;  %v1952_v27 = vld [vmem:[#allocation2 + $0xb8] sm:$0xff]  ;;  %v1953_v28 = vld [vmem:[#allocation2 + $0xc0] sm:$0xff] }
 0x107   : > { %887 = vmatprep.mubr.bf16.mxu0 %v445_v29  ;;  %1079 = vmatprep.mubr.bf16.mxu1 %v517_v30  ;;  %v1954_v29 = vld [vmem:[#allocation2 + $0xc8] sm:$0xff] }
 0x108   : > { %2103 = vrot.lane.b32.xlu1 %v1952_v27, %s6476_s24  ;;  %2105 = vrot.lane.b32.xlu0 %v1953_v28, %s6476_s24  ;;  %v471_v30 = vld [vmem:[#allocation3 + $0x108] sm:$0xff]  ;;  %v1983_v27 = vld [vmem:[#allocation2 + $0x1b0] sm:$0xff]  ;;  %v1984_v28 = vld [vmem:[#allocation2 + $0x1b8] sm:$0xff] }
 0x10c   : > { %2107 = vrot.lane.b32.xlu1 %v1954_v29, %s6476_s24  ;;  %v1985_v29 = vld [vmem:[#allocation2 + $0x1c0] sm:$0xff] }
 0x10e   : > { %888 = vmatmul.mubr.bf16.gmra.mrb[8].mxu0 %v444_v31  ;;  %1080 = vmatmul.mubr.bf16.gmra.mrb[8].mxu1 %v516_v32  ;;  %v461_v31 = vld [vmem:[#allocation3 + $0xb8] sm:$0xff]  ;;  %v475_v32 = vld [vmem:[#allocation3 + $0x128] sm:$0xff] }
 0x10f   : > { %895 = vmatprep.mubr.bf16.mxu0 %v448_v33  ;;  %1087 = vmatprep.mubr.bf16.mxu1 %v520_v34  ;;  %v464_v33 = vld [vmem:[#allocation3 + $0xd0] sm:$0xff] }
 0x110   : > { %v1955_v34 = vld [vmem:[#allocation2 + $0xd0] sm:$0xff] }
 0x111   : > { %2109 = vrot.lane.b32.xlu0 %v1955_v34, %s6476_s24  ;;  %v512_v34 = vld [vmem:[#allocation3 + $0x250] sm:$0xff] }
 0x116   : > { %896 = vmatmul.mubr.bf16.gmra.mrb[12].mxu0 %v447_v35  ;;  %1088 = vmatmul.mubr.bf16.gmra.mrb[12].mxu1 %v519_v36  ;;  %v1956_v35 = vld [vmem:[#allocation2 + $0xd8] sm:$0xff]  ;;  %v1957_v36 = vld [vmem:[#allocation2 + $0xe0] sm:$0xff] }
 0x117   : > { %903 = vmatprep.mubr.bf16.mxu0 %v451_v37  ;;  %1095 = vmatprep.mubr.bf16.mxu1 %v523_v38  ;;  %v1958_v37 = vld [vmem:[#allocation2 + $0xe8] sm:$0xff]  ;;  %v474_v38 = vld [vmem:[#allocation3 + $0x120] sm:$0xff] }
 0x118   : > { %2111 = vrot.lane.b32.xlu1 %v1956_v35, %s6476_s24  ;;  %2113 = vrot.lane.b32.xlu0 %v1957_v36, %s6476_s24  ;;  %v1987_v35 = vld [vmem:[#allocation2 + $0x1d0] sm:$0xff]  ;;  %v1988_v36 = vld [vmem:[#allocation2 + $0x1d8] sm:$0xff] }
 0x11c   : > { %2115 = vrot.lane.b32.xlu1 %v1958_v37, %s6476_s24  ;;  %v498_v37 = vld [vmem:[#allocation3 + $0x1e0] sm:$0xff] }
 0x11e   : > { %904 = vmatmul.mubr.bf16.gmra.mrb[16].mxu0 %v450_v39  ;;  %1096 = vmatmul.mubr.bf16.gmra.mrb[16].mxu1 %v522_v40  ;;  %v467_v39 = vld [vmem:[#allocation3 + $0xe8] sm:$0xff]  ;;  %v478_v40 = vld [vmem:[#allocation3 + $0x140] sm:$0xff] }
 0x11f   : > { %911 = vmatprep.mubr.bf16.mxu0 %v454_v41  ;;  %1103 = vmatprep.mubr.bf16.mxu1 %v526_v42  ;;  %v470_v41 = vld [vmem:[#allocation3 + $0x100] sm:$0xff]  ;;  %v1959_v42 = vld [vmem:[#allocation2 + $0xf0] sm:$0xff] }
 0x120   : > { %2117 = vrot.lane.b32.xlu0 %v1959_v42, %s6476_s24  ;;  %2119 = vrot.lane.b32.xlu1 %v1960_v43, %s6476_s24  ;;  %v1990_v42 = vld [vmem:[#allocation2 + $0x1e8] sm:$0xff]  ;;  %v501_v43 = vld [vmem:[#allocation3 + $0x1f8] sm:$0xff] }
 0x124   : > { %2121 = vrot.lane.b32.xlu0 %v1961_v44, %s6476_s24  ;;  %2123 = vrot.lane.b32.xlu1 %v1962_v45, %s6476_s24  ;;  %v521_v44 = vld [vmem:[#allocation3 + $0x298] sm:$0xff]  ;;  %v1991_v45 = vld [vmem:[#allocation2 + $0x1f0] sm:$0xff] }
 0x126   : > { %912 = vmatmul.mubr.bf16.gmra.mrb[20].mxu0 %v453_v46  ;;  %1104 = vmatmul.mubr.bf16.gmra.mrb[20].mxu1 %v525_v47  ;;  %v477_v46 = vld [vmem:[#allocation3 + $0x138] sm:$0xff] }
 0x127   : > { %919 = vmatprep.mubr.bf16.mxu0 %v457_v48  ;;  %1111 = vmatprep.mubr.bf16.mxu1 %v529_v49  ;;  %v473_v47 = vld [vmem:[#allocation3 + $0x118] sm:$0xff]  ;;  %v476_v49 = vld [vmem:[#allocation3 + $0x130] sm:$0xff] }
 0x128   : > { %v481_v48 = vld [vmem:[#allocation3 + $0x158] sm:$0xff]  ;;  %2125 = vrot.lane.b32.xlu0 %v1963_v50, %s6476_s24  ;;  %2127 = vrot.lane.b32.xlu1 %v1964_v51, %s6476_s24  ;;  %v527_v50 = vld [vmem:[#allocation3 + $0x2c8] sm:$0xff]  ;;  %v508_v51 = vld [vmem:[#allocation3 + $0x230] sm:$0xff] }
 0x12c   : > { %2129 = vrot.lane.b32.xlu0 %v1965_v52, %s6476_s24  ;;  %2131 = vrot.lane.b32.xlu1 %v1966_v53, %s6476_s24  ;;  %v530_v52 = vld [vmem:[#allocation3 + $0x2e0] sm:$0xff] }
 0x12e   : > { %920 = vmatmul.mubr.bf16.gmra.mrb[24].mxu0 %v456_v54  ;;  %1112 = vmatmul.mubr.bf16.gmra.mrb[24].mxu1 %v528_v55  ;;  %v480_v54 = vld [vmem:[#allocation3 + $0x150] sm:$0xff]  ;;  %v479_v55 = vld [vmem:[#allocation3 + $0x148] sm:$0xff] }
 0x12f   : > { %927 = vmatprep.mubr.bf16.mxu0 %v460_v56  ;;  %1119 = vmatprep.mubr.bf16.mxu1 %v532_v57  ;;  %v484_v56 = vld [vmem:[#allocation3 + $0x170] sm:$0xff]  ;;  %v482_v57 = vld [vmem:[#allocation3 + $0x160] sm:$0xff] }
 0x130   : > { %2133 = vrot.lane.b32.xlu0 %v1967_v58, %s6476_s24  ;;  %2135 = vrot.lane.b32.xlu1 %v1968_v59, %s6476_s24 }
 0x134   : > { %2137 = vrot.lane.b32.xlu0 %v1969_v60, %s6476_s24  ;;  %2139 = vrot.lane.b32.xlu1 %v1970_v61, %s6476_s24 }
 0x136   : > { %928 = vmatmul.mubr.bf16.gmra.mrb[28].mxu0 %v459_v62  ;;  %1120 = vmatmul.mubr.bf16.gmra.mrb[28].mxu1 %v531_v63  ;;  %v483_v62 = vld [vmem:[#allocation3 + $0x168] sm:$0xff]  ;;  %v485_v63 = vld [vmem:[#allocation3 + $0x178] sm:$0xff] }
 0x137   : > { %935 = vmatprep.mubr.bf16.mxu0 %v463_v0  ;;  %5572 = vmatprep.mubr.msk.bf16.mxu1 %vm742_vm1, %v440_v1  ;;  %v487_v0 = vld [vmem:[#allocation3 + $0x188] sm:$0xff]  ;;  %v488_v1 = vld [vmem:[#allocation3 + $0x190] sm:$0xff] }
 0x138   : > { %2141 = vrot.lane.b32.xlu0 %v1971_v2, %s6476_s24  ;;  %2143 = vrot.lane.b32.xlu1 %v1972_v4, %s6476_s24 }
 0x13c   : > { %2145 = vrot.lane.b32.xlu0 %v1973_v5, %s6476_s24  ;;  %2147 = vrot.lane.b32.xlu1 %v1974_v6, %s6476_s24 }
 0x13e   : > { %936 = vmatmul.mubr.bf16.gmra.mrb[32].mxu0 %v462_v7  ;;  %5573 = vmatmul.mubr.msk.bf16.vlgmr.msra.gmra.mrb[32].mxu1 %vm742_vm1, %v443_v8  ;;  %v486_v7 = vld [vmem:[#allocation3 + $0x180] sm:$0xff]  ;;  %v491_v8 = vld [vmem:[#allocation3 + $0x1a8] sm:$0xff] }
 0x13f   : > { %943 = vmatprep.mubr.bf16.mxu0 %v466_v9  ;;  %5576 = vmatprep.mubr.msk.bf16.mxu1 %vm742_vm1, %v446_v10  ;;  %v490_v9 = vld [vmem:[#allocation3 + $0x1a0] sm:$0xff]  ;;  %v7125_v53 = vpop.permute.xlu0 %2057 }
 0x140   : > { %v494_v10 = vld [vmem:[#allocation3 + $0x1c0] sm:$0xff]  ;;  %2149 = vrot.lane.b32.xlu0 %v1975_v11, %s6476_s24  ;;  %2151 = vrot.lane.b32.xlu1 %v1976_v12, %s6476_s24  ;;  %10949 = vst [vmem:[#allocation25_spill] sm:$0xff] %v7125_v53  ;;  %v560_v53 = vld [vmem:[%s6710_s27 + $0xd0] sm:$0xff] }
 0x144   : > { %2153 = vrot.lane.b32.xlu0 %v1977_v13, %s6476_s24  ;;  %2155 = vrot.lane.b32.xlu1 %v1978_v14, %s6476_s24 }
 0x146   : > { %944 = vmatmul.mubr.bf16.gmra.mrb[36].mxu0 %v465_v15  ;;  %5577 = vmatmul.mubr.msk.bf16.gmra.mrb[36].mxu1 %vm742_vm1, %v449_v16  ;;  %v489_v15 = vld [vmem:[#allocation3 + $0x198] sm:$0xff] }
 0x147   : > { %951 = vmatprep.mubr.bf16.mxu0 %v469_v17  ;;  %5580 = vmatprep.mubr.msk.bf16.mxu1 %vm742_vm1, %v452_v18  ;;  %v497_v16 = vld [vmem:[#allocation3 + $0x1d8] sm:$0xff]  ;;  %v500_v18 = vld [vmem:[#allocation3 + $0x1f0] sm:$0xff] }
 0x148   : > { %v493_v17 = vld [vmem:[#allocation3 + $0x1b8] sm:$0xff]  ;;  %2157 = vrot.lane.b32.xlu0 %v1979_v19, %s6476_s24  ;;  %2159 = vrot.lane.b32.xlu1 %v1980_v20, %s6476_s24 }
 0x14c   : > { %2161 = vrot.lane.b32.xlu0 %v1981_v21, %s6476_s24  ;;  %2163 = vrot.lane.b32.xlu1 %v1982_v22, %s6476_s24 }
 0x14e   : > { %952 = vmatmul.mubr.bf16.gmra.mrb[40].mxu0 %v468_v23  ;;  %5581 = vmatmul.mubr.msk.bf16.gmra.mrb[40].mxu1 %vm742_vm1, %v455_v24  ;;  %v492_v23 = vld [vmem:[#allocation3 + $0x1b0] sm:$0xff]  ;;  %v503_v24 = vld [vmem:[#allocation3 + $0x208] sm:$0xff] }
 0x14f   : > { %959 = vmatprep.mubr.bf16.mxu0 %v472_v25  ;;  %5584 = vmatprep.mubr.msk.bf16.mxu1 %vm742_vm1, %v458_v26  ;;  %v496_v25 = vld [vmem:[#allocation3 + $0x1d0] sm:$0xff]  ;;  %v506_v26 = vld [vmem:[#allocation3 + $0x220] sm:$0xff] }
 0x150   : > { %2165 = vrot.lane.b32.xlu0 %v1983_v27, %s6476_s24  ;;  %2167 = vrot.lane.b32.xlu1 %v1984_v28, %s6476_s24 }
 0x154   : > { %2169 = vrot.lane.b32.xlu0 %v1985_v29, %s6476_s24 }
 0x156   : > { %960 = vmatmul.mubr.bf16.gmra.mrb[44].mxu0 %v471_v30  ;;  %5585 = vmatmul.mubr.msk.bf16.gmra.mrb[44].mxu1 %vm742_vm1, %v461_v31  ;;  %v1986_v30 = vld [vmem:[#allocation2 + $0x1c8] sm:$0xff] }
 0x157   : > { %967 = vmatprep.mubr.bf16.mxu0 %v475_v32  ;;  %5588 = vmatprep.mubr.msk.bf16.mxu1 %vm742_vm1, %v464_v33  ;;  %v495_v31 = vld [vmem:[#allocation3 + $0x1c8] sm:$0xff]  ;;  %v509_v32 = vld [vmem:[#allocation3 + $0x238] sm:$0xff] }
 0x158   : > { %v499_v33 = vld [vmem:[#allocation3 + $0x1e8] sm:$0xff]  ;;  %2171 = vrot.lane.b32.xlu1 %v1986_v30, %s6476_s24  ;;  %2173 = vrot.lane.b32.xlu0 %v1987_v35, %s6476_s24 }
 0x15c   : > { %2175 = vrot.lane.b32.xlu1 %v1988_v36, %s6476_s24 }
 0x15e   : > { %968 = vmatmul.mubr.bf16.gmra.mrb[48].mxu0 %v474_v38  ;;  %5589 = vmatmul.mubr.msk.bf16.gmra.mrb[48].mxu1 %vm742_vm1, %v467_v39  ;;  %v515_v38 = vld [vmem:[#allocation3 + $0x268] sm:$0xff]  ;;  %v502_v39 = vld [vmem:[#allocation3 + $0x200] sm:$0xff] }
 0x15f   : > { %975 = vmatprep.mubr.bf16.mxu0 %v478_v40  ;;  %5592 = vmatprep.mubr.msk.bf16.mxu1 %vm742_vm1, %v470_v41  ;;  %v518_v40 = vld [vmem:[#allocation3 + $0x280] sm:$0xff] }
 0x160   : > { %v1989_v41 = vld [vmem:[#allocation2 + $0x1e0] sm:$0xff]  ;;  %2179 = vrot.lane.b32.xlu1 %v1990_v42, %s6476_s24 }
 0x161   : > { %2177 = vrot.lane.b32.xlu0 %v1989_v41, %s6476_s24 }
 0x165   : > { %2181 = vrot.lane.b32.xlu0 %v1991_v45, %s6476_s24 }
 0x166   : > { %976 = vmatmul.mubr.bf16.gmra.mrb[52].mxu0 %v477_v46  ;;  %5593 = vmatmul.mubr.msk.bf16.gmra.mrb[52].mxu1 %vm742_vm1, %v473_v47  ;;  %v505_v46 = vld [vmem:[#allocation3 + $0x218] sm:$0xff]  ;;  %v524_v47 = vld [vmem:[#allocation3 + $0x2b0] sm:$0xff] }
 0x167   : > { %983 = vmatprep.mubr.bf16.mxu0 %v481_v48  ;;  %5596 = vmatprep.mubr.msk.bf16.mxu1 %vm742_vm1, %v476_v49  ;;  %v1992_v48 = vld [vmem:[#allocation2 + $0x1f8] sm:$0xff]  ;;  %v504_v49 = vld [vmem:[#allocation3 + $0x210] sm:$0xff] }
 0x168   : > { %2183 = vrot.lane.b32.xlu1 %v1992_v48, %s6476_s24 }
 0x16e   : > { %984 = vmatmul.mubr.bf16.gmra.mrb[56].mxu0 %v480_v54  ;;  %5597 = vmatmul.mubr.msk.bf16.gmra.mrb[56].mxu1 %vm742_vm1, %v479_v55  ;;  %v7129_v54 = vpop.permute.xlu0 %2059  ;;  %v507_v55 = vld [vmem:[#allocation3 + $0x228] sm:$0xff] }
 0x16f   : > { %991 = vmatprep.mubr.bf16.mxu0 %v484_v56  ;;  %5600 = vmatprep.mubr.msk.bf16.mxu1 %vm742_vm1, %v482_v57  ;;  %10950 = vst [vmem:[#allocation26_spill] sm:$0xff] %v7129_v54  ;;  %v533_v56 = vld [vmem:[#allocation3 + $0x2f8] sm:$0xff]  ;;  %v7132_v57 = vpop.permute.xlu1 %2061 }
 0x170   : > { %10951 = vst [vmem:[#allocation27_spill] sm:$0xff] %v7132_v57 }
 0x172   : > { %v7134_v58 = vpop.permute.xlu0 %2065 }
 0x173   : > { %10952 = vst [vmem:[#allocation28_spill] sm:$0xff] %v7134_v58  ;;  %v7136_v59 = vpop.permute.xlu1 %2063 }
 0x174   : > { %10953 = vst [vmem:[#allocation29_spill] sm:$0xff] %v7136_v59 }
 0x176   : > { %992 = vmatmul.mubr.bf16.gmra.mrb[60].mxu0 %v483_v62  ;;  %5601 = vmatmul.mubr.msk.bf16.gmra.mrb[60].mxu1 %vm742_vm1, %v485_v63  ;;  %v7138_v60 = vpop.permute.xlu0 %2069 }
 0x177   : > { %999 = vmatprep.mubr.bf16.mxu0 %v487_v0  ;;  %5604 = vmatprep.mubr.msk.bf16.mxu1 %vm742_vm1, %v488_v1  ;;  %10954 = vst [vmem:[#allocation30_spill] sm:$0xff] %v7138_v60  ;;  %v7140_v61 = vpop.permute.xlu1 %2067 }
 0x178   : > { %10955 = vst [vmem:[#allocation31_spill] sm:$0xff] %v7140_v61 }
 0x17a   : > { %v7142_v62 = vpop.permute.xlu0 %2073 }
 0x17b   : > { %10956 = vst [vmem:[#allocation32_spill] sm:$0xff] %v7142_v62  ;;  %v7144_v63 = vpop.permute.xlu1 %2071 }
 0x17c   : > { %10957 = vst [vmem:[#allocation33_spill] sm:$0xff] %v7144_v63 }
 0x17e   : > { %1000 = vmatmul.mubr.bf16.gmra.mrb[64].mxu0 %v486_v7  ;;  %5605 = vmatmul.mubr.msk.bf16.gmra.mrb[64].mxu1 %vm742_vm1, %v491_v8  ;;  %v7146_v0 = vpop.permute.xlu0 %2077 }
 0x17f   : > { %1007 = vmatprep.mubr.bf16.mxu0 %v490_v9  ;;  %5608 = vmatprep.mubr.msk.bf16.mxu1 %vm742_vm1, %v494_v10  ;;  %10958 = vst [vmem:[#allocation34_spill] sm:$0xff] %v7146_v0  ;;  %v7148_v1 = vpop.permute.xlu1 %2075 }
 0x180   : > { %10959 = vst [vmem:[#allocation35_spill] sm:$0xff] %v7148_v1 }
 0x182   : > { %v7150_v2 = vpop.permute.xlu0 %2081 }
 0x183   : > { %10960 = vst [vmem:[#allocation36_spill] sm:$0xff] %v7150_v2  ;;  %v7160_v12 = vpop.permute.xlu1 %2079 }
 0x184   : > { %10961 = vst [vmem:[#allocation37_spill] sm:$0xff] %v7160_v12 }
 0x186   : > { %1008 = vmatmul.mubr.bf16.gmra.mrb[68].mxu0 %v489_v15  ;;  %5609 = vmatmul.mubr.msk.bf16.gmra.mrb[68].mxu1 %vm742_vm1, %v497_v16  ;;  %v7162_v13 = vpop.permute.xlu0 %2085 }
 0x187   : > { %1015 = vmatprep.mubr.bf16.mxu0 %v493_v17  ;;  %5612 = vmatprep.mubr.msk.bf16.mxu1 %vm742_vm1, %v500_v18  ;;  %10962 = vst [vmem:[#allocation38_spill] sm:$0xff] %v7162_v13  ;;  %v7172_v22 = vpop.permute.xlu1 %2083 }
 0x188   : > { %10963 = vst [vmem:[#allocation39_spill] sm:$0xff] %v7172_v22 }
 0x18e   : > { %1016 = vmatmul.mubr.bf16.gmra.mrb[72].mxu0 %v492_v23  ;;  %5613 = vmatmul.mubr.msk.bf16.gmra.mrb[72].mxu1 %vm742_vm1, %v503_v24  ;;  %v7174_v23 = vpop.permute.xlu0 %2089 }
 0x18f   : > { %1023 = vmatprep.mubr.bf16.mxu0 %v496_v25  ;;  %5616 = vmatprep.mubr.msk.bf16.mxu1 %vm742_vm1, %v506_v26  ;;  %10964 = vst [vmem:[#allocation40_spill] sm:$0xff] %v7174_v23 }
 0x196   : > { %1024 = vmatmul.mubr.bf16.gmra.mrb[76].mxu0 %v495_v31  ;;  %5617 = vmatmul.mubr.msk.bf16.gmra.mrb[76].mxu1 %vm742_vm1, %v509_v32  ;;  %v7184_v32 = vpop.permute.xlu1 %2087 }
 0x197   : > { %1031 = vmatprep.mubr.bf16.mxu0 %v499_v33  ;;  %5620 = vmatprep.mubr.msk.bf16.mxu1 %vm742_vm1, %v512_v34  ;;  %10965 = vst [vmem:[#allocation41_spill] sm:$0xff] %v7184_v32  ;;  %v7186_v33 = vpop.permute.xlu0 %2093 }
 0x198   : > { %10966 = vst [vmem:[#allocation42_spill] sm:$0xff] %v7186_v33 }
 0x19a   : > { %v7196_v42 = vpop.permute.xlu1 %2091 }
 0x19b   : > { %10967 = vst [vmem:[#allocation43_spill] sm:$0xff] %v7196_v42 }
 0x19e   : > { %1032 = vmatmul.mubr.bf16.gmra.mrb[80].mxu0 %v498_v37  ;;  %5621 = vmatmul.mubr.msk.bf16.gmra.mrb[80].mxu1 %vm742_vm1, %v515_v38 }
 0x19f   : > { %1039 = vmatprep.mubr.bf16.mxu0 %v502_v39  ;;  %5624 = vmatprep.mubr.msk.bf16.mxu1 %vm742_vm1, %v518_v40 }
 0x1a6   : > { %1040 = vmatmul.mubr.bf16.gmra.mrb[84].mxu0 %v501_v43  ;;  %5625 = vmatmul.mubr.msk.bf16.gmra.mrb[84].mxu1 %vm742_vm1, %v521_v44  ;;  %v7198_v43 = vpop.permute.xlu0 %2097 }
 0x1a7   : > { %1047 = vmatprep.mubr.bf16.mxu0 %v505_v46  ;;  %5628 = vmatprep.mubr.msk.bf16.mxu1 %vm742_vm1, %v524_v47  ;;  %10968 = vst [vmem:[#allocation44_spill] sm:$0xff] %v7198_v43  ;;  %v534_v43 = vld [vmem:[%s6710_s27] sm:$0xff] }
 0x1ae   : > { %1048 = vmatmul.mubr.bf16.gmra.mrb[88].mxu0 %v504_v49  ;;  %5629 = vmatmul.mubr.msk.bf16.gmra.mrb[88].mxu1 %vm742_vm1, %v527_v50 }
 0x1af   : > { %1055 = vmatprep.mubr.bf16.mxu0 %v508_v51  ;;  %5632 = vmatprep.mubr.msk.bf16.mxu1 %vm742_vm1, %v530_v52  ;;  %v7208_v52 = vpop.permute.xlu1 %2095 }
 0x1b0   : > { %10969 = vst [vmem:[#allocation45_spill] sm:$0xff] %v7208_v52 }
 0x1b6   : > { %1056 = vmatmul.mubr.bf16.gmra.mrb[92].mxu0 %v507_v55  ;;  %5633 = vmatmul.mubr.msk.bf16.gmra.mrb[92].mxu1 %vm742_vm1, %v533_v56  ;;  %v7210_v55 = vpop.permute.xlu0 %2101 }
 0x1b7   : > { %10970 = vst [vmem:[#allocation46_spill] sm:$0xff] %v7210_v55 }
 0x1d1   : > { %v7152_v4 = vpop.f32.mrb[0].mxu0  ;;  %v7154_v5 = vpop.f32.mrb[0].mxu1 }
 0x1d2   : > { %v875_v6 = vpop.f32.mrb[1].mxu0  ;;  %v1067_v7 = vpop.f32.mrb[1].mxu1 }
 0x1d3   : > { %v7156_v8 = vpop.f32.mrb[2].mxu0  ;;  %v7158_v9 = vpop.f32.mrb[2].mxu1 }
 0x1d4   : > { %v878_v10 = vpop.f32.mrb[3].mxu0  ;;  %v1070_v11 = vpop.f32.mrb[3].mxu1 }
 0x1d9   : > { %v7164_v14 = vpop.f32.mrb[4].mxu0  ;;  %v7166_v15 = vpop.f32.mrb[4].mxu1 }
 0x1da   : > { %v883_v16 = vpop.f32.mrb[5].mxu0  ;;  %v1075_v17 = vpop.f32.mrb[5].mxu1 }
 0x1db   : > { %v7168_v18 = vpop.f32.mrb[6].mxu0  ;;  %v7170_v19 = vpop.f32.mrb[6].mxu1 }
 0x1dc   : > { %v886_v20 = vpop.f32.mrb[7].mxu0  ;;  %v1078_v21 = vpop.f32.mrb[7].mxu1 }
 0x1dd   : > { %v7220_v21 = vpop.permute.xlu1 %2099 }
 0x1de   : > { %10971 = vst [vmem:[#allocation47_spill] sm:$0xff] %v7220_v21 }
 0x1e1   : > { %v7176_v24 = vpop.f32.mrb[8].mxu0  ;;  %v7178_v25 = vpop.f32.mrb[8].mxu1 }
 0x1e2   : > { %v891_v26 = vpop.f32.mrb[9].mxu0  ;;  %v1083_v27 = vpop.f32.mrb[9].mxu1 }
 0x1e3   : > { %v7180_v28 = vpop.f32.mrb[10].mxu0  ;;  %v7182_v29 = vpop.f32.mrb[10].mxu1 }
 0x1e4   : > { %v894_v30 = vpop.f32.mrb[11].mxu0  ;;  %v1086_v31 = vpop.f32.mrb[11].mxu1 }
 0x1e5   : > { %v7222_v26 = vpop.permute.xlu0 %2105 }
 0x1e6   : > { %10972 = vst [vmem:[#allocation48_spill] sm:$0xff] %v7222_v26 }
 0x1e9   : > { %v7188_v34 = vpop.f32.mrb[12].mxu0  ;;  %v7190_v35 = vpop.f32.mrb[12].mxu1 }
 0x1ea   : > { %v899_v36 = vpop.f32.mrb[13].mxu0  ;;  %v1091_v37 = vpop.f32.mrb[13].mxu1 }
 0x1eb   : > { %v7192_v38 = vpop.f32.mrb[14].mxu0  ;;  %v7194_v39 = vpop.f32.mrb[14].mxu1 }
 0x1ec   : > { %v902_v40 = vpop.f32.mrb[15].mxu0  ;;  %v1094_v41 = vpop.f32.mrb[15].mxu1 }
 0x1f1   : > { %v7200_v44 = vpop.f32.mrb[16].mxu0  ;;  %v7202_v45 = vpop.f32.mrb[16].mxu1 }
 0x1f2   : > { %v907_v46 = vpop.f32.mrb[17].mxu0  ;;  %v1099_v47 = vpop.f32.mrb[17].mxu1 }
 0x1f3   : > { %v7204_v48 = vpop.f32.mrb[18].mxu0  ;;  %v7206_v49 = vpop.f32.mrb[18].mxu1 }
 0x1f4   : > { %v910_v50 = vpop.f32.mrb[19].mxu0  ;;  %v1102_v51 = vpop.f32.mrb[19].mxu1 }
 0x1f5   : > { %v7232_v47 = vpop.permute.xlu1 %2103  ;;  %v7234_v50 = vpop.permute.xlu0 %2109 }
 0x1f6   : > { %10973 = vst [vmem:[#allocation49_spill] sm:$0xff] %v7232_v47  ;;  %10974 = vst [vmem:[#allocation50_spill] sm:$0xff] %v7234_v50  ;;  %v536_v50 = vld [vmem:[%s6710_s27 + $0x10] sm:$0xff] }
 0x1f9   : > { %v7212_v56 = vpop.f32.mrb[20].mxu0  ;;  %v7214_v6 = vpop.f32.mrb[20].mxu1 }
 0x1fa   : > { %v915_v7 = vpop.f32.mrb[21].mxu0  ;;  %v1107_v10 = vpop.f32.mrb[21].mxu1 }
 0x1fb   : > { %v7216_v11 = vpop.f32.mrb[22].mxu0  ;;  %v7218_v16 = vpop.f32.mrb[22].mxu1 }
 0x1fc   : > { %v918_v17 = vpop.f32.mrb[23].mxu0  ;;  %v1110_v20 = vpop.f32.mrb[23].mxu1 }
 0x201   : > { %v7224_v27 = vpop.f32.mrb[24].mxu0  ;;  %v7226_v30 = vpop.f32.mrb[24].mxu1 }
 0x202   : > { %v923_v31 = vpop.f32.mrb[25].mxu0  ;;  %v1115_v36 = vpop.f32.mrb[25].mxu1 }
 0x203   : > { %v7228_v37 = vpop.f32.mrb[26].mxu0  ;;  %v7230_v40 = vpop.f32.mrb[26].mxu1 }
 0x204   : > { %v926_v41 = vpop.f32.mrb[27].mxu0  ;;  %v1118_v46 = vpop.f32.mrb[27].mxu1 }
 0x205   : > { %v7244_v41 = vpop.permute.xlu1 %2107  ;;  %v7246_v46 = vpop.permute.xlu0 %2113 }
 0x206   : > { %10975 = vst [vmem:[#allocation51_spill] sm:$0xff] %v7244_v41  ;;  %10976 = vst [vmem:[#allocation52_spill] sm:$0xff] %v7246_v46  ;;  %v537_v41 = vld [vmem:[%s6710_s27 + $0x18] sm:$0xff] }
 0x209   : > { %v7236_v51 = vpop.f32.mrb[28].mxu0  ;;  %v7238_v7 = vpop.f32.mrb[28].mxu1 }
 0x20a   : > { %v931_v10 = vpop.f32.mrb[29].mxu0  ;;  %v1123_v17 = vpop.f32.mrb[29].mxu1 }
 0x20b   : > { %v7240_v20 = vpop.f32.mrb[30].mxu0  ;;  %v7242_v31 = vpop.f32.mrb[30].mxu1 }
 0x20c   : > { %v934_v36 = vpop.f32.mrb[31].mxu0  ;;  %v1126_v3 = vpop.f32.mrb[31].mxu1 }
 0x211   : > { %v7248_v26 = vpop.f32.mrb[32].mxu0  ;;  %v5574_v21 = vpop.f32.mrb[32].mxu1 }
 0x212   : > { %v1171_v47 = vadd.f32 %v5574_v21, %v7164_v14  ;;  %v939_v10 = vpop.f32.mrb[33].mxu0  ;;  %v1162_v17 = vpop.f32.mrb[33].mxu1 }
 0x213   : > { %v1163_v55 = vadd.f32 %v1162_v17, %v7152_v4  ;;  %v7254_v42 = vpop.f32.mrb[34].mxu0  ;;  %v5575_v3 = vpop.f32.mrb[34].mxu1  ;;  %v535_v4 = vld [vmem:[%s6710_s27 + $0x8] sm:$0xff] }
 0x214   : > { %v7256_v36 = vadd.f32 %v1171_v47, %v536_v50  ;;  %v1174_v46 = vadd.f32 %v5575_v3, %v7168_v18  ;;  %v942_v52 = vpop.f32.mrb[35].mxu0  ;;  %v1165_v23 = vpop.f32.mrb[35].mxu1  ;;  %v540_v18 = vld [vmem:[%s6710_s27 + $0x30] sm:$0xff] }
 0x215   : > { %v1166_v33 = vadd.f32 %v1165_v23, %v7156_v8  ;;  %v7262_v14 = vadd.f32 %v1163_v55, %v534_v43  ;;  %v7267_v10 = vpop.permute.xlu1 %2111  ;;  %v7269_v47 = vpop.permute.xlu0 %2117  ;;  %v538_v55 = vld [vmem:[%s6710_s27 + $0x20] sm:$0xff] }
 0x216   : > { %5823 = vtanh.f32 %v7256_v36  ;;  %v7264_v21 = vadd.f32 %v1174_v46, %v537_v41  ;;  %10977 = vst [vmem:[#allocation53_spill] sm:$0xff] %v7267_v10  ;;  %10978 = vst [vmem:[#allocation54_spill] sm:$0xff] %v7269_v47  ;;  %v541_v10 = vld [vmem:[%s6710_s27 + $0x38] sm:$0xff] }
 0x217   : > { %5825 = vtanh.f32 %v7262_v14  ;;  %v7277_v43 = vadd.f32 %v1166_v33, %v535_v4 }
 0x218   : > { %5827 = vtanh.f32 %v7264_v21 }
 0x219   : > { %v7271_v50 = vpop.f32.mrb[36].mxu0  ;;  %v5578_v52 = vpop.f32.mrb[36].mxu1 }
 0x21a   : > { %v1187_v8 = vadd.f32 %v5578_v52, %v7188_v34  ;;  %v947_v23 = vpop.f32.mrb[37].mxu0  ;;  %v1178_v17 = vpop.f32.mrb[37].mxu1 }
 0x21b   : > { %v1179_v41 = vadd.f32 %v1178_v17, %v7176_v24  ;;  %v7281_v46 = vpop.f32.mrb[38].mxu0  ;;  %v5579_v3 = vpop.f32.mrb[38].mxu1 }
 0x21c   : > { %v7283_v47 = vadd.f32 %v1187_v8, %v540_v18  ;;  %v1190_v22 = vadd.f32 %v5579_v3, %v7192_v38  ;;  %v950_v32 = vpop.f32.mrb[39].mxu0  ;;  %v1181_v34 = vpop.f32.mrb[39].mxu1  ;;  %v539_v8 = vld [vmem:[%s6710_s27 + $0x28] sm:$0xff] }
 0x21d   : > { %v1182_v52 = vadd.f32 %v1181_v34, %v7180_v28  ;;  %v7289_v33 = vadd.f32 %v1179_v41, %v538_v55  ;;  %v7294_v23 = vpop.permute.xlu1 %2115  ;;  %v7296_v18 = vpop.permute.xlu0 %2121 }
 0x21e   : > { %5829 = vtanh.f32 %v7283_v47  ;;  %v7292_v24 = vadd.f32 %v1190_v22, %v541_v10  ;;  %10979 = vst [vmem:[#allocation55_spill] sm:$0xff] %v7294_v23  ;;  %10980 = vst [vmem:[#allocation56_spill] sm:$0xff] %v7296_v18 }
 0x21f   : > { %5831 = vtanh.f32 %v7277_v43  ;;  %v7308_v34 = vadd.f32 %v1182_v52, %v539_v8 }
 0x220   : > { %v5824_v4 = vpop.eup %5823  ;;  %5833 = vtanh.f32 %v7289_v33 }
 0x221   : > { %v5582_v38 = vpop.f32.mrb[40].mxu1  ;;  %2381 = vrot.lane.b32.xlu0 %v5824_v4, %s6476_s24  ;;  %v7300_v32 = vpop.f32.mrb[40].mxu0  ;;  %5835 = vtanh.f32 %v7292_v24  ;;  %v544_v4 = vld [vmem:[%s6710_s27 + $0x50] sm:$0xff] }
 0x222   : > { %v1203_v28 = vadd.f32 %v5582_v38, %v7212_v56  ;;  %v955_v17 = vpop.f32.mrb[41].mxu0  ;;  %v1194_v55 = vpop.f32.mrb[41].mxu1  ;;  %5837 = vtanh.f32 %v7308_v34 }
 0x223   : > { %v1195_v22 = vadd.f32 %v1194_v55, %v7200_v44  ;;  %v5583_v10 = vpop.f32.mrb[42].mxu1  ;;  %v7306_v41 = vpop.f32.mrb[42].mxu0 }
 0x224   : > { %v5826_v3 = vpop.eup %5825  ;;  %v1206_v18 = vadd.f32 %v5583_v10, %v7216_v11  ;;  %v958_v23 = vpop.f32.mrb[43].mxu0  ;;  %v7315_v44 = vadd.f32 %v1203_v28, %v544_v4 }
 0x225   : > { %v1197_v2 = vpop.f32.mrb[43].mxu1  ;;  %v5828_v13 = vpop.eup %5827  ;;  %2377 = vrot.lane.b32.xlu0 %v5826_v3, %s6476_s24  ;;  %v542_v23 = vld [vmem:[%s6710_s27 + $0x40] sm:$0xff] }
 0x226   : > { %v1198_v56 = vadd.f32 %v1197_v2, %v7204_v48  ;;  %2383 = vrot.lane.b32.xlu1 %v5828_v13, %s6476_s24  ;;  %v7318_v17 = vpop.permute.xlu1 %2119  ;;  %v7320_v52 = vpop.permute.xlu0 %2125  ;;  %5839 = vtanh.f32 %v7315_v44 }
 0x227   : > { %10981 = vst [vmem:[#allocation57_spill] sm:$0xff] %v7318_v17  ;;  %10982 = vst [vmem:[#allocation58_spill] sm:$0xff] %v7320_v52  ;;  %v7328_v52 = vadd.f32 %v1195_v22, %v542_v23  ;;  %v545_v17 = vld [vmem:[%s6710_s27 + $0x58] sm:$0xff]  ;;  %v548_v23 = vld [vmem:[%s6710_s27 + $0x70] sm:$0xff] }
 0x228   : > { %v5830_v38 = vpop.eup %5829 }
 0x229   : > { %v5832_v11 = vpop.eup %5831  ;;  %v5586_v8 = vpop.f32.mrb[44].mxu1  ;;  %2389 = vrot.lane.b32.xlu0 %v5830_v38, %s6476_s24  ;;  %5841 = vtanh.f32 %v7328_v52 }
 0x22a   : > { %v961_v2 = vpop.f32.mrb[44].mxu0  ;;  %2379 = vrot.lane.b32.xlu1 %v5832_v11, %s6476_s24  ;;  %v1219_v13 = vadd.f32 %v5586_v8, %v7236_v51  ;;  %v1210_v28 = vpop.f32.mrb[45].mxu1  ;;  %v7335_v8 = vadd.f32 %v1206_v18, %v545_v17 }
 0x22b   : > { %v963_v48 = vpop.f32.mrb[45].mxu0  ;;  %v1211_v55 = vadd.f32 %v1210_v28, %v7224_v27  ;;  %v5587_v10 = vpop.f32.mrb[46].mxu1  ;;  %v543_v27 = vld [vmem:[%s6710_s27 + $0x48] sm:$0xff] }
 0x22c   : > { %v964_v3 = vpop.f32.mrb[46].mxu0  ;;  %v5834_v4 = vpop.eup %5833  ;;  %v1222_v38 = vadd.f32 %v5587_v10, %v7240_v20  ;;  %5843 = vtanh.f32 %v7335_v8 }
 0x22d   : > { %v966_v1 = vpop.f32.mrb[47].mxu0  ;;  %v1213_v11 = vpop.f32.mrb[47].mxu1  ;;  %2385 = vrot.lane.b32.xlu0 %v5834_v4, %s6476_s24 }
 0x22e   : > { %v5836_v12 = vpop.eup %5835  ;;  %v1214_v51 = vadd.f32 %v1213_v11, %v7228_v37  ;;  %v7339_v48 = vpop.permute.xlu1 %2123 }
 0x22f   : > { %2391 = vrot.lane.b32.xlu1 %v5836_v12, %s6476_s24  ;;  %10983 = vst [vmem:[#allocation59_spill] sm:$0xff] %v7339_v48  ;;  %v7341_v22 = vpop.permute.xlu0 %2129  ;;  %v5838_v28 = vpop.eup %5837  ;;  %v7346_v12 = vadd.f32 %v1198_v56, %v543_v27  ;;  %v549_v56 = vld [vmem:[%s6710_s27 + $0x78] sm:$0xff] }
 0x230   : > { %10984 = vst [vmem:[#allocation60_spill] sm:$0xff] %v7341_v22  ;;  %v7350_v22 = vadd.f32 %v1219_v13, %v548_v23 }
 0x231   : > { %v5590_v20 = vpop.f32.mrb[48].mxu1  ;;  %v969_v1 = vpop.f32.mrb[48].mxu0  ;;  %5845 = vtanh.f32 %v7346_v12 }
 0x232   : > { %v1235_v37 = vadd.f32 %v5590_v20, %v7271_v50  ;;  %v971_v10 = vpop.f32.mrb[49].mxu0  ;;  %v1226_v4 = vpop.f32.mrb[49].mxu1  ;;  %5847 = vtanh.f32 %v7350_v22 }
 0x233   : > { %2387 = vrot.lane.b32.xlu1 %v5838_v28, %s6476_s24  ;;  %v1227_v18 = vadd.f32 %v1226_v4, %v7248_v26  ;;  %v5591_v17 = vpop.f32.mrb[50].mxu1  ;;  %v972_v11 = vpop.f32.mrb[50].mxu0  ;;  %v546_v10 = vld [vmem:[%s6710_s27 + $0x60] sm:$0xff] }
 0x234   : > { %v1238_v48 = vadd.f32 %v5591_v17, %v7281_v46  ;;  %v974_v62 = vpop.f32.mrb[51].mxu0  ;;  %v1229_v50 = vpop.f32.mrb[51].mxu1  ;;  %v7361_v26 = vadd.f32 %v1211_v55, %v546_v10 }
 0x235   : > { %v5840_v20 = vpop.eup %5839  ;;  %v7355_v0 = vadd.f32 %v1229_v50, %v7254_v42  ;;  %v7363_v13 = vpop.permute.xlu1 %2127  ;;  %v7367_v62 = vadd.f32 %v1222_v38, %v549_v56  ;;  %v547_v42 = vld [vmem:[%s6710_s27 + $0x68] sm:$0xff] }
 0x236   : > { %2397 = vrot.lane.b32.xlu0 %v5840_v20, %s6476_s24  ;;  %10985 = vst [vmem:[#allocation61_spill] sm:$0xff] %v7363_v13  ;;  %v7365_v46 = vpop.permute.xlu0 %2133  ;;  %v5842_v28 = vpop.eup %5841  ;;  %5849 = vtanh.f32 %v7361_v26 }
 0x237   : > { %10986 = vst [vmem:[#allocation62_spill] sm:$0xff] %v7365_v46  ;;  %v5844_v13 = vpop.eup %5843  ;;  %5851 = vtanh.f32 %v7367_v62 }
 0x238   : > { %2399 = vrot.lane.b32.xlu1 %v5844_v13, %s6476_s24 }
 0x239   : > { %v5594_v27 = vpop.f32.mrb[52].mxu1  ;;  %v977_v23 = vpop.f32.mrb[52].mxu0 }
 0x23a   : > { %v1251_v4 = vadd.f32 %v5594_v27, %v961_v2  ;;  %v979_v17 = vpop.f32.mrb[53].mxu0  ;;  %v1242_v50 = vpop.f32.mrb[53].mxu1  ;;  %2393 = vrot.lane.b32.xlu0 %v5842_v28, %s6476_s24  ;;  %v7378_v2 = vadd.f32 %v1214_v51, %v547_v42  ;;  %v552_v27 = vld [vmem:[%s6710_s27 + $0x90] sm:$0xff] }
 0x23b   : > { %v7372_v20 = vadd.f32 %v1242_v50, %v7300_v32  ;;  %v5595_v55 = vpop.f32.mrb[54].mxu1  ;;  %v980_v10 = vpop.f32.mrb[54].mxu0  ;;  %v7385_v32 = vadd.f32 %v1235_v37, %v552_v27  ;;  %v553_v37 = vld [vmem:[%s6710_s27 + $0x98] sm:$0xff] }
 0x23c   : > { %v7375_v38 = vadd.f32 %v5595_v55, %v964_v3  ;;  %v982_v56 = vpop.f32.mrb[55].mxu0  ;;  %v1245_v46 = vpop.f32.mrb[55].mxu1  ;;  %5853 = vtanh.f32 %v7378_v2  ;;  %v550_v55 = vld [vmem:[%s6710_s27 + $0x80] sm:$0xff]  ;;  %v7407_v58 = vadd.f32 %v1238_v48, %v553_v37 }
 0x23d   : > { %v7382_v28 = vadd.f32 %v1245_v46, %v7306_v41  ;;  %v7387_v17 = vpop.permute.xlu1 %2131  ;;  %v7389_v3 = vpop.permute.xlu0 %2137  ;;  %5855 = vtanh.f32 %v7385_v32 }
 0x23e   : > { %10987 = vst [vmem:[#allocation63_spill] sm:$0xff] %v7387_v17  ;;  %10988 = vst [vmem:[#allocation64_spill] sm:$0xff] %v7389_v3  ;;  %v5846_v50 = vpop.eup %5845  ;;  %v7401_v17 = vadd.f32 %v1227_v18, %v550_v55 }
 0x23f   : > { %v5848_v42 = vpop.eup %5847  ;;  %2395 = vrot.lane.b32.xlu1 %v5846_v50, %s6476_s24  ;;  %10989 = vst [vmem:[#allocation65_spill] sm:$0xff] %v7407_v58 }
 0x240   : > { %2405 = vrot.lane.b32.xlu0 %v5848_v42, %s6476_s24  ;;  %v551_v42 = vld [vmem:[%s6710_s27 + $0x88] sm:$0xff]  ;;  %5857 = vtanh.f32 %v7401_v17 }
 0x241   : > { %v5598_v56 = vpop.f32.mrb[56].mxu1  ;;  %v985_v51 = vpop.f32.mrb[56].mxu0  ;;  %5859 = vtanh.f32 %v7407_v58  ;;  %v7420_v48 = vadd.f32 %v7355_v0, %v551_v42  ;;  %v554_v0 = vld [vmem:[%s6710_s27 + $0xa0] sm:$0xff] }
 0x242   : > { %v7394_v61 = vadd.f32 %v5598_v56, %v977_v23  ;;  %v987_v41 = vpop.f32.mrb[57].mxu0  ;;  %v1258_v13 = vpop.f32.mrb[57].mxu1 }
 0x243   : > { %v7398_v46 = vadd.f32 %v1258_v13, %v969_v1  ;;  %v5599_v27 = vpop.f32.mrb[58].mxu1  ;;  %v988_v3 = vpop.f32.mrb[58].mxu0  ;;  %10992 = vst [vmem:[#allocation68_spill] sm:$0xff] %v7420_v48  ;;  %5861 = vtanh.f32 %v7420_v48 }
 0x244   : > { %v7403_v63 = vadd.f32 %v5599_v27, %v980_v10  ;;  %v990_v50 = vpop.f32.mrb[59].mxu0  ;;  %v1261_v23 = vpop.f32.mrb[59].mxu1  ;;  %v556_v10 = vld [vmem:[%s6710_s27 + $0xb0] sm:$0xff] }
 0x245   : > { %v7405_v56 = vadd.f32 %v1261_v23, %v972_v11  ;;  %v5850_v41 = vpop.eup %5849  ;;  %v7413_v1 = vpop.permute.xlu1 %2135 }
 0x246   : > { %v5852_v60 = vpop.eup %5851  ;;  %2401 = vrot.lane.b32.xlu0 %v5850_v41, %s6476_s24  ;;  %10990 = vst [vmem:[#allocation66_spill] sm:$0xff] %v7413_v1  ;;  %v7415_v18 = vpop.permute.xlu0 %2141 }
 0x247   : > { %2407 = vrot.lane.b32.xlu1 %v5852_v60, %s6476_s24  ;;  %10991 = vst [vmem:[#allocation67_spill] sm:$0xff] %v7415_v18  ;;  %v5854_v50 = vpop.eup %5853  ;;  %v7426_v18 = vadd.f32 %v1251_v4, %v556_v10  ;;  %v7439_v4 = vadd.f32 %v7372_v20, %v554_v0 }
 0x249   : > { %v5602_v55 = vpop.f32.mrb[60].mxu1  ;;  %v993_v11 = vpop.f32.mrb[60].mxu0  ;;  %10993 = vst [vmem:[#allocation69_spill] sm:$0xff] %v7426_v18  ;;  %5863 = vtanh.f32 %v7426_v18  ;;  %10994 = vst [vmem:[#allocation70_spill] sm:$0xff] %v7439_v4 }
 0x24a   : > { %v7422_v13 = vadd.f32 %v5602_v55, %v993_v11  ;;  %v995_v37 = vpop.f32.mrb[61].mxu0  ;;  %v1274_v27 = vpop.f32.mrb[61].mxu1  ;;  %v557_v11 = vld [vmem:[%s6710_s27 + $0xb8] sm:$0xff]  ;;  %5865 = vtanh.f32 %v7439_v4 }
 0x24b   : > { %v7424_v60 = vadd.f32 %v1274_v27, %v985_v51  ;;  %v5603_v23 = vpop.f32.mrb[62].mxu1  ;;  %v996_v41 = vpop.f32.mrb[62].mxu0  ;;  %2403 = vrot.lane.b32.xlu1 %v5854_v50, %s6476_s24 }
 0x24c   : > { %v7429_v1 = vadd.f32 %v5603_v23, %v996_v41  ;;  %v998_v54 = vpop.f32.mrb[63].mxu0  ;;  %v1277_v59 = vpop.f32.mrb[63].mxu1  ;;  %v555_v23 = vld [vmem:[%s6710_s27 + $0xa8] sm:$0xff] }
 0x24d   : > { %v7432_v42 = vadd.f32 %v1277_v59, %v988_v3  ;;  %v5856_v55 = vpop.eup %5855  ;;  %v7441_v51 = vpop.permute.xlu1 %2139  ;;  %v7446_v3 = vadd.f32 %v7375_v38, %v557_v11  ;;  %v7459_v11 = vadd.f32 %v7382_v28, %v555_v23 }
 0x24e   : > { %2413 = vrot.lane.b32.xlu0 %v5856_v55, %s6476_s24  ;;  %10995 = vst [vmem:[#allocation71_spill] sm:$0xff] %v7441_v51  ;;  %v7443_v10 = vpop.permute.xlu0 %2145  ;;  %v5858_v59 = vpop.eup %5857 }
 0x24f   : > { %10996 = vst [vmem:[#allocation72_spill] sm:$0xff] %v7443_v10  ;;  %10997 = vst [vmem:[#allocation73_spill] sm:$0xff] %v7446_v3  ;;  %v5860_v55 = vpop.eup %5859  ;;  %5867 = vtanh.f32 %v7446_v3  ;;  %v561_v3 = vld [vmem:[%s6710_s27 + $0xd8] sm:$0xff] }
 0x250   : > { %2415 = vrot.lane.b32.xlu1 %v5860_v55, %s6476_s24  ;;  %10998 = vst [vmem:[#allocation74_spill] sm:$0xff] %v7459_v11  ;;  %5869 = vtanh.f32 %v7459_v11 }
 0x251   : > { %v5606_v54 = vpop.f32.mrb[64].mxu1  ;;  %v1001_v37 = vpop.f32.mrb[64].mxu0 }
 0x252   : > { %v1003_v27 = vpop.f32.mrb[65].mxu0  ;;  %v1290_v50 = vpop.f32.mrb[65].mxu1  ;;  %2409 = vrot.lane.b32.xlu0 %v5858_v59, %s6476_s24  ;;  %v7462_v59 = vadd.f32 %v7394_v61, %v560_v53 }
 0x253   : > { %v7450_v41 = vadd.f32 %v1290_v50, %v1001_v37  ;;  %v5607_v20 = vpop.f32.mrb[66].mxu1  ;;  %v1004_v0 = vpop.f32.mrb[66].mxu0 }
 0x254   : > { %v1006_v10 = vpop.f32.mrb[67].mxu0  ;;  %v1293_v51 = vpop.f32.mrb[67].mxu1  ;;  %10999 = vst [vmem:[#allocation75_spill] sm:$0xff] %v7462_v59  ;;  %5871 = vtanh.f32 %v7462_v59 }
 0x255   : > { %v7455_v38 = vadd.f32 %v1293_v51, %v1004_v0  ;;  %v5862_v37 = vpop.eup %5861  ;;  %v7464_v27 = vpop.permute.xlu1 %2143  ;;  %v558_v10 = vld [vmem:[%s6710_s27 + $0xc0] sm:$0xff] }
 0x256   : > { %11000 = vst [vmem:[#allocation76_spill] sm:$0xff] %v7464_v27  ;;  %v7466_v50 = vpop.permute.xlu0 %2149  ;;  %2411 = vrot.lane.b32.xlu1 %v5862_v37, %s6476_s24  ;;  %v5864_v0 = vpop.eup %5863  ;;  %v7477_v37 = vadd.f32 %v7398_v46, %v558_v10  ;;  %v564_v46 = vld [vmem:[%s6710_s27 + $0xf0] sm:$0xff] }
 0x257   : > { %11001 = vst [vmem:[#allocation77_spill] sm:$0xff] %v7466_v50  ;;  %2421 = vrot.lane.b32.xlu0 %v5864_v0, %s6476_s24  ;;  %v5866_v11 = vpop.eup %5865 }
 0x258   : > { %11002 = vst [vmem:[#allocation78_spill] sm:$0xff] %v7477_v37  ;;  %5873 = vtanh.f32 %v7477_v37  ;;  %v7504_v37 = vadd.f32 %v7422_v13, %v564_v46 }
 0x259   : > { %v1009_v55 = vpop.f32.mrb[68].mxu0  ;;  %v5610_v51 = vpop.f32.mrb[68].mxu1 }
 0x25a   : > { %v7471_v57 = vadd.f32 %v5606_v54, %v1009_v55  ;;  %v1011_v28 = vpop.f32.mrb[69].mxu0  ;;  %v1306_v23 = vpop.f32.mrb[69].mxu1  ;;  %v7482_v54 = vadd.f32 %v7403_v63, %v561_v3  ;;  %v559_v55 = vld [vmem:[%s6710_s27 + $0xc8] sm:$0xff]  ;;  %11007 = vst [vmem:[#allocation83_spill] sm:$0xff] %v7504_v37 }
 0x25b   : > { %v1012_v53 = vpop.f32.mrb[70].mxu0  ;;  %v5611_v61 = vpop.f32.mrb[70].mxu1  ;;  %2417 = vrot.lane.b32.xlu0 %v5866_v11, %s6476_s24  ;;  %v7497_v63 = vadd.f32 %v7405_v56, %v559_v55 }
 0x25c   : > { %v7479_v50 = vadd.f32 %v5607_v20, %v1012_v53  ;;  %v1014_v27 = vpop.f32.mrb[71].mxu0  ;;  %v1309_v4 = vpop.f32.mrb[71].mxu1  ;;  %11003 = vst [vmem:[#allocation79_spill] sm:$0xff] %v7482_v54  ;;  %5875 = vtanh.f32 %v7482_v54  ;;  %v562_v54 = vld [vmem:[%s6710_s27 + $0xe0] sm:$0xff] }
 0x25d   : > { %v5868_v0 = vpop.eup %5867  ;;  %v7487_v28 = vpop.permute.xlu1 %2147  ;;  %11006 = vst [vmem:[#allocation82_spill] sm:$0xff] %v7497_v63  ;;  %5877 = vtanh.f32 %v7497_v63  ;;  %v7515_v55 = vadd.f32 %v7424_v60, %v562_v54  ;;  %v563_v60 = vld [vmem:[%s6710_s27 + $0xe8] sm:$0xff] }
 0x25e   : > { %11004 = vst [vmem:[#allocation80_spill] sm:$0xff] %v7487_v28  ;;  %v7489_v59 = vpop.permute.xlu0 %2153  ;;  %2423 = vrot.lane.b32.xlu1 %v5868_v0, %s6476_s24  ;;  %5879 = vtanh.f32 %v7504_v37 }
 0x25f   : > { %11005 = vst [vmem:[#allocation81_spill] sm:$0xff] %v7489_v59  ;;  %v5870_v59 = vpop.eup %5869  ;;  %11008 = vst [vmem:[#allocation84_spill] sm:$0xff] %v7515_v55  ;;  %5881 = vtanh.f32 %v7515_v55 }
 0x260   : > { %v5872_v56 = vpop.eup %5871 }
 0x261   : > { %v1017_v20 = vpop.f32.mrb[72].mxu0  ;;  %v7493_v27 = vpop.f32.mrb[72].mxu1  ;;  %2429 = vrot.lane.b32.xlu0 %v5872_v56, %s6476_s24 }
 0x262   : > { %v7499_v3 = vadd.f32 %v1306_v23, %v1017_v20  ;;  %v1019_v11 = vpop.f32.mrb[73].mxu0  ;;  %v1322_v10 = vpop.f32.mrb[73].mxu1  ;;  %2419 = vrot.lane.b32.xlu1 %v5870_v59, %s6476_s24  ;;  %v565_v23 = vld [vmem:[%s6710_s27 + $0xf8] sm:$0xff] }
 0x263   : > { %v1020_v53 = vpop.f32.mrb[74].mxu0  ;;  %v7501_v28 = vpop.f32.mrb[74].mxu1  ;;  %v7524_v20 = vadd.f32 %v7429_v1, %v565_v23  ;;  %v7543_v23 = vadd.f32 %v7432_v42, %v563_v60 }
 0x264   : > { %v7506_v0 = vadd.f32 %v1309_v4, %v1020_v53  ;;  %v1022_v18 = vpop.f32.mrb[75].mxu0  ;;  %v1325_v48 = vpop.f32.mrb[75].mxu1 }
 0x265   : > { %v7517_v13 = vpop.permute.xlu1 %2151  ;;  %v7519_v4 = vpop.permute.xlu0 %2157  ;;  %11011 = vst [vmem:[#allocation87_spill] sm:$0xff] %v7524_v20  ;;  %5883 = vtanh.f32 %v7524_v20 }
 0x266   : > { %11009 = vst [vmem:[#allocation85_spill] sm:$0xff] %v7517_v13  ;;  %11010 = vst [vmem:[#allocation86_spill] sm:$0xff] %v7519_v4  ;;  %v5874_v59 = vpop.eup %5873  ;;  %5885 = vtanh.f32 %v7543_v23 }
 0x267   : > { %2425 = vrot.lane.b32.xlu0 %v5874_v59, %s6476_s24  ;;  %v5876_v4 = vpop.eup %5875 }
 0x268   : > { %2431 = vrot.lane.b32.xlu1 %v5876_v4, %s6476_s24 }
 0x269   : > { %v1025_v18 = vpop.f32.mrb[76].mxu0  ;;  %v7521_v46 = vpop.f32.mrb[76].mxu1 }
 0x26a   : > { %v7526_v11 = vadd.f32 %v5610_v51, %v1025_v18  ;;  %v1027_v53 = vpop.f32.mrb[77].mxu0  ;;  %v7528_v56 = vpop.f32.mrb[77].mxu1  ;;  %v566_v51 = vld [vmem:[%s6710_s27 + $0x100] sm:$0xff] }
 0x26b   : > { %v1028_v54 = vpop.f32.mrb[78].mxu0  ;;  %v7532_v13 = vpop.f32.mrb[78].mxu1  ;;  %v7546_v59 = vadd.f32 %v7450_v41, %v566_v51  ;;  %v567_v53 = vld [vmem:[%s6710_s27 + $0x108] sm:$0xff] }
 0x26c   : > { %v7535_v63 = vadd.f32 %v5611_v61, %v1028_v54  ;;  %v1030_v37 = vpop.f32.mrb[79].mxu0  ;;  %v7537_v1 = vpop.f32.mrb[79].mxu1  ;;  %v7561_v20 = vadd.f32 %v7455_v38, %v567_v53  ;;  %v569_v53 = vld [vmem:[%s6710_s27 + $0x118] sm:$0xff] }
 0x26d   : > { %v5878_v18 = vpop.eup %5877  ;;  %v7549_v55 = vpop.permute.xlu1 %2155  ;;  %5887 = vtanh.f32 %v7546_v59 }
 0x26e   : > { %11012 = vst [vmem:[#allocation88_spill] sm:$0xff] %v7549_v55  ;;  %v7551_v61 = vpop.permute.xlu0 %2161  ;;  %2427 = vrot.lane.b32.xlu1 %v5878_v18, %s6476_s24  ;;  %v5880_v4 = vpop.eup %5879  ;;  %11014 = vst [vmem:[#allocation90_spill] sm:$0xff] %v7561_v20  ;;  %5889 = vtanh.f32 %v7561_v20 }
 0x26f   : > { %11013 = vst [vmem:[#allocation89_spill] sm:$0xff] %v7551_v61  ;;  %2437 = vrot.lane.b32.xlu0 %v5880_v4, %s6476_s24  ;;  %v568_v61 = vld [vmem:[%s6710_s27 + $0x110] sm:$0xff] }
 0x270   : > { %v7573_v38 = vadd.f32 %v7471_v57, %v568_v61  ;;  %v7589_v57 = vadd.f32 %v7479_v50, %v569_v53  ;;  %v571_v53 = vld [vmem:[%s6710_s27 + $0x128] sm:$0xff] }
 0x271   : > { %v5622_v37 = vpop.f32.mrb[80].mxu1  ;;  %v1033_v54 = vpop.f32.mrb[80].mxu0 }
 0x272   : > { %v7556_v42 = vadd.f32 %v5622_v37, %v7166_v15  ;;  %v7558_v60 = vadd.f32 %v1322_v10, %v1033_v54  ;;  %v1035_v41 = vpop.f32.mrb[81].mxu0  ;;  %v1354_v51 = vpop.f32.mrb[81].mxu1  ;;  %5891 = vtanh.f32 %v7573_v38 }
 0x273   : > { %v7566_v18 = vadd.f32 %v1354_v51, %v7154_v5  ;;  %v5623_v55 = vpop.f32.mrb[82].mxu1  ;;  %v1036_v58 = vpop.f32.mrb[82].mxu0  ;;  %5893 = vtanh.f32 %v7589_v57 }
 0x274   : > { %v1038_v15 = vpop.f32.mrb[83].mxu0  ;;  %v1357_v37 = vpop.f32.mrb[83].mxu1  ;;  %v7570_v10 = vadd.f32 %v5623_v55, %v7170_v19  ;;  %v7576_v4 = vadd.f32 %v1325_v48, %v1036_v58  ;;  %v570_v58 = vld [vmem:[%s6710_s27 + $0x120] sm:$0xff] }
 0x275   : > { %v5882_v54 = vpop.eup %5881  ;;  %v7581_v41 = vadd.f32 %v1357_v37, %v7158_v9  ;;  %v7583_v51 = vpop.permute.xlu1 %2159  ;;  %v7600_v50 = vadd.f32 %v7499_v3, %v570_v58  ;;  %v7613_v3 = vadd.f32 %v7506_v0, %v571_v53  ;;  %v572_v58 = vld [vmem:[%s6710_s27 + $0x130] sm:$0xff]  ;;  %v573_v53 = vld [vmem:[%s6710_s27 + $0x138] sm:$0xff] }
 0x276   : > { %2433 = vrot.lane.b32.xlu0 %v5882_v54, %s6476_s24  ;;  %v5884_v5 = vpop.eup %5883  ;;  %11015 = vst [vmem:[#allocation91_spill] sm:$0xff] %v7583_v51  ;;  %v7585_v19 = vpop.permute.xlu0 %2165  ;;  %v7629_v0 = vadd.f32 %v7526_v11, %v572_v58  ;;  %v7641_v11 = vadd.f32 %v7535_v63, %v573_v53 }
 0x277   : > { %11016 = vst [vmem:[#allocation92_spill] sm:$0xff] %v7585_v19  ;;  %2439 = vrot.lane.b32.xlu1 %v5884_v5, %s6476_s24  ;;  %v5886_v5 = vpop.eup %5885  ;;  %5895 = vtanh.f32 %v7600_v50 }
 0x278   : > { %5897 = vtanh.f32 %v7613_v3 }
 0x279   : > { %v5626_v48 = vpop.f32.mrb[84].mxu1  ;;  %v1041_v55 = vpop.f32.mrb[84].mxu0  ;;  %5899 = vtanh.f32 %v7629_v0 }
 0x27a   : > { %v1043_v61 = vpop.f32.mrb[85].mxu0  ;;  %v1370_v15 = vpop.f32.mrb[85].mxu1  ;;  %v7594_v9 = vadd.f32 %v5626_v48, %v7190_v35  ;;  %v7597_v37 = vadd.f32 %v7493_v27, %v1041_v55  ;;  %5901 = vtanh.f32 %v7641_v11 }
 0x27b   : > { %v5627_v54 = vpop.f32.mrb[86].mxu1  ;;  %v1044_v19 = vpop.f32.mrb[86].mxu0  ;;  %v7604_v51 = vadd.f32 %v1370_v15, %v7178_v25  ;;  %2435 = vrot.lane.b32.xlu1 %v5886_v5, %s6476_s24 }
 0x27c   : > { %v7607_v61 = vadd.f32 %v5627_v54, %v7194_v39  ;;  %v1373_v20 = vpop.f32.mrb[87].mxu1  ;;  %v1046_v35 = vpop.f32.mrb[87].mxu0  ;;  %v7617_v25 = vadd.f32 %v7501_v28, %v1044_v19 }
 0x27d   : > { %v5888_v27 = vpop.eup %5887  ;;  %v7620_v39 = vpop.permute.xlu1 %2163  ;;  %v7625_v15 = vadd.f32 %v1373_v20, %v7182_v29 }
 0x27e   : > { %2441 = vrot.lane.b32.xlu0 %v5888_v27, %s6476_s24  ;;  %11017 = vst [vmem:[#allocation93_spill] sm:$0xff] %v7620_v39  ;;  %v7622_v48 = vpop.permute.xlu0 %2169  ;;  %v5890_v55 = vpop.eup %5889 }
 0x27f   : > { %11018 = vst [vmem:[#allocation94_spill] sm:$0xff] %v7622_v48  ;;  %2443 = vrot.lane.b32.xlu1 %v5890_v55, %s6476_s24  ;;  %v5892_v48 = vpop.eup %5891 }
 0x281   : > { %v5630_v54 = vpop.f32.mrb[88].mxu1  ;;  %v1049_v5 = vpop.f32.mrb[88].mxu0 }
 0x282   : > { %v7633_v28 = vadd.f32 %v5630_v54, %v7214_v6  ;;  %v7636_v19 = vadd.f32 %v7528_v56, %v1049_v5  ;;  %v1051_v35 = vpop.f32.mrb[89].mxu0  ;;  %v1386_v27 = vpop.f32.mrb[89].mxu1  ;;  %2445 = vrot.lane.b32.xlu0 %v5892_v48, %s6476_s24  ;;  %v574_v5 = vld [vmem:[%s6710_s27 + $0x140] sm:$0xff] }
 0x283   : > { %v5631_v29 = vpop.f32.mrb[90].mxu1  ;;  %v1052_v20 = vpop.f32.mrb[90].mxu0  ;;  %v7644_v6 = vadd.f32 %v1386_v27, %v7202_v45 }
 0x284   : > { %v1389_v39 = vpop.f32.mrb[91].mxu1  ;;  %v1054_v55 = vpop.f32.mrb[91].mxu0  ;;  %v7647_v56 = vadd.f32 %v5631_v29, %v7218_v16  ;;  %v7655_v48 = vadd.f32 %v7537_v1, %v1052_v20  ;;  %v7665_v29 = vadd.f32 %v7558_v60, %v574_v5 }
 0x285   : > { %v7650_v58 = vpop.permute.xlu1 %2167  ;;  %v5894_v54 = vpop.eup %5893  ;;  %v7658_v63 = vadd.f32 %v1389_v39, %v7206_v49 }
 0x286   : > { %11019 = vst [vmem:[#allocation95_spill] sm:$0xff] %v7650_v58  ;;  %2447 = vrot.lane.b32.xlu1 %v5894_v54, %s6476_s24  ;;  %v7661_v45 = vpop.permute.xlu0 %2173  ;;  %v5896_v53 = vpop.eup %5895  ;;  %v584_v54 = vld [vmem:[%s6710_s27 + $0x190] sm:$0xff]  ;;  %5903 = vtanh.f32 %v7665_v29 }
 0x287   : > { %11020 = vst [vmem:[#allocation96_spill] sm:$0xff] %v7661_v45  ;;  %2449 = vrot.lane.b32.xlu0 %v5896_v53, %s6476_s24  ;;  %v5898_v58 = vpop.eup %5897 }
 0x289   : > { %v5634_v16 = vpop.f32.mrb[92].mxu1  ;;  %v1057_v35 = vpop.f32.mrb[92].mxu0 }
 0x28a   : > { %v1402_v27 = vpop.f32.mrb[93].mxu1  ;;  %v7668_v55 = vadd.f32 %v5634_v16, %v7238_v7  ;;  %v7671_v1 = vadd.f32 %v7521_v46, %v1057_v35  ;;  %v1059_v49 = vpop.f32.mrb[93].mxu0  ;;  %2451 = vrot.lane.b32.xlu1 %v5898_v58, %s6476_s24  ;;  %v582_v35 = vld [vmem:[%s6710_s27 + $0x180] sm:$0xff] }
 0x28b   : > { %v7674_v39 = vadd.f32 %v1402_v27, %v7226_v30  ;;  %v5635_v20 = vpop.f32.mrb[94].mxu1  ;;  %v7677_v45 = vpop.permute.xlu1 %2171  ;;  %v7687_v30 = vadd.f32 %v7556_v42, %v584_v54  ;;  %v575_v49 = vld [vmem:[%s6710_s27 + $0x148] sm:$0xff]  ;;  %v585_v54 = vld [vmem:[%s6710_s27 + $0x198] sm:$0xff] }
 0x28c   : > { %11021 = vst [vmem:[#allocation97_spill] sm:$0xff] %v7677_v45  ;;  %v1060_v53 = vpop.f32.mrb[94].mxu0  ;;  %v1405_v60 = vpop.f32.mrb[95].mxu1  ;;  %v7681_v7 = vadd.f32 %v5635_v20, %v7242_v31  ;;  %v7705_v20 = vadd.f32 %v7576_v4, %v575_v49  ;;  %v576_v4 = vld [vmem:[%s6710_s27 + $0x150] sm:$0xff]  ;;  %v587_v45 = vld [vmem:[%s6710_s27 + $0x1a8] sm:$0xff] }
 0x28d   : > { %v1062_v5 = vpop.f32.mrb[95].mxu0  ;;  %v7684_v46 = vadd.f32 %v7532_v13, %v1060_v53  ;;  %v5900_v16 = vpop.eup %5899  ;;  %v7696_v31 = vadd.f32 %v1405_v60, %v7230_v40  ;;  %5905 = vtanh.f32 %v7687_v30  ;;  %v7700_v13 = vadd.f32 %v7566_v18, %v582_v35  ;;  %v583_v60 = vld [vmem:[%s6710_s27 + $0x188] sm:$0xff] }
 0x28e   : > { %v7691_v27 = vpop.permute.xlu0 %2177  ;;  %2453 = vrot.lane.b32.xlu0 %v5900_v16, %s6476_s24  ;;  %v5902_v58 = vpop.eup %5901  ;;  %v7713_v40 = vadd.f32 %v7570_v10, %v585_v54  ;;  %v7723_v16 = vadd.f32 %v7581_v41, %v583_v60  ;;  %v7728_v49 = vadd.f32 %v7597_v37, %v576_v4  ;;  %v586_v60 = vld [vmem:[%s6710_s27 + $0x1a0] sm:$0xff]  ;;  %v577_v4 = vld [vmem:[%s6710_s27 + $0x158] sm:$0xff] }
 0x28f   : > { %11022 = vst [vmem:[#allocation98_spill] sm:$0xff] %v7691_v27  ;;  %v7702_v42 = vpop.permute.xlu1 %2175  ;;  %2455 = vrot.lane.b32.xlu1 %v5902_v58, %s6476_s24  ;;  %5907 = vtanh.f32 %v7700_v13  ;;  %v588_v58 = vld [vmem:[%s6710_s27 + $0x1b0] sm:$0xff]  ;;  %v589_v27 = vld [vmem:[%s6710_s27 + $0x1b8] sm:$0xff] }
 0x290   : > { %11023 = vst [vmem:[#allocation99_spill] sm:$0xff] %v7702_v42  ;;  %5909 = vtanh.f32 %v7705_v20  ;;  %v5904_v18 = vpop.eup %5903 }
 0x291   : > { %5911 = vtanh.f32 %v7713_v40 }
 0x292   : > { %v7709_v53 = vpop.permute.xlu0 %2181  ;;  %2457 = vrot.lane.b32.xlu0 %v5904_v18, %s6476_s24  ;;  %5913 = vtanh.f32 %v7723_v16 }
 0x293   : > { %11024 = vst [vmem:[#allocation100_spill] sm:$0xff] %v7709_v53  ;;  %v7717_v5 = vpop.permute.xlu1 %2179  ;;  %5915 = vtanh.f32 %v7728_v49 }
 0x294   : > { %11025 = vst [vmem:[#allocation101_spill] sm:$0xff] %v7717_v5  ;;  %v7736_v5 = vadd.f32 %v7594_v9, %v588_v58  ;;  %v7752_v58 = vadd.f32 %v7617_v25, %v577_v4  ;;  %v578_v4 = vld [vmem:[%s6710_s27 + $0x160] sm:$0xff] }
 0x295   : > { %v7778_v42 = vadd.f32 %v7636_v19, %v578_v4 }
 0x296   : > { %v7725_v35 = vpop.permute.xlu0 %2381  ;;  %5917 = vtanh.f32 %v7736_v5 }
 0x297   : > { %v5906_v10 = vpop.eup %5905  ;;  %v7732_v54 = vpop.permute.xlu1 %2183 }
 0x298   : > { %2477 = vrot.lane.b32.xlu0 %v5906_v10, %s6476_s24  ;;  %11026 = vst [vmem:[#allocation102_spill] sm:$0xff] %v7732_v54  ;;  %v7747_v10 = vadd.f32 %v7604_v51, %v586_v60  ;;  %v7761_v51 = vadd.f32 %v7607_v61, %v589_v27  ;;  %v7773_v61 = vadd.f32 %v7625_v15, %v587_v45 }
 0x299   : > { %v5908_v18 = vpop.eup %5907 }
 0x29a   : > { %v5910_v41 = vpop.eup %5909  ;;  %v7741_v37 = vpop.permute.xlu0 %2377  ;;  %5919 = vtanh.f32 %v7747_v10  ;;  %11027 = vst [vmem:[#allocation103_spill] sm:$0xff] %v7761_v51  ;;  %11028 = vst [vmem:[#allocation104_spill] sm:$0xff] %v7773_v61 }
 0x29b   : > { %2459 = vrot.lane.b32.xlu1 %v5910_v41, %s6476_s24  ;;  %v7749_v54 = vpop.permute.xlu1 %2383  ;;  %v5912_v9 = vpop.eup %5911  ;;  %5921 = vtanh.f32 %v7752_v58 }
 0x29c   : > { %2473 = vrot.lane.b32.xlu0 %v5908_v18, %s6476_s24  ;;  %v5465_v18 = vmul.f32 -1.442695, %v7256_v36  ;;  %v5914_v41 = vpop.eup %5913  ;;  %v5463_v36 = vmul.f32 -1.442695, %v7262_v14  ;;  %v5466_v14 = vmul.f32 -1.442695, %v7264_v21 }
 0x29d   : > { %v5916_v60 = vpop.eup %5915  ;;  %v5469_v21 = vmul.f32 -1.442695, %v7283_v47 }
 0x29e   : > { %v7757_v53 = vpop.permute.xlu0 %2389  ;;  %5923 = vpow2.f32 %v5465_v18  ;;  %v592_v18 = vld [vmem:[%s6710_s27 + $0x1d0] sm:$0xff] }
 0x29f   : > { %2479 = vrot.lane.b32.xlu1 %v5912_v9, %s6476_s24  ;;  %v7766_v25 = vpop.permute.xlu1 %2379  ;;  %5925 = vtanh.f32 %v7761_v51  ;;  %v7788_v45 = vadd.f32 %v7633_v28, %v592_v18  ;;  %v5467_v28 = vmul.f32 -1.442695, %v7289_v33  ;;  %v593_v51 = vld [vmem:[%s6710_s27 + $0x1d8] sm:$0xff] }
 0x2a0   : > { %2461 = vrot.lane.b32.xlu0 %v5916_v60, %s6476_s24  ;;  %v5918_v9 = vpop.eup %5917  ;;  %5927 = vpow2.f32 %v5463_v36  ;;  %v5464_v60 = vmul.f32 -1.442695, %v7277_v43  ;;  %v590_v36 = vld [vmem:[%s6710_s27 + $0x1c0] sm:$0xff] }
 0x2a1   : > { %5929 = vtanh.f32 %v7773_v61  ;;  %v7801_v18 = vadd.f32 %v7644_v6, %v590_v36 }
 0x2a2   : > { %v7775_v27 = vpop.permute.xlu0 %2385  ;;  %5931 = vtanh.f32 %v7778_v42 }
 0x2a3   : > { %2475 = vrot.lane.b32.xlu1 %v5914_v41, %s6476_s24  ;;  %v7783_v41 = vpop.permute.xlu1 %2391  ;;  %5933 = vpow2.f32 %v5466_v14  ;;  %11029 = vst [vmem:[#allocation105_spill] sm:$0xff] %v7801_v18 }
 0x2a4   : > { %2485 = vrot.lane.b32.xlu0 %v5918_v9, %s6476_s24  ;;  %v5920_v15 = vpop.eup %5919  ;;  %v579_v9 = vld [vmem:[%s6710_s27 + $0x168] sm:$0xff]  ;;  %5935 = vpow2.f32 %v5464_v60 }
 0x2a5   : > { %v5922_v19 = vpop.eup %5921  ;;  %5937 = vtanh.f32 %v7788_v45  ;;  %v7806_v14 = vadd.f32 %v7655_v48, %v579_v9 }
 0x2a6   : > { %5939 = vpow2.f32 %v5469_v21  ;;  %v591_v21 = vld [vmem:[%s6710_s27 + $0x1c8] sm:$0xff] }
 0x2a7   : > { %2463 = vrot.lane.b32.xlu1 %v5922_v19, %s6476_s24  ;;  %v7803_v61 = vpop.permute.xlu1 %2387  ;;  %11030 = vst [vmem:[#allocation106_spill] sm:$0xff] %v7806_v14  ;;  %5941 = vpow2.f32 %v5467_v28  ;;  %v7814_v19 = vadd.f32 %v7647_v56, %v593_v51  ;;  %v7826_v56 = vadd.f32 %v7658_v63, %v591_v21  ;;  %v580_v51 = vld [vmem:[%s6710_s27 + $0x170] sm:$0xff] }
 0x2a8   : > { %2481 = vrot.lane.b32.xlu0 %v5920_v15, %s6476_s24  ;;  %v7793_v4 = vpop.permute.xlu0 %2397  ;;  %v5924_v43 = vpop.eup %5923  ;;  %5943 = vtanh.f32 %v7801_v18 }
 0x2a9   : > { %v5926_v15 = vpop.eup %5925  ;;  %v1675_v47 = vadd.f32 1.0, %v5924_v43  ;;  %11031 = vst [vmem:[#allocation107_spill] sm:$0xff] %v7814_v19  ;;  %5945 = vtanh.f32 %v7806_v14  ;;  %v5470_v43 = vmul.f32 -1.442695, %v7292_v24  ;;  %v596_v14 = vld [vmem:[%s6710_s27 + $0x1f0] sm:$0xff] }
 0x2aa   : > { %v5928_v60 = vpop.eup %5927 }
 0x2ab   : > { %2487 = vrot.lane.b32.xlu1 %v5926_v15, %s6476_s24  ;;  %v5930_v6 = vpop.eup %5929  ;;  %5947 = vrcp.f32 %v1675_v47  ;;  %v1673_v36 = vadd.f32 1.0, %v5928_v60  ;;  %v7819_v9 = vpop.permute.xlu1 %2399  ;;  %v5468_v15 = vmul.f32 -1.442695, %v7308_v34  ;;  %v7834_v34 = vadd.f32 %v7671_v1, %v580_v51 }
 0x2ac   : > { %v7810_v33 = vpop.permute.xlu0 %2393  ;;  %v5932_v48 = vpop.eup %5931  ;;  %5949 = vtanh.f32 %v7814_v19 }
 0x2ad   : > { %2465 = vrot.lane.b32.xlu0 %v5932_v48, %s6476_s24  ;;  %v5934_v28 = vpop.eup %5933  ;;  %5951 = vrcp.f32 %v1673_v36 }
 0x2ae   : > { %v5936_v18 = vpop.eup %5935  ;;  %v1676_v24 = vadd.f32 1.0, %v5934_v28  ;;  %5953 = vpow2.f32 %v5470_v43 }
 0x2af   : > { %2483 = vrot.lane.b32.xlu1 %v5930_v6, %s6476_s24  ;;  %v5938_v60 = vpop.eup %5937  ;;  %v5473_v6 = vmul.f32 -1.442695, %v7315_v44  ;;  %5955 = vpow2.f32 %v5468_v15  ;;  %v1674_v21 = vadd.f32 1.0, %v5936_v18  ;;  %v5471_v44 = vmul.f32 -1.442695, %v7328_v52  ;;  %v594_v52 = vld [vmem:[%s6710_s27 + $0x1e0] sm:$0xff] }
 0x2b0   : > { %v5940_v48 = vpop.eup %5939  ;;  %5957 = vtanh.f32 %v7826_v56  ;;  %v7847_v18 = vadd.f32 %v7668_v55, %v596_v14  ;;  %v5474_v55 = vmul.f32 -1.442695, %v7335_v8 }
 0x2b1   : > { %2493 = vrot.lane.b32.xlu0 %v5938_v60, %s6476_s24  ;;  %v7836_v19 = vpop.permute.xlu1 %2395  ;;  %v5942_v63 = vpop.eup %5941  ;;  %5959 = vpow2.f32 %v5473_v6  ;;  %v1679_v28 = vadd.f32 1.0, %v5940_v48  ;;  %v5477_v6 = vmul.f32 -1.442695, %v7350_v22 }
 0x2b2   : > { %v7829_v47 = vpop.permute.xlu0 %2405  ;;  %v5944_v36 = vpop.eup %5943  ;;  %5961 = vrcp.f32 %v1676_v24  ;;  %v1677_v51 = vadd.f32 1.0, %v5942_v63  ;;  %v581_v24 = vld [vmem:[%s6710_s27 + $0x178] sm:$0xff]  ;;  %v7864_v63 = vadd.f32 %v7674_v39, %v594_v52  ;;  %v5475_v52 = vmul.f32 -1.442695, %v7361_v26 }
 0x2b3   : > { %v5946_v43 = vpop.eup %5945  ;;  %5963 = vtanh.f32 %v7834_v34 }
 0x2b4   : > { %2467 = vrot.lane.b32.xlu1 %v5946_v43, %s6476_s24  ;;  %5965 = vrcp.f32 %v1674_v21  ;;  %v5472_v43 = vmul.f32 -1.442695, %v7346_v12 }
 0x2b5   : > { %2489 = vrot.lane.b32.xlu0 %v5944_v36, %s6476_s24  ;;  %v7844_v15 = vpop.eup %5947  ;;  %5967 = vpow2.f32 %v5471_v44 }
 0x2b6   : > { %11032 = vst [vmem:[#allocation108_spill] sm:$0xff] %v7844_v15  ;;  %v2571_v60 = vmul.f32 %v7844_v15, %v7725_v35  ;;  %v5950_v36 = vpop.eup %5949  ;;  %5969 = vrcp.f32 %v1679_v28  ;;  %v7868_v35 = vadd.f32 %v7684_v46, %v581_v24  ;;  %v597_v28 = vld [vmem:[%s6710_s27 + $0x1f8] sm:$0xff]  ;;  %v5478_v46 = vmul.f32 -1.442695, %v7367_v62  ;;  %v595_v24 = vld [vmem:[%s6710_s27 + $0x1e8] sm:$0xff] }
 0x2b7   : > { %v7860_v14 = vpop.eup %5951  ;;  %5971 = vtanh.f32 %v7847_v18  ;;  %v7886_v12 = vadd.f32 %v7681_v7, %v597_v28  ;;  %v5481_v7 = vmul.f32 -1.442695, %v7385_v32  ;;  %v5476_v28 = vmul.f32 -1.442695, %v7378_v2 }
 0x2b8   : > { %v7842_v1 = vpop.permute.xlu0 %2401  ;;  %11033 = vst [vmem:[#allocation109_spill] sm:$0xff] %v7860_v14  ;;  %2495 = vrot.lane.b32.xlu1 %v5950_v36, %s6476_s24  ;;  %v5954_v22 = vpop.eup %5953  ;;  %5973 = vrcp.f32 %v1677_v51  ;;  %v2569_v21 = vmul.f32 %v7860_v14, %v7741_v37 }
 0x2b9   : > { %v7856_v48 = vpop.permute.xlu1 %2407  ;;  %2701 = vrot.lane.b32.xlu0 %v2571_v60, %s6476_s24  ;;  %v5956_v44 = vpop.eup %5955  ;;  %5975 = vpow2.f32 %v5477_v6  ;;  %v1680_v26 = vadd.f32 1.0, %v5954_v22 }
 0x2ba   : > { %v5958_v39 = vpop.eup %5957  ;;  %5977 = vpow2.f32 %v5474_v55  ;;  %v1678_v32 = vadd.f32 1.0, %v5956_v44 }
 0x2bb   : > { %v5960_v51 = vpop.eup %5959  ;;  %5979 = vtanh.f32 %v7864_v63 }
 0x2bc   : > { %2491 = vrot.lane.b32.xlu1 %v5958_v39, %s6476_s24  ;;  %v7883_v60 = vpop.eup %5961  ;;  %5981 = vtanh.f32 %v7868_v35  ;;  %v1683_v55 = vadd.f32 1.0, %v5960_v51 }
 0x2bd   : > { %2697 = vrot.lane.b32.xlu0 %v2569_v21, %s6476_s24  ;;  %v7881_v37 = vpop.permute.xlu1 %2403  ;;  %11034 = vst [vmem:[#allocation110_spill] sm:$0xff] %v7883_v60  ;;  %v5964_v6 = vpop.eup %5963  ;;  %5983 = vpow2.f32 %v5472_v43  ;;  %v2572_v62 = vmul.f32 %v7883_v60, %v7749_v54  ;;  %v7903_v54 = vadd.f32 %v7696_v31, %v595_v24  ;;  %v11038_v24 = vld [vmem:[#allocation65_spill] sm:$0xff] }
 0x2be   : > { %v7892_v36 = vpop.eup %5965  ;;  %5985 = vpow2.f32 %v5475_v52  ;;  %v11040_v60 = vld [vmem:[#allocation69_spill] sm:$0xff] }
 0x2bf   : > { %11035 = vst [vmem:[#allocation111_spill] sm:$0xff] %v7892_v36  ;;  %v5968_v39 = vpop.eup %5967  ;;  %5987 = vpow2.f32 %v5478_v46  ;;  %v2570_v52 = vmul.f32 %v7892_v36, %v7766_v25  ;;  %v5482_v36 = vmul.f32 -1.442695, %v11038_v24  ;;  %v5485_v14 = vmul.f32 -1.442695, %v11040_v60 }
 0x2c0   : > { %v7872_v8 = vpop.permute.xlu0 %2413  ;;  %2703 = vrot.lane.b32.xlu1 %v2572_v62, %s6476_s24  ;;  %v7899_v22 = vpop.eup %5969  ;;  %5989 = vtanh.f32 %v7886_v12  ;;  %v1681_v62 = vadd.f32 1.0, %v5968_v39 }
 0x2c1   : > { %2469 = vrot.lane.b32.xlu0 %v5964_v6, %s6476_s24  ;;  %11036 = vst [vmem:[#allocation112_spill] sm:$0xff] %v7899_v22  ;;  %v5972_v43 = vpop.eup %5971  ;;  %5991 = vrcp.f32 %v1680_v26  ;;  %v5479_v26 = vmul.f32 -1.442695, %v7401_v17 }
 0x2c2   : > { %v7908_v51 = vpop.permute.xlu1 %2415  ;;  %v7910_v46 = vpop.eup %5973  ;;  %5993 = vrcp.f32 %v1683_v55 }
 0x2c3   : > { %11037 = vst [vmem:[#allocation113_spill] sm:$0xff] %v7910_v46  ;;  %v5976_v6 = vpop.eup %5975  ;;  %5995 = vpow2.f32 %v5481_v7  ;;  %v11039_v7 = vld [vmem:[#allocation68_spill] sm:$0xff] }
 0x2c4   : > { %v7895_v21 = vpop.permute.xlu0 %2409  ;;  %2699 = vrot.lane.b32.xlu1 %v2570_v52, %s6476_s24  ;;  %v5978_v31 = vpop.eup %5977  ;;  %5997 = vtanh.f32 %v7903_v54  ;;  %v1687_v55 = vadd.f32 1.0, %v5976_v6 }
 0x2c5   : > { %2501 = vrot.lane.b32.xlu0 %v5972_v43, %s6476_s24  ;;  %v5980_v25 = vpop.eup %5979  ;;  %5999 = vpow2.f32 %v5476_v28  ;;  %v5480_v43 = vmul.f32 -1.442695, %v11039_v7  ;;  %v2575_v28 = vmul.f32 %v7899_v22, %v7757_v53  ;;  %v1684_v15 = vadd.f32 1.0, %v5978_v31 }
 0x2c6   : > { %v5982_v44 = vpop.eup %5981  ;;  %6001 = vrcp.f32 %v1678_v32  ;;  %v11041_v32 = vld [vmem:[#allocation70_spill] sm:$0xff] }
 0x2c7   : > { %v5984_v39 = vpop.eup %5983  ;;  %6003 = vrcp.f32 %v1681_v62  ;;  %v5483_v6 = vmul.f32 -1.442695, %v11041_v32  ;;  %v11044_v32 = vld [vmem:[#allocation73_spill] sm:$0xff] }
 0x2c8   : > { %2471 = vrot.lane.b32.xlu1 %v5982_v44, %s6476_s24  ;;  %v7922_v17 = vpop.permute.xlu1 %2411  ;;  %v5986_v52 = vpop.eup %5985  ;;  %6005 = vpow2.f32 %v5479_v26  ;;  %v1682_v7 = vadd.f32 1.0, %v5984_v39  ;;  %v5486_v22 = vmul.f32 -1.442695, %v11044_v32 }
 0x2c9   : > { %v7916_v2 = vpop.permute.xlu0 %2421  ;;  %2497 = vrot.lane.b32.xlu0 %v5980_v25, %s6476_s24  ;;  %v5988_v24 = vpop.eup %5987  ;;  %6007 = vpow2.f32 %v5482_v36  ;;  %v1685_v53 = vadd.f32 1.0, %v5986_v52  ;;  %v2573_v36 = vmul.f32 %v7910_v46, %v7775_v27 }
 0x2ca   : > { %v5990_v25 = vpop.eup %5989  ;;  %6009 = vrcp.f32 %v1687_v55  ;;  %v1688_v31 = vadd.f32 1.0, %v5988_v24 }
 0x2cb   : > { %v7931_v44 = vpop.eup %5991  ;;  %6011 = vpow2.f32 %v5480_v43  ;;  %v11045_v43 = vld [vmem:[#allocation75_spill] sm:$0xff] }
 0x2cc   : > { %11042 = vst [vmem:[#allocation65_spill] sm:$0xff] %v7931_v44  ;;  %2503 = vrot.lane.b32.xlu1 %v5990_v25, %s6476_s24  ;;  %v7934_v60 = vpop.eup %5993  ;;  %6013 = vpow2.f32 %v5485_v14  ;;  %v5489_v25 = vmul.f32 -1.442695, %v11045_v43 }
 0x2cd   : > { %2709 = vrot.lane.b32.xlu0 %v2575_v28, %s6476_s24  ;;  %v7929_v62 = vpop.permute.xlu0 %2417  ;;  %11043 = vst [vmem:[#allocation68_spill] sm:$0xff] %v7934_v60  ;;  %v5996_v26 = vpop.eup %5995  ;;  %6015 = vpow2.f32 %v5483_v6  ;;  %v2579_v52 = vmul.f32 %v7934_v60, %v7793_v4  ;;  %v11048_v6 = vld [vmem:[#allocation74_spill] sm:$0xff] }
 0x2ce   : > { %v5998_v28 = vpop.eup %5997  ;;  %6017 = vrcp.f32 %v1684_v15  ;;  %v1691_v27 = vadd.f32 1.0, %v5996_v26  ;;  %v11049_v26 = vld [vmem:[#allocation78_spill] sm:$0xff] }
 0x2cf   : > { %v6000_v39 = vpop.eup %5999  ;;  %6019 = vrcp.f32 %v1682_v7  ;;  %v2576_v7 = vmul.f32 %v7931_v44, %v7783_v41 }
 0x2d0   : > { %v7938_v55 = vpop.permute.xlu1 %2423  ;;  %2499 = vrot.lane.b32.xlu1 %v5998_v28, %s6476_s24  ;;  %v7944_v14 = vpop.eup %6001  ;;  %6021 = vrcp.f32 %v1685_v53  ;;  %v1686_v43 = vadd.f32 1.0, %v6000_v39  ;;  %v5487_v28 = vmul.f32 -1.442695, %v11049_v26 }
 0x2d1   : > { %2705 = vrot.lane.b32.xlu0 %v2573_v36, %s6476_s24  ;;  %11046 = vst [vmem:[#allocation69_spill] sm:$0xff] %v7944_v14  ;;  %v7950_v15 = vpop.eup %6003  ;;  %6023 = vrcp.f32 %v1688_v31  ;;  %v5484_v36 = vmul.f32 -1.442695, %v11048_v6  ;;  %v11051_v31 = vld [vmem:[#allocation79_spill] sm:$0xff] }
 0x2d2   : > { %11047 = vst [vmem:[#allocation70_spill] sm:$0xff] %v7950_v15  ;;  %v6006_v32 = vpop.eup %6005  ;;  %6025 = vpow2.f32 %v5486_v22  ;;  %v5490_v6 = vmul.f32 -1.442695, %v11051_v31  ;;  %v2577_v41 = vmul.f32 %v7950_v15, %v7810_v33 }
 0x2d3   : > { %v7948_v24 = vpop.permute.xlu0 %2429  ;;  %v6008_v53 = vpop.eup %6007  ;;  %6027 = vpow2.f32 %v5489_v25  ;;  %v1689_v22 = vadd.f32 1.0, %v6006_v32  ;;  %v2574_v25 = vmul.f32 %v7944_v14, %v7803_v61 }
 0x2d4   : > { %2711 = vrot.lane.b32.xlu1 %v2576_v7, %s6476_s24  ;;  %v7958_v4 = vpop.permute.xlu1 %2419  ;;  %v7960_v60 = vpop.eup %6009  ;;  %6029 = vrcp.f32 %v1691_v27  ;;  %v1692_v26 = vadd.f32 1.0, %v6008_v53  ;;  %v11052_v27 = vld [vmem:[#allocation83_spill] sm:$0xff] }
 0x2d5   : > { %2717 = vrot.lane.b32.xlu0 %v2579_v52, %s6476_s24  ;;  %11050 = vst [vmem:[#allocation73_spill] sm:$0xff] %v7960_v60  ;;  %v6012_v39 = vpop.eup %6011  ;;  %6031 = vpow2.f32 %v5484_v36  ;;  %v5493_v31 = vmul.f32 -1.442695, %v11052_v27  ;;  %v2583_v61 = vmul.f32 %v7960_v60, %v7829_v47 }
 0x2d6   : > { %v6014_v52 = vpop.eup %6013  ;;  %6033 = vrcp.f32 %v1686_v43  ;;  %v1690_v32 = vadd.f32 1.0, %v6012_v39 }
 0x2d7   : > { %v6016_v44 = vpop.eup %6015  ;;  %6035 = vpow2.f32 %v5487_v28  ;;  %v1695_v43 = vadd.f32 1.0, %v6014_v52 }
 0x2d8   : > { %2707 = vrot.lane.b32.xlu1 %v2574_v25, %s6476_s24  ;;  %v7972_v33 = vpop.eup %6017  ;;  %6037 = vpow2.f32 %v5490_v6  ;;  %v1693_v25 = vadd.f32 1.0, %v6016_v44  ;;  %v11057_v6 = vld [vmem:[#allocation82_spill] sm:$0xff]  ;;  %v11059_v44 = vld [vmem:[#allocation87_spill] sm:$0xff] }
 0x2d9   : > { %2713 = vrot.lane.b32.xlu0 %v2577_v41, %s6476_s24  ;;  %v7968_v7 = vpop.permute.xlu0 %2425  ;;  %11053 = vst [vmem:[#allocation75_spill] sm:$0xff] %v7972_v33  ;;  %v7976_v36 = vpop.eup %6019  ;;  %6039 = vrcp.f32 %v1689_v22  ;;  %v2580_v53 = vmul.f32 %v7972_v33, %v7819_v9  ;;  %v5488_v27 = vmul.f32 -1.442695, %v11057_v6  ;;  %v11058_v22 = vld [vmem:[#allocation84_spill] sm:$0xff] }
 0x2da   : > { %11054 = vst [vmem:[#allocation74_spill] sm:$0xff] %v7976_v36  ;;  %v7980_v41 = vpop.permute.xlu1 %2431  ;;  %v7982_v28 = vpop.eup %6021  ;;  %6041 = vrcp.f32 %v1692_v26  ;;  %v5491_v52 = vmul.f32 -1.442695, %v11058_v22  ;;  %v2578_v33 = vmul.f32 %v7976_v36, %v7836_v19 }
 0x2db   : > { %11055 = vst [vmem:[#allocation78_spill] sm:$0xff] %v7982_v28  ;;  %v7985_v39 = vpop.eup %6023  ;;  %6043 = vpow2.f32 %v5493_v31  ;;  %v2581_v9 = vmul.f32 %v7982_v28, %v7842_v1  ;;  %v5495_v31 = vmul.f32 -1.442695, %v7546_v59  ;;  %v5492_v59 = vmul.f32 -1.442695, %v7543_v23 }
 0x2dc   : > { %11056 = vst [vmem:[#allocation79_spill] sm:$0xff] %v7985_v39  ;;  %2719 = vrot.lane.b32.xlu1 %v2580_v53, %s6476_s24  ;;  %v6026_v47 = vpop.eup %6025  ;;  %6045 = vrcp.f32 %v1690_v32 }
 0x2dd   : > { %2725 = vrot.lane.b32.xlu0 %v2583_v61, %s6476_s24  ;;  %v6028_v26 = vpop.eup %6027  ;;  %6047 = vrcp.f32 %v1695_v43  ;;  %v5494_v61 = vmul.f32 -1.442695, %v11059_v44  ;;  %v1696_v53 = vadd.f32 1.0, %v6026_v47 }
 0x2de   : > { %v7997_v6 = vpop.eup %6029  ;;  %6049 = vrcp.f32 %v1693_v25  ;;  %v1699_v22 = vadd.f32 1.0, %v6028_v26  ;;  %v2584_v25 = vmul.f32 %v7985_v39, %v7856_v48 }
 0x2df   : > { %11060 = vst [vmem:[#allocation83_spill] sm:$0xff] %v7997_v6  ;;  %v6032_v32 = vpop.eup %6031  ;;  %6051 = vpow2.f32 %v5488_v27  ;;  %v2587_v19 = vmul.f32 %v7997_v6, %v7872_v8 }
 0x2e0   : > { %2715 = vrot.lane.b32.xlu1 %v2578_v33, %s6476_s24  ;;  %v8002_v1 = vpop.permute.xlu1 %2427  ;;  %v8004_v43 = vpop.eup %6033  ;;  %6053 = vpow2.f32 %v5491_v52  ;;  %v1694_v27 = vadd.f32 1.0, %v6032_v32  ;;  %v5497_v52 = vmul.f32 -1.442695, %v7573_v38  ;;  %v11064_v38 = vld [vmem:[#allocation90_spill] sm:$0xff] }
 0x2e1   : > { %v7992_v60 = vpop.permute.xlu0 %2437  ;;  %2721 = vrot.lane.b32.xlu0 %v2581_v9, %s6476_s24  ;;  %v6036_v44 = vpop.eup %6035  ;;  %6055 = vpow2.f32 %v5494_v61 }
 0x2e2   : > { %v6038_v47 = vpop.eup %6037  ;;  %6057 = vpow2.f32 %v5495_v31  ;;  %v1697_v23 = vadd.f32 1.0, %v6036_v44  ;;  %v2582_v31 = vmul.f32 %v8004_v43, %v7881_v37 }
 0x2e3   : > { %v8014_v9 = vpop.eup %6039  ;;  %6059 = vrcp.f32 %v1696_v53  ;;  %v1700_v61 = vadd.f32 1.0, %v6038_v47 }
 0x2e4   : > { %11061 = vst [vmem:[#allocation82_spill] sm:$0xff] %v8014_v9  ;;  %2727 = vrot.lane.b32.xlu1 %v2584_v25, %s6476_s24  ;;  %v8018_v8 = vpop.eup %6041  ;;  %6061 = vrcp.f32 %v1699_v22  ;;  %v2585_v48 = vmul.f32 %v8014_v9, %v7895_v21  ;;  %v5499_v21 = vmul.f32 -1.442695, %v7600_v50  ;;  %v5501_v50 = vmul.f32 -1.442695, %v7629_v0 }
 0x2e5   : > { %2733 = vrot.lane.b32.xlu0 %v2587_v19, %s6476_s24  ;;  %11062 = vst [vmem:[#allocation84_spill] sm:$0xff] %v8018_v8  ;;  %v6044_v26 = vpop.eup %6043  ;;  %6063 = vpow2.f32 %v5492_v59  ;;  %v5496_v19 = vmul.f32 -1.442695, %v11064_v38 }
 0x2e6   : > { %v8026_v53 = vpop.eup %6045  ;;  %6065 = vrcp.f32 %v1694_v27  ;;  %v1703_v37 = vadd.f32 1.0, %v6044_v26  ;;  %v5498_v27 = vmul.f32 -1.442695, %v7589_v57 }
 0x2e7   : > { %11063 = vst [vmem:[#allocation87_spill] sm:$0xff] %v8026_v53  ;;  %v8030_v22 = vpop.eup %6047  ;;  %6067 = vpow2.f32 %v5497_v52  ;;  %v2588_v52 = vmul.f32 %v8018_v8, %v7908_v51  ;;  %v2586_v0 = vmul.f32 %v8026_v53, %v7922_v17 }
 0x2e8   : > { %v8011_v33 = vpop.permute.xlu0 %2433  ;;  %11065 = vst [vmem:[#allocation90_spill] sm:$0xff] %v8030_v22  ;;  %2723 = vrot.lane.b32.xlu1 %v2582_v31, %s6476_s24  ;;  %v8034_v44 = vpop.eup %6049  ;;  %6069 = vrcp.f32 %v1697_v23  ;;  %v2591_v59 = vmul.f32 %v8030_v22, %v7916_v2 }
 0x2e9   : > { %v8024_v32 = vpop.permute.xlu1 %2439  ;;  %2729 = vrot.lane.b32.xlu0 %v2585_v48, %s6476_s24  ;;  %11066 = vst [vmem:[#allocation114_spill] sm:$0xff] %v8034_v44  ;;  %v6052_v47 = vpop.eup %6051  ;;  %6071 = vrcp.f32 %v1700_v61  ;;  %v2589_v57 = vmul.f32 %v8034_v44, %v7929_v62 }
 0x2ea   : > { %v6054_v48 = vpop.eup %6053  ;;  %6073 = vpow2.f32 %v5496_v19  ;;  %v1698_v31 = vadd.f32 1.0, %v6052_v47  ;;  %v5503_v47 = vmul.f32 -1.442695, %v7665_v29 }
 0x2eb   : > { %v6056_v23 = vpop.eup %6055  ;;  %6075 = vpow2.f32 %v5499_v21  ;;  %v1701_v38 = vadd.f32 1.0, %v6054_v48  ;;  %v5500_v48 = vmul.f32 -1.442695, %v7613_v3 }
 0x2ec   : > { %2735 = vrot.lane.b32.xlu1 %v2588_v52, %s6476_s24  ;;  %v6058_v2 = vpop.eup %6057  ;;  %6077 = vrcp.f32 %v1703_v37  ;;  %v1704_v21 = vadd.f32 1.0, %v6056_v23 }
 0x2ed   : > { %2741 = vrot.lane.b32.xlu0 %v2591_v59, %s6476_s24  ;;  %v8045_v26 = vpop.permute.xlu1 %2435  ;;  %v8052_v51 = vpop.eup %6059  ;;  %6079 = vpow2.f32 %v5498_v27  ;;  %v1705_v37 = vadd.f32 1.0, %v6058_v2 }
 0x2ee   : > { %11067 = vst [vmem:[#allocation115_spill] sm:$0xff] %v8052_v51  ;;  %v8056_v19 = vpop.eup %6061  ;;  %6081 = vpow2.f32 %v5501_v50  ;;  %v2592_v50 = vmul.f32 %v8052_v51, %v7938_v55 }
 0x2ef   : > { %11068 = vst [vmem:[#allocation116_spill] sm:$0xff] %v8056_v19  ;;  %v6064_v59 = vpop.eup %6063  ;;  %6083 = vrcp.f32 %v1698_v31  ;;  %v2595_v27 = vmul.f32 %v8056_v19, %v7948_v24  ;;  %v5513_v24 = vmul.f32 -1.442695, %v7687_v30 }
 0x2f0   : > { %v8038_v25 = vpop.permute.xlu0 %2441  ;;  %2731 = vrot.lane.b32.xlu1 %v2586_v0, %s6476_s24  ;;  %v8060_v62 = vpop.eup %6065  ;;  %6085 = vrcp.f32 %v1701_v38  ;;  %v1702_v31 = vadd.f32 1.0, %v6064_v59 }
 0x2f1   : > { %2737 = vrot.lane.b32.xlu0 %v2589_v57, %s6476_s24  ;;  %11069 = vst [vmem:[#allocation117_spill] sm:$0xff] %v8060_v62  ;;  %v6068_v17 = vpop.eup %6067  ;;  %v8070_v23 = vpop.permute.xlu1 %2443  ;;  %6087 = vrcp.f32 %v1704_v21  ;;  %v5502_v21 = vmul.f32 -1.442695, %v7641_v11  ;;  %v2590_v59 = vmul.f32 %v8060_v62, %v7958_v4 }
 0x2f2   : > { %v8072_v2 = vpop.eup %6069  ;;  %6089 = vrcp.f32 %v1705_v37  ;;  %v1707_v3 = vadd.f32 1.0, %v6068_v17 }
 0x2f3   : > { %11070 = vst [vmem:[#allocation118_spill] sm:$0xff] %v8072_v2  ;;  %v8075_v29 = vpop.eup %6071  ;;  %6091 = vpow2.f32 %v5503_v47  ;;  %v2593_v55 = vmul.f32 %v8072_v2, %v7968_v7 }
 0x2f4   : > { %v8050_v61 = vpop.permute.xlu0 %2445  ;;  %11071 = vst [vmem:[#allocation119_spill] sm:$0xff] %v8075_v29  ;;  %2743 = vrot.lane.b32.xlu1 %v2592_v50, %s6476_s24  ;;  %v6074_v57 = vpop.eup %6073  ;;  %6093 = vpow2.f32 %v5500_v48  ;;  %v5504_v50 = vmul.f32 -1.442695, %v7705_v20  ;;  %v5505_v20 = vmul.f32 -1.442695, %v7728_v49 }
 0x2f5   : > { %2749 = vrot.lane.b32.xlu0 %v2595_v27, %s6476_s24  ;;  %v6076_v0 = vpop.eup %6075  ;;  %6095 = vrcp.f32 %v1702_v31  ;;  %v5511_v27 = vmul.f32 -1.442695, %v7700_v13  ;;  %v1706_v7 = vadd.f32 1.0, %v6074_v57  ;;  %v2596_v13 = vmul.f32 %v8075_v29, %v7980_v41 }
 0x2f6   : > { %v8088_v30 = vpop.eup %6077  ;;  %6097 = vpow2.f32 %v5513_v24  ;;  %v1709_v11 = vadd.f32 1.0, %v6076_v0 }
 0x2f7   : > { %v6080_v47 = vpop.eup %6079  ;;  %6099 = vrcp.f32 %v1707_v3  ;;  %v2599_v4 = vmul.f32 %v8088_v30, %v7992_v60 }
 0x2f8   : > { %v8086_v37 = vpop.permute.xlu1 %2447  ;;  %2739 = vrot.lane.b32.xlu1 %v2590_v59, %s6476_s24  ;;  %v6082_v17 = vpop.eup %6081  ;;  %6101 = vpow2.f32 %v5502_v21  ;;  %v1708_v24 = vadd.f32 1.0, %v6080_v47  ;;  %v5514_v21 = vmul.f32 -1.442695, %v7713_v40  ;;  %v5512_v40 = vmul.f32 -1.442695, %v7723_v16 }
 0x2f9   : > { %v8065_v52 = vpop.permute.xlu0 %2449  ;;  %2745 = vrot.lane.b32.xlu0 %v2593_v55, %s6476_s24  ;;  %v8102_v57 = vpop.eup %6083  ;;  %6103 = vpow2.f32 %v5511_v27  ;;  %v1711_v60 = vadd.f32 1.0, %v6082_v17  ;;  %v5515_v16 = vmul.f32 -1.442695, %v7747_v10 }
 0x2fa   : > { %11072 = vst [vmem:[#allocation120_spill] sm:$0xff] %v8102_v57  ;;  %v8105_v3 = vpop.eup %6085  ;;  %6105 = vrcp.f32 %v1706_v7  ;;  %v2594_v59 = vmul.f32 %v8102_v57, %v8002_v1  ;;  %v5517_v7 = vmul.f32 -1.442695, %v7736_v5 }
 0x2fb   : > { %11073 = vst [vmem:[#allocation121_spill] sm:$0xff] %v8105_v3  ;;  %v8108_v55 = vpop.eup %6087  ;;  %6107 = vrcp.f32 %v1709_v11  ;;  %v2597_v41 = vmul.f32 %v8105_v3, %v8011_v33 }
 0x2fc   : > { %v8100_v31 = vpop.permute.xlu1 %2451  ;;  %2751 = vrot.lane.b32.xlu1 %v2596_v13, %s6476_s24  ;;  %v8113_v0 = vpop.eup %6089  ;;  %6109 = vpow2.f32 %v5504_v50  ;;  %v2600_v5 = vmul.f32 %v8108_v55, %v8024_v32 }
 0x2fd   : > { %2757 = vrot.lane.b32.xlu0 %v2599_v4, %s6476_s24  ;;  %v6092_v47 = vpop.eup %6091  ;;  %6111 = vrcp.f32 %v1708_v24  ;;  %v2601_v1 = vmul.f32 %v8113_v0, %v8038_v25 }
 0x2fe   : > { %v6094_v17 = vpop.eup %6093  ;;  %6113 = vrcp.f32 %v1711_v60  ;;  %v1713_v4 = vadd.f32 1.0, %v6092_v47 }
 0x2ff   : > { %v8125_v33 = vpop.eup %6095  ;;  %6115 = vpow2.f32 %v5505_v20  ;;  %v1710_v24 = vadd.f32 1.0, %v6094_v17 }
 0x300   : > { %v8081_v38 = vpop.permute.xlu0 %2453  ;;  %2747 = vrot.lane.b32.xlu1 %v2594_v59, %s6476_s24  ;;  %v6098_v11 = vpop.eup %6097  ;;  %6117 = vpow2.f32 %v5514_v21  ;;  %v5506_v59 = vmul.f32 -1.442695, %v7752_v58  ;;  %v2598_v47 = vmul.f32 %v8125_v33, %v8045_v26  ;;  %v5507_v58 = vmul.f32 -1.442695, %v7778_v42  ;;  %v11076_v42 = vld [vmem:[#allocation104_spill] sm:$0xff] }
 0x301   : > { %v8118_v27 = vpop.permute.xlu1 %2455  ;;  %2753 = vrot.lane.b32.xlu0 %v2597_v41, %s6476_s24  ;;  %v8134_v13 = vpop.eup %6099  ;;  %6119 = vpow2.f32 %v5517_v7  ;;  %v1723_v20 = vadd.f32 1.0, %v6098_v11 }
 0x302   : > { %v6102_v60 = vpop.eup %6101  ;;  %6121 = vpow2.f32 %v5512_v40  ;;  %v2603_v41 = vmul.f32 %v8134_v13, %v8050_v61 }
 0x303   : > { %v6104_v25 = vpop.eup %6103  ;;  %6123 = vrcp.f32 %v1713_v4  ;;  %v1712_v10 = vadd.f32 1.0, %v6102_v60  ;;  %v11075_v4 = vld [vmem:[#allocation103_spill] sm:$0xff] }
 0x304   : > { %v8095_v48 = vpop.permute.xlu0 %2457  ;;  %2759 = vrot.lane.b32.xlu1 %v2600_v5, %s6476_s24  ;;  %v8143_v21 = vpop.eup %6105  ;;  %6125 = vrcp.f32 %v1710_v24  ;;  %v1721_v40 = vadd.f32 1.0, %v6104_v25  ;;  %v5518_v5 = vmul.f32 -1.442695, %v11075_v4 }
 0x305   : > { %2761 = vrot.lane.b32.xlu0 %v2601_v1, %s6476_s24  ;;  %v8148_v7 = vpop.eup %6107  ;;  %6127 = vpow2.f32 %v5515_v16  ;;  %v2602_v24 = vmul.f32 %v8143_v21, %v8070_v23 }
 0x306   : > { %v6110_v17 = vpop.eup %6109  ;;  %6129 = vrcp.f32 %v1723_v20  ;;  %v2605_v26 = vmul.f32 %v8148_v7, %v8065_v52 }
 0x307   : > { %v8154_v1 = vpop.eup %6111  ;;  %6131 = vpow2.f32 %v5506_v59  ;;  %v1714_v16 = vadd.f32 1.0, %v6110_v17 }
 0x308   : > { %2755 = vrot.lane.b32.xlu1 %v2598_v47, %s6476_s24  ;;  %v8159_v11 = vpop.eup %6113  ;;  %6133 = vrcp.f32 %v1712_v10  ;;  %v5521_v47 = vmul.f32 -1.442695, %v7788_v45  ;;  %v2604_v10 = vmul.f32 %v8154_v1, %v8086_v37 }
 0x309   : > { %2765 = vrot.lane.b32.xlu0 %v2603_v41, %s6476_s24  ;;  %11074 = vst [vmem:[#allocation122_spill] sm:$0xff] %v8159_v11  ;;  %v6116_v60 = vpop.eup %6115  ;;  %6135 = vrcp.f32 %v1721_v40  ;;  %v5516_v41 = vmul.f32 -1.442695, %v11076_v42  ;;  %v2607_v23 = vmul.f32 %v8159_v11, %v8081_v38  ;;  %v11078_v38 = vld [vmem:[#allocation105_spill] sm:$0xff] }
 0x30a   : > { %v8122_v49 = vpop.permute.xlu0 %2477  ;;  %v6118_v20 = vpop.eup %6117  ;;  %6137 = vpow2.f32 %v5507_v58  ;;  %v1715_v59 = vadd.f32 1.0, %v6116_v60  ;;  %v5519_v58 = vmul.f32 -1.442695, %v11078_v38  ;;  %v11082_v38 = vld [vmem:[#allocation107_spill] sm:$0xff] }
 0x30b   : > { %v6120_v52 = vpop.eup %6119  ;;  %6139 = vpow2.f32 %v5518_v5  ;;  %v1724_v40 = vadd.f32 1.0, %v6118_v20 }
 0x30c   : > { %2763 = vrot.lane.b32.xlu1 %v2602_v24, %s6476_s24  ;;  %6141 = vrcp.f32 %v1714_v16  ;;  %v1727_v24 = vadd.f32 1.0, %v6120_v52  ;;  %v11079_v16 = vld [vmem:[#allocation106_spill] sm:$0xff] }
 0x30d   : > { %v8132_v50 = vpop.permute.xlu1 %2459  ;;  %2769 = vrot.lane.b32.xlu0 %v2605_v26, %s6476_s24  ;;  %v6122_v26 = vpop.eup %6121  ;;  %6143 = vpow2.f32 %v5516_v41  ;;  %v5508_v20 = vmul.f32 -1.442695, %v11079_v16 }
 0x30e   : > { %v8141_v32 = vpop.permute.xlu0 %2473  ;;  %v8177_v4 = vpop.eup %6123  ;;  %6145 = vpow2.f32 %v5521_v47  ;;  %v1722_v41 = vadd.f32 1.0, %v6122_v26 }
 0x30f   : > { %11077 = vst [vmem:[#allocation103_spill] sm:$0xff] %v8177_v4  ;;  %v8180_v45 = vpop.eup %6125  ;;  %v2609_v37 = vmul.f32 %v8177_v4, %v8095_v48  ;;  %6147 = vrcp.f32 %v1715_v59 }
 0x310   : > { %2767 = vrot.lane.b32.xlu1 %v2604_v10, %s6476_s24  ;;  %v6128_v60 = vpop.eup %6127  ;;  %v2606_v42 = vmul.f32 %v8180_v45, %v8100_v31  ;;  %6149 = vrcp.f32 %v1724_v40  ;;  %v5522_v40 = vmul.f32 -1.442695, %v11082_v38 }
 0x311   : > { %v8152_v61 = vpop.permute.xlu1 %2479  ;;  %2773 = vrot.lane.b32.xlu0 %v2607_v23, %s6476_s24  ;;  %v8188_v52 = vpop.eup %6129  ;;  %6151 = vrcp.f32 %v1727_v24  ;;  %v1725_v59 = vadd.f32 1.0, %v6128_v60 }
 0x312   : > { %v8165_v25 = vpop.permute.xlu0 %2461  ;;  %11080 = vst [vmem:[#allocation104_spill] sm:$0xff] %v8188_v52  ;;  %v6132_v47 = vpop.eup %6131  ;;  %6153 = vpow2.f32 %v5519_v58  ;;  %v2619_v10 = vmul.f32 %v8188_v52, %v8122_v49  ;;  %v5520_v49 = vmul.f32 -1.442695, %v7826_v56 }
 0x313   : > { %v8194_v48 = vpop.eup %6133  ;;  %6155 = vpow2.f32 %v5508_v20 }
 0x314   : > { %2771 = vrot.lane.b32.xlu1 %v2606_v42, %s6476_s24  ;;  %v8198_v31 = vpop.eup %6135  ;;  %v2608_v26 = vmul.f32 %v8194_v48, %v8118_v27  ;;  %6157 = vrcp.f32 %v1722_v41 }
 0x315   : > { %v8174_v17 = vpop.permute.xlu1 %2475  ;;  %2777 = vrot.lane.b32.xlu0 %v2609_v37, %s6476_s24  ;;  %11081 = vst [vmem:[#allocation105_spill] sm:$0xff] %v8198_v31  ;;  %v6138_v24 = vpop.eup %6137  ;;  %v1716_v37 = vadd.f32 1.0, %v6132_v47  ;;  %6159 = vrcp.f32 %v1725_v59  ;;  %v2617_v60 = vmul.f32 %v8198_v31, %v8141_v32  ;;  %v5509_v32 = vmul.f32 -1.442695, %v7834_v34 }
 0x316   : > { %v2486_v5 = vpop.permute.xlu0 %2485  ;;  %v6140_v42 = vpop.eup %6139  ;;  %v1717_v38 = vadd.f32 1.0, %v6138_v24  ;;  %6161 = vpow2.f32 %v5522_v40 }
 0x317   : > { %v8205_v58 = vpop.eup %6141  ;;  %6163 = vrcp.f32 %v1716_v37 }
 0x318   : > { %2775 = vrot.lane.b32.xlu1 %v2608_v26, %s6476_s24  ;;  %11083 = vst [vmem:[#allocation106_spill] sm:$0xff] %v8205_v58  ;;  %v6144_v20 = vpop.eup %6143  ;;  %v2610_v27 = vmul.f32 %v8205_v58, %v8132_v50  ;;  %6165 = vpow2.f32 %v5520_v49  ;;  %v11120_v58 = vld [vmem:[#allocation32_spill] sm:$0xff] }
 0x319   : > { %v8192_v23 = vpop.permute.xlu1 %2463  ;;  %2797 = vrot.lane.b32.xlu0 %v2619_v10, %s6476_s24  ;;  %v6146_v47 = vpop.eup %6145  ;;  %v1728_v10 = vadd.f32 1.0, %v6140_v42  ;;  %6167 = vrcp.f32 %v1717_v38 }
 0x31a   : > { %v2482_v16 = vpop.permute.xlu0 %2481  ;;  %v8213_v26 = vpop.eup %6147  ;;  %v1731_v24 = vadd.f32 1.0, %v6146_v47 }
 0x31b   : > { %11084 = vst [vmem:[#allocation107_spill] sm:$0xff] %v8213_v26  ;;  %v8216_v56 = vpop.eup %6149  ;;  %v2611_v59 = vmul.f32 %v8213_v26, %v8165_v25  ;;  %6169 = vrcp.f32 %v1728_v10  ;;  %v5525_v25 = vmul.f32 -1.442695, %v7847_v18  ;;  %v5523_v18 = vmul.f32 -1.442695, %v7864_v63 }
 0x31c   : > { %2779 = vrot.lane.b32.xlu1 %v2610_v27, %s6476_s24  ;;  %11085 = vst [vmem:[#allocation123_spill] sm:$0xff] %v8216_v56  ;;  %v8221_v50 = vpop.eup %6151  ;;  %v2620_v37 = vmul.f32 %v8216_v56, %v8152_v61  ;;  %6171 = vpow2.f32 %v5509_v32  ;;  %v11118_v56 = vld [vmem:[#allocation34_spill] sm:$0xff] }
 0x31d   : > { %v2488_v41 = vpop.permute.xlu1 %2487  ;;  %2793 = vrot.lane.b32.xlu0 %v2617_v60, %s6476_s24  ;;  %11086 = vst [vmem:[#allocation124_spill] sm:$0xff] %v8221_v50  ;;  %v6154_v42 = vpop.eup %6153  ;;  %v1726_v60 = vadd.f32 1.0, %v6144_v20  ;;  %v2623_v47 = vmul.f32 %v8221_v50, %v2486_v5  ;;  %6173 = vrcp.f32 %v1731_v24 }
 0x31e   : > { %v6156_v27 = vpop.eup %6155  ;;  %v1729_v26 = vadd.f32 1.0, %v6154_v42 }
 0x31f   : > { %v2466_v40 = vpop.permute.xlu0 %2465  ;;  %v8227_v49 = vpop.eup %6157  ;;  %6175 = vrcp.f32 %v1726_v60  ;;  %v1718_v10 = vadd.f32 1.0, %v6156_v27 }
 0x320   : > { %2799 = vrot.lane.b32.xlu1 %v2620_v37, %s6476_s24  ;;  %11087 = vst [vmem:[#allocation125_spill] sm:$0xff] %v8227_v49  ;;  %v2618_v61 = vmul.f32 %v8227_v49, %v8174_v17  ;;  %v8233_v20 = vpop.eup %6159  ;;  %6177 = vpow2.f32 %v5525_v25  ;;  %v5510_v17 = vmul.f32 -1.442695, %v7868_v35  ;;  %v5526_v35 = vmul.f32 -1.442695, %v7886_v12 }
 0x321   : > { %2781 = vrot.lane.b32.xlu0 %v2611_v59, %s6476_s24  ;;  %v2484_v34 = vpop.permute.xlu1 %2483  ;;  %11088 = vst [vmem:[#allocation126_spill] sm:$0xff] %v8233_v20  ;;  %v6162_v59 = vpop.eup %6161  ;;  %v2621_v5 = vmul.f32 %v8233_v20, %v2482_v16  ;;  %6179 = vrcp.f32 %v1729_v26 }
 0x322   : > { %v8237_v37 = vpop.eup %6163  ;;  %v1732_v27 = vadd.f32 1.0, %v6162_v59  ;;  %6181 = vrcp.f32 %v1718_v10 }
 0x323   : > { %v2494_v38 = vpop.permute.xlu0 %2493  ;;  %11089 = vst [vmem:[#allocation127_spill] sm:$0xff] %v8237_v37  ;;  %v2612_v24 = vmul.f32 %v8237_v37, %v8192_v23  ;;  %v6166_v60 = vpop.eup %6165  ;;  %6183 = vpow2.f32 %v5523_v18 }
 0x324   : > { %2795 = vrot.lane.b32.xlu1 %v2618_v61, %s6476_s24  ;;  %6185 = vpow2.f32 %v5510_v17  ;;  %v1730_v10 = vadd.f32 1.0, %v6166_v60 }
 0x325   : > { %2805 = vrot.lane.b32.xlu0 %v2623_v47, %s6476_s24  ;;  %v8245_v47 = vpop.eup %6167  ;;  %6187 = vrcp.f32 %v1732_v27 }
 0x326   : > { %v2468_v42 = vpop.permute.xlu1 %2467  ;;  %11090 = vst [vmem:[#allocation128_spill] sm:$0xff] %v8245_v47  ;;  %v8248_v63 = vpop.eup %6169  ;;  %v2613_v16 = vmul.f32 %v8245_v47, %v2466_v40  ;;  %v5524_v40 = vmul.f32 -1.442695, %v7903_v54  ;;  %6189 = vpow2.f32 %v5526_v35 }
 0x327   : > { %v2490_v32 = vpop.permute.xlu0 %2489  ;;  %11091 = vst [vmem:[#allocation129_spill] sm:$0xff] %v8248_v63  ;;  %v2624_v23 = vmul.f32 %v8248_v63, %v2488_v41  ;;  %v6172_v61 = vpop.eup %6171  ;;  %6191 = vrcp.f32 %v1730_v10  ;;  %v11097_v10 = vld [vmem:[#allocation108_spill] sm:$0xff] }
 0x328   : > { %2783 = vrot.lane.b32.xlu1 %v2612_v24, %s6476_s24  ;;  %v8254_v59 = vpop.eup %6173  ;;  %v1719_v17 = vadd.f32 1.0, %v6172_v61  ;;  %6193 = vpow2.f32 %v5524_v40 }
 0x329   : > { %2801 = vrot.lane.b32.xlu0 %v2621_v5, %s6476_s24  ;;  %11092 = vst [vmem:[#allocation130_spill] sm:$0xff] %v8254_v59  ;;  %v8257_v5 = vpop.eup %6175  ;;  %v2627_v18 = vmul.f32 %v8254_v59, %v2494_v38  ;;  %v11096_v59 = vld [vmem:[#allocation27_spill] sm:$0xff] }
 0x32a   : > { %v2496_v25 = vpop.permute.xlu1 %2495  ;;  %11093 = vst [vmem:[#allocation131_spill] sm:$0xff] %v8257_v5  ;;  %v2622_v41 = vmul.f32 %v8257_v5, %v2484_v34  ;;  %v6178_v27 = vpop.eup %6177  ;;  %6195 = vrcp.f32 %v1719_v17  ;;  %v2251_v47 = vmul.f32 %v11097_v10, %v11096_v59 }
 0x32b   : > { %v2702_v26 = vpop.permute.xlu0 %2701  ;;  %v8263_v60 = vpop.eup %6179 }
 0x32c   : > { %2807 = vrot.lane.b32.xlu1 %v2624_v23, %s6476_s24  ;;  %11094 = vst [vmem:[#allocation132_spill] sm:$0xff] %v8263_v60  ;;  %v2625_v54 = vmul.f32 %v8263_v60, %v2490_v32  ;;  %v1735_v23 = vadd.f32 1.0, %v6178_v27  ;;  %v2891_v40 = vadd.f32 %v2702_v26, %v2251_v47 }
 0x32d   : > { %2785 = vrot.lane.b32.xlu0 %v2613_v16, %s6476_s24  ;;  %v8266_v16 = vpop.eup %6181 }
 0x32e   : > { %v2492_v24 = vpop.permute.xlu1 %2491  ;;  %11095 = vst [vmem:[#allocation133_spill] sm:$0xff] %v8266_v16  ;;  %v2614_v35 = vmul.f32 %v8266_v16, %v2468_v42  ;;  %v6184_v61 = vpop.eup %6183  ;;  %6197 = vrcp.f32 %v1735_v23  ;;  %v11099_v42 = vld [vmem:[#allocation25_spill] sm:$0xff] }
 0x32f   : > { %v2698_v12 = vpop.permute.xlu0 %2697  ;;  %v1733_v32 = vadd.f32 1.0, %v6184_v61  ;;  %v11100_v16 = vld [vmem:[#allocation109_spill] sm:$0xff] }
 0x330   : > { %2803 = vrot.lane.b32.xlu1 %v2622_v41, %s6476_s24  ;;  %v2249_v60 = vmul.f32 %v11100_v16, %v11099_v42  ;;  %v11103_v42 = vld [vmem:[#allocation29_spill] sm:$0xff] }
 0x331   : > { %2813 = vrot.lane.b32.xlu0 %v2627_v18, %s6476_s24  ;;  %v6186_v18 = vpop.eup %6185  ;;  %6199 = vrcp.f32 %v1733_v32 }
 0x332   : > { %v2704_v34 = vpop.permute.xlu1 %2703  ;;  %v8274_v41 = vpop.eup %6187  ;;  %v1720_v63 = vadd.f32 1.0, %v6186_v18 }
 0x333   : > { %v2470_v38 = vpop.permute.xlu0 %2469  ;;  %11098 = vst [vmem:[#allocation27_spill] sm:$0xff] %v8274_v41  ;;  %v2628_v17 = vmul.f32 %v8274_v41, %v2496_v25  ;;  %v6190_v59 = vpop.eup %6189  ;;  %v11104_v41 = vld [vmem:[#allocation110_spill] sm:$0xff] }
 0x334   : > { %2787 = vrot.lane.b32.xlu1 %v2614_v35, %s6476_s24  ;;  %v2889_v35 = vadd.f32 %v2698_v12, %v2249_v60  ;;  %v1736_v61 = vadd.f32 1.0, %v6190_v59  ;;  %6201 = vrcp.f32 %v1720_v63  ;;  %v2252_v37 = vmul.f32 %v11104_v41, %v11103_v42  ;;  %v11106_v63 = vld [vmem:[#allocation26_spill] sm:$0xff] }
 0x335   : > { %2809 = vrot.lane.b32.xlu0 %v2625_v54, %s6476_s24  ;;  %v8281_v54 = vpop.eup %6191 }
 0x336   : > { %v2700_v27 = vpop.permute.xlu1 %2699  ;;  %11101 = vst [vmem:[#allocation108_spill] sm:$0xff] %v8281_v54  ;;  %v2626_v26 = vmul.f32 %v8281_v54, %v2492_v24  ;;  %v6194_v25 = vpop.eup %6193  ;;  %v2892_v60 = vadd.f32 %v2704_v34, %v2252_v37  ;;  %6203 = vrcp.f32 %v1736_v61  ;;  %v11107_v54 = vld [vmem:[#allocation111_spill] sm:$0xff] }
 0x337   : > { %v2502_v5 = vpop.permute.xlu0 %2501  ;;  %v8285_v18 = vpop.eup %6195  ;;  %v1734_v24 = vadd.f32 1.0, %v6194_v25  ;;  %v2250_v20 = vmul.f32 %v11107_v54, %v11106_v63  ;;  %v11110_v63 = vld [vmem:[#allocation30_spill] sm:$0xff] }
 0x338   : > { %2815 = vrot.lane.b32.xlu1 %v2628_v17, %s6476_s24  ;;  %11102 = vst [vmem:[#allocation25_spill] sm:$0xff] %v8285_v18  ;;  %v2615_v17 = vmul.f32 %v8285_v18, %v2470_v38  ;;  %v8292_v59 = vpop.eup %6197 }
 0x339   : > { %3405 = vrot.lane.b32.xlu0 %v2891_v40, %s6477_s4  ;;  %11105 = vst [vmem:[#allocation109_spill] sm:$0xff] %v8292_v59  ;;  %v2631_v42 = vmul.f32 %v8292_v59, %v2502_v5  ;;  %6205 = vrcp.f32 %v1734_v24  ;;  %v11111_v5 = vld [vmem:[#allocation112_spill] sm:$0xff] }
 0x33a   : > { %v2472_v23 = vpop.permute.xlu1 %2471  ;;  %v2255_v59 = vmul.f32 %v11111_v5, %v11110_v63  ;;  %6207 = vtanh.f32 %v2891_v40 }
 0x33b   : > { %v2498_v47 = vpop.permute.xlu0 %2497  ;;  %v8299_v37 = vpop.eup %6199  ;;  %6209 = vtanh.f32 %v2889_v35 }
 0x33c   : > { %2811 = vrot.lane.b32.xlu1 %v2626_v26, %s6476_s24  ;;  %v2890_v26 = vadd.f32 %v2700_v27, %v2250_v20  ;;  %11108 = vst [vmem:[#allocation29_spill] sm:$0xff] %v8299_v37  ;;  %v2629_v34 = vmul.f32 %v8299_v37, %v2498_v47  ;;  %v11113_v47 = vld [vmem:[#allocation28_spill] sm:$0xff]  ;;  %6211 = vtanh.f32 %v2892_v60 }
 0x33d   : > { %3401 = vrot.lane.b32.xlu0 %v2889_v35, %s6477_s4  ;;  %v2253_v37 = vmul.f32 %v7910_v46, %v11113_v47 }
 0x33e   : > { %v2504_v32 = vpop.permute.xlu1 %2503  ;;  %v8302_v38 = vpop.eup %6201  ;;  %6213 = vtanh.f32 %v2890_v26 }
 0x33f   : > { %v2710_v12 = vpop.permute.xlu0 %2709  ;;  %11109 = vst [vmem:[#allocation110_spill] sm:$0xff] %v8302_v38  ;;  %v2616_v61 = vmul.f32 %v8302_v38, %v2472_v23 }
 0x340   : > { %3407 = vrot.lane.b32.xlu1 %v2892_v60, %s6477_s4  ;;  %v8310_v20 = vpop.eup %6203  ;;  %v2895_v27 = vadd.f32 %v2710_v12, %v2255_v59  ;;  %v11115_v12 = vld [vmem:[#allocation33_spill] sm:$0xff] }
 0x341   : > { %2789 = vrot.lane.b32.xlu0 %v2615_v17, %s6476_s24  ;;  %11112 = vst [vmem:[#allocation26_spill] sm:$0xff] %v8310_v20 }
 0x342   : > { %v2500_v49 = vpop.permute.xlu1 %2499  ;;  %6215 = vtanh.f32 %v2895_v27 }
 0x343   : > { %v2706_v50 = vpop.permute.xlu0 %2705  ;;  %v8317_v23 = vpop.eup %6205 }
 0x344   : > { %3403 = vrot.lane.b32.xlu1 %v2890_v26, %s6477_s4  ;;  %11114 = vst [vmem:[#allocation111_spill] sm:$0xff] %v8317_v23  ;;  %v2893_v40 = vadd.f32 %v2706_v50, %v2253_v37  ;;  %v2257_v26 = vmul.f32 %v7950_v15, %v11120_v58 }
 0x345   : > { %2821 = vrot.lane.b32.xlu0 %v2631_v42, %s6476_s24  ;;  %v2632_v42 = vmul.f32 %v8310_v20, %v2504_v32  ;;  %v11116_v32 = vld [vmem:[#allocation65_spill] sm:$0xff]  ;;  %v6208_v20 = vpop.eup %6207 }
 0x346   : > { %v2712_v17 = vpop.permute.xlu1 %2711  ;;  %v2256_v59 = vmul.f32 %v11116_v32, %v11115_v12  ;;  %v6210_v37 = vpop.eup %6209  ;;  %6217 = vtanh.f32 %v2893_v40 }
 0x347   : > { %v2718_v25 = vpop.permute.xlu0 %2717 }
 0x348   : > { %2791 = vrot.lane.b32.xlu1 %v2616_v61, %s6476_s24  ;;  %v2630_v61 = vmul.f32 %v8317_v23, %v2500_v49  ;;  %v2896_v35 = vadd.f32 %v2712_v17, %v2256_v59 }
 0x349   : > { %2817 = vrot.lane.b32.xlu0 %v2629_v34, %s6476_s24 }
 0x34a   : > { %v2708_v18 = vpop.permute.xlu1 %2707  ;;  %6219 = vtanh.f32 %v2896_v35 }
 0x34b   : > { %v2714_v24 = vpop.permute.xlu0 %2713 }
 0x34c   : > { %2823 = vrot.lane.b32.xlu1 %v2632_v42, %s6476_s24  ;;  %v11117_v42 = vld [vmem:[#allocation31_spill] sm:$0xff] }
 0x34d   : > { %3413 = vrot.lane.b32.xlu0 %v2895_v27, %s6477_s4  ;;  %v2254_v50 = vmul.f32 %v7944_v14, %v11117_v42  ;;  %v6212_v42 = vpop.eup %6211  ;;  %v11125_v14 = vld [vmem:[#allocation73_spill] sm:$0xff] }
 0x34e   : > { %v2720_v63 = vpop.permute.xlu1 %2719  ;;  %v6214_v27 = vpop.eup %6213 }
 0x34f   : > { %v2726_v34 = vpop.permute.xlu0 %2725  ;;  %v2894_v23 = vadd.f32 %v2708_v18, %v2254_v50  ;;  %v2897_v18 = vadd.f32 %v2714_v24, %v2257_v26  ;;  %v6216_v15 = vpop.eup %6215  ;;  %v11123_v24 = vld [vmem:[#allocation35_spill] sm:$0xff] }
 0x350   : > { %2819 = vrot.lane.b32.xlu1 %v2630_v61, %s6476_s24  ;;  %v11119_v61 = vld [vmem:[#allocation68_spill] sm:$0xff] }
 0x351   : > { %3409 = vrot.lane.b32.xlu0 %v2893_v40, %s6477_s4  ;;  %v2259_v60 = vmul.f32 %v11119_v61, %v11118_v56  ;;  %6221 = vtanh.f32 %v2894_v23 }
 0x352   : > { %v2716_v38 = vpop.permute.xlu1 %2715 }
 0x353   : > { %v2722_v47 = vpop.permute.xlu0 %2721  ;;  %v2899_v17 = vadd.f32 %v2718_v25, %v2259_v60  ;;  %v11121_v25 = vld [vmem:[#allocation37_spill] sm:$0xff] }
 0x354   : > { %3415 = vrot.lane.b32.xlu1 %v2896_v35, %s6477_s4  ;;  %v11124_v35 = vld [vmem:[#allocation38_spill] sm:$0xff] }
 0x355   : > { %3085 = vrot.lane.b32.xlu0 %v6208_v20, %s6476_s24  ;;  %v2263_v46 = vmul.f32 %v11125_v14, %v11124_v35  ;;  %6223 = vtanh.f32 %v2899_v17 }
 0x356   : > { %v2728_v12 = vpop.permute.xlu1 %2727  ;;  %6225 = vtanh.f32 %v2897_v18 }
 0x357   : > { %v8328_v49 = vpop.permute.xlu0 %2733 }
 0x358   : > { %3411 = vrot.lane.b32.xlu1 %v2894_v23, %s6477_s4 }
 0x359   : > { %3081 = vrot.lane.b32.xlu0 %v6210_v37, %s6476_s24  ;;  %v11122_v37 = vld [vmem:[#allocation75_spill] sm:$0xff] }
 0x35a   : > { %v2724_v59 = vpop.permute.xlu1 %2723  ;;  %v2260_v60 = vmul.f32 %v11122_v37, %v11121_v25  ;;  %v6218_v25 = vpop.eup %6217 }
 0x35b   : > { %v8334_v20 = vpop.permute.xlu0 %2729  ;;  %v6220_v23 = vpop.eup %6219 }
 0x35c   : > { %3087 = vrot.lane.b32.xlu1 %v6212_v42, %s6476_s24  ;;  %v2900_v40 = vadd.f32 %v2720_v63, %v2260_v60  ;;  %v2258_v42 = vmul.f32 %v7976_v36, %v11123_v24  ;;  %v11126_v24 = vld [vmem:[#allocation36_spill] sm:$0xff] }
 0x35d   : > { %3421 = vrot.lane.b32.xlu0 %v2899_v17, %s6477_s4  ;;  %v2261_v36 = vmul.f32 %v7982_v28, %v11126_v24 }
 0x35e   : > { %v8342_v50 = vpop.permute.xlu1 %2735  ;;  %v2898_v37 = vadd.f32 %v2716_v38, %v2258_v42  ;;  %6227 = vtanh.f32 %v2900_v40 }
 0x35f   : > { %v8340_v56 = vpop.permute.xlu0 %2741  ;;  %v2901_v38 = vadd.f32 %v2722_v47, %v2261_v36  ;;  %v11128_v36 = vld [vmem:[#allocation39_spill] sm:$0xff] }
 0x360   : > { %3083 = vrot.lane.b32.xlu1 %v6214_v27, %s6476_s24  ;;  %v2262_v47 = vmul.f32 %v8004_v43, %v11128_v36  ;;  %6229 = vtanh.f32 %v2898_v37  ;;  %v11130_v36 = vld [vmem:[#allocation40_spill] sm:$0xff] }
 0x361   : > { %3417 = vrot.lane.b32.xlu0 %v2897_v18, %s6477_s4 }
 0x362   : > { %v8350_v61 = vpop.permute.xlu1 %2731 }
 0x363   : > { %v8348_v58 = vpop.permute.xlu0 %2737 }
 0x364   : > { %3423 = vrot.lane.b32.xlu1 %v2900_v40, %s6477_s4  ;;  %v11129_v40 = vld [vmem:[#allocation42_spill] sm:$0xff] }
 0x365   : > { %3093 = vrot.lane.b32.xlu0 %v6216_v15, %s6476_s24  ;;  %v2903_v15 = vadd.f32 %v2726_v34, %v2263_v46  ;;  %v11127_v46 = vld [vmem:[#allocation41_spill] sm:$0xff]  ;;  %v2267_v14 = vmul.f32 %v7997_v6, %v11129_v40 }
 0x366   : > { %v8358_v27 = vpop.permute.xlu1 %2743  ;;  %v2264_v34 = vmul.f32 %v7985_v39, %v11127_v46  ;;  %v2902_v39 = vadd.f32 %v2724_v59, %v2262_v47  ;;  %v2265_v59 = vmul.f32 %v8014_v9, %v11130_v36 }
 0x367   : > { %v8356_v26 = vpop.permute.xlu0 %2749  ;;  %6231 = vtanh.f32 %v2903_v15 }
 0x368   : > { %3419 = vrot.lane.b32.xlu1 %v2898_v37, %s6477_s4  ;;  %v2904_v18 = vadd.f32 %v2728_v12, %v2264_v34  ;;  %v2907_v12 = vadd.f32 %v8328_v49, %v2267_v14  ;;  %6233 = vtanh.f32 %v2901_v38  ;;  %v2905_v47 = vadd.f32 %v8334_v20, %v2265_v59  ;;  %v11131_v49 = vld [vmem:[#allocation45_spill] sm:$0xff]  ;;  %v11132_v20 = vld [vmem:[#allocation43_spill] sm:$0xff] }
 0x369   : > { %3089 = vrot.lane.b32.xlu0 %v6218_v25, %s6476_s24  ;;  %v6222_v25 = vpop.eup %6221  ;;  %v2268_v40 = vmul.f32 %v8018_v8, %v11131_v49  ;;  %v2266_v59 = vmul.f32 %v8026_v53, %v11132_v20  ;;  %v11133_v8 = vld [vmem:[#allocation46_spill] sm:$0xff]  ;;  %v11134_v53 = vld [vmem:[#allocation44_spill] sm:$0xff] }
 0x36a   : > { %v8366_v60 = vpop.permute.xlu1 %2739  ;;  %v6224_v24 = vpop.eup %6223  ;;  %6235 = vtanh.f32 %v2904_v18 }
 0x36b   : > { %v8364_v63 = vpop.permute.xlu0 %2745  ;;  %v6226_v46 = vpop.eup %6225  ;;  %6237 = vtanh.f32 %v2902_v39 }
 0x36c   : > { %3095 = vrot.lane.b32.xlu1 %v6220_v23, %s6476_s24  ;;  %v6228_v37 = vpop.eup %6227  ;;  %6239 = vtanh.f32 %v2907_v12 }
 0x36d   : > { %3429 = vrot.lane.b32.xlu0 %v2903_v15, %s6477_s4  ;;  %v6230_v14 = vpop.eup %6229  ;;  %6241 = vtanh.f32 %v2905_v47 }
 0x36e   : > { %v8374_v17 = vpop.permute.xlu1 %2751 }
 0x36f   : > { %v8372_v42 = vpop.permute.xlu0 %2757 }
 0x370   : > { %3091 = vrot.lane.b32.xlu1 %v6222_v25, %s6476_s24 }
 0x371   : > { %3425 = vrot.lane.b32.xlu0 %v2901_v38, %s6477_s4  ;;  %v6232_v38 = vpop.eup %6231 }
 0x372   : > { %v8382_v28 = vpop.permute.xlu1 %2747  ;;  %v6234_v49 = vpop.eup %6233 }
 0x373   : > { %v8380_v35 = vpop.permute.xlu0 %2753 }
 0x374   : > { %3431 = vrot.lane.b32.xlu1 %v2904_v18, %s6477_s4  ;;  %v2906_v18 = vadd.f32 %v8350_v61, %v2266_v59  ;;  %v6236_v20 = vpop.eup %6235  ;;  %v2269_v61 = vmul.f32 %v8034_v44, %v11134_v53 }
 0x375   : > { %3101 = vrot.lane.b32.xlu0 %v6224_v24, %s6476_s24 }
 0x376   : > { %v8390_v25 = vpop.permute.xlu1 %2759 }
 0x377   : > { %v8388_v23 = vpop.permute.xlu0 %2761 }
 0x378   : > { %3427 = vrot.lane.b32.xlu1 %v2902_v39, %s6477_s4 }
 0x379   : > { %3097 = vrot.lane.b32.xlu0 %v6226_v46, %s6476_s24 }
 0x37a   : > { %v8399_v24 = vpop.permute.xlu1 %2755 }
 0x37b   : > { %v8397_v34 = vpop.permute.xlu0 %2765 }
 0x37c   : > { %3103 = vrot.lane.b32.xlu1 %v6228_v37, %s6476_s24  ;;  %v2908_v37 = vadd.f32 %v8342_v50, %v2268_v40  ;;  %v2271_v50 = vmul.f32 %v8030_v22, %v11133_v8  ;;  %v2909_v8 = vadd.f32 %v8348_v58, %v2269_v61  ;;  %v11136_v58 = vld [vmem:[#allocation47_spill] sm:$0xff] }
 0x37d   : > { %3437 = vrot.lane.b32.xlu0 %v2907_v12, %s6477_s4  ;;  %v2270_v61 = vmul.f32 %v8060_v62, %v11136_v58  ;;  %v11138_v62 = vld [vmem:[#allocation48_spill] sm:$0xff] }
 0x37e   : > { %v8408_v46 = vpop.permute.xlu1 %2763  ;;  %v2911_v40 = vadd.f32 %v8340_v56, %v2271_v50  ;;  %v6238_v56 = vpop.eup %6237  ;;  %6243 = vtanh.f32 %v2908_v37 }
 0x37f   : > { %v8406_v15 = vpop.permute.xlu0 %2769  ;;  %6245 = vtanh.f32 %v2906_v18 }
 0x380   : > { %3099 = vrot.lane.b32.xlu1 %v6230_v14, %s6476_s24  ;;  %6247 = vtanh.f32 %v2911_v40 }
 0x381   : > { %3433 = vrot.lane.b32.xlu0 %v2905_v47, %s6477_s4  ;;  %v6240_v47 = vpop.eup %6239  ;;  %6249 = vtanh.f32 %v2909_v8 }
 0x382   : > { %v8417_v9 = vpop.permute.xlu1 %2767 }
 0x383   : > { %v8414_v36 = vpop.permute.xlu0 %2773 }
 0x384   : > { %3439 = vrot.lane.b32.xlu1 %v2908_v37, %s6477_s4  ;;  %v2910_v37 = vadd.f32 %v8366_v60, %v2270_v61  ;;  %v2273_v60 = vmul.f32 %v8072_v2, %v11138_v62 }
 0x385   : > { %3109 = vrot.lane.b32.xlu0 %v6232_v38, %s6476_s24 }
 0x386   : > { %v8426_v14 = vpop.permute.xlu1 %2771 }
 0x387   : > { %v8423_v6 = vpop.permute.xlu0 %2777 }
 0x388   : > { %3435 = vrot.lane.b32.xlu1 %v2906_v18, %s6477_s4 }
 0x389   : > { %3105 = vrot.lane.b32.xlu0 %v6234_v49, %s6476_s24  ;;  %v11135_v49 = vld [vmem:[#allocation49_spill] sm:$0xff] }
 0x38a   : > { %v8435_v39 = vpop.permute.xlu1 %2775  ;;  %v2272_v50 = vmul.f32 %v8052_v51, %v11135_v49  ;;  %v6242_v49 = vpop.eup %6241  ;;  %v11137_v51 = vld [vmem:[#allocation50_spill] sm:$0xff] }
 0x38b   : > { %v8433_v38 = vpop.permute.xlu0 %2797  ;;  %v6244_v58 = vpop.eup %6243 }
 0x38c   : > { %3111 = vrot.lane.b32.xlu1 %v6236_v20, %s6476_s24  ;;  %v2912_v20 = vadd.f32 %v8358_v27, %v2272_v50  ;;  %v2275_v27 = vmul.f32 %v8056_v19, %v11137_v51  ;;  %v2913_v51 = vadd.f32 %v8364_v63, %v2273_v60  ;;  %v11140_v63 = vld [vmem:[#allocation51_spill] sm:$0xff] }
 0x38d   : > { %3445 = vrot.lane.b32.xlu0 %v2911_v40, %s6477_s4  ;;  %v2274_v60 = vmul.f32 %v8102_v57, %v11140_v63  ;;  %v11142_v57 = vld [vmem:[#allocation52_spill] sm:$0xff] }
 0x38e   : > { %v8444_v59 = vpop.permute.xlu1 %2779  ;;  %v2915_v50 = vadd.f32 %v8356_v26, %v2275_v27  ;;  %v6246_v26 = vpop.eup %6245  ;;  %6251 = vtanh.f32 %v2912_v20 }
 0x38f   : > { %v8442_v12 = vpop.permute.xlu0 %2793  ;;  %6253 = vtanh.f32 %v2910_v37 }
 0x390   : > { %3107 = vrot.lane.b32.xlu1 %v6238_v56, %s6476_s24  ;;  %6255 = vtanh.f32 %v2915_v50 }
 0x391   : > { %3441 = vrot.lane.b32.xlu0 %v2909_v8, %s6477_s4  ;;  %v6248_v8 = vpop.eup %6247  ;;  %6257 = vtanh.f32 %v2913_v51 }
 0x392   : > { %v8453_v44 = vpop.permute.xlu1 %2799 }
 0x393   : > { %v8450_v53 = vpop.permute.xlu0 %2781 }
 0x394   : > { %3447 = vrot.lane.b32.xlu1 %v2912_v20, %s6477_s4  ;;  %v2914_v20 = vadd.f32 %v8382_v28, %v2274_v60  ;;  %v2277_v28 = vmul.f32 %v8105_v3, %v11142_v57  ;;  %v11145_v3 = vld [vmem:[#allocation56_spill] sm:$0xff] }
 0x395   : > { %3117 = vrot.lane.b32.xlu0 %v6240_v47, %s6476_s24 }
 0x396   : > { %v8462_v56 = vpop.permute.xlu1 %2795 }
 0x397   : > { %v8459_v22 = vpop.permute.xlu0 %2805 }
 0x398   : > { %3443 = vrot.lane.b32.xlu1 %v2910_v37, %s6477_s4 }
 0x399   : > { %3113 = vrot.lane.b32.xlu0 %v6242_v49, %s6476_s24  ;;  %v11139_v49 = vld [vmem:[#allocation53_spill] sm:$0xff] }
 0x39a   : > { %v8471_v18 = vpop.permute.xlu1 %2783  ;;  %v2276_v27 = vmul.f32 %v8075_v29, %v11139_v49  ;;  %v6250_v49 = vpop.eup %6249  ;;  %v11141_v29 = vld [vmem:[#allocation54_spill] sm:$0xff] }
 0x39b   : > { %v8469_v47 = vpop.permute.xlu0 %2801  ;;  %v6252_v37 = vpop.eup %6251 }
 0x39c   : > { %3119 = vrot.lane.b32.xlu1 %v6244_v58, %s6476_s24  ;;  %v2916_v58 = vadd.f32 %v8374_v17, %v2276_v27  ;;  %v2279_v17 = vmul.f32 %v8088_v30, %v11141_v29  ;;  %v2917_v29 = vadd.f32 %v8380_v35, %v2277_v28 }
 0x39d   : > { %3453 = vrot.lane.b32.xlu0 %v2915_v50, %s6477_s4 }
 0x39e   : > { %v8480_v61 = vpop.permute.xlu1 %2807  ;;  %v2919_v27 = vadd.f32 %v8372_v42, %v2279_v17  ;;  %v6254_v42 = vpop.eup %6253  ;;  %6259 = vtanh.f32 %v2916_v58 }
 0x39f   : > { %v8478_v40 = vpop.permute.xlu0 %2785 }
 0x3a0   : > { %3115 = vrot.lane.b32.xlu1 %v6246_v26, %s6476_s24  ;;  %6261 = vtanh.f32 %v2919_v27 }
 0x3a1   : > { %3449 = vrot.lane.b32.xlu0 %v2913_v51, %s6477_s4  ;;  %v6256_v51 = vpop.eup %6255  ;;  %6263 = vtanh.f32 %v2914_v20 }
 0x3a2   : > { %v8489_v2 = vpop.permute.xlu1 %2803  ;;  %6265 = vtanh.f32 %v2917_v29 }
 0x3a3   : > { %v8486_v62 = vpop.permute.xlu0 %2813 }
 0x3a4   : > { %3455 = vrot.lane.b32.xlu1 %v2916_v58, %s6477_s4  ;;  %v6258_v58 = vpop.eup %6257 }
 0x3a5   : > { %3125 = vrot.lane.b32.xlu0 %v6248_v8, %s6476_s24 }
 0x3a6   : > { %v8498_v26 = vpop.permute.xlu1 %2787 }
 0x3a7   : > { %v8495_v19 = vpop.permute.xlu0 %2809 }
 0x3a8   : > { %3451 = vrot.lane.b32.xlu1 %v2914_v20, %s6477_s4 }
 0x3a9   : > { %3121 = vrot.lane.b32.xlu0 %v6250_v49, %s6476_s24  ;;  %v11143_v49 = vld [vmem:[#allocation57_spill] sm:$0xff] }
 0x3aa   : > { %v8505_v63 = vpop.permute.xlu1 %2815  ;;  %v2280_v17 = vmul.f32 %v8108_v55, %v11143_v49 }
 0x3ab   : > { %v3406_v8 = vpop.permute.xlu0 %3405 }
 0x3ac   : > { %3595 = vst.msk [vmem:[#allocation2 + $0x10] sm:$0xff] %vm742_vm1, %v3406_v8  ;;  %3127 = vrot.lane.b32.xlu1 %v6252_v37, %s6476_s24  ;;  %v2920_v8 = vadd.f32 %v8390_v25, %v2280_v17  ;;  %v11144_v37 = vld [vmem:[#allocation55_spill] sm:$0xff]  ;;  %v2281_v25 = vmul.f32 %v8113_v0, %v11145_v3 }
 0x3ad   : > { %3461 = vrot.lane.b32.xlu0 %v2919_v27, %s6477_s4  ;;  %v2278_v28 = vmul.f32 %v8125_v33, %v11144_v37 }
 0x3ae   : > { %v8513_v60 = vpop.permute.xlu1 %2811  ;;  %v2921_v27 = vadd.f32 %v8388_v23, %v2281_v25  ;;  %6267 = vtanh.f32 %v2920_v8  ;;  %v11146_v23 = vld [vmem:[#allocation59_spill] sm:$0xff] }
 0x3af   : > { %v3402_v50 = vpop.permute.xlu0 %3401  ;;  %v2282_v37 = vmul.f32 %v8143_v21, %v11146_v23  ;;  %v11148_v23 = vld [vmem:[#allocation60_spill] sm:$0xff] }
 0x3b0   : > { %3593 = vst.msk [vmem:[#allocation2] sm:$0xff] %vm742_vm1, %v3402_v50  ;;  %3123 = vrot.lane.b32.xlu1 %v6254_v42, %s6476_s24  ;;  %v2918_v42 = vadd.f32 %v8399_v24, %v2278_v28  ;;  %6269 = vtanh.f32 %v2921_v27 }
 0x3b1   : > { %3457 = vrot.lane.b32.xlu0 %v2917_v29, %s6477_s4 }
 0x3b2   : > { %v3408_v35 = vpop.permute.xlu1 %3407  ;;  %6271 = vtanh.f32 %v2918_v42 }
 0x3b3   : > { %v8520_v57 = vpop.permute.xlu0 %2789  ;;  %3596 = vst.msk [vmem:[#allocation2 + $0x18] sm:$0xff] %vm742_vm1, %v3408_v35 }
 0x3b4   : > { %3463 = vrot.lane.b32.xlu1 %v2920_v8, %s6477_s4  ;;  %v2922_v8 = vadd.f32 %v8408_v46, %v2282_v37  ;;  %v2285_v37 = vmul.f32 %v8148_v7, %v11148_v23 }
 0x3b5   : > { %3133 = vrot.lane.b32.xlu0 %v6256_v51, %s6476_s24  ;;  %v6260_v51 = vpop.eup %6259 }
 0x3b6   : > { %v3404_v49 = vpop.permute.xlu1 %3403  ;;  %v6262_v24 = vpop.eup %6261 }
 0x3b7   : > { %v8528_v50 = vpop.permute.xlu0 %2821  ;;  %3594 = vst.msk [vmem:[#allocation2 + $0x8] sm:$0xff] %vm742_vm1, %v3404_v49  ;;  %v6264_v29 = vpop.eup %6263  ;;  %v11147_v49 = vld [vmem:[#allocation58_spill] sm:$0xff] }
 0x3b8   : > { %3459 = vrot.lane.b32.xlu1 %v2918_v42, %s6477_s4  ;;  %v2283_v25 = vmul.f32 %v8134_v13, %v11147_v49 }
 0x3b9   : > { %3129 = vrot.lane.b32.xlu0 %v6258_v58, %s6476_s24  ;;  %v6266_v58 = vpop.eup %6265 }
 0x3ba   : > { %v8539_v20 = vpop.permute.xlu1 %2791  ;;  %v6268_v42 = vpop.eup %6267 }
 0x3bb   : > { %v8537_v17 = vpop.permute.xlu0 %2817 }
 0x3bc   : > { %3135 = vrot.lane.b32.xlu1 %v6260_v51, %s6476_s24 }
 0x3bd   : > { %3465 = vrot.lane.b32.xlu0 %v2921_v27, %s6477_s4 }
 0x3be   : > { %v8543_v35 = vpop.permute.xlu1 %2823 }
 0x3bf   : > { %v3414_v3 = vpop.permute.xlu0 %3413 }
 0x3c0   : > { %3599 = vst.msk [vmem:[#allocation2 + $0x30] sm:$0xff] %vm742_vm1, %v3414_v3  ;;  %3131 = vrot.lane.b32.xlu1 %v6264_v29, %s6476_s24  ;;  %v2923_v3 = vadd.f32 %v8397_v34, %v2283_v25  ;;  %v6270_v29 = vpop.eup %6269  ;;  %v2925_v25 = vadd.f32 %v8406_v15, %v2285_v37  ;;  %v11150_v37 = vld [vmem:[#allocation62_spill] sm:$0xff] }
 0x3c1   : > { %3141 = vrot.lane.b32.xlu0 %v6262_v24, %s6476_s24  ;;  %v6272_v34 = vpop.eup %6271 }
 0x3c2   : > { %v8553_v51 = vpop.permute.xlu1 %2819  ;;  %6273 = vtanh.f32 %v2923_v3 }
 0x3c3   : > { %v3410_v28 = vpop.permute.xlu0 %3409  ;;  %6275 = vtanh.f32 %v2922_v8 }
 0x3c4   : > { %3597 = vst.msk [vmem:[#allocation2 + $0x20] sm:$0xff] %vm742_vm1, %v3410_v28  ;;  %3467 = vrot.lane.b32.xlu1 %v2922_v8, %s6477_s4  ;;  %6277 = vtanh.f32 %v2925_v25 }
 0x3c5   : > { %3137 = vrot.lane.b32.xlu0 %v6266_v58, %s6476_s24  ;;  %v11149_v58 = vld [vmem:[#allocation61_spill] sm:$0xff] }
 0x3c6   : > { %v3416_v24 = vpop.permute.xlu1 %3415  ;;  %v2284_v49 = vmul.f32 %v8154_v1, %v11149_v58 }
 0x3c7   : > { %v3086_v27 = vpop.permute.xlu0 %3085  ;;  %3600 = vst.msk [vmem:[#allocation2 + $0x38] sm:$0xff] %vm742_vm1, %v3416_v24 }
 0x3c8   : > { %3143 = vrot.lane.b32.xlu1 %v6268_v42, %s6476_s24  ;;  %v2924_v8 = vadd.f32 %v8417_v9, %v2284_v49  ;;  %v8573_v42 = vmul.f32 %v11097_v10, %v3086_v27  ;;  %v11151_v27 = vld [vmem:[#allocation63_spill] sm:$0xff] }
 0x3c9   : > { %3469 = vrot.lane.b32.xlu0 %v2923_v3, %s6477_s4 }
 0x3ca   : > { %v3412_v28 = vpop.permute.xlu1 %3411  ;;  %6279 = vtanh.f32 %v2924_v8 }
 0x3cb   : > { %v3082_v46 = vpop.permute.xlu0 %3081  ;;  %3598 = vst.msk [vmem:[#allocation2 + $0x28] sm:$0xff] %vm742_vm1, %v3412_v28  ;;  %v2287_v28 = vmul.f32 %v8159_v11, %v11150_v37 }
 0x3cc   : > { %3139 = vrot.lane.b32.xlu1 %v6272_v34, %s6476_s24  ;;  %v2286_v34 = vmul.f32 %v8180_v45, %v11151_v27  ;;  %v8591_v49 = vmul.f32 %v11100_v16, %v3082_v46 }
 0x3cd   : > { %3145 = vrot.lane.b32.xlu0 %v6270_v29, %s6476_s24  ;;  %v6274_v29 = vpop.eup %6273 }
 0x3ce   : > { %v3088_v24 = vpop.permute.xlu1 %3087 }
 0x3cf   : > { %v3422_v3 = vpop.permute.xlu0 %3421  ;;  %v8576_v23 = vmul.f32 %v11104_v41, %v3088_v24  ;;  %v6276_v41 = vpop.eup %6275 }
 0x3d0   : > { %3603 = vst.msk [vmem:[#allocation2 + $0x50] sm:$0xff] %vm742_vm1, %v3422_v3  ;;  %3471 = vrot.lane.b32.xlu1 %v2924_v8, %s6477_s4  ;;  %v2927_v8 = vadd.f32 %v8414_v36, %v2287_v28  ;;  %v2926_v3 = vadd.f32 %v8426_v14, %v2286_v34  ;;  %v11153_v34 = vld [vmem:[#allocation64_spill] sm:$0xff] }
 0x3d1   : > { %3473 = vrot.lane.b32.xlu0 %v2925_v25, %s6477_s4  ;;  %v8582_v15 = vpack.c.bf16 %v8576_v23, %v8573_v42 }
 0x3d2   : > { %v3084_v10 = vpop.permute.xlu1 %3083  ;;  %6281 = vtanh.f32 %v2926_v3 }
 0x3d3   : > { %v3418_v9 = vpop.permute.xlu0 %3417  ;;  %v10860_v58 = vshll.u32 %v8582_v15, 16  ;;  %v8594_v25 = vmul.f32 %v11107_v54, %v3084_v10  ;;  %v10861_v24 = vshrl.u32 %v8582_v15, 16  ;;  %v6278_v10 = vpop.eup %6277  ;;  %6283 = vtanh.f32 %v2927_v8 }
 0x3d4   : > { %3601 = vst.msk [vmem:[#allocation2 + $0x40] sm:$0xff] %vm742_vm1, %v3418_v9  ;;  %3147 = vrot.lane.b32.xlu1 %v6276_v41, %s6476_s24  ;;  %v6280_v27 = vpop.eup %6279 }
 0x3d5   : > { %3149 = vrot.lane.b32.xlu0 %v6274_v29, %s6476_s24  ;;  %v8603_v9 = vpack.c.bf16 %v8594_v25, %v8591_v49  ;;  %v4366_v16 = vrot.slane %v10860_v58, 1 }
 0x3d6   : > { %v3424_v54 = vpop.permute.xlu1 %3423 }
 0x3d7   : > { %v3094_v37 = vpop.permute.xlu0 %3093  ;;  %v10862_v46 = vshll.u32 %v8603_v9, 16  ;;  %3604 = vst.msk [vmem:[#allocation2 + $0x58] sm:$0xff] %vm742_vm1, %v3424_v54  ;;  %v8612_v36 = vor.u32 %v4366_v16, %v10861_v24  ;;  %v10864_v14 = vshrl.u32 %v8603_v9, 16  ;;  %v2289_v54 = vmul.f32 %v8177_v4, %v11153_v34  ;;  %v11166_v4 = vld [vmem:[#allocation107_spill] sm:$0xff] }
 0x3d8   : > { %3475 = vrot.lane.b32.xlu1 %v2926_v3, %s6477_s4  ;;  %v11155_v3 = vld [vmem:[#allocation66_spill] sm:$0xff]  ;;  %v8635_v34 = vmul.f32 %v11111_v5, %v3094_v37  ;;  %v11157_v37 = vld [vmem:[#allocation81_spill] sm:$0xff] }
 0x3d9   : > { %3477 = vrot.lane.b32.xlu0 %v2927_v8, %s6477_s4  ;;  %11152 = vst [vmem:[#allocation30_spill] sm:$0xff] %v8612_v36  ;;  %v4364_v28 = vrot.slane %v10862_v46, 1  ;;  %v2288_v58 = vmul.f32 %v8194_v48, %v11155_v3  ;;  %v2929_v24 = vadd.f32 %v8423_v6, %v2289_v54  ;;  %v11159_v54 = vld [vmem:[#allocation69_spill] sm:$0xff] }
 0x3da   : > { %v3420_v41 = vpop.permute.xlu1 %3419 }
 0x3db   : > { %v3090_v29 = vpop.permute.xlu0 %3089  ;;  %3602 = vst.msk [vmem:[#allocation2 + $0x48] sm:$0xff] %vm742_vm1, %v3420_v41  ;;  %v8624_v16 = vor.u32 %v4364_v28, %v10864_v14  ;;  %v2928_v36 = vadd.f32 %v8435_v39, %v2288_v58  ;;  %v11156_v41 = vld [vmem:[#allocation86_spill] sm:$0xff] }
 0x3dc   : > { %3151 = vrot.lane.b32.xlu1 %v6280_v27, %s6476_s24  ;;  %v6282_v5 = vpop.eup %6281  ;;  %v11158_v27 = vld [vmem:[#allocation113_spill] sm:$0xff] }
 0x3dd   : > { %3153 = vrot.lane.b32.xlu0 %v6278_v10, %s6476_s24  ;;  %11154 = vst [vmem:[#allocation112_spill] sm:$0xff] %v8624_v16  ;;  %v2299_v10 = vmul.f32 %v8188_v52, %v11156_v41  ;;  %v8652_v8 = vmul.f32 %v11158_v27, %v3090_v29  ;;  %v11161_v41 = vld [vmem:[#allocation106_spill] sm:$0xff]  ;;  %6285 = vtanh.f32 %v2928_v36 }
 0x3de   : > { %v3096_v11 = vpop.permute.xlu1 %3095  ;;  %6287 = vtanh.f32 %v2929_v24 }
 0x3df   : > { %v3430_v46 = vpop.permute.xlu0 %3429  ;;  %v8638_v28 = vmul.f32 %v11116_v32, %v3096_v11  ;;  %v2939_v6 = vadd.f32 %v8433_v38, %v2299_v10  ;;  %v2297_v11 = vmul.f32 %v8198_v31, %v11157_v37  ;;  %v11160_v38 = vld [vmem:[#allocation71_spill] sm:$0xff] }
 0x3e0   : > { %3607 = vst.msk [vmem:[#allocation2 + $0x70] sm:$0xff] %vm742_vm1, %v3430_v46  ;;  %3479 = vrot.lane.b32.xlu1 %v2928_v36, %s6477_s4  ;;  %v2290_v10 = vmul.f32 %v11161_v41, %v11160_v38  ;;  %v11165_v41 = vld [vmem:[#allocation67_spill] sm:$0xff] }
 0x3e1   : > { %3481 = vrot.lane.b32.xlu0 %v2929_v24, %s6477_s4  ;;  %v8645_v39 = vpack.c.bf16 %v8638_v28, %v8635_v34  ;;  %v11177_v24 = vld [vmem:[#allocation70_spill] sm:$0xff]  ;;  %6289 = vtanh.f32 %v2939_v6 }
 0x3e2   : > { %v3092_v46 = vpop.permute.xlu1 %3091  ;;  %v2930_v27 = vadd.f32 %v8444_v59, %v2290_v10 }
 0x3e3   : > { %v3426_v58 = vpop.permute.xlu0 %3425  ;;  %v10865_v32 = vshll.u32 %v8645_v39, 16  ;;  %v8655_v3 = vmul.f32 %v11159_v54, %v3092_v46  ;;  %v10869_v37 = vshrl.u32 %v8645_v39, 16 }
 0x3e4   : > { %3605 = vst.msk [vmem:[#allocation2 + $0x60] sm:$0xff] %vm742_vm1, %v3426_v58  ;;  %3155 = vrot.lane.b32.xlu1 %v6282_v5, %s6476_s24  ;;  %v8662_v58 = vadd.f32 %v8442_v12, %v2297_v11  ;;  %v11163_v5 = vld [vmem:[#allocation91_spill] sm:$0xff] }
 0x3e5   : > { %3501 = vrot.lane.b32.xlu0 %v2939_v6, %s6477_s4  ;;  %v8667_v14 = vpack.c.bf16 %v8655_v3, %v8652_v8  ;;  %v4370_v46 = vrot.slane %v10865_v32, 1  ;;  %v11164_v11 = vld [vmem:[#allocation123_spill] sm:$0xff] }
 0x3e6   : > { %v3432_v54 = vpop.permute.xlu1 %3431  ;;  %v2300_v16 = vmul.f32 %v11164_v11, %v11163_v5  ;;  %v11168_v5 = vld [vmem:[#allocation88_spill] sm:$0xff]  ;;  %6291 = vtanh.f32 %v8662_v58 }
 0x3e7   : > { %v3102_v29 = vpop.permute.xlu0 %3101  ;;  %v10870_v38 = vshll.u32 %v8667_v14, 16  ;;  %3608 = vst.msk [vmem:[#allocation2 + $0x78] sm:$0xff] %vm742_vm1, %v3432_v54  ;;  %v8678_v12 = vor.u32 %v4370_v46, %v10869_v37  ;;  %v10871_v59 = vshrl.u32 %v8667_v14, 16  ;;  %v6284_v54 = vpop.eup %6283  ;;  %v2291_v46 = vmul.f32 %v11166_v4, %v11165_v41  ;;  %v11169_v37 = vld [vmem:[#allocation125_spill] sm:$0xff]  ;;  %v11172_v11 = vld [vmem:[#allocation68_spill] sm:$0xff] }
 0x3e8   : > { %3483 = vrot.lane.b32.xlu1 %v2930_v27, %s6477_s4  ;;  %v2940_v31 = vadd.f32 %v8453_v44, %v2300_v16  ;;  %6293 = vtanh.f32 %v2930_v27  ;;  %v11185_v27 = vld [vmem:[#allocation93_spill] sm:$0xff] }
 0x3e9   : > { %3497 = vrot.lane.b32.xlu0 %v8662_v58, %s6477_s4  ;;  %11162 = vst [vmem:[#allocation28_spill] sm:$0xff] %v8678_v12  ;;  %v4368_v32 = vrot.slane %v10870_v38, 1  ;;  %v2298_v12 = vmul.f32 %v11169_v37, %v11168_v5  ;;  %v8699_v38 = vadd.f32 %v8450_v53, %v2291_v46 }
 0x3ea   : > { %v3428_v52 = vpop.permute.xlu1 %3427  ;;  %6295 = vtanh.f32 %v2940_v31 }
 0x3eb   : > { %v3098_v10 = vpop.permute.xlu0 %3097  ;;  %3606 = vst.msk [vmem:[#allocation2 + $0x68] sm:$0xff] %vm742_vm1, %v3428_v52  ;;  %v8693_v36 = vor.u32 %v4368_v32, %v10871_v59  ;;  %v2938_v16 = vadd.f32 %v8462_v56, %v2298_v12  ;;  %v11170_v52 = vld [vmem:[#allocation92_spill] sm:$0xff]  ;;  %v8706_v32 = vmul.f32 %v11172_v11, %v3102_v29  ;;  %v11173_v59 = vld [vmem:[#allocation75_spill] sm:$0xff]  ;;  %v6286_v29 = vpop.eup %6285  ;;  %v11175_v11 = vld [vmem:[#allocation89_spill] sm:$0xff] }
 0x3ec   : > { %3503 = vrot.lane.b32.xlu1 %v2940_v31, %s6477_s4 }
 0x3ed   : > { %3157 = vrot.lane.b32.xlu0 %v6284_v54, %s6476_s24  ;;  %11167 = vst [vmem:[#allocation33_spill] sm:$0xff] %v8693_v36  ;;  %v11171_v54 = vld [vmem:[#allocation124_spill] sm:$0xff]  ;;  %6297 = vtanh.f32 %v2938_v16 }
 0x3ee   : > { %v3104_v41 = vpop.permute.xlu1 %3103  ;;  %v2303_v4 = vmul.f32 %v11171_v54, %v11170_v52  ;;  %v11178_v52 = vld [vmem:[#allocation74_spill] sm:$0xff]  ;;  %v11180_v54 = vld [vmem:[#allocation127_spill] sm:$0xff]  ;;  %6299 = vtanh.f32 %v8699_v38 }
 0x3ef   : > { %v3438_v44 = vpop.permute.xlu0 %3437  ;;  %v8709_v36 = vmul.f32 %v11173_v59, %v3104_v41  ;;  %v11176_v59 = vld [vmem:[#allocation126_spill] sm:$0xff]  ;;  %v8726_v41 = vmul.f32 %v11177_v24, %v3098_v10 }
 0x3f0   : > { %3611 = vst.msk [vmem:[#allocation2 + $0x90] sm:$0xff] %vm742_vm1, %v3438_v44  ;;  %3499 = vrot.lane.b32.xlu1 %v2938_v16, %s6477_s4  ;;  %v8715_v53 = vadd.f32 %v8459_v22, %v2303_v4  ;;  %v2301_v5 = vmul.f32 %v11176_v59, %v11175_v11  ;;  %v11179_v4 = vld [vmem:[#allocation76_spill] sm:$0xff] }
 0x3f1   : > { %3485 = vrot.lane.b32.xlu0 %v8699_v38, %s6477_s4  ;;  %v8719_v56 = vpack.c.bf16 %v8709_v36, %v8706_v32  ;;  %v2292_v37 = vmul.f32 %v11180_v54, %v11179_v4  ;;  %v11202_v38 = vld [vmem:[#allocation80_spill] sm:$0xff] }
 0x3f2   : > { %v3100_v46 = vpop.permute.xlu1 %3099  ;;  %6301 = vtanh.f32 %v8715_v53 }
 0x3f3   : > { %11174 = vst [vmem:[#allocation65_spill] sm:$0xff] %v8719_v56  ;;  %v3434_v12 = vpop.permute.xlu0 %3433  ;;  %v10872_v44 = vshll.u32 %v8719_v56, 16  ;;  %v8729_v22 = vmul.f32 %v11178_v52, %v3100_v46  ;;  %v10873_v11 = vshrl.u32 %v8719_v56, 16  ;;  %v8747_v6 = vadd.f32 %v8471_v18, %v2292_v37  ;;  %v11200_v56 = vld [vmem:[#allocation132_spill] sm:$0xff] }
 0x3f4   : > { %3609 = vst.msk [vmem:[#allocation2 + $0x80] sm:$0xff] %vm742_vm1, %v3434_v12  ;;  %3159 = vrot.lane.b32.xlu1 %v6286_v29, %s6476_s24  ;;  %v8737_v12 = vadd.f32 %v8469_v47, %v2301_v5  ;;  %v11182_v29 = vld [vmem:[#allocation95_spill] sm:$0xff]  ;;  %v11183_v5 = vld [vmem:[#allocation129_spill] sm:$0xff] }
 0x3f5   : > { %3509 = vrot.lane.b32.xlu0 %v8715_v53, %s6477_s4  ;;  %v8742_v10 = vpack.c.bf16 %v8729_v22, %v8726_v41  ;;  %v4374_v24 = vrot.slane %v10872_v44, 1  ;;  %v2304_v59 = vmul.f32 %v11183_v5, %v11182_v29  ;;  %v6288_v44 = vpop.eup %6287  ;;  %v11186_v29 = vld [vmem:[#allocation131_spill] sm:$0xff]  ;;  %v11197_v5 = vld [vmem:[#allocation130_spill] sm:$0xff] }
 0x3f6   : > { %v3440_v52 = vpop.permute.xlu1 %3439  ;;  %6303 = vtanh.f32 %v8737_v12 }
 0x3f7   : > { %v3110_v46 = vpop.permute.xlu0 %3109  ;;  %v10874_v4 = vshll.u32 %v8742_v10, 16  ;;  %3612 = vst.msk [vmem:[#allocation2 + $0x98] sm:$0xff] %vm742_vm1, %v3440_v52  ;;  %v8755_v47 = vor.u32 %v4374_v24, %v10873_v11  ;;  %v10875_v18 = vshrl.u32 %v8742_v10, 16  ;;  %v8766_v54 = vadd.f32 %v8480_v61, %v2304_v59 }
 0x3f8   : > { %3487 = vrot.lane.b32.xlu1 %v8747_v6, %s6477_s4  ;;  %v2302_v11 = vmul.f32 %v11186_v29, %v11185_v27  ;;  %6305 = vtanh.f32 %v8747_v6  ;;  %v11212_v6 = vld [vmem:[#allocation97_spill] sm:$0xff] }
 0x3f9   : > { %3505 = vrot.lane.b32.xlu0 %v8737_v12, %s6477_s4  ;;  %11181 = vst [vmem:[#allocation31_spill] sm:$0xff] %v8755_v47  ;;  %v4372_v52 = vrot.slane %v10874_v4, 1  ;;  %v6290_v47 = vpop.eup %6289  ;;  %v11209_v12 = vld [vmem:[#allocation82_spill] sm:$0xff]  ;;  %6307 = vtanh.f32 %v8766_v54 }
 0x3fa   : > { %v3436_v24 = vpop.permute.xlu1 %3435  ;;  %v8779_v61 = vadd.f32 %v8489_v2, %v2302_v11  ;;  %v6292_v11 = vpop.eup %6291 }
 0x3fb   : > { %v3106_v37 = vpop.permute.xlu0 %3105  ;;  %3610 = vst.msk [vmem:[#allocation2 + $0x88] sm:$0xff] %vm742_vm1, %v3436_v24  ;;  %v8772_v58 = vor.u32 %v4372_v52, %v10875_v18  ;;  %v11188_v52 = vld [vmem:[#allocation79_spill] sm:$0xff] }
 0x3fc   : > { %3511 = vrot.lane.b32.xlu1 %v8766_v54, %s6477_s4  ;;  %6309 = vtanh.f32 %v8779_v61 }
 0x3fd   : > { %3161 = vrot.lane.b32.xlu0 %v6288_v44, %s6476_s24  ;;  %11184 = vst [vmem:[#allocation34_spill] sm:$0xff] %v8772_v58  ;;  %v11187_v44 = vld [vmem:[#allocation73_spill] sm:$0xff] }
 0x3fe   : > { %v3112_v59 = vpop.permute.xlu1 %3111  ;;  %v8783_v24 = vmul.f32 %v11187_v44, %v3110_v46  ;;  %v6294_v46 = vpop.eup %6293  ;;  %v11192_v44 = vld [vmem:[#allocation128_spill] sm:$0xff] }
 0x3ff   : > { %v3446_v4 = vpop.permute.xlu0 %3445  ;;  %v8786_v18 = vmul.f32 %v11188_v52, %v3112_v59 }
 0x400   : > { %3615 = vst.msk [vmem:[#allocation2 + $0xb0] sm:$0xff] %vm742_vm1, %v3446_v4  ;;  %3507 = vrot.lane.b32.xlu1 %v8779_v61, %s6477_s4  ;;  %v11191_v4 = vld [vmem:[#allocation72_spill] sm:$0xff] }
 0x401   : > { %11189 = vst [vmem:[#allocation32_spill] sm:$0xff] %v8786_v18  ;;  %3181 = vrot.lane.b32.xlu0 %v6290_v47, %s6476_s24  ;;  %v8793_v31 = vpack.c.bf16 %v8786_v18, %v8783_v24  ;;  %v2293_v59 = vmul.f32 %v11192_v44, %v11191_v4  ;;  %v11193_v47 = vld [vmem:[#allocation78_spill] sm:$0xff] }
 0x402   : > { %v3108_v27 = vpop.permute.xlu1 %3107  ;;  %v8800_v58 = vmul.f32 %v11193_v47, %v3106_v37  ;;  %v11199_v18 = vld [vmem:[#allocation94_spill] sm:$0xff] }
 0x403   : > { %11190 = vst [vmem:[#allocation37_spill] sm:$0xff] %v8793_v31  ;;  %v3442_v2 = vpop.permute.xlu0 %3441  ;;  %v8803_v16 = vmul.f32 %v8004_v43, %v3108_v27  ;;  %v8808_v29 = vadd.f32 %v8478_v40, %v2293_v59  ;;  %v11195_v37 = vshll.u32 %v8793_v31, 16  ;;  %v6296_v43 = vpop.eup %6295  ;;  %v11196_v27 = vld [vmem:[#allocation96_spill] sm:$0xff] }
 0x404   : > { %3613 = vst.msk [vmem:[#allocation2 + $0xa0] sm:$0xff] %vm742_vm1, %v3442_v2  ;;  %3163 = vrot.lane.b32.xlu1 %v6294_v46, %s6476_s24  ;;  %v10882_v2 = vshrl.u32 %v8793_v31, 16  ;;  %v2305_v31 = vmul.f32 %v11200_v56, %v11199_v18  ;;  %v11215_v56 = vld [vmem:[#allocation77_spill] sm:$0xff] }
 0x405   : > { %11194 = vst [vmem:[#allocation35_spill] sm:$0xff] %v8803_v16  ;;  %3177 = vrot.lane.b32.xlu0 %v6292_v11, %s6476_s24  ;;  %v8813_v4 = vpack.c.bf16 %v8803_v16, %v8800_v58  ;;  %v4378_v47 = vrot.slane %v11195_v37, 1  ;;  %v2307_v11 = vmul.f32 %v11197_v5, %v11196_v27  ;;  %v6298_v16 = vpop.eup %6297  ;;  %6311 = vtanh.f32 %v8808_v29 }
 0x406   : > { %v3448_v44 = vpop.permute.xlu1 %3447 }
 0x407   : > { %v3118_v52 = vpop.permute.xlu0 %3117  ;;  %v10883_v46 = vshll.u32 %v8813_v4, 16  ;;  %3616 = vst.msk [vmem:[#allocation2 + $0xb8] sm:$0xff] %vm742_vm1, %v3448_v44  ;;  %v8825_v40 = vor.u32 %v4378_v47, %v10882_v2  ;;  %v8830_v59 = vadd.f32 %v8486_v62, %v2307_v11  ;;  %v10884_v37 = vshrl.u32 %v8813_v4, 16  ;;  %v11203_v47 = vld [vmem:[#allocation133_spill] sm:$0xff] }
 0x408   : > { %3183 = vrot.lane.b32.xlu1 %v6296_v43, %s6476_s24  ;;  %v2294_v43 = vmul.f32 %v11203_v47, %v11202_v38  ;;  %v8849_v11 = vadd.f32 %v8495_v19, %v2305_v31  ;;  %v11207_v38 = vld [vmem:[#allocation27_spill] sm:$0xff]  ;;  %v11218_v47 = vld [vmem:[#allocation100_spill] sm:$0xff] }
 0x409   : > { %3489 = vrot.lane.b32.xlu0 %v8808_v29, %s6477_s4  ;;  %11198 = vst [vmem:[#allocation38_spill] sm:$0xff] %v8825_v40  ;;  %v4376_v44 = vrot.slane %v10883_v46, 1  ;;  %v11204_v46 = vld [vmem:[#allocation83_spill] sm:$0xff]  ;;  %v11213_v40 = vld [vmem:[#allocation108_spill] sm:$0xff]  ;;  %v11224_v29 = vld [vmem:[#allocation114_spill] sm:$0xff]  ;;  %6313 = vtanh.f32 %v8830_v59 }
 0x40a   : > { %v3444_v5 = vpop.permute.xlu1 %3443  ;;  %6315 = vtanh.f32 %v8849_v11 }
 0x40b   : > { %v3114_v27 = vpop.permute.xlu0 %3113  ;;  %3614 = vst.msk [vmem:[#allocation2 + $0xa8] sm:$0xff] %vm742_vm1, %v3444_v5  ;;  %v8842_v62 = vor.u32 %v4376_v44, %v10884_v37  ;;  %v8852_v5 = vadd.f32 %v8498_v26, %v2294_v43  ;;  %v8856_v44 = vmul.f32 %v11204_v46, %v3118_v52  ;;  %v11205_v37 = vld [vmem:[#allocation84_spill] sm:$0xff]  ;;  %v6300_v52 = vpop.eup %6299 }
 0x40c   : > { %3179 = vrot.lane.b32.xlu1 %v6298_v16, %s6476_s24  ;;  %v11206_v16 = vld [vmem:[#allocation99_spill] sm:$0xff]  ;;  %v8879_v43 = vmul.f32 %v11209_v12, %v3114_v27 }
 0x40d   : > { %3517 = vrot.lane.b32.xlu0 %v8830_v59, %s6477_s4  ;;  %11201 = vst [vmem:[#allocation36_spill] sm:$0xff] %v8842_v62  ;;  %v2308_v19 = vmul.f32 %v11207_v38, %v11206_v16  ;;  %v2306_v62 = vmul.f32 %v11213_v40, %v11212_v6  ;;  %6317 = vtanh.f32 %v8852_v5 }
 0x40e   : > { %v3120_v2 = vpop.permute.xlu1 %3119 }
 0x40f   : > { %v3454_v18 = vpop.permute.xlu0 %3453  ;;  %v8859_v53 = vmul.f32 %v11205_v37, %v3120_v2  ;;  %v8874_v2 = vadd.f32 %v8505_v63, %v2308_v19 }
 0x410   : > { %3619 = vst.msk [vmem:[#allocation2 + $0xd0] sm:$0xff] %vm742_vm1, %v3454_v18  ;;  %3491 = vrot.lane.b32.xlu1 %v8852_v5, %s6477_s4  ;;  %v11210_v18 = vld [vmem:[#allocation87_spill] sm:$0xff]  ;;  %v11233_v5 = vld [vmem:[#allocation101_spill] sm:$0xff] }
 0x411   : > { %3513 = vrot.lane.b32.xlu0 %v8849_v11, %s6477_s4  ;;  %v8871_v26 = vpack.c.bf16 %v8859_v53, %v8856_v44  ;;  %6319 = vtanh.f32 %v8874_v2 }
 0x412   : > { %v3116_v46 = vpop.permute.xlu1 %3115 }
 0x413   : > { %11208 = vst [vmem:[#allocation41_spill] sm:$0xff] %v8871_v26  ;;  %v3450_v31 = vpop.permute.xlu0 %3449  ;;  %v10885_v37 = vshll.u32 %v8871_v26, 16  ;;  %v8882_v16 = vmul.f32 %v11210_v18, %v3116_v46  ;;  %v10886_v63 = vshrl.u32 %v8871_v26, 16  ;;  %v6302_v46 = vpop.eup %6301 }
 0x414   : > { %3617 = vst.msk [vmem:[#allocation2 + $0xc0] sm:$0xff] %vm742_vm1, %v3450_v31  ;;  %3519 = vrot.lane.b32.xlu1 %v8874_v2, %s6477_s4 }
 0x415   : > { %11211 = vst [vmem:[#allocation39_spill] sm:$0xff] %v8882_v16  ;;  %3165 = vrot.lane.b32.xlu0 %v6300_v52, %s6476_s24  ;;  %v8893_v19 = vpack.c.bf16 %v8882_v16, %v8879_v43  ;;  %v4382_v31 = vrot.slane %v10885_v37, 1  ;;  %v8898_v52 = vadd.f32 %v8513_v60, %v2306_v62  ;;  %v6304_v37 = vpop.eup %6303 }
 0x416   : > { %v3456_v12 = vpop.permute.xlu1 %3455 }
 0x417   : > { %v3126_v27 = vpop.permute.xlu0 %3125  ;;  %v10887_v18 = vshll.u32 %v8893_v19, 16  ;;  %3620 = vst.msk [vmem:[#allocation2 + $0xd8] sm:$0xff] %vm742_vm1, %v3456_v12  ;;  %v8905_v54 = vor.u32 %v4382_v31, %v10886_v63  ;;  %v10891_v6 = vshrl.u32 %v8893_v19, 16  ;;  %v6306_v12 = vpop.eup %6305  ;;  %6321 = vtanh.f32 %v8898_v52 }
 0x418   : > { %3515 = vrot.lane.b32.xlu1 %v8898_v52, %s6477_s4 }
 0x419   : > { %3189 = vrot.lane.b32.xlu0 %v6302_v46, %s6476_s24  ;;  %11214 = vst [vmem:[#allocation42_spill] sm:$0xff] %v8905_v54  ;;  %v4380_v62 = vrot.slane %v10887_v18, 1  ;;  %v11216_v46 = vld [vmem:[#allocation25_spill] sm:$0xff]  ;;  %v6308_v54 = vpop.eup %6307 }
 0x41a   : > { %v3452_v40 = vpop.permute.xlu1 %3451  ;;  %v2295_v38 = vmul.f32 %v11216_v46, %v11215_v56  ;;  %v11219_v56 = vld [vmem:[#allocation109_spill] sm:$0xff] }
 0x41b   : > { %v3122_v60 = vpop.permute.xlu0 %3121  ;;  %3618 = vst.msk [vmem:[#allocation2 + $0xc8] sm:$0xff] %vm742_vm1, %v3452_v40  ;;  %v8919_v31 = vor.u32 %v4380_v62, %v10891_v6  ;;  %v2311_v46 = vmul.f32 %v11219_v56, %v11218_v47  ;;  %v11220_v40 = vld [vmem:[#allocation90_spill] sm:$0xff]  ;;  %v11223_v62 = vld [vmem:[#allocation29_spill] sm:$0xff] }
 0x41c   : > { %3167 = vrot.lane.b32.xlu1 %v6306_v12, %s6476_s24  ;;  %v8923_v61 = vadd.f32 %v8520_v57, %v2295_v38  ;;  %v8929_v26 = vmul.f32 %v11220_v40, %v3126_v27  ;;  %v6310_v27 = vpop.eup %6309  ;;  %v11227_v6 = vld [vmem:[#allocation110_spill] sm:$0xff] }
 0x41d   : > { %3185 = vrot.lane.b32.xlu0 %v6304_v37, %s6476_s24  ;;  %11217 = vst [vmem:[#allocation40_spill] sm:$0xff] %v8919_v31  ;;  %v11221_v37 = vld [vmem:[#allocation115_spill] sm:$0xff]  ;;  %v8939_v57 = vadd.f32 %v8528_v50, %v2311_v46  ;;  %v11226_v46 = vld [vmem:[#allocation85_spill] sm:$0xff] }
 0x41e   : > { %v3128_v18 = vpop.permute.xlu1 %3127  ;;  %6323 = vtanh.f32 %v8923_v61 }
 0x41f   : > { %v3462_v63 = vpop.permute.xlu0 %3461  ;;  %v8932_v16 = vmul.f32 %v11221_v37, %v3128_v18  ;;  %v11222_v18 = vld [vmem:[#allocation98_spill] sm:$0xff]  ;;  %v8950_v37 = vmul.f32 %v11224_v29, %v3122_v60  ;;  %6325 = vtanh.f32 %v8939_v57 }
 0x420   : > { %3623 = vst.msk [vmem:[#allocation2 + $0xf0] sm:$0xff] %vm742_vm1, %v3462_v63  ;;  %3191 = vrot.lane.b32.xlu1 %v6308_v54, %s6476_s24  ;;  %v2309_v12 = vmul.f32 %v11223_v62, %v11222_v18  ;;  %v11225_v54 = vld [vmem:[#allocation117_spill] sm:$0xff] }
 0x421   : > { %3493 = vrot.lane.b32.xlu0 %v8923_v61, %s6477_s4  ;;  %v8943_v38 = vpack.c.bf16 %v8932_v16, %v8929_v26 }
 0x422   : > { %v3124_v63 = vpop.permute.xlu1 %3123  ;;  %v8962_v18 = vadd.f32 %v8537_v17, %v2309_v12  ;;  %v11231_v12 = vld [vmem:[#allocation26_spill] sm:$0xff] }
 0x423   : > { %v3458_v47 = vpop.permute.xlu0 %3457  ;;  %v8953_v50 = vmul.f32 %v11225_v54, %v3124_v63  ;;  %v10892_v40 = vshrl.u32 %v8943_v38, 16  ;;  %v11228_v29 = vshll.u32 %v8943_v38, 16 }
 0x424   : > { %3621 = vst.msk [vmem:[#allocation2 + $0xe0] sm:$0xff] %vm742_vm1, %v3458_v47  ;;  %v2296_v47 = vmul.f32 %v11227_v6, %v11226_v46  ;;  %3187 = vrot.lane.b32.xlu1 %v6310_v27, %s6476_s24  ;;  %v11230_v27 = vld [vmem:[#allocation102_spill] sm:$0xff]  ;;  %6327 = vtanh.f32 %v8962_v18 }
 0x425   : > { %3525 = vrot.lane.b32.xlu0 %v8939_v57, %s6477_s4  ;;  %v8967_v60 = vpack.c.bf16 %v8953_v50, %v8950_v37  ;;  %v4386_v54 = vrot.slane %v11228_v29, 1  ;;  %v2312_v62 = vmul.f32 %v11231_v12, %v11230_v27  ;;  %v6312_v29 = vpop.eup %6311  ;;  %v11234_v27 = vld [vmem:[#allocation111_spill] sm:$0xff] }
 0x426   : > { %v8972_v59 = vadd.f32 %v8539_v20, %v2296_v47  ;;  %v3464_v31 = vpop.permute.xlu1 %3463 }
 0x427   : > { %v3134_v63 = vpop.permute.xlu0 %3133  ;;  %v10893_v46 = vshll.u32 %v8967_v60, 16  ;;  %3624 = vst.msk [vmem:[#allocation2 + $0xf8] sm:$0xff] %vm742_vm1, %v3464_v31  ;;  %v8980_v17 = vor.u32 %v4386_v54, %v10892_v40  ;;  %v10894_v20 = vshrl.u32 %v8967_v60, 16  ;;  %v8992_v54 = vadd.f32 %v8543_v35, %v2312_v62  ;;  %v6314_v35 = vpop.eup %6313 }
 0x428   : > { %3495 = vrot.lane.b32.xlu1 %v8972_v59, %s6477_s4  ;;  %6329 = vtanh.f32 %v8972_v59 }
 0x429   : > { %3521 = vrot.lane.b32.xlu0 %v8962_v18, %s6477_s4  ;;  %11229 = vst [vmem:[#allocation45_spill] sm:$0xff] %v8980_v17  ;;  %v4384_v47 = vrot.slane %v10893_v46, 1  ;;  %v2310_v17 = vmul.f32 %v11234_v27, %v11233_v5  ;;  %6331 = vtanh.f32 %v8992_v54 }
 0x42a   : > { %v3460_v40 = vpop.permute.xlu1 %3459 }
 0x42b   : > { %v3130_v31 = vpop.permute.xlu0 %3129  ;;  %3622 = vst.msk [vmem:[#allocation2 + $0xe8] sm:$0xff] %vm742_vm1, %v3460_v40  ;;  %v8998_v11 = vor.u32 %v4384_v47, %v10894_v20  ;;  %v9006_v62 = vadd.f32 %v8553_v51, %v2310_v17  ;;  %v11236_v47 = vld [vmem:[#allocation119_spill] sm:$0xff]  ;;  %v6316_v17 = vpop.eup %6315 }
 0x42c   : > { %3527 = vrot.lane.b32.xlu1 %v8992_v54, %s6477_s4  ;;  %v6318_v5 = vpop.eup %6317 }
 0x42d   : > { %3169 = vrot.lane.b32.xlu0 %v6312_v29, %s6476_s24  ;;  %11232 = vst [vmem:[#allocation43_spill] sm:$0xff] %v8998_v11  ;;  %v11235_v29 = vld [vmem:[#allocation116_spill] sm:$0xff]  ;;  %v6320_v56 = vpop.eup %6319  ;;  %6333 = vtanh.f32 %v9006_v62 }
 0x42e   : > { %v3136_v40 = vpop.permute.xlu1 %3135  ;;  %v9010_v12 = vmul.f32 %v11235_v29, %v3134_v63  ;;  %v11237_v29 = vld [vmem:[#allocation118_spill] sm:$0xff] }
 0x42f   : > { %v3466_v46 = vpop.permute.xlu0 %3465  ;;  %v9013_v20 = vmul.f32 %v11236_v47, %v3136_v40  ;;  %v9025_v40 = vmul.f32 %v11237_v29, %v3130_v31  ;;  %v11238_v47 = vld [vmem:[#allocation120_spill] sm:$0xff] }
 0x430   : > { %3625 = vst.msk [vmem:[#allocation2 + $0x100] sm:$0xff] %vm742_vm1, %v3466_v46  ;;  %3523 = vrot.lane.b32.xlu1 %v9006_v62, %s6477_s4 }
 0x431   : > { %3197 = vrot.lane.b32.xlu0 %v6314_v35, %s6476_s24  ;;  %v9021_v51 = vpack.c.bf16 %v9013_v20, %v9010_v12 }
 0x432   : > { %v3132_v46 = vpop.permute.xlu1 %3131 }
 0x433   : > { %v3142_v2 = vpop.permute.xlu0 %3141  ;;  %v10895_v63 = vshll.u32 %v9021_v51, 16  ;;  %v9028_v35 = vmul.f32 %v11238_v47, %v3132_v46  ;;  %v10896_v52 = vshrl.u32 %v9021_v51, 16 }
 0x434   : > { %3171 = vrot.lane.b32.xlu1 %v6318_v5, %s6476_s24 }
 0x435   : > { %3193 = vrot.lane.b32.xlu0 %v6316_v17, %s6476_s24  ;;  %v9036_v11 = vpack.c.bf16 %v9028_v35, %v9025_v40  ;;  %v4390_v31 = vrot.slane %v10895_v63, 1 }
 0x436   : > { %v3468_v29 = vpop.permute.xlu1 %3467 }
 0x437   : > { %v3138_v27 = vpop.permute.xlu0 %3137  ;;  %v10898_v46 = vshll.u32 %v9036_v11, 16  ;;  %3626 = vst.msk [vmem:[#allocation2 + $0x108] sm:$0xff] %vm742_vm1, %v3468_v29  ;;  %v9046_v61 = vor.u32 %v4390_v31, %v10896_v52  ;;  %v10904_v17 = vshrl.u32 %v9036_v11, 16  ;;  %v6322_v29 = vpop.eup %6321 }
 0x438   : > { %3199 = vrot.lane.b32.xlu1 %v6320_v56, %s6476_s24 }
 0x439   : > { %3725 = vrot.lane.b32.xlu0 %v8573_v42, %s6478_s0  ;;  %11239 = vst [vmem:[#allocation46_spill] sm:$0xff] %v9046_v61  ;;  %v4388_v47 = vrot.slane %v10898_v46, 1  ;;  %v9055_v42 = vmul.f32 %v8088_v30, %v3142_v2  ;;  %v6324_v2 = vpop.eup %6323  ;;  %v11307_v61 = vld [vmem:[#allocation108_spill] sm:$0xff] }
 0x43a   : > { %v3144_v63 = vpop.permute.xlu1 %3143 }
 0x43b   : > { %v3470_v5 = vpop.permute.xlu0 %3469  ;;  %v9058_v31 = vmul.f32 %v8108_v55, %v3144_v63  ;;  %v9064_v56 = vor.u32 %v4388_v47, %v10904_v17  ;;  %v11241_v63 = vld [vmem:[#allocation121_spill] sm:$0xff]  ;;  %v11247_v17 = vshrl.u32 %v8582_v15, 16 }
 0x43c   : > { %3627 = vst.msk [vmem:[#allocation2 + $0x110] sm:$0xff] %vm742_vm1, %v3470_v5  ;;  %3195 = vrot.lane.b32.xlu1 %v6322_v29, %s6476_s24  ;;  %v9074_v52 = vmul.f32 %v11241_v63, %v3138_v27  ;;  %v6326_v63 = vpop.eup %6325 }
 0x43d   : > { %3721 = vrot.lane.b32.xlu0 %v8591_v49, %s6478_s0  ;;  %11240 = vst [vmem:[#allocation44_spill] sm:$0xff] %v9064_v56  ;;  %v9070_v57 = vpack.c.bf16 %v9058_v31, %v9055_v42  ;;  %v11325_v56 = vld [vmem:[#allocation111_spill] sm:$0xff] }
 0x43e   : > { %v3140_v5 = vpop.permute.xlu1 %3139 }
 0x43f   : > { %v3146_v30 = vpop.permute.xlu0 %3145  ;;  %v10897_v55 = vshll.u32 %v9070_v57, 16  ;;  %v9077_v49 = vmul.f32 %v8125_v33, %v3140_v5  ;;  %v10899_v18 = vshrl.u32 %v9070_v57, 16 }
 0x440   : > { %3727 = vrot.lane.b32.xlu1 %v8576_v23, %s6478_s0 }
 0x441   : > { %3173 = vrot.lane.b32.xlu0 %v6324_v2, %s6476_s24  ;;  %v9086_v47 = vpack.c.bf16 %v9077_v49, %v9074_v52  ;;  %v4394_v27 = vrot.slane %v10897_v55, 1  ;;  %v6328_v55 = vpop.eup %6327 }
 0x442   : > { %v3472_v33 = vpop.permute.xlu1 %3471 }
 0x443   : > { %v3474_v29 = vpop.permute.xlu0 %3473  ;;  %v10900_v2 = vshll.u32 %v9086_v47, 16  ;;  %3628 = vst.msk [vmem:[#allocation2 + $0x118] sm:$0xff] %vm742_vm1, %v3472_v33  ;;  %v9096_v23 = vor.u32 %v4394_v27, %v10899_v18  ;;  %v10902_v59 = vshrl.u32 %v9086_v47, 16  ;;  %v9105_v33 = vmul.f32 %v8113_v0, %v3146_v30 }
 0x444   : > { %3629 = vst.msk [vmem:[#allocation2 + $0x120] sm:$0xff] %vm742_vm1, %v3474_v29  ;;  %3723 = vrot.lane.b32.xlu1 %v8594_v25, %s6478_s0 }
 0x445   : > { %3205 = vrot.lane.b32.xlu0 %v6326_v63, %s6476_s24  ;;  %11242 = vst [vmem:[#allocation49_spill] sm:$0xff] %v9096_v23  ;;  %v4392_v29 = vrot.slane %v10900_v2, 1 }
 0x446   : > { %v3148_v46 = vpop.permute.xlu1 %3147 }
 0x447   : > { %v3150_v5 = vpop.permute.xlu0 %3149  ;;  %v9108_v63 = vmul.f32 %v8143_v21, %v3148_v46  ;;  %v9113_v25 = vor.u32 %v4392_v29, %v10902_v59  ;;  %v6330_v21 = vpop.eup %6329 }
 0x448   : > { %4529 = vrot.lane.b32.xlu1 %v8582_v15, %s6477_s4  ;;  %v6332_v18 = vpop.eup %6331 }
 0x449   : > { %3201 = vrot.lane.b32.xlu0 %v6328_v55, %s6476_s24  ;;  %11243 = vst [vmem:[#allocation47_spill] sm:$0xff] %v9113_v25  ;;  %v9120_v54 = vpack.c.bf16 %v9108_v63, %v9105_v33 }
 0x44a   : > { %v3476_v30 = vpop.permute.xlu1 %3475 }
 0x44b   : > { %v3478_v0 = vpop.permute.xlu0 %3477  ;;  %v10901_v46 = vshll.u32 %v9120_v54, 16  ;;  %3630 = vst.msk [vmem:[#allocation2 + $0x128] sm:$0xff] %vm742_vm1, %v3476_v30  ;;  %v10903_v62 = vshrl.u32 %v9120_v54, 16 }
 0x44c   : > { %3631 = vst.msk [vmem:[#allocation2 + $0x130] sm:$0xff] %vm742_vm1, %v3478_v0  ;;  %3175 = vrot.lane.b32.xlu1 %v6330_v21, %s6476_s24  ;;  %v9132_v0 = vmul.f32 %v8134_v13, %v3150_v5  ;;  %v11245_v13 = vshrl.u32 %v8603_v9, 16 }
 0x44d   : > { %4527 = vrot.lane.b32.xlu0 %v8603_v9, %s6477_s4  ;;  %v4396_v27 = vrot.slane %v10901_v46, 1 }
 0x44e   : > { %v3152_v29 = vpop.permute.xlu1 %3151  ;;  %v4012_v5 = vrot.slane %v11245_v13, 7 }
 0x44f   : > { %v3154_v55 = vpop.permute.xlu0 %3153  ;;  %v9135_v2 = vmul.f32 %v8154_v1, %v3152_v29  ;;  %v9141_v30 = vor.u32 %v4396_v27, %v10903_v62  ;;  %v6334_v1 = vpop.eup %6333  ;;  %v11246_v29 = vshll.u32 %v8603_v9, 16 }
 0x450   : > { %3207 = vrot.lane.b32.xlu1 %v6332_v18, %s6476_s24  ;;  %v9165_v23 = vmul.f32 %v8148_v7, %v3154_v55  ;;  %v11249_v7 = vshll.u32 %v8582_v15, 16 }
 0x451   : > { %3733 = vrot.lane.b32.xlu0 %v8635_v34, %s6478_s0  ;;  %11244 = vst [vmem:[#allocation50_spill] sm:$0xff] %v9141_v30  ;;  %v9146_v21 = vpack.c.bf16 %v9135_v2, %v9132_v0  ;;  %v4015_v62 = vor.u32 %v11246_v29, %v4012_v5 }
 0x452   : > { %v3480_v59 = vpop.permute.xlu1 %3479 }
 0x453   : > { %v3482_v46 = vpop.permute.xlu0 %3481  ;;  %v10907_v34 = vshll.u32 %v9146_v21, 16  ;;  %3632 = vst.msk [vmem:[#allocation2 + $0x138] sm:$0xff] %vm742_vm1, %v3480_v59  ;;  %v10912_v18 = vshrl.u32 %v9146_v21, 16  ;;  %v4019_v59 = vrot.slane %v11247_v17, 7 }
 0x454   : > { %3633 = vst.msk [vmem:[#allocation2 + $0x140] sm:$0xff] %vm742_vm1, %v3482_v46  ;;  %3203 = vrot.lane.b32.xlu1 %v6334_v1, %s6476_s24 }
 0x455   : > { %3729 = vrot.lane.b32.xlu0 %v8652_v8, %s6478_s0  ;;  %v4398_v13 = vrot.slane %v10907_v34, 1  ;;  %v4022_v55 = vor.u32 %v11249_v7, %v4019_v59  ;;  %v11269_v34 = vld [vmem:[#allocation35_spill] sm:$0xff] }
 0x456   : > { %v3156_v46 = vpop.permute.xlu1 %3155 }
 0x457   : > { %v3502_v27 = vpop.permute.xlu0 %3501  ;;  %v9168_v8 = vmul.f32 %v8180_v45, %v3156_v46  ;;  %v9173_v9 = vor.u32 %v4398_v13, %v10912_v18  ;;  %v11251_v46 = vshrl.u32 %v8667_v14, 16  ;;  %v11274_v18 = vshll.u32 %v8813_v4, 16 }
 0x458   : > { %3643 = vst.msk [vmem:[#allocation2 + $0x190] sm:$0xff] %vm742_vm1, %v3502_v27  ;;  %3735 = vrot.lane.b32.xlu1 %v8638_v28, %s6478_s0 }
 0x459   : > { %4233 = vrot.lane.b32.xlu0 %v4015_v62, %s6478_s0  ;;  %11248 = vst [vmem:[#allocation48_spill] sm:$0xff] %v9173_v9  ;;  %v9179_v5 = vpack.c.bf16 %v9168_v8, %v9165_v23  ;;  %v4026_v59 = vrot.slane %v11251_v46, 7 }
 0x45a   : > { %v3484_v1 = vpop.permute.xlu1 %3483 }
 0x45b   : > { %v3498_v17 = vpop.permute.xlu0 %3497  ;;  %v10909_v45 = vshll.u32 %v9179_v5, 16  ;;  %3634 = vst.msk [vmem:[#allocation2 + $0x148] sm:$0xff] %vm742_vm1, %v3484_v1  ;;  %v10913_v28 = vshrl.u32 %v9179_v5, 16  ;;  %v11252_v1 = vshll.u32 %v8667_v14, 16 }
 0x45c   : > { %3641 = vst.msk [vmem:[#allocation2 + $0x180] sm:$0xff] %vm742_vm1, %v3498_v17  ;;  %4235 = vrot.lane.b32.xlu1 %v4022_v55, %s6478_s0  ;;  %v11253_v55 = vshrl.u32 %v8645_v39, 16 }
 0x45d   : > { %4531 = vrot.lane.b32.xlu0 %v8667_v14, %s6477_s4  ;;  %v4400_v27 = vrot.slane %v10909_v45, 1  ;;  %v4029_v7 = vor.u32 %v11252_v1, %v4026_v59 }
 0x45e   : > { %v3504_v29 = vpop.permute.xlu1 %3503 }
 0x45f   : > { %v3158_v62 = vpop.permute.xlu0 %3157  ;;  %3644 = vst.msk [vmem:[#allocation2 + $0x198] sm:$0xff] %vm742_vm1, %v3504_v29  ;;  %v9197_v15 = vor.u32 %v4400_v27, %v10913_v28  ;;  %v4033_v27 = vrot.slane %v11253_v55, 7  ;;  %v11254_v29 = vld [vmem:[#allocation122_spill] sm:$0xff]  ;;  %v11257_v55 = vshrl.u32 %v8742_v10, 16 }
 0x460   : > { %3731 = vrot.lane.b32.xlu1 %v8655_v3, %s6478_s0 }
 0x461   : > { %3741 = vrot.lane.b32.xlu0 %v8706_v32, %s6478_s0  ;;  %11250 = vst [vmem:[#allocation53_spill] sm:$0xff] %v9197_v15 }
 0x462   : > { %v3500_v17 = vpop.permute.xlu1 %3499 }
 0x463   : > { %v3486_v13 = vpop.permute.xlu0 %3485  ;;  %3642 = vst.msk [vmem:[#allocation2 + $0x188] sm:$0xff] %vm742_vm1, %v3500_v17  ;;  %v11255_v17 = vshll.u32 %v8645_v39, 16 }
 0x464   : > { %3635 = vst.msk [vmem:[#allocation2 + $0x150] sm:$0xff] %vm742_vm1, %v3486_v13  ;;  %4533 = vrot.lane.b32.xlu1 %v8645_v39, %s6477_s4  ;;  %v9215_v13 = vmul.f32 %v11254_v29, %v3158_v62 }
 0x465   : > { %3737 = vrot.lane.b32.xlu0 %v8726_v41, %s6478_s0 }
 0x466   : > { %v3160_v3 = vpop.permute.xlu1 %3159 }
 0x467   : > { %v3510_v32 = vpop.permute.xlu0 %3509  ;;  %v9218_v46 = vmul.f32 %v8194_v48, %v3160_v3 }
 0x468   : > { %3647 = vst.msk [vmem:[#allocation2 + $0x1b0] sm:$0xff] %vm742_vm1, %v3510_v32  ;;  %3743 = vrot.lane.b32.xlu1 %v8709_v36, %s6478_s0  ;;  %v4036_v32 = vor.u32 %v11255_v17, %v4033_v27  ;;  %v4040_v27 = vrot.slane %v11257_v55, 7  ;;  %v11262_v55 = vld [vmem:[#allocation106_spill] sm:$0xff] }
 0x469   : > { %4237 = vrot.lane.b32.xlu0 %v4029_v7, %s6478_s0  ;;  %v9225_v14 = vpack.c.bf16 %v9218_v46, %v9215_v13 }
 0x46a   : > { %v3488_v59 = vpop.permute.xlu1 %3487 }
 0x46b   : > { %v3506_v41 = vpop.permute.xlu0 %3505  ;;  %v10905_v62 = vshll.u32 %v9225_v14, 16  ;;  %3636 = vst.msk [vmem:[#allocation2 + $0x158] sm:$0xff] %vm742_vm1, %v3488_v59  ;;  %v10906_v48 = vshrl.u32 %v9225_v14, 16  ;;  %v11259_v59 = vshll.u32 %v8742_v10, 16 }
 0x46c   : > { %3645 = vst.msk [vmem:[#allocation2 + $0x1a0] sm:$0xff] %vm742_vm1, %v3506_v41  ;;  %4239 = vrot.lane.b32.xlu1 %v4036_v32, %s6478_s0  ;;  %v11258_v41 = vld [vmem:[#allocation65_spill] sm:$0xff] }
 0x46d   : > { %4535 = vrot.lane.b32.xlu0 %v8742_v10, %s6477_s4  ;;  %v4402_v1 = vrot.slane %v10905_v62, 1  ;;  %v4043_v17 = vor.u32 %v11259_v59, %v4040_v27  ;;  %v11264_v59 = vshll.u32 %v11258_v41, 16 }
 0x46e   : > { %v3512_v7 = vpop.permute.xlu1 %3511 }
 0x46f   : > { %v3162_v36 = vpop.permute.xlu0 %3161  ;;  %3648 = vst.msk [vmem:[#allocation2 + $0x1b8] sm:$0xff] %vm742_vm1, %v3512_v7  ;;  %v9243_v39 = vor.u32 %v4402_v1, %v10906_v48  ;;  %v11261_v7 = vld [vmem:[#allocation103_spill] sm:$0xff] }
 0x470   : > { %3739 = vrot.lane.b32.xlu1 %v8729_v22, %s6478_s0  ;;  %v11260_v22 = vshrl.u32 %v11258_v41, 16  ;;  %v9259_v62 = vmul.f32 %v11261_v7, %v3162_v36 }
 0x471   : > { %3749 = vrot.lane.b32.xlu0 %v8783_v24, %s6478_s0  ;;  %11256 = vst [vmem:[#allocation51_spill] sm:$0xff] %v9243_v39 }
 0x472   : > { %v3508_v29 = vpop.permute.xlu1 %3507  ;;  %v4047_v1 = vrot.slane %v11260_v22, 7 }
 0x473   : > { %v3182_v3 = vpop.permute.xlu0 %3181  ;;  %3646 = vst.msk [vmem:[#allocation2 + $0x1a8] sm:$0xff] %vm742_vm1, %v3508_v29 }
 0x474   : > { %4537 = vrot.lane.b32.xlu1 %v11258_v41, %s6477_s4  ;;  %v4050_v22 = vor.u32 %v11264_v59, %v4047_v1  ;;  %v11267_v59 = vld [vmem:[#allocation105_spill] sm:$0xff] }
 0x475   : > { %3745 = vrot.lane.b32.xlu0 %v8800_v58, %s6478_s0  ;;  %v11263_v58 = vld [vmem:[#allocation32_spill] sm:$0xff] }
 0x476   : > { %v3164_v32 = vpop.permute.xlu1 %3163 }
 0x477   : > { %v3178_v24 = vpop.permute.xlu0 %3177  ;;  %v9262_v48 = vmul.f32 %v11262_v55, %v3164_v32  ;;  %v11265_v32 = vld [vmem:[#allocation104_spill] sm:$0xff] }
 0x478   : > { %3751 = vrot.lane.b32.xlu1 %v11263_v58, %s6478_s0  ;;  %v9276_v7 = vmul.f32 %v11265_v32, %v3182_v3  ;;  %v9294_v32 = vmul.f32 %v11267_v59, %v3178_v24 }
 0x479   : > { %4241 = vrot.lane.b32.xlu0 %v4043_v17, %s6478_s0  ;;  %v9269_v29 = vpack.c.bf16 %v9262_v48, %v9259_v62  ;;  %v11266_v17 = vld [vmem:[#allocation123_spill] sm:$0xff] }
 0x47a   : > { %v3184_v27 = vpop.permute.xlu1 %3183 }
 0x47b   : > { %v3490_v10 = vpop.permute.xlu0 %3489  ;;  %v10908_v36 = vshll.u32 %v9269_v29, 16  ;;  %v9279_v55 = vmul.f32 %v11266_v17, %v3184_v27  ;;  %v11268_v17 = vld [vmem:[#allocation125_spill] sm:$0xff] }
 0x47c   : > { %3637 = vst.msk [vmem:[#allocation2 + $0x160] sm:$0xff] %vm742_vm1, %v3490_v10  ;;  %4243 = vrot.lane.b32.xlu1 %v4050_v22, %s6478_s0  ;;  %v10910_v10 = vshrl.u32 %v9269_v29, 16 }
 0x47d   : > { %4539 = vrot.lane.b32.xlu0 %v8813_v4, %s6477_s4  ;;  %v9286_v58 = vpack.c.bf16 %v9279_v55, %v9276_v7  ;;  %v4404_v1 = vrot.slane %v10908_v36, 1 }
 0x47e   : > { %v3180_v3 = vpop.permute.xlu1 %3179 }
 0x47f   : > { %v3518_v41 = vpop.permute.xlu0 %3517  ;;  %v10911_v27 = vshll.u32 %v9286_v58, 16  ;;  %v9297_v22 = vmul.f32 %v11268_v17, %v3180_v3  ;;  %v9305_v36 = vor.u32 %v4404_v1, %v10910_v10  ;;  %v11271_v3 = vshrl.u32 %v8813_v4, 16  ;;  %v11273_v10 = vld [vmem:[#allocation37_spill] sm:$0xff] }
 0x480   : > { %3651 = vst.msk [vmem:[#allocation2 + $0x1d0] sm:$0xff] %vm742_vm1, %v3518_v41  ;;  %3747 = vrot.lane.b32.xlu1 %v11269_v34, %s6478_s0  ;;  %v10915_v41 = vshrl.u32 %v9286_v58, 16  ;;  %v11275_v39 = vshrl.u32 %v11273_v10, 16 }
 0x481   : > { %3757 = vrot.lane.b32.xlu0 %v8856_v44, %s6478_s0  ;;  %11270 = vst [vmem:[#allocation54_spill] sm:$0xff] %v9305_v36  ;;  %v9310_v45 = vpack.c.bf16 %v9297_v22, %v9294_v32  ;;  %v4054_v59 = vrot.slane %v11271_v3, 7  ;;  %v4414_v44 = vrot.slane %v10911_v27, 1  ;;  %v11289_v36 = vld [vmem:[#allocation131_spill] sm:$0xff] }
 0x482   : > { %v3492_v17 = vpop.permute.xlu1 %3491 }
 0x483   : > { %v3514_v24 = vpop.permute.xlu0 %3513  ;;  %v10914_v34 = vshll.u32 %v9310_v45, 16  ;;  %3638 = vst.msk [vmem:[#allocation2 + $0x168] sm:$0xff] %vm742_vm1, %v3492_v17  ;;  %v9323_v1 = vor.u32 %v4414_v44, %v10915_v41  ;;  %v10916_v3 = vshrl.u32 %v9310_v45, 16  ;;  %v11279_v41 = vld [vmem:[#allocation107_spill] sm:$0xff] }
 0x484   : > { %3649 = vst.msk [vmem:[#allocation2 + $0x1c0] sm:$0xff] %vm742_vm1, %v3514_v24  ;;  %4541 = vrot.lane.b32.xlu1 %v11273_v10, %s6477_s4  ;;  %v4057_v24 = vor.u32 %v11274_v18, %v4054_v59  ;;  %v11277_v59 = vshll.u32 %v11273_v10, 16  ;;  %v11281_v10 = vld [vmem:[#allocation39_spill] sm:$0xff] }
 0x485   : > { %3753 = vrot.lane.b32.xlu0 %v8879_v43, %s6478_s0  ;;  %11272 = vst [vmem:[#allocation52_spill] sm:$0xff] %v9323_v1  ;;  %v4412_v28 = vrot.slane %v10914_v34, 1  ;;  %v4061_v43 = vrot.slane %v11275_v39, 7 }
 0x486   : > { %v3520_v17 = vpop.permute.xlu1 %3519 }
 0x487   : > { %v3166_v27 = vpop.permute.xlu0 %3165  ;;  %3652 = vst.msk [vmem:[#allocation2 + $0x1d8] sm:$0xff] %vm742_vm1, %v3520_v17  ;;  %v9338_v44 = vor.u32 %v4412_v28, %v10916_v3  ;;  %v4064_v34 = vor.u32 %v11277_v59, %v4061_v43  ;;  %v11282_v43 = vshll.u32 %v8893_v19, 16 }
 0x488   : > { %3759 = vrot.lane.b32.xlu1 %v8859_v53, %s6478_s0  ;;  %v9351_v3 = vmul.f32 %v11279_v41, %v3166_v27  ;;  %v11280_v53 = vld [vmem:[#allocation127_spill] sm:$0xff]  ;;  %v11283_v27 = vld [vmem:[#allocation41_spill] sm:$0xff] }
 0x489   : > { %4245 = vrot.lane.b32.xlu0 %v4057_v24, %s6478_s0  ;;  %11276 = vst [vmem:[#allocation57_spill] sm:$0xff] %v9338_v44  ;;  %v11278_v24 = vshrl.u32 %v8893_v19, 16  ;;  %v11284_v41 = vshrl.u32 %v11283_v27, 16 }
 0x48a   : > { %v3516_v18 = vpop.permute.xlu1 %3515 }
 0x48b   : > { %v3190_v4 = vpop.permute.xlu0 %3189  ;;  %3650 = vst.msk [vmem:[#allocation2 + $0x1c8] sm:$0xff] %vm742_vm1, %v3516_v18  ;;  %v4068_v28 = vrot.slane %v11278_v24, 7  ;;  %v4075_v24 = vrot.slane %v11284_v41, 7 }
 0x48c   : > { %4247 = vrot.lane.b32.xlu1 %v4064_v34, %s6478_s0 }
 0x48d   : > { %3765 = vrot.lane.b32.xlu0 %v8929_v26, %s6478_s0  ;;  %v4071_v18 = vor.u32 %v11282_v43, %v4068_v28 }
 0x48e   : > { %v3168_v17 = vpop.permute.xlu1 %3167 }
 0x48f   : > { %v3186_v39 = vpop.permute.xlu0 %3185  ;;  %v9354_v1 = vmul.f32 %v11280_v53, %v3168_v17 }
 0x490   : > { %3755 = vrot.lane.b32.xlu1 %v11281_v10, %s6478_s0  ;;  %v11286_v10 = vld [vmem:[#allocation129_spill] sm:$0xff] }
 0x491   : > { %3761 = vrot.lane.b32.xlu0 %v8950_v37, %s6478_s0  ;;  %v9362_v26 = vpack.c.bf16 %v9354_v1, %v9351_v3  ;;  %v11285_v37 = vld [vmem:[#allocation124_spill] sm:$0xff] }
 0x492   : > { %v3192_v59 = vpop.permute.xlu1 %3191  ;;  %v9371_v53 = vmul.f32 %v11285_v37, %v3190_v4  ;;  %v11287_v37 = vshll.u32 %v11283_v27, 16 }
 0x493   : > { %v3494_v34 = vpop.permute.xlu0 %3493  ;;  %v10917_v17 = vshll.u32 %v9362_v26, 16  ;;  %v9374_v44 = vmul.f32 %v11286_v10, %v3192_v59  ;;  %v10919_v41 = vshrl.u32 %v9362_v26, 16  ;;  %v11288_v10 = vld [vmem:[#allocation126_spill] sm:$0xff] }
 0x494   : > { %3639 = vst.msk [vmem:[#allocation2 + $0x170] sm:$0xff] %vm742_vm1, %v3494_v34  ;;  %3767 = vrot.lane.b32.xlu1 %v8932_v16, %s6478_s0  ;;  %v4078_v59 = vor.u32 %v11287_v37, %v4075_v24  ;;  %v9391_v16 = vmul.f32 %v11288_v10, %v3186_v39  ;;  %v11291_v37 = vshrl.u32 %v8967_v60, 16 }
 0x495   : > { %4249 = vrot.lane.b32.xlu0 %v4071_v18, %s6478_s0  ;;  %v9381_v28 = vpack.c.bf16 %v9374_v44, %v9371_v53  ;;  %v4406_v43 = vrot.slane %v10917_v17, 1 }
 0x496   : > { %v3188_v4 = vpop.permute.xlu1 %3187 }
 0x497   : > { %v3526_v34 = vpop.permute.xlu0 %3525  ;;  %v10918_v18 = vshll.u32 %v9381_v28, 16  ;;  %v9394_v9 = vmul.f32 %v11289_v36, %v3188_v4  ;;  %v9401_v17 = vor.u32 %v4406_v43, %v10919_v41  ;;  %v10920_v24 = vshrl.u32 %v9381_v28, 16 }
 0x498   : > { %3655 = vst.msk [vmem:[#allocation2 + $0x1f0] sm:$0xff] %vm742_vm1, %v3526_v34  ;;  %4251 = vrot.lane.b32.xlu1 %v4078_v59, %s6478_s0  ;;  %v4082_v36 = vrot.slane %v11291_v37, 7 }
 0x499   : > { %3773 = vrot.lane.b32.xlu0 %v9010_v12, %s6478_s0  ;;  %11290 = vst [vmem:[#allocation55_spill] sm:$0xff] %v9401_v17  ;;  %v9406_v34 = vpack.c.bf16 %v9394_v9, %v9391_v16  ;;  %v4418_v4 = vrot.slane %v10918_v18, 1  ;;  %v11293_v18 = vshll.u32 %v8967_v60, 16  ;;  %v11294_v17 = vshrl.u32 %v8943_v38, 16 }
 0x49a   : > { %v3496_v12 = vpop.permute.xlu1 %3495 }
 0x49b   : > { %v3522_v39 = vpop.permute.xlu0 %3521  ;;  %v10921_v59 = vshll.u32 %v9406_v34, 16  ;;  %3640 = vst.msk [vmem:[#allocation2 + $0x178] sm:$0xff] %vm742_vm1, %v3496_v12  ;;  %v9419_v43 = vor.u32 %v4418_v4, %v10920_v24  ;;  %v10922_v10 = vshrl.u32 %v9406_v34, 16 }
 0x49c   : > { %3653 = vst.msk [vmem:[#allocation2 + $0x1e0] sm:$0xff] %vm742_vm1, %v3522_v39  ;;  %3763 = vrot.lane.b32.xlu1 %v8953_v50, %s6478_s0  ;;  %v4085_v39 = vor.u32 %v11293_v18, %v4082_v36  ;;  %v11296_v36 = vshll.u32 %v8943_v38, 16 }
 0x49d   : > { %3769 = vrot.lane.b32.xlu0 %v9025_v40, %s6478_s0  ;;  %11292 = vst [vmem:[#allocation56_spill] sm:$0xff] %v9419_v43  ;;  %v4416_v41 = vrot.slane %v10921_v59, 1  ;;  %v4089_v40 = vrot.slane %v11294_v17, 7  ;;  %v11298_v59 = vld [vmem:[#allocation128_spill] sm:$0xff] }
 0x49e   : > { %v3528_v12 = vpop.permute.xlu1 %3527 }
 0x49f   : > { %v3170_v37 = vpop.permute.xlu0 %3169  ;;  %3656 = vst.msk [vmem:[#allocation2 + $0x1f8] sm:$0xff] %vm742_vm1, %v3528_v12  ;;  %v9434_v50 = vor.u32 %v4416_v41, %v10922_v10  ;;  %v4092_v24 = vor.u32 %v11296_v36, %v4089_v40  ;;  %v11297_v41 = vshrl.u32 %v9036_v11, 16  ;;  %v11299_v10 = vld [vmem:[#allocation133_spill] sm:$0xff]  ;;  %v11300_v40 = vshll.u32 %v9036_v11, 16  ;;  %v11302_v36 = vld [vmem:[#allocation130_spill] sm:$0xff] }
 0x4a0   : > { %3775 = vrot.lane.b32.xlu1 %v9013_v20, %s6478_s0  ;;  %v9447_v20 = vmul.f32 %v11298_v59, %v3170_v37 }
 0x4a1   : > { %4253 = vrot.lane.b32.xlu0 %v4085_v39, %s6478_s0  ;;  %11295 = vst [vmem:[#allocation59_spill] sm:$0xff] %v9434_v50  ;;  %v4096_v39 = vrot.slane %v11297_v41, 7  ;;  %v11306_v50 = vld [vmem:[#allocation132_spill] sm:$0xff] }
 0x4a2   : > { %v3524_v18 = vpop.permute.xlu1 %3523 }
 0x4a3   : > { %v3198_v4 = vpop.permute.xlu0 %3197  ;;  %3654 = vst.msk [vmem:[#allocation2 + $0x1e8] sm:$0xff] %vm742_vm1, %v3524_v18  ;;  %v4099_v18 = vor.u32 %v11300_v40, %v4096_v39  ;;  %v11304_v40 = vshrl.u32 %v9086_v47, 16 }
 0x4a4   : > { %4255 = vrot.lane.b32.xlu1 %v4092_v24, %s6478_s0  ;;  %v9468_v41 = vmul.f32 %v11302_v36, %v3198_v4 }
 0x4a5   : > { %3781 = vrot.lane.b32.xlu0 %v9055_v42, %s6478_s0 }
 0x4a6   : > { %v3172_v12 = vpop.permute.xlu1 %3171 }
 0x4a7   : > { %v3194_v17 = vpop.permute.xlu0 %3193  ;;  %v9450_v43 = vmul.f32 %v11299_v10, %v3172_v12  ;;  %v11301_v10 = vshrl.u32 %v9021_v51, 16 }
 0x4a8   : > { %3771 = vrot.lane.b32.xlu1 %v9028_v35, %s6478_s0  ;;  %v11303_v35 = vld [vmem:[#allocation27_spill] sm:$0xff]  ;;  %v9491_v15 = vmul.f32 %v11306_v50, %v3194_v17  ;;  %v11309_v17 = vshll.u32 %v9086_v47, 16 }
 0x4a9   : > { %3777 = vrot.lane.b32.xlu0 %v9074_v52, %s6478_s0  ;;  %v9458_v42 = vpack.c.bf16 %v9450_v43, %v9447_v20  ;;  %v4103_v37 = vrot.slane %v11301_v10, 7  ;;  %v4110_v10 = vrot.slane %v11304_v40, 7 }
 0x4aa   : > { %v3200_v59 = vpop.permute.xlu1 %3199 }
 0x4ab   : > { %v3726_v24 = vpop.permute.xlu0 %3725  ;;  %v10923_v52 = vshll.u32 %v9458_v42, 16  ;;  %v9471_v12 = vmul.f32 %v11303_v35, %v3200_v59  ;;  %v10925_v36 = vshrl.u32 %v9458_v42, 16  ;;  %v11305_v35 = vshll.u32 %v9021_v51, 16 }
 0x4ac   : > { %3915 = vst.msk [vmem:[%s6723_s22 + $0x10] sm:$0xff] %vm742_vm1, %v3726_v24  ;;  %3783 = vrot.lane.b32.xlu1 %v9058_v31, %s6478_s0 }
 0x4ad   : > { %4257 = vrot.lane.b32.xlu0 %v4099_v18, %s6478_s0  ;;  %v9478_v39 = vpack.c.bf16 %v9471_v12, %v9468_v41  ;;  %v4408_v4 = vrot.slane %v10923_v52, 1  ;;  %v4106_v18 = vor.u32 %v11305_v35, %v4103_v37  ;;  %v11310_v35 = vshrl.u32 %v9070_v57, 16 }
 0x4ae   : > { %v3196_v59 = vpop.permute.xlu1 %3195 }
 0x4af   : > { %v3722_v24 = vpop.permute.xlu0 %3721  ;;  %v10924_v31 = vshll.u32 %v9478_v39, 16  ;;  %v9494_v30 = vmul.f32 %v11307_v61, %v3196_v59  ;;  %v9501_v40 = vor.u32 %v4408_v4, %v10925_v36  ;;  %v10927_v37 = vshrl.u32 %v9478_v39, 16 }
 0x4b0   : > { %3913 = vst.msk [vmem:[%s6723_s22] sm:$0xff] %vm742_vm1, %v3722_v24  ;;  %4259 = vrot.lane.b32.xlu1 %v4106_v18, %s6478_s0  ;;  %v4113_v61 = vor.u32 %v11309_v17, %v4110_v10  ;;  %v4117_v18 = vrot.slane %v11310_v35, 7 }
 0x4b1   : > { %3785 = vrot.lane.b32.xlu0 %v9105_v33, %s6478_s0  ;;  %11308 = vst [vmem:[#allocation58_spill] sm:$0xff] %v9501_v40  ;;  %v9506_v24 = vpack.c.bf16 %v9494_v30, %v9491_v15  ;;  %v4422_v33 = vrot.slane %v10924_v31, 1  ;;  %v11312_v31 = vshrl.u32 %v9120_v54, 16 }
 0x4b2   : > { %v3728_v59 = vpop.permute.xlu1 %3727 }
 0x4b3   : > { %v3174_v50 = vpop.permute.xlu0 %3173  ;;  %v10926_v4 = vshll.u32 %v9506_v24, 16  ;;  %3916 = vst.msk [vmem:[%s6723_s22 + $0x18] sm:$0xff] %vm742_vm1, %v3728_v59  ;;  %v9520_v52 = vor.u32 %v4422_v33, %v10927_v37  ;;  %v10928_v10 = vshrl.u32 %v9506_v24, 16  ;;  %v4124_v36 = vrot.slane %v11312_v31, 7 }
 0x4b4   : > { %3779 = vrot.lane.b32.xlu1 %v9077_v49, %s6478_s0  ;;  %v11313_v59 = vshll.u32 %v9070_v57, 16  ;;  %v11315_v33 = vshll.u32 %v9120_v54, 16 }
 0x4b5   : > { %4261 = vrot.lane.b32.xlu0 %v4113_v61, %s6478_s0  ;;  %11311 = vst [vmem:[#allocation60_spill] sm:$0xff] %v9520_v52  ;;  %v4420_v35 = vrot.slane %v10926_v4, 1 }
 0x4b6   : > { %v3724_v40 = vpop.permute.xlu1 %3723  ;;  %v4120_v61 = vor.u32 %v11313_v59, %v4117_v18  ;;  %v4127_v4 = vor.u32 %v11315_v33, %v4124_v36  ;;  %v11317_v18 = vld [vmem:[#allocation25_spill] sm:$0xff] }
 0x4b7   : > { %v3206_v17 = vpop.permute.xlu0 %3205  ;;  %3914 = vst.msk [vmem:[%s6723_s22 + $0x8] sm:$0xff] %vm742_vm1, %v3724_v40  ;;  %v9537_v49 = vor.u32 %v4420_v35, %v10928_v10  ;;  %v9550_v35 = vmul.f32 %v11317_v18, %v3174_v50  ;;  %v11321_v18 = vld [vmem:[#allocation26_spill] sm:$0xff] }
 0x4b8   : > { %4263 = vrot.lane.b32.xlu1 %v4120_v61, %s6478_s0 }
 0x4b9   : > { %3789 = vrot.lane.b32.xlu0 %v9132_v0, %s6478_s0  ;;  %11314 = vst [vmem:[#allocation61_spill] sm:$0xff] %v9537_v49 }
 0x4ba   : > { %v9542_v37 = vpop.permute.xlu1 %4529 }
 0x4bb   : > { %v3202_v31 = vpop.permute.xlu0 %3201  ;;  %11316 = vst [vmem:[#allocation62_spill] sm:$0xff] %v9542_v37 }
 0x4bc   : > { %3787 = vrot.lane.b32.xlu1 %v9108_v63, %s6478_s0 }
 0x4bd   : > { %4265 = vrot.lane.b32.xlu0 %v4127_v4, %s6478_s0  ;;  %v11318_v4 = vshrl.u32 %v9179_v5, 16 }
 0x4be   : > { %v3176_v0 = vpop.permute.xlu1 %3175 }
 0x4bf   : > { %v9547_v40 = vpop.permute.xlu0 %4527  ;;  %v9553_v59 = vmul.f32 %v11227_v6, %v3176_v0  ;;  %v4138_v61 = vrot.slane %v11318_v4, 7  ;;  %v11319_v6 = vshrl.u32 %v9146_v21, 16  ;;  %v11320_v0 = vld [vmem:[#allocation109_spill] sm:$0xff] }
 0x4c0   : > { %3791 = vrot.lane.b32.xlu1 %v9135_v2, %s6478_s0 }
 0x4c1   : > { %3793 = vrot.lane.b32.xlu0 %v9165_v23, %s6478_s0  ;;  %v9561_v36 = vpack.c.bf16 %v9553_v59, %v9550_v35  ;;  %v4131_v33 = vrot.slane %v11319_v6, 7  ;;  %v9570_v23 = vmul.f32 %v11320_v0, %v3206_v17  ;;  %v11322_v6 = vshll.u32 %v9179_v5, 16 }
 0x4c2   : > { %v3208_v50 = vpop.permute.xlu1 %3207 }
 0x4c3   : > { %v3734_v63 = vpop.permute.xlu0 %3733  ;;  %v10931_v2 = vshll.u32 %v9561_v36, 16  ;;  %v9574_v10 = vmul.f32 %v11321_v18, %v3208_v50  ;;  %v4141_v17 = vor.u32 %v11322_v6, %v4138_v61  ;;  %v4171_v50 = vshrl.u32 %v9561_v36, 16 }
 0x4c4   : > { %3919 = vst.msk [vmem:[%s6723_s22 + $0x30] sm:$0xff] %vm742_vm1, %v3734_v63  ;;  %3795 = vrot.lane.b32.xlu1 %v9168_v8, %s6478_s0  ;;  %v11324_v8 = vld [vmem:[#allocation29_spill] sm:$0xff] }
 0x4c5   : > { %3797 = vrot.lane.b32.xlu0 %v9215_v13, %s6478_s0  ;;  %v9582_v63 = vpack.c.bf16 %v9574_v10, %v9570_v23  ;;  %v4410_v0 = vrot.slane %v10931_v2, 1  ;;  %v11323_v13 = vshll.u32 %v9146_v21, 16  ;;  %v9594_v49 = vmul.f32 %v11324_v8, %v3202_v31 }
 0x4c6   : > { %v3204_v18 = vpop.permute.xlu1 %3203 }
 0x4c7   : > { %v3730_v4 = vpop.permute.xlu0 %3729  ;;  %v4134_v52 = vor.u32 %v11323_v13, %v4131_v33  ;;  %v10929_v25 = vshll.u32 %v9582_v63, 16  ;;  %v9598_v37 = vmul.f32 %v11325_v56, %v3204_v18  ;;  %v9604_v61 = vor.u32 %v4410_v0, %v4171_v50 }
 0x4c8   : > { %3917 = vst.msk [vmem:[%s6723_s22 + $0x20] sm:$0xff] %vm742_vm1, %v3730_v4  ;;  %v10930_v56 = vshrl.u32 %v9582_v63, 16 }
 0x4c9   : > { %4269 = vrot.lane.b32.xlu0 %v4141_v17, %s6478_s0  ;;  %4267 = vrot.lane.b32.xlu1 %v4134_v52, %s6478_s0  ;;  %v9608_v33 = vpack.c.bf16 %v9598_v37, %v9594_v49  ;;  %v4426_v31 = vrot.slane %v10929_v25, 1 }
 0x4ca   : > { %v3736_v6 = vpop.permute.xlu1 %3735 }
 0x4cb   : > { %v9610_v4 = vpop.permute.xlu0 %4233  ;;  %v4223_v17 = vshll.u32 %v9608_v33, 16  ;;  %3920 = vst.msk [vmem:[%s6723_s22 + $0x38] sm:$0xff] %vm742_vm1, %v3736_v6  ;;  %v9624_v52 = vor.u32 %v4426_v31, %v10930_v56  ;;  %v4220_v0 = vshrl.u32 %v9608_v33, 16  ;;  %v11326_v6 = vshrl.u32 %v9225_v14, 16 }
 0x4cd   : > { %3801 = vrot.lane.b32.xlu0 %v9259_v62, %s6478_s0  ;;  %3799 = vrot.lane.b32.xlu1 %v9218_v46, %s6478_s0  ;;  %v4424_v13 = vrot.slane %v4223_v17, 1  ;;  %v4145_v25 = vrot.slane %v11326_v6, 7 }
 0x4ce   : > { %v9631_v8 = vpop.permute.xlu1 %4235 }
 0x4cf   : > { %v9627_v18 = vpop.permute.xlu0 %4531  ;;  %v9637_v46 = vor.u32 %v4424_v13, %v4220_v0 }
 0x4d1   : > { %3821 = vrot.lane.b32.xlu0 %v9276_v7, %s6478_s0  ;;  %3803 = vrot.lane.b32.xlu1 %v9262_v48, %s6478_s0  ;;  %v11327_v48 = vshll.u32 %v9225_v14, 16 }
 0x4d2   : > { %v3732_v31 = vpop.permute.xlu1 %3731 }
 0x4d3   : > { %v3742_v62 = vpop.permute.xlu0 %3741  ;;  %3918 = vst.msk [vmem:[%s6723_s22 + $0x28] sm:$0xff] %vm742_vm1, %v3732_v31  ;;  %v4148_v56 = vor.u32 %v11327_v48, %v4145_v25 }
 0x4d4   : > { %3923 = vst.msk [vmem:[%s6723_s22 + $0x50] sm:$0xff] %vm742_vm1, %v3742_v62 }
 0x4d5   : > { %3817 = vrot.lane.b32.xlu0 %v9294_v32, %s6478_s0  ;;  %3823 = vrot.lane.b32.xlu1 %v9279_v55, %s6478_s0  ;;  %v11328_v55 = vshrl.u32 %v9269_v29, 16 }
 0x4d6   : > { %v9651_v13 = vpop.permute.xlu1 %4533 }
 0x4d7   : > { %v3738_v7 = vpop.permute.xlu0 %3737 }
 0x4d8   : > { %3921 = vst.msk [vmem:[%s6723_s22 + $0x40] sm:$0xff] %vm742_vm1, %v3738_v7 }
 0x4d9   : > { %3805 = vrot.lane.b32.xlu0 %v9351_v3, %s6478_s0  ;;  %4271 = vrot.lane.b32.xlu1 %v4148_v56, %s6478_s0  ;;  %v4152_v3 = vrot.slane %v11328_v55, 7 }
 0x4da   : > { %v3744_v32 = vpop.permute.xlu1 %3743 }
 0x4db   : > { %v9660_v62 = vpop.permute.xlu0 %4237  ;;  %3924 = vst.msk [vmem:[%s6723_s22 + $0x58] sm:$0xff] %vm742_vm1, %v3744_v32  ;;  %v11331_v32 = vshrl.u32 %v9286_v58, 16 }
 0x4dd   : > { %3829 = vrot.lane.b32.xlu0 %v9371_v53, %s6478_s0  ;;  %3819 = vrot.lane.b32.xlu1 %v9297_v22, %s6478_s0  ;;  %v11329_v53 = vshll.u32 %v9269_v29, 16  ;;  %v11330_v22 = vshrl.u32 %v9310_v45, 16  ;;  %v4187_v55 = vrot.slane %v11331_v32, 7 }
 0x4de   : > { %v9672_v31 = vpop.permute.xlu1 %4239 }
 0x4df   : > { %v9668_v25 = vpop.permute.xlu0 %4535  ;;  %v4155_v6 = vor.u32 %v11329_v53, %v4152_v3  ;;  %v4180_v7 = vrot.slane %v11330_v22, 7  ;;  %v11333_v22 = vshll.u32 %v9286_v58, 16 }
 0x4e1   : > { %3825 = vrot.lane.b32.xlu0 %v9391_v16, %s6478_s0  ;;  %3807 = vrot.lane.b32.xlu1 %v9354_v1, %s6478_s0  ;;  %v11332_v16 = vshll.u32 %v9310_v45, 16  ;;  %v4190_v2 = vor.u32 %v11333_v22, %v4187_v55 }
 0x4e2   : > { %v3740_v48 = vpop.permute.xlu1 %3739 }
 0x4e3   : > { %v3750_v56 = vpop.permute.xlu0 %3749  ;;  %3922 = vst.msk [vmem:[%s6723_s22 + $0x48] sm:$0xff] %vm742_vm1, %v3740_v48  ;;  %v4183_v3 = vor.u32 %v11332_v16, %v4180_v7  ;;  %v11334_v48 = vshrl.u32 %v9406_v34, 16 }
 0x4e4   : > { %3927 = vst.msk [vmem:[%s6723_s22 + $0x70] sm:$0xff] %vm742_vm1, %v3750_v56 }
 0x4e5   : > { %4273 = vrot.lane.b32.xlu0 %v4155_v6, %s6478_s0  ;;  %3831 = vrot.lane.b32.xlu1 %v9374_v44, %s6478_s0  ;;  %v4194_v32 = vrot.slane %v11334_v48, 7  ;;  %v11339_v48 = vshll.u32 %v9381_v28, 16 }
 0x4e6   : > { %v9693_v53 = vpop.permute.xlu1 %4537 }
 0x4e7   : > { %v3746_v1 = vpop.permute.xlu0 %3745 }
 0x4e8   : > { %3925 = vst.msk [vmem:[%s6723_s22 + $0x60] sm:$0xff] %vm742_vm1, %v3746_v1 }
 0x4e9   : > { %4281 = vrot.lane.b32.xlu0 %v4183_v3, %s6478_s0  ;;  %4283 = vrot.lane.b32.xlu1 %v4190_v2, %s6478_s0  ;;  %v11337_v3 = vshll.u32 %v9362_v26, 16 }
 0x4ea   : > { %v3752_v44 = vpop.permute.xlu1 %3751 }
 0x4eb   : > { %v9701_v56 = vpop.permute.xlu0 %4241  ;;  %3928 = vst.msk [vmem:[%s6723_s22 + $0x78] sm:$0xff] %vm742_vm1, %v3752_v44  ;;  %v11338_v44 = vshrl.u32 %v9381_v28, 16 }
 0x4ed   : > { %3809 = vrot.lane.b32.xlu0 %v9447_v20, %s6478_s0  ;;  %3827 = vrot.lane.b32.xlu1 %v9394_v9, %s6478_s0  ;;  %v11335_v9 = vshrl.u32 %v9362_v26, 16 }
 0x4ee   : > { %v9711_v7 = vpop.permute.xlu1 %4243 }
 0x4ef   : > { %v9709_v6 = vpop.permute.xlu0 %4539  ;;  %v4159_v20 = vrot.slane %v11335_v9, 7 }
 0x4f1   : > { %3837 = vrot.lane.b32.xlu0 %v9468_v41, %s6478_s0  ;;  %3811 = vrot.lane.b32.xlu1 %v9450_v43, %s6478_s0  ;;  %v11336_v41 = vshll.u32 %v9406_v34, 16  ;;  %v4162_v22 = vor.u32 %v11337_v3, %v4159_v20  ;;  %v11342_v3 = vshrl.u32 %v9506_v24, 16 }
 0x4f2   : > { %v3748_v55 = vpop.permute.xlu1 %3747 }
 0x4f3   : > { %v3758_v2 = vpop.permute.xlu0 %3757  ;;  %3926 = vst.msk [vmem:[%s6723_s22 + $0x68] sm:$0xff] %vm742_vm1, %v3748_v55  ;;  %v4197_v1 = vor.u32 %v11336_v41, %v4194_v32 }
 0x4f4   : > { %3931 = vst.msk [vmem:[%s6723_s22 + $0x90] sm:$0xff] %vm742_vm1, %v3758_v2  ;;  %v4201_v2 = vrot.slane %v11338_v44, 7 }
 0x4f5   : > { %3833 = vrot.lane.b32.xlu0 %v9491_v15, %s6478_s0  ;;  %3839 = vrot.lane.b32.xlu1 %v9471_v12, %s6478_s0 }
 0x4f6   : > { %v9731_v16 = vpop.permute.xlu1 %4541  ;;  %v4204_v32 = vor.u32 %v11339_v48, %v4201_v2  ;;  %v11343_v2 = vshrl.u32 %v9478_v39, 16 }
 0x4f7   : > { %v3754_v43 = vpop.permute.xlu0 %3753 }
 0x4f8   : > { %3929 = vst.msk [vmem:[%s6723_s22 + $0x80] sm:$0xff] %vm742_vm1, %v3754_v43  ;;  %v11340_v43 = vshrl.u32 %v9458_v42, 16 }
 0x4f9   : > { %4285 = vrot.lane.b32.xlu0 %v4197_v1, %s6478_s0  ;;  %4275 = vrot.lane.b32.xlu1 %v4162_v22, %s6478_s0  ;;  %v4208_v22 = vrot.slane %v11342_v3, 7  ;;  %v11346_v3 = vshll.u32 %v9561_v36, 16 }
 0x4fa   : > { %v3760_v12 = vpop.permute.xlu1 %3759  ;;  %v4166_v41 = vrot.slane %v11340_v43, 7 }
 0x4fb   : > { %v9741_v15 = vpop.permute.xlu0 %4245  ;;  %3932 = vst.msk [vmem:[%s6723_s22 + $0x98] sm:$0xff] %vm742_vm1, %v3760_v12  ;;  %v4215_v12 = vrot.slane %v11343_v2, 7  ;;  %v11348_v2 = vshll.u32 %v9582_v63, 16 }
 0x4fd   : > { %3813 = vrot.lane.b32.xlu0 %v9550_v35, %s6478_s0  ;;  %4287 = vrot.lane.b32.xlu1 %v4204_v32, %s6478_s0 }
 0x4fe   : > { %v9750_v9 = vpop.permute.xlu1 %4247 }
 0x4ff   : > { %v3766_v55 = vpop.permute.xlu0 %3765 }
 0x500   : > { %3935 = vst.msk [vmem:[%s6723_s22 + $0xb0] sm:$0xff] %vm742_vm1, %v3766_v55  ;;  %v11345_v55 = vshll.u32 %v9478_v39, 16 }
 0x501   : > { %3845 = vrot.lane.b32.xlu0 %v9570_v23, %s6478_s0  ;;  %3835 = vrot.lane.b32.xlu1 %v9494_v30, %s6478_s0  ;;  %v11341_v30 = vshll.u32 %v9458_v42, 16 }
 0x502   : > { %v3756_v1 = vpop.permute.xlu1 %3755 }
 0x503   : > { %v3762_v20 = vpop.permute.xlu0 %3761  ;;  %3930 = vst.msk [vmem:[%s6723_s22 + $0x88] sm:$0xff] %vm742_vm1, %v3756_v1  ;;  %v4169_v23 = vor.u32 %v11341_v30, %v4166_v41 }
 0x504   : > { %3933 = vst.msk [vmem:[%s6723_s22 + $0xa0] sm:$0xff] %vm742_vm1, %v3762_v20  ;;  %v4218_v20 = vor.u32 %v11345_v55, %v4215_v12 }
 0x505   : > { %3841 = vrot.lane.b32.xlu0 %v9594_v49, %s6478_s0  ;;  %3815 = vrot.lane.b32.xlu1 %v9553_v59, %s6478_s0  ;;  %v11344_v59 = vshll.u32 %v9506_v24, 16 }
 0x506   : > { %v3768_v44 = vpop.permute.xlu1 %3767 }
 0x507   : > { %v9768_v35 = vpop.permute.xlu0 %4249  ;;  %3936 = vst.msk [vmem:[%s6723_s22 + $0xb8] sm:$0xff] %vm742_vm1, %v3768_v44  ;;  %v4211_v48 = vor.u32 %v11344_v59, %v4208_v22  ;;  %v11347_v22 = vshrl.u32 %v9582_v63, 16 }
 0x509   : > { %4277 = vrot.lane.b32.xlu0 %v4169_v23, %s6478_s0  ;;  %3847 = vrot.lane.b32.xlu1 %v9574_v10, %s6478_s0  ;;  %v4222_v10 = vrot.slane %v4220_v0, 7  ;;  %v4173_v0 = vrot.slane %v4171_v50, 7  ;;  %v4229_v44 = vrot.slane %v11347_v22, 7  ;;  %v11356_v22 = vld [vmem:[#allocation34_spill] sm:$0xff] }
 0x50a   : > { %v9783_v32 = vpop.permute.xlu1 %4251 }
 0x50b   : > { %v3774_v49 = vpop.permute.xlu0 %3773  ;;  %v4225_v30 = vor.u32 %v4223_v17, %v4222_v10  ;;  %v4176_v17 = vor.u32 %v11346_v3, %v4173_v0  ;;  %v4232_v12 = vor.u32 %v11348_v2, %v4229_v44  ;;  %v4336_v10 = vsel %vm9892_vm4, 0, %v9701_v56 }
 0x50c   : > { %3939 = vst.msk [vmem:[%s6723_s22 + $0xd0] sm:$0xff] %vm742_vm1, %v3774_v49  ;;  %v4605_v56 = vsel %vm742_vm1, %v4336_v10, %v9668_v25  ;;  %v4338_v3 = vsel %vm9892_vm4, 0, %v9741_v15  ;;  %v4467_v44 = vsel %vm9916_vm7, %v11356_v22, 0 }
 0x50d   : > { %4289 = vrot.lane.b32.xlu0 %v4211_v48, %s6478_s0  ;;  %4291 = vrot.lane.b32.xlu1 %v4218_v20, %s6478_s0 }
 0x50e   : > { %v3764_v41 = vpop.permute.xlu1 %3763 }
 0x50f   : > { %v3770_v43 = vpop.permute.xlu0 %3769  ;;  %3934 = vst.msk [vmem:[%s6723_s22 + $0xa8] sm:$0xff] %vm742_vm1, %v3764_v41  ;;  %v4333_v41 = vsel %vm9892_vm4, 0, %v9631_v8 }
 0x510   : > { %3937 = vst.msk [vmem:[%s6723_s22 + $0xc0] sm:$0xff] %vm742_vm1, %v3770_v43  ;;  %v11353_v43 = vld [vmem:[#allocation112_spill] sm:$0xff] }
 0x511   : > { %4543 = vrot.lane.b32.xlu0 %v8893_v19, %s6477_s4  ;;  %3843 = vrot.lane.b32.xlu1 %v9598_v37, %s6478_s0 }
 0x512   : > { %v3776_v23 = vpop.permute.xlu1 %3775 }
 0x513   : > { %v9801_v1 = vpop.permute.xlu0 %4253  ;;  %3940 = vst.msk [vmem:[%s6723_s22 + $0xd8] sm:$0xff] %vm742_vm1, %v3776_v23  ;;  %v11354_v23 = vld [vmem:[#allocation33_spill] sm:$0xff] }
 0x515   : > { %4293 = vrot.lane.b32.xlu0 %v4225_v30, %s6478_s0  ;;  %4545 = vrot.lane.b32.xlu1 %v11283_v27, %s6477_s4 }
 0x516   : > { %v9812_v37 = vpop.permute.xlu1 %4255 }
 0x517   : > { %v3782_v19 = vpop.permute.xlu0 %3781 }
 0x518   : > { %3943 = vst.msk [vmem:[%s6723_s22 + $0xf0] sm:$0xff] %vm742_vm1, %v3782_v19 }
 0x519   : > { %4547 = vrot.lane.b32.xlu0 %v8967_v60, %s6477_s4  ;;  %4279 = vrot.lane.b32.xlu1 %v4176_v17, %s6478_s0  ;;  %v4335_v17 = vsel %vm9892_vm4, 0, %v9672_v31  ;;  %v4611_v31 = vsel %vm742_vm1, %v4338_v3, %v9709_v6 }
 0x51a   : > { %v3772_v27 = vpop.permute.xlu1 %3771 }
 0x51b   : > { %v3778_v50 = vpop.permute.xlu0 %3777  ;;  %3938 = vst.msk [vmem:[%s6723_s22 + $0xc8] sm:$0xff] %vm742_vm1, %v3772_v27  ;;  %v11357_v27 = vld [vmem:[#allocation30_spill] sm:$0xff] }
 0x51c   : > { %3941 = vst.msk [vmem:[%s6723_s22 + $0xe0] sm:$0xff] %vm742_vm1, %v3778_v50  ;;  %v4464_v15 = vsel %vm9916_vm7, %v11357_v27, 0 }
 0x51d   : > { %4551 = vrot.lane.b32.xlu0 %v9036_v11, %s6477_s4  ;;  %4295 = vrot.lane.b32.xlu1 %v4232_v12, %s6478_s0  ;;  %v4602_v12 = vsel %vm742_vm1, %v4335_v17, %v9651_v13 }
 0x51e   : > { %v3784_v60 = vpop.permute.xlu1 %3783 }
 0x51f   : > { %v9832_v49 = vpop.permute.xlu0 %4257  ;;  %3944 = vst.msk [vmem:[%s6723_s22 + $0xf8] sm:$0xff] %vm742_vm1, %v3784_v60  ;;  %v4337_v60 = vsel %vm9892_vm4, 0, %v9711_v7 }
 0x521   : > { %4555 = vrot.lane.b32.xlu0 %v9086_v47, %s6477_s4  ;;  %4549 = vrot.lane.b32.xlu1 %v8943_v38, %s6477_s4 }
 0x522   : > { %v9840_v48 = vpop.permute.xlu1 %4259 }
 0x523   : > { %v3786_v59 = vpop.permute.xlu0 %3785 }
 0x524   : > { %3945 = vst.msk [vmem:[%s6723_s22 + $0x100] sm:$0xff] %vm742_vm1, %v3786_v59 }
 0x525   : > { %4559 = vrot.lane.b32.xlu0 %v9120_v54, %s6477_s4  ;;  %4553 = vrot.lane.b32.xlu1 %v9021_v51, %s6477_s4 }
 0x526   : > { %v3780_v55 = vpop.permute.xlu1 %3779 }
 0x527   : > { %v9848_v11 = vpop.permute.xlu0 %4261  ;;  %3942 = vst.msk [vmem:[%s6723_s22 + $0xe8] sm:$0xff] %vm742_vm1, %v3780_v55  ;;  %v11358_v55 = vld [vmem:[#allocation36_spill] sm:$0xff] }
 0x528   : > { %v4469_v6 = vsel %vm9916_vm7, %v11358_v55, 0 }
 0x529   : > { %4563 = vrot.lane.b32.xlu0 %v9179_v5, %s6477_s4  ;;  %4557 = vrot.lane.b32.xlu1 %v9070_v57, %s6477_s4  ;;  %v10002_v13 = vsel %vm4687_vm8, %v4611_v31, %v4469_v6  ;;  %v11362_v6 = vld [vmem:[#allocation40_spill] sm:$0xff] }
 0x52a   : > { %v9856_v47 = vpop.permute.xlu1 %4263 }
 0x52b   : > { %v3790_v38 = vpop.permute.xlu0 %3789 }
 0x52c   : > { %3947 = vst.msk [vmem:[%s6723_s22 + $0x110] sm:$0xff] %vm742_vm1, %v3790_v38 }
 0x52d   : > { %4567 = vrot.lane.b32.xlu0 %v9269_v29, %s6477_s4  ;;  %4561 = vrot.lane.b32.xlu1 %v9146_v21, %s6477_s4 }
 0x52e   : > { %v3788_v54 = vpop.permute.xlu1 %3787 }
 0x52f   : > { %v9864_v51 = vpop.permute.xlu0 %4265  ;;  %3946 = vst.msk [vmem:[%s6723_s22 + $0x108] sm:$0xff] %vm742_vm1, %v3788_v54  ;;  %v11359_v54 = vld [vmem:[#allocation28_spill] sm:$0xff] }
 0x531   : > { %4571 = vrot.lane.b32.xlu0 %v9458_v42, %s6477_s4  ;;  %4565 = vrot.lane.b32.xlu1 %v9225_v14, %s6477_s4 }
 0x532   : > { %v3792_v5 = vpop.permute.xlu1 %3791 }
 0x533   : > { %v3794_v57 = vpop.permute.xlu0 %3793  ;;  %3948 = vst.msk [vmem:[%s6723_s22 + $0x118] sm:$0xff] %vm742_vm1, %v3792_v5  ;;  %v4608_v5 = vsel %vm742_vm1, %v4337_v60, %v9693_v53 }
 0x534   : > { %3949 = vst.msk [vmem:[%s6723_s22 + $0x120] sm:$0xff] %vm742_vm1, %v3794_v57  ;;  %v4466_v57 = vsel %vm9916_vm7, %v11359_v54, 0 }
 0x535   : > { %4575 = vrot.lane.b32.xlu0 %v9310_v45, %s6477_s4  ;;  %4569 = vrot.lane.b32.xlu1 %v9362_v26, %s6477_s4  ;;  %v10007_v7 = vsel %vm4687_vm8, %v4602_v12, %v4466_v57  ;;  %v4340_v12 = vsel %vm9892_vm4, 0, %v9768_v35  ;;  %v4341_v35 = vsel %vm9892_vm4, 0, %v9783_v32  ;;  %v4494_v26 = vsel %vm9916_vm7, %v9624_v52, 0 }
 0x536   : > { %v3796_v29 = vpop.permute.xlu1 %3795  ;;  %v11383_v52 = vmov 0  }
 0x537   : > { %v3798_v21 = vpop.permute.xlu0 %3797  ;;  %3950 = vst.msk [vmem:[%s6723_s22 + $0x128] sm:$0xff] %vm742_vm1, %v3796_v29 }
 0x538   : > { %3951 = vst.msk [vmem:[%s6723_s22 + $0x130] sm:$0xff] %vm742_vm1, %v3798_v21  ;;  %v4339_v21 = vsel %vm9892_vm4, 0, %v9750_v9 }
 0x539   : > { %4579 = vrot.lane.b32.xlu0 %v9406_v34, %s6477_s4  ;;  %4573 = vrot.lane.b32.xlu1 %v9561_v36, %s6477_s4  ;;  %v4332_v34 = vsel %vm9892_vm4, 0, %v9610_v4 }
 0x53a   : > { %v4593_v20 = vsel %vm742_vm1, %v4332_v34, %v9547_v40  ;;  %v4463_v40 = vsel %vm9916_vm7, %v11353_v43, 0 }
 0x53b   : > { %v9888_v45 = vpop.permute.xlu0 %4269  ;;  %v9890_v14 = vpop.permute.xlu1 %4267 }
 0x53d   : > { %4583 = vrot.lane.b32.xlu0 %v9506_v24, %s6477_s4  ;;  %4577 = vrot.lane.b32.xlu1 %v9286_v58, %s6477_s4  ;;  %v4334_v58 = vsel %vm9892_vm4, 0, %v9660_v62  ;;  %v9926_v62 = vsel %vm4687_vm8, %v4593_v20, %v4463_v40  ;;  %v4614_v20 = vsel %vm742_vm1, %v4339_v21, %v9731_v16 }
 0x53f   : > { %v3802_v42 = vpop.permute.xlu0 %3801  ;;  %v3800_v36 = vpop.permute.xlu1 %3799 }
 0x540   : > { %3953 = vst.msk [vmem:[%s6723_s22 + $0x140] sm:$0xff] %vm742_vm1, %v3802_v42  ;;  %3952 = vst.msk [vmem:[%s6723_s22 + $0x138] sm:$0xff] %vm742_vm1, %v3800_v36  ;;  %v11360_v42 = vld [vmem:[#allocation31_spill] sm:$0xff] }
 0x541   : > { %4587 = vrot.lane.b32.xlu0 %v9608_v33, %s6477_s4  ;;  %4581 = vrot.lane.b32.xlu1 %v9381_v28, %s6477_s4  ;;  %v4599_v28 = vsel %vm742_vm1, %v4334_v58, %v9627_v18  ;;  %v4465_v18 = vsel %vm9916_vm7, %v11354_v23, 0  ;;  %v4468_v36 = vsel %vm9916_vm7, %v11360_v42, 0 }
 0x542   : > { %v9948_v19 = vsel %vm4687_vm8, %v4599_v28, %v4465_v18  ;;  %v10026_v53 = vsel %vm4687_vm8, %v4608_v5, %v4468_v36  ;;  %v4342_v36 = vsel %vm9892_vm4, 0, %v9801_v1  ;;  %v4344_v1 = vsel %vm9892_vm4, 0, %v9832_v49 }
 0x543   : > { %v3822_v4 = vpop.permute.xlu0 %3821  ;;  %v3804_v33 = vpop.permute.xlu1 %3803 }
 0x544   : > { %3963 = vst.msk [vmem:[%s6723_s22 + $0x190] sm:$0xff] %vm742_vm1, %v3822_v4  ;;  %3954 = vst.msk [vmem:[%s6723_s22 + $0x148] sm:$0xff] %vm742_vm1, %v3804_v33  ;;  %v11361_v4 = vld [vmem:[#allocation38_spill] sm:$0xff] }
 0x545   : > { %4784 = vrot.lane.b32.xlu0 %v9926_v62, %s6477_s4  ;;  %4585 = vrot.lane.b32.xlu1 %v9478_v39, %s6477_s4  ;;  %v11355_v39 = vld [vmem:[#allocation62_spill] sm:$0xff]  ;;  %v4470_v43 = vsel %vm9916_vm7, %v11361_v4, 0  ;;  %v11364_v4 = vld [vmem:[#allocation43_spill] sm:$0xff] }
 0x546   : > { %v4596_v8 = vsel %vm742_vm1, %v4333_v41, %v11355_v39  ;;  %v10040_v40 = vsel %vm4687_vm8, %v4614_v20, %v4470_v43  ;;  %v4473_v43 = vsel %vm9916_vm7, %v11364_v4, 0 }
 0x547   : > { %v3818_v30 = vpop.permute.xlu0 %3817  ;;  %v3824_v0 = vpop.permute.xlu1 %3823  ;;  %v9982_v2 = vsel %vm4687_vm8, %v4596_v8, %v4464_v15 }
 0x548   : > { %3961 = vst.msk [vmem:[%s6723_s22 + $0x180] sm:$0xff] %vm742_vm1, %v3818_v30  ;;  %3964 = vst.msk [vmem:[%s6723_s22 + $0x198] sm:$0xff] %vm742_vm1, %v3824_v0 }
 0x549   : > { %4788 = vrot.lane.b32.xlu0 %v9948_v19, %s6477_s4  ;;  %4589 = vrot.lane.b32.xlu1 %v9582_v63, %s6477_s4  ;;  %v9977_v63 = vsel %vm4687_vm8, %v4605_v56, %v4467_v44 }
 0x54b   : > { %v3806_v25 = vpop.permute.xlu0 %3805  ;;  %v9969_v50 = vpop.permute.xlu1 %4271 }
 0x54c   : > { %3955 = vst.msk [vmem:[%s6723_s22 + $0x150] sm:$0xff] %vm742_vm1, %v3806_v25 }
 0x54d   : > { %4792 = vrot.lane.b32.xlu0 %v9977_v63, %s6477_s4  ;;  %4786 = vrot.lane.b32.xlu1 %v9982_v2, %s6477_s4 }
 0x54f   : > { %v3830_v59 = vpop.permute.xlu0 %3829  ;;  %v3820_v38 = vpop.permute.xlu1 %3819 }
 0x550   : > { %3967 = vst.msk [vmem:[%s6723_s22 + $0x1b0] sm:$0xff] %vm742_vm1, %v3830_v59  ;;  %3962 = vst.msk [vmem:[%s6723_s22 + $0x188] sm:$0xff] %vm742_vm1, %v3820_v38  ;;  %v4471_v38 = vsel %vm9916_vm7, %v11362_v6, 0 }
 0x551   : > { %4796 = vrot.lane.b32.xlu0 %v10002_v13, %s6477_s4  ;;  %4790 = vrot.lane.b32.xlu1 %v10007_v7, %s6477_s4 }
 0x553   : > { %v3826_v29 = vpop.permute.xlu0 %3825  ;;  %v3808_v34 = vpop.permute.xlu1 %3807 }
 0x554   : > { %3965 = vst.msk [vmem:[%s6723_s22 + $0x1a0] sm:$0xff] %vm742_vm1, %v3826_v29  ;;  %3956 = vst.msk [vmem:[%s6723_s22 + $0x158] sm:$0xff] %vm742_vm1, %v3808_v34  ;;  %v11363_v29 = vld [vmem:[#allocation42_spill] sm:$0xff] }
 0x555   : > { %4794 = vrot.lane.b32.xlu1 %v10026_v53, %s6477_s4  ;;  %v4472_v34 = vsel %vm9916_vm7, %v11363_v29, 0  ;;  %v11368_v29 = vld [vmem:[#allocation50_spill] sm:$0xff] }
 0x557   : > { %v10032_v9 = vpop.permute.xlu0 %4273  ;;  %v3832_v58 = vpop.permute.xlu1 %3831 }
 0x558   : > { %3968 = vst.msk [vmem:[%s6723_s22 + $0x1b8] sm:$0xff] %vm742_vm1, %v3832_v58 }
 0x559   : > { %4798 = vrot.lane.b32.xlu1 %v10040_v40, %s6477_s4 }
 0x55b   : > { %v10044_v16 = vpop.permute.xlu0 %4281  ;;  %v10046_v33 = vpop.permute.xlu1 %4283 }
 0x55f   : > { %v3810_v28 = vpop.permute.xlu0 %3809  ;;  %v3828_v10 = vpop.permute.xlu1 %3827 }
 0x560   : > { %3957 = vst.msk [vmem:[%s6723_s22 + $0x160] sm:$0xff] %vm742_vm1, %v3810_v28  ;;  %3966 = vst.msk [vmem:[%s6723_s22 + $0x1a8] sm:$0xff] %vm742_vm1, %v3828_v10 }
 0x563   : > { %v3838_v41 = vpop.permute.xlu0 %3837  ;;  %v3812_v30 = vpop.permute.xlu1 %3811 }
 0x564   : > { %3971 = vst.msk [vmem:[%s6723_s22 + $0x1d0] sm:$0xff] %vm742_vm1, %v3838_v41  ;;  %3958 = vst.msk [vmem:[%s6723_s22 + $0x168] sm:$0xff] %vm742_vm1, %v3812_v30 }
 0x567   : > { %v3834_v23 = vpop.permute.xlu0 %3833  ;;  %v3840_v18 = vpop.permute.xlu1 %3839 }
 0x568   : > { %3969 = vst.msk [vmem:[%s6723_s22 + $0x1c0] sm:$0xff] %vm742_vm1, %v3834_v23  ;;  %3972 = vst.msk [vmem:[%s6723_s22 + $0x1d8] sm:$0xff] %vm742_vm1, %v3840_v18  ;;  %v11365_v23 = vld [vmem:[#allocation44_spill] sm:$0xff] }
 0x569   : > { %v4475_v18 = vsel %vm9916_vm7, %v11365_v23, 0  ;;  %v11370_v23 = vld [vmem:[#allocation53_spill] sm:$0xff] }
 0x56b   : > { %v10060_v0 = vpop.permute.xlu0 %4285  ;;  %v10062_v56 = vpop.permute.xlu1 %4275 }
 0x56f   : > { %v3814_v39 = vpop.permute.xlu0 %3813  ;;  %v10064_v8 = vpop.permute.xlu1 %4287 }
 0x570   : > { %3959 = vst.msk [vmem:[%s6723_s22 + $0x170] sm:$0xff] %vm742_vm1, %v3814_v39 }
 0x573   : > { %v3846_v3 = vpop.permute.xlu0 %3845  ;;  %v3836_v17 = vpop.permute.xlu1 %3835 }
 0x574   : > { %3975 = vst.msk [vmem:[%s6723_s22 + $0x1f0] sm:$0xff] %vm742_vm1, %v3846_v3  ;;  %3970 = vst.msk [vmem:[%s6723_s22 + $0x1c8] sm:$0xff] %vm742_vm1, %v3836_v17  ;;  %v4346_v3 = vsel %vm9892_vm4, 0, %v9848_v11  ;;  %v4343_v17 = vsel %vm9892_vm4, 0, %v9812_v37  ;;  %v4348_v37 = vsel %vm9892_vm4, 0, %v9864_v51 }
 0x577   : > { %v3842_v25 = vpop.permute.xlu0 %3841  ;;  %v3816_v22 = vpop.permute.xlu1 %3815 }
 0x578   : > { %3973 = vst.msk [vmem:[%s6723_s22 + $0x1e0] sm:$0xff] %vm742_vm1, %v3842_v25  ;;  %3960 = vst.msk [vmem:[%s6723_s22 + $0x178] sm:$0xff] %vm742_vm1, %v3816_v22 }
 0x57b   : > { %v10076_v44 = vpop.permute.xlu0 %4277  ;;  %v3848_v27 = vpop.permute.xlu1 %3847 }
 0x57c   : > { %3976 = vst.msk [vmem:[%s6723_s22 + $0x1f8] sm:$0xff] %vm742_vm1, %v3848_v27  ;;  %v11366_v27 = vld [vmem:[#allocation47_spill] sm:$0xff] }
 0x57f   : > { %v10080_v15 = vpop.permute.xlu0 %4289  ;;  %v10082_v31 = vpop.permute.xlu1 %4291 }
 0x583   : > { %v4544_v60 = vpop.permute.xlu0 %4543  ;;  %v3844_v59 = vpop.permute.xlu1 %3843 }
 0x584   : > { %v4617_v55 = vsel %vm742_vm1, %v4340_v12, %v4544_v60  ;;  %3974 = vst.msk [vmem:[%s6723_s22 + $0x1e8] sm:$0xff] %vm742_vm1, %v3844_v59  ;;  %v4477_v12 = vsel %vm9916_vm7, %v11366_v27, 0  ;;  %v11367_v59 = vld [vmem:[#allocation45_spill] sm:$0xff] }
 0x585   : > { %v10094_v54 = vsel %vm4687_vm8, %v4617_v55, %v4471_v38  ;;  %v4474_v55 = vsel %vm9916_vm7, %v11367_v59, 0  ;;  %v11372_v59 = vld [vmem:[#allocation48_spill] sm:$0xff] }
 0x586   : > { %4800 = vrot.lane.b32.xlu0 %v10094_v54, %s6477_s4 }
 0x587   : > { %v10098_v57 = vpop.permute.xlu0 %4293  ;;  %v4546_v5 = vpop.permute.xlu1 %4545 }
 0x588   : > { %v4620_v21 = vsel %vm742_vm1, %v4341_v35, %v4546_v5  ;;  %v4345_v35 = vsel %vm9892_vm4, 0, %v9840_v48  ;;  %v4350_v48 = vsel %vm9892_vm4, 0, %v9888_v45 }
 0x589   : > { %v10108_v42 = vsel %vm4687_vm8, %v4620_v21, %v4472_v34  ;;  %v4479_v34 = vsel %vm9916_vm7, %v11368_v29, 0 }
 0x58a   : > { %4802 = vrot.lane.b32.xlu1 %v10108_v42, %s6477_s4 }
 0x58b   : > { %v4548_v20 = vpop.permute.xlu0 %4547  ;;  %v10115_v58 = vpop.permute.xlu1 %4279 }
 0x58c   : > { %v4623_v32 = vsel %vm742_vm1, %v4342_v36, %v4548_v20  ;;  %v11369_v20 = vld [vmem:[#allocation46_spill] sm:$0xff] }
 0x58d   : > { %v10122_v28 = vsel %vm4687_vm8, %v4623_v32, %v4473_v43  ;;  %v4476_v51 = vsel %vm9916_vm7, %v11369_v20, 0 }
 0x58e   : > { %4804 = vrot.lane.b32.xlu0 %v10122_v28, %s6477_s4 }
 0x58f   : > { %v4552_v10 = vpop.permute.xlu0 %4551  ;;  %v10129_v41 = vpop.permute.xlu1 %4295 }
 0x590   : > { %v4629_v30 = vsel %vm742_vm1, %v4344_v1, %v4552_v10  ;;  %v4347_v1 = vsel %vm9892_vm4, 0, %v9856_v47 }
 0x591   : > { %v10136_v39 = vsel %vm4687_vm8, %v4629_v30, %v4475_v18  ;;  %v4481_v18 = vsel %vm9916_vm7, %v11370_v23, 0 }
 0x592   : > { %4808 = vrot.lane.b32.xlu0 %v10136_v39, %s6477_s4 }
 0x593   : > { %v4556_v49 = vpop.permute.xlu0 %4555  ;;  %v4550_v25 = vpop.permute.xlu1 %4549 }
 0x594   : > { %v4635_v22 = vsel %vm742_vm1, %v4346_v3, %v4556_v49  ;;  %v4626_v60 = vsel %vm742_vm1, %v4343_v17, %v4550_v25  ;;  %v11371_v49 = vld [vmem:[#allocation49_spill] sm:$0xff] }
 0x595   : > { %v10155_v11 = vsel %vm4687_vm8, %v4635_v22, %v4477_v12  ;;  %v10158_v6 = vsel %vm4687_vm8, %v4626_v60, %v4474_v55  ;;  %v4478_v45 = vsel %vm9916_vm7, %v11371_v49, 0  ;;  %v4349_v22 = vsel %vm9892_vm4, 0, %v9890_v14 }
 0x596   : > { %4812 = vrot.lane.b32.xlu0 %v10155_v11, %s6477_s4  ;;  %4806 = vrot.lane.b32.xlu1 %v10158_v6, %s6477_s4  ;;  %v4352_v12 = vsel %vm9892_vm4, 0, %v10032_v9  ;;  %v4480_v55 = vsel %vm9916_vm7, %v11372_v59, 0  ;;  %v4351_v9 = vsel %vm9892_vm4, 0, %v9969_v50  ;;  %v4356_v50 = vsel %vm9892_vm4, 0, %v10044_v16  ;;  %v11377_v59 = vld [vmem:[#allocation52_spill] sm:$0xff] }
 0x597   : > { %v4560_v38 = vpop.permute.xlu0 %4559  ;;  %v4554_v5 = vpop.permute.xlu1 %4553 }
 0x598   : > { %v4641_v21 = vsel %vm742_vm1, %v4348_v37, %v4560_v38  ;;  %v4632_v36 = vsel %vm742_vm1, %v4345_v35, %v4554_v5  ;;  %v11373_v5 = vld [vmem:[#allocation54_spill] sm:$0xff] }
 0x599   : > { %v10179_v32 = vsel %vm4687_vm8, %v4641_v21, %v4479_v34  ;;  %v10182_v4 = vsel %vm4687_vm8, %v4632_v36, %v4476_v51  ;;  %v4483_v21 = vsel %vm9916_vm7, %v11373_v5, 0  ;;  %v11374_v34 = vld [vmem:[#allocation51_spill] sm:$0xff] }
 0x59a   : > { %4816 = vrot.lane.b32.xlu0 %v10179_v32, %s6477_s4  ;;  %4810 = vrot.lane.b32.xlu1 %v10182_v4, %s6477_s4  ;;  %v4482_v36 = vsel %vm9916_vm7, %v11374_v34, 0 }
 0x59b   : > { %v4564_v43 = vpop.permute.xlu0 %4563  ;;  %v4558_v10 = vpop.permute.xlu1 %4557 }
 0x59c   : > { %v4647_v30 = vsel %vm742_vm1, %v4350_v48, %v4564_v43  ;;  %v4638_v3 = vsel %vm742_vm1, %v4347_v1, %v4558_v10  ;;  %v11375_v10 = vld [vmem:[#allocation57_spill] sm:$0xff] }
 0x59d   : > { %v10203_v17 = vsel %vm4687_vm8, %v4647_v30, %v4481_v18  ;;  %v10206_v25 = vsel %vm4687_vm8, %v4638_v3, %v4478_v45  ;;  %v4487_v30 = vsel %vm9916_vm7, %v11375_v10, 0  ;;  %v4358_v3 = vsel %vm9892_vm4, 0, %v10060_v0 }
 0x59e   : > { %4820 = vrot.lane.b32.xlu0 %v10203_v17, %s6477_s4  ;;  %4814 = vrot.lane.b32.xlu1 %v10206_v25, %s6477_s4 }
 0x59f   : > { %v4568_v47 = vpop.permute.xlu0 %4567  ;;  %v4562_v27 = vpop.permute.xlu1 %4561 }
 0x5a0   : > { %v4644_v60 = vsel %vm742_vm1, %v4349_v22, %v4562_v27  ;;  %v4653_v38 = vsel %vm742_vm1, %v4352_v12, %v4568_v47  ;;  %v4357_v47 = vsel %vm9892_vm4, 0, %v10046_v33  ;;  %v11376_v27 = vld [vmem:[#allocation59_spill] sm:$0xff]  ;;  %v4353_v33 = vsel %vm9892_vm4, 0, %v10062_v56 }
 0x5a1   : > { %v10223_v37 = vsel %vm4687_vm8, %v4644_v60, %v4480_v55  ;;  %v10241_v20 = vsel %vm4687_vm8, %v4653_v38, %v4483_v21  ;;  %v4489_v12 = vsel %vm9916_vm7, %v11376_v27, 0  ;;  %v4354_v60 = vsel %vm9892_vm4, 0, %v10076_v44 }
 0x5a2   : > { %4849 = vrot.lane.b32.xlu0 %v9982_v2, %s6478_s0  ;;  %4818 = vrot.lane.b32.xlu1 %v10223_v37, %s6477_s4  ;;  %v4488_v55 = vsel %vm9916_vm7, %v11377_v59, 0  ;;  %v4360_v56 = vsel %vm9892_vm4, 0, %v10080_v15  ;;  %v4361_v59 = vsel %vm9892_vm4, 0, %v10082_v31  ;;  %v4493_v31 = vsel %vm9916_vm7, %v9637_v46, 0 }
 0x5a3   : > { %v4572_v14 = vpop.permute.xlu0 %4571  ;;  %v4566_v35 = vpop.permute.xlu1 %4565 }
 0x5a4   : > { %v4650_v29 = vsel %vm742_vm1, %v4351_v9, %v4566_v35  ;;  %v4659_v9 = vsel %vm742_vm1, %v4354_v60, %v4572_v14  ;;  %v11379_v14 = vld [vmem:[#allocation55_spill] sm:$0xff] }
 0x5a5   : > { %v10244_v51 = vsel %vm4687_vm8, %v4650_v29, %v4482_v36  ;;  %v11378_v29 = vld [vmem:[#allocation58_spill] sm:$0xff]  ;;  %v4484_v36 = vsel %vm9916_vm7, %v11379_v14, 0 }
 0x5a6   : > { %4824 = vrot.lane.b32.xlu0 %v10241_v20, %s6477_s4  ;;  %4822 = vrot.lane.b32.xlu1 %v10244_v51, %s6477_s4  ;;  %v4485_v34 = vsel %vm9916_vm7, %v11378_v29, 0 }
 0x5a7   : > { %v4576_v48 = vpop.permute.xlu0 %4575  ;;  %v4570_v43 = vpop.permute.xlu1 %4569 }
 0x5a8   : > { %v4665_v1 = vsel %vm742_vm1, %v4356_v50, %v4576_v48  ;;  %v4656_v44 = vsel %vm742_vm1, %v4353_v33, %v4570_v43  ;;  %v10310_v50 = vsel %vm4687_vm8, %v4659_v9, %v4485_v34  ;;  %v4359_v48 = vsel %vm9892_vm4, 0, %v10064_v8  ;;  %v11380_v8 = vld [vmem:[#allocation61_spill] sm:$0xff] }
 0x5a9   : > { %v10258_v23 = vsel %vm4687_vm8, %v4665_v1, %v4487_v30  ;;  %v10317_v1 = vsel %vm4687_vm8, %v4656_v44, %v4484_v36  ;;  %v4486_v36 = vsel %vm9916_vm7, %v9604_v61, 0 }
 0x5aa   : > { %4832 = vrot.lane.b32.xlu0 %v10258_v23, %s6477_s4  ;;  %4851 = vrot.lane.b32.xlu1 %v9948_v19, %s6478_s0 }
 0x5ab   : > { %v4580_v16 = vpop.permute.xlu0 %4579  ;;  %v10264_v18 = vpop.permute.xlu1 %4573 }
 0x5ac   : > { %v4671_v49 = vsel %vm742_vm1, %v4358_v3, %v4580_v16  ;;  %v4491_v3 = vsel %vm9916_vm7, %v11380_v8, 0 }
 0x5ad   : > { %v10286_v38 = vsel %vm4687_vm8, %v4671_v49, %v4489_v12  ;;  %v11381_v49 = vld [vmem:[#allocation56_spill] sm:$0xff] }
 0x5ae   : > { %4853 = vrot.lane.b32.xlu0 %v10007_v7, %s6478_s0 }
 0x5af   : > { %v4584_v45 = vpop.permute.xlu0 %4583  ;;  %v4578_v22 = vpop.permute.xlu1 %4577 }
 0x5b0   : > { %v4668_v0 = vsel %vm742_vm1, %v4357_v47, %v4578_v22  ;;  %v4677_v43 = vsel %vm742_vm1, %v4360_v56, %v4584_v45  ;;  %v4490_v45 = vsel %vm9916_vm7, %v11381_v49, 0 }
 0x5b1   : > { %v10293_v35 = vsel %vm4687_vm8, %v4668_v0, %v4488_v55  ;;  %v10335_v47 = vsel %vm4687_vm8, %v4677_v43, %v4491_v3  ;;  %v4362_v0 = vsel %vm9892_vm4, 0, %v10098_v57 }
 0x5b2   : > { %4836 = vrot.lane.b32.xlu0 %v10286_v38, %s6477_s4  ;;  %4834 = vrot.lane.b32.xlu1 %v10293_v35, %s6477_s4 }
 0x5b3   : > { %v4588_v5 = vpop.permute.xlu0 %4587  ;;  %v4582_v21 = vpop.permute.xlu1 %4581 }
 0x5b4   : > { %v4674_v15 = vsel %vm742_vm1, %v4359_v48, %v4582_v21  ;;  %v4683_v55 = vsel %vm742_vm1, %v4362_v0, %v4588_v5  ;;  %v11382_v5 = vld [vmem:[#allocation60_spill] sm:$0xff] }
 0x5b5   : > { %v10338_v22 = vsel %vm4687_vm8, %v4674_v15, %v4490_v45  ;;  %v4492_v21 = vsel %vm9916_vm7, %v11382_v5, 0  ;;  %v10378_v29 = vsel %vm4687_vm8, %v4683_v55, %v4493_v31 }
 0x5b6   : > { %4828 = vrot.lane.b32.xlu0 %v10310_v50, %s6477_s4  ;;  %4826 = vrot.lane.b32.xlu1 %v10317_v1, %s6477_s4 }
 0x5b7   : > { %v10324_v10 = vpop.permute.xlu0 %4784  ;;  %v4586_v30 = vpop.permute.xlu1 %4585 }
 0x5b8   : > { %v4945_v16 = vsel %vm4942_vm9, 0, %v10324_v10  ;;  %v4680_v33 = vsel %vm742_vm1, %v4361_v59, %v4586_v30 }
 0x5b9   : > { %5135 = vst [vmem:[#allocation3] sm:$0xff] %v4945_v16  ;;  %v10384_v34 = vsel %vm4687_vm8, %v4680_v33, %v4492_v21 }
 0x5ba   : > { %4840 = vrot.lane.b32.xlu0 %v10335_v47, %s6477_s4  ;;  %4838 = vrot.lane.b32.xlu1 %v10338_v22, %s6477_s4 }
 0x5bb   : > { %v10344_v27 = vpop.permute.xlu0 %4788  ;;  %v4590_v12 = vpop.permute.xlu1 %4589 }
 0x5bc   : > { %v4951_v60 = vsel %vm4942_vm9, %v9982_v2, %v10344_v27 }
 0x5bd   : > { %5141 = vst [vmem:[#allocation3 + $0x30] sm:$0xff] %v4951_v60 }
 0x5be   : > { %4857 = vrot.lane.b32.xlu0 %v10026_v53, %s6478_s0  ;;  %4855 = vrot.lane.b32.xlu1 %v9977_v63, %s6478_s0 }
 0x5bf   : > { %v10361_v2 = vpop.permute.xlu0 %4792  ;;  %v10363_v9 = vpop.permute.xlu1 %4786 }
 0x5c0   : > { %v4957_v57 = vsel %vm4942_vm9, %v10007_v7, %v10361_v2  ;;  %v4948_v44 = vsel %vm4942_vm9, %v9926_v62, %v10363_v9  ;;  %v4355_v7 = vsel %vm9892_vm4, 0, %v10115_v58 }
 0x5c1   : > { %5147 = vst [vmem:[#allocation3 + $0x60] sm:$0xff] %v4957_v57  ;;  %5138 = vst [vmem:[#allocation3 + $0x18] sm:$0xff] %v4948_v44  ;;  %v4662_v46 = vsel %vm742_vm1, %v4355_v7, %v10264_v18  ;;  %v4363_v18 = vsel %vm9892_vm4, 0, %v10129_v41 }
 0x5c2   : > { %4844 = vrot.lane.b32.xlu0 %v10378_v29, %s6477_s4  ;;  %4842 = vrot.lane.b32.xlu1 %v10384_v34, %s6477_s4  ;;  %v10409_v48 = vsel %vm4687_vm8, %v4662_v46, %v4486_v36 }
 0x5c3   : > { %v10392_v62 = vpop.permute.xlu0 %4796  ;;  %v10394_v56 = vpop.permute.xlu1 %4790 }
 0x5c4   : > { %v4963_v58 = vsel %vm4942_vm9, %v10026_v53, %v10392_v62  ;;  %v4954_v14 = vsel %vm4942_vm9, %v9948_v19, %v10394_v56  ;;  %v4686_v53 = vsel %vm742_vm1, %v4363_v18, %v4590_v12 }
 0x5c5   : > { %5153 = vst [vmem:[#allocation3 + $0x90] sm:$0xff] %v4963_v58  ;;  %5144 = vst [vmem:[#allocation3 + $0x48] sm:$0xff] %v4954_v14  ;;  %v4751_v41 = vsel %vm4687_vm8, %v4686_v53, %v4494_v26 }
 0x5c6   : > { %4861 = vrot.lane.b32.xlu0 %v10040_v40, %s6478_s0  ;;  %4830 = vrot.lane.b32.xlu1 %v10409_v48, %s6477_s4 }
 0x5c7   : > { %v10416_v19 = vpop.permute.xlu1 %4794 }
 0x5c8   : > { %v4960_v61 = vsel %vm4942_vm9, %v9977_v63, %v10416_v19 }
 0x5c9   : > { %5150 = vst [vmem:[#allocation3 + $0x78] sm:$0xff] %v4960_v61 }
 0x5ca   : > { %4865 = vrot.lane.b32.xlu0 %v10108_v42, %s6478_s0  ;;  %4846 = vrot.lane.b32.xlu1 %v4751_v41, %s6477_s4 }
 0x5cb   : > { %v10428_v43 = vpop.permute.xlu1 %4798 }
 0x5cc   : > { %v4966_v15 = vsel %vm4942_vm9, %v10002_v13, %v10428_v43 }
 0x5cd   : > { %5156 = vst [vmem:[#allocation3 + $0xa8] sm:$0xff] %v4966_v15 }
 0x5ce   : > { %4869 = vrot.lane.b32.xlu0 %v10158_v6, %s6478_s0  ;;  %4859 = vrot.lane.b32.xlu1 %v10002_v13, %s6478_s0 }
 0x5d2   : > { %4873 = vrot.lane.b32.xlu0 %v10182_v4, %s6478_s0  ;;  %4863 = vrot.lane.b32.xlu1 %v10094_v54, %s6478_s0 }
 0x5d6   : > { %4877 = vrot.lane.b32.xlu0 %v10206_v25, %s6478_s0  ;;  %4867 = vrot.lane.b32.xlu1 %v10122_v28, %s6478_s0 }
 0x5da   : > { %4881 = vrot.lane.b32.xlu0 %v10223_v37, %s6478_s0  ;;  %4871 = vrot.lane.b32.xlu1 %v10136_v39, %s6478_s0 }
 0x5de   : > { %4885 = vrot.lane.b32.xlu0 %v10244_v51, %s6478_s0  ;;  %4875 = vrot.lane.b32.xlu1 %v10155_v11, %s6478_s0 }
 0x5e2   : > { %4889 = vrot.lane.b32.xlu0 %v10317_v1, %s6478_s0  ;;  %4879 = vrot.lane.b32.xlu1 %v11383_v52, %s6478_s0 }
 0x5e6   : > { %4893 = vrot.lane.b32.xlu0 %v10409_v48, %s6478_s0  ;;  %4883 = vrot.lane.b32.xlu1 %v10203_v17, %s6478_s0 }
 0x5ea   : > { %4897 = vrot.lane.b32.xlu0 %v10293_v35, %s6478_s0  ;;  %4887 = vrot.lane.b32.xlu1 %v10241_v20, %s6478_s0 }
 0x5ee   : > { %4901 = vrot.lane.b32.xlu0 %v10338_v22, %s6478_s0  ;;  %4891 = vrot.lane.b32.xlu1 %v10310_v50, %s6478_s0 }
 0x5f2   : > { %4905 = vrot.lane.b32.xlu0 %v10384_v34, %s6478_s0  ;;  %4895 = vrot.lane.b32.xlu1 %v10258_v23, %s6478_s0 }
 0x5f6   : > { %4909 = vrot.lane.b32.xlu0 %v4751_v41, %s6478_s0  ;;  %4899 = vrot.lane.b32.xlu1 %v10286_v38, %s6478_s0 }
 0x5f8   : > { %v10476_v24 = vpop.permute.xlu0 %4800 }
 0x5f9   : > { %v4969_v63 = vsel %vm4942_vm9, %v10040_v40, %v10476_v24 }
 0x5fa   : > { %5159 = vst [vmem:[#allocation3 + $0xc0] sm:$0xff] %v4969_v63  ;;  %4903 = vrot.lane.b32.xlu1 %v10335_v47, %s6478_s0 }
 0x5fc   : > { %v10483_v13 = vpop.permute.xlu1 %4802 }
 0x5fd   : > { %v4972_v25 = vsel %vm4942_vm9, %v10094_v54, %v10483_v13 }
 0x5fe   : > { %5162 = vst [vmem:[#allocation3 + $0xd8] sm:$0xff] %v4972_v25  ;;  %4907 = vrot.lane.b32.xlu1 %v10378_v29, %s6478_s0 }
 0x600   : > { %v10490_v30 = vpop.permute.xlu0 %4804 }
 0x601   : > { %v4975_v40 = vsel %vm4942_vm9, %v10108_v42, %v10490_v30 }
 0x602   : > { %5165 = vst [vmem:[#allocation3 + $0xf0] sm:$0xff] %v4975_v40 }
 0x604   : > { %v10495_v16 = vpop.permute.xlu0 %4808 }
 0x605   : > { %v4981_v8 = vsel %vm4942_vm9, %v10158_v6, %v10495_v16 }
 0x606   : > { %5171 = vst [vmem:[#allocation3 + $0x120] sm:$0xff] %v4981_v8 }
 0x608   : > { %v10500_v3 = vpop.permute.xlu0 %4812  ;;  %v10502_v54 = vpop.permute.xlu1 %4806 }
 0x609   : > { %v4987_v49 = vsel %vm4942_vm9, %v10182_v4, %v10500_v3  ;;  %v4978_v42 = vsel %vm4942_vm9, %v10122_v28, %v10502_v54 }
 0x60a   : > { %5177 = vst [vmem:[#allocation3 + $0x150] sm:$0xff] %v4987_v49  ;;  %5168 = vst [vmem:[#allocation3 + $0x108] sm:$0xff] %v4978_v42 }
 0x60c   : > { %v10510_v45 = vpop.permute.xlu0 %4816  ;;  %v10512_v12 = vpop.permute.xlu1 %4810 }
 0x60d   : > { %v4993_v6 = vsel %vm4942_vm9, 0, %v10510_v45  ;;  %v4984_v60 = vsel %vm4942_vm9, %v10136_v39, %v10512_v12 }
 0x60e   : > { %5183 = vst [vmem:[#allocation3 + $0x180] sm:$0xff] %v4993_v6  ;;  %5174 = vst [vmem:[#allocation3 + $0x138] sm:$0xff] %v4984_v60 }
 0x610   : > { %v10519_v4 = vpop.permute.xlu0 %4820  ;;  %v10521_v0 = vpop.permute.xlu1 %4814 }
 0x611   : > { %v4999_v28 = vsel %vm4942_vm9, %v10223_v37, %v10519_v4  ;;  %v4990_v59 = vsel %vm4942_vm9, %v10155_v11, %v10521_v0 }
 0x612   : > { %5189 = vst [vmem:[#allocation3 + $0x1b0] sm:$0xff] %v4999_v28  ;;  %5180 = vst [vmem:[#allocation3 + $0x168] sm:$0xff] %v4990_v59 }
 0x614   : > { %v4850_v55 = vpop.permute.xlu0 %4849  ;;  %v10529_v33 = vpop.permute.xlu1 %4818 }
 0x615   : > { %v5041_v39 = vsel %vm4687_vm8, %v10324_v10, %v4850_v55  ;;  %5137 = vst.msk [vmem:[#allocation3 + $0x10] sm:$0xff] %vm742_vm1, %v4850_v55  ;;  %v4996_v57 = vsel %vm4942_vm9, %v10179_v32, %v10529_v33 }
 0x616   : > { %5136 = vst [vmem:[#allocation3 + $0x8] sm:$0xff] %v5041_v39  ;;  %5186 = vst [vmem:[#allocation3 + $0x198] sm:$0xff] %v4996_v57 }
 0x618   : > { %v10537_v37 = vpop.permute.xlu0 %4824  ;;  %v10539_v31 = vpop.permute.xlu1 %4822 }
 0x619   : > { %v5005_v11 = vsel %vm4942_vm9, %v10244_v51, %v10537_v37  ;;  %v5002_v10 = vsel %vm4942_vm9, %v10203_v17, %v10539_v31 }
 0x61a   : > { %5195 = vst [vmem:[#allocation3 + $0x1e0] sm:$0xff] %v5005_v11  ;;  %5192 = vst [vmem:[#allocation3 + $0x1c8] sm:$0xff] %v5002_v10 }
 0x61c   : > { %v10547_v44 = vpop.permute.xlu0 %4832  ;;  %v4852_v5 = vpop.permute.xlu1 %4851 }
 0x61d   : > { %v5017_v32 = vsel %vm4942_vm9, %v10409_v48, %v10547_v44  ;;  %v5044_v21 = vsel %vm4687_vm8, %v10363_v9, %v4852_v5  ;;  %5140 = vst.msk [vmem:[#allocation3 + $0x28] sm:$0xff] %vm742_vm1, %v4852_v5 }
 0x61e   : > { %5207 = vst [vmem:[#allocation3 + $0x240] sm:$0xff] %v5017_v32  ;;  %5139 = vst [vmem:[#allocation3 + $0x20] sm:$0xff] %v5044_v21 }
 0x620   : > { %v4854_v51 = vpop.permute.xlu0 %4853 }
 0x621   : > { %v5047_v17 = vsel %vm4687_vm8, %v10344_v27, %v4854_v51  ;;  %5143 = vst.msk [vmem:[#allocation3 + $0x40] sm:$0xff] %vm742_vm1, %v4854_v51 }
 0x622   : > { %5142 = vst [vmem:[#allocation3 + $0x38] sm:$0xff] %v5047_v17 }
 0x624   : > { %v10558_v7 = vpop.permute.xlu0 %4836  ;;  %v10560_v46 = vpop.permute.xlu1 %4834 }
 0x625   : > { %v5023_v58 = vsel %vm4942_vm9, %v10293_v35, %v10558_v7  ;;  %v5020_v9 = vsel %vm4942_vm9, %v10258_v23, %v10560_v46 }
 0x626   : > { %5213 = vst [vmem:[#allocation3 + $0x270] sm:$0xff] %v5023_v58  ;;  %5210 = vst [vmem:[#allocation3 + $0x258] sm:$0xff] %v5020_v9 }
 0x628   : > { %v10568_v14 = vpop.permute.xlu0 %4828  ;;  %v10570_v27 = vpop.permute.xlu1 %4826 }
 0x629   : > { %v5011_v36 = vsel %vm4942_vm9, %v10317_v1, %v10568_v14  ;;  %v5008_v18 = vsel %vm4942_vm9, %v10241_v20, %v10570_v27 }
 0x62a   : > { %5201 = vst [vmem:[#allocation3 + $0x210] sm:$0xff] %v5011_v36  ;;  %5198 = vst [vmem:[#allocation3 + $0x1f8] sm:$0xff] %v5008_v18 }
 0x62c   : > { %v10578_v35 = vpop.permute.xlu0 %4840  ;;  %v10580_v48 = vpop.permute.xlu1 %4838 }
 0x62d   : > { %v5029_v23 = vsel %vm4942_vm9, %v10338_v22, %v10578_v35  ;;  %v5026_v53 = vsel %vm4942_vm9, %v10286_v38, %v10580_v48 }
 0x62e   : > { %5219 = vst [vmem:[#allocation3 + $0x2a0] sm:$0xff] %v5029_v23  ;;  %5216 = vst [vmem:[#allocation3 + $0x288] sm:$0xff] %v5026_v53 }
 0x630   : > { %v4858_v1 = vpop.permute.xlu0 %4857  ;;  %v4856_v61 = vpop.permute.xlu1 %4855 }
 0x631   : > { %v5053_v20 = vsel %vm4687_vm8, %v10361_v2, %v4858_v1  ;;  %5149 = vst.msk [vmem:[#allocation3 + $0x70] sm:$0xff] %vm742_vm1, %v4858_v1  ;;  %v5050_v26 = vsel %vm4687_vm8, %v10394_v56, %v4856_v61  ;;  %5146 = vst.msk [vmem:[#allocation3 + $0x58] sm:$0xff] %vm742_vm1, %v4856_v61 }
 0x632   : > { %5148 = vst [vmem:[#allocation3 + $0x68] sm:$0xff] %v5053_v20  ;;  %5145 = vst [vmem:[#allocation3 + $0x50] sm:$0xff] %v5050_v26 }
 0x634   : > { %v10594_v22 = vpop.permute.xlu0 %4844  ;;  %v10596_v41 = vpop.permute.xlu1 %4842 }
 0x635   : > { %v5035_v38 = vsel %vm4942_vm9, %v10384_v34, %v10594_v22  ;;  %v5032_v2 = vsel %vm4942_vm9, %v10335_v47, %v10596_v41 }
 0x636   : > { %5225 = vst [vmem:[#allocation3 + $0x2d0] sm:$0xff] %v5035_v38  ;;  %5222 = vst [vmem:[#allocation3 + $0x2b8] sm:$0xff] %v5032_v2 }
 0x638   : > { %v4862_v15 = vpop.permute.xlu0 %4861  ;;  %v10604_v56 = vpop.permute.xlu1 %4830 }
 0x639   : > { %v5059_v52 = vsel %vm4687_vm8, %v10392_v62, %v4862_v15  ;;  %5155 = vst.msk [vmem:[#allocation3 + $0xa0] sm:$0xff] %vm742_vm1, %v4862_v15  ;;  %v5014_v63 = vsel %vm4942_vm9, %v10310_v50, %v10604_v56 }
 0x63a   : > { %5154 = vst [vmem:[#allocation3 + $0x98] sm:$0xff] %v5059_v52  ;;  %5204 = vst [vmem:[#allocation3 + $0x228] sm:$0xff] %v5014_v63 }
 0x63c   : > { %v4866_v34 = vpop.permute.xlu0 %4865  ;;  %v4847_v25 = vpop.permute.xlu1 %4846 }
 0x63d   : > { %v5065_v47 = vsel %vm4687_vm8, %v10476_v24, %v4866_v34  ;;  %5161 = vst.msk [vmem:[#allocation3 + $0xd0] sm:$0xff] %vm742_vm1, %v4866_v34  ;;  %v5038_v40 = vsel %vm4942_vm9, %v10378_v29, %v4847_v25 }
 0x63e   : > { %5160 = vst [vmem:[#allocation3 + $0xc8] sm:$0xff] %v5065_v47  ;;  %5228 = vst [vmem:[#allocation3 + $0x2e8] sm:$0xff] %v5038_v40 }
 0x640   : > { %v4870_v62 = vpop.permute.xlu0 %4869  ;;  %v4860_v8 = vpop.permute.xlu1 %4859 }
 0x641   : > { %v5071_v49 = vsel %vm4687_vm8, %v10490_v30, %v4870_v62  ;;  %5167 = vst.msk [vmem:[#allocation3 + $0x100] sm:$0xff] %vm742_vm1, %v4870_v62  ;;  %v5056_v50 = vsel %vm4687_vm8, %v10416_v19, %v4860_v8  ;;  %5152 = vst.msk [vmem:[#allocation3 + $0x88] sm:$0xff] %vm742_vm1, %v4860_v8 }
 0x642   : > { %5166 = vst [vmem:[#allocation3 + $0xf8] sm:$0xff] %v5071_v49  ;;  %5151 = vst [vmem:[#allocation3 + $0x80] sm:$0xff] %v5056_v50 }
 0x644   : > { %v4874_v24 = vpop.permute.xlu0 %4873  ;;  %v4864_v42 = vpop.permute.xlu1 %4863 }
 0x645   : > { %v5077_v29 = vsel %vm4687_vm8, %v10495_v16, %v4874_v24  ;;  %5173 = vst.msk [vmem:[#allocation3 + $0x130] sm:$0xff] %vm742_vm1, %v4874_v24  ;;  %v5062_v6 = vsel %vm4687_vm8, %v10428_v43, %v4864_v42  ;;  %5158 = vst.msk [vmem:[#allocation3 + $0xb8] sm:$0xff] %vm742_vm1, %v4864_v42 }
 0x646   : > { %5172 = vst [vmem:[#allocation3 + $0x128] sm:$0xff] %v5077_v29  ;;  %5157 = vst [vmem:[#allocation3 + $0xb0] sm:$0xff] %v5062_v6 }
 0x648   : > { %v4878_v30 = vpop.permute.xlu0 %4877  ;;  %v4868_v19 = vpop.permute.xlu1 %4867 }
 0x649   : > { %v5083_v60 = vsel %vm4687_vm8, %v10500_v3, %v4878_v30  ;;  %5179 = vst.msk [vmem:[#allocation3 + $0x160] sm:$0xff] %vm742_vm1, %v4878_v30  ;;  %v5068_v28 = vsel %vm4687_vm8, %v10483_v13, %v4868_v19  ;;  %5164 = vst.msk [vmem:[#allocation3 + $0xe8] sm:$0xff] %vm742_vm1, %v4868_v19 }
 0x64a   : > { %5178 = vst [vmem:[#allocation3 + $0x158] sm:$0xff] %v5083_v60  ;;  %5163 = vst [vmem:[#allocation3 + $0xe0] sm:$0xff] %v5068_v28 }
 0x64c   : > { %v4882_v16 = vpop.permute.xlu0 %4881  ;;  %v4872_v43 = vpop.permute.xlu1 %4871 }
 0x64d   : > { %v5089_v59 = vsel %vm4687_vm8, %v10510_v45, %v4882_v16  ;;  %5185 = vst.msk [vmem:[#allocation3 + $0x190] sm:$0xff] %vm742_vm1, %v4882_v16  ;;  %v5074_v55 = vsel %vm4687_vm8, %v10502_v54, %v4872_v43  ;;  %5170 = vst.msk [vmem:[#allocation3 + $0x118] sm:$0xff] %vm742_vm1, %v4872_v43 }
 0x64e   : > { %5184 = vst [vmem:[#allocation3 + $0x188] sm:$0xff] %v5089_v59  ;;  %5169 = vst [vmem:[#allocation3 + $0x110] sm:$0xff] %v5074_v55 }
 0x650   : > { %v4886_v3 = vpop.permute.xlu0 %4885  ;;  %v4876_v13 = vpop.permute.xlu1 %4875 }
 0x651   : > { %v5095_v39 = vsel %vm4687_vm8, %v10519_v4, %v4886_v3  ;;  %5191 = vst.msk [vmem:[#allocation3 + $0x1c0] sm:$0xff] %vm742_vm1, %v4886_v3  ;;  %v5080_v57 = vsel %vm4687_vm8, %v10512_v12, %v4876_v13  ;;  %5176 = vst.msk [vmem:[#allocation3 + $0x148] sm:$0xff] %vm742_vm1, %v4876_v13 }
 0x652   : > { %5190 = vst [vmem:[#allocation3 + $0x1b8] sm:$0xff] %v5095_v39  ;;  %5175 = vst [vmem:[#allocation3 + $0x140] sm:$0xff] %v5080_v57 }
 0x654   : > { %v4890_v45 = vpop.permute.xlu0 %4889  ;;  %v4880_v54 = vpop.permute.xlu1 %4879 }
 0x655   : > { %v5101_v11 = vsel %vm4687_vm8, %v10537_v37, %v4890_v45  ;;  %5197 = vst.msk [vmem:[#allocation3 + $0x1f0] sm:$0xff] %vm742_vm1, %v4890_v45  ;;  %v5086_v10 = vsel %vm4687_vm8, %v10521_v0, %v4880_v54  ;;  %v5133_v4 = vsel %vm4687_vm8, %v4847_v25, %v4880_v54  ;;  %5182 = vst.msk [vmem:[#allocation3 + $0x178] sm:$0xff] %vm742_vm1, %v4880_v54 }
 0x656   : > { %5230 = vst.msk [vmem:[#allocation3 + $0x2f8] sm:$0xff] %vm742_vm1, %v4880_v54  ;;  %5196 = vst [vmem:[#allocation3 + $0x1e8] sm:$0xff] %v5101_v11 }
 0x657   : > { %5181 = vst [vmem:[#allocation3 + $0x170] sm:$0xff] %v5086_v10  ;;  %5229 = vst [vmem:[#allocation3 + $0x2f0] sm:$0xff] %v5133_v4 }
 0x658   : > { %v4894_v12 = vpop.permute.xlu0 %4893  ;;  %v4884_v5 = vpop.permute.xlu1 %4883 }
 0x659   : > { %v5107_v32 = vsel %vm4687_vm8, %v10568_v14, %v4894_v12  ;;  %5203 = vst.msk [vmem:[#allocation3 + $0x220] sm:$0xff] %vm742_vm1, %v4894_v12  ;;  %v5092_v37 = vsel %vm4687_vm8, %v10529_v33, %v4884_v5  ;;  %5188 = vst.msk [vmem:[#allocation3 + $0x1a8] sm:$0xff] %vm742_vm1, %v4884_v5 }
 0x65a   : > { %5202 = vst [vmem:[#allocation3 + $0x218] sm:$0xff] %v5107_v32  ;;  %5187 = vst [vmem:[#allocation3 + $0x1a0] sm:$0xff] %v5092_v37 }
 0x65c   : > { %v4898_v0 = vpop.permute.xlu0 %4897  ;;  %v4888_v21 = vpop.permute.xlu1 %4887 }
 0x65d   : > { %v5113_v51 = vsel %vm4687_vm8, %v10547_v44, %v4898_v0  ;;  %5209 = vst.msk [vmem:[#allocation3 + $0x250] sm:$0xff] %vm742_vm1, %v4898_v0  ;;  %v5098_v17 = vsel %vm4687_vm8, %v10539_v31, %v4888_v21  ;;  %5194 = vst.msk [vmem:[#allocation3 + $0x1d8] sm:$0xff] %vm742_vm1, %v4888_v21 }
 0x65e   : > { %5208 = vst [vmem:[#allocation3 + $0x248] sm:$0xff] %v5113_v51  ;;  %5193 = vst [vmem:[#allocation3 + $0x1d0] sm:$0xff] %v5098_v17 }
 0x660   : > { %v4902_v58 = vpop.permute.xlu0 %4901  ;;  %v4892_v33 = vpop.permute.xlu1 %4891 }
 0x661   : > { %v5119_v9 = vsel %vm4687_vm8, %v10558_v7, %v4902_v58  ;;  %5215 = vst.msk [vmem:[#allocation3 + $0x280] sm:$0xff] %vm742_vm1, %v4902_v58  ;;  %v5104_v14 = vsel %vm4687_vm8, %v10570_v27, %v4892_v33  ;;  %5200 = vst.msk [vmem:[#allocation3 + $0x208] sm:$0xff] %vm742_vm1, %v4892_v33 }
 0x662   : > { %5214 = vst [vmem:[#allocation3 + $0x278] sm:$0xff] %v5119_v9  ;;  %5199 = vst [vmem:[#allocation3 + $0x200] sm:$0xff] %v5104_v14 }
 0x664   : > { %v4906_v44 = vpop.permute.xlu0 %4905  ;;  %v4896_v31 = vpop.permute.xlu1 %4895 }
 0x665   : > { %v5125_v36 = vsel %vm4687_vm8, %v10578_v35, %v4906_v44  ;;  %5221 = vst.msk [vmem:[#allocation3 + $0x2b0] sm:$0xff] %vm742_vm1, %v4906_v44  ;;  %v5110_v18 = vsel %vm4687_vm8, %v10604_v56, %v4896_v31  ;;  %5206 = vst.msk [vmem:[#allocation3 + $0x238] sm:$0xff] %vm742_vm1, %v4896_v31 }
 0x666   : > { %5220 = vst [vmem:[#allocation3 + $0x2a8] sm:$0xff] %v5125_v36  ;;  %5205 = vst [vmem:[#allocation3 + $0x230] sm:$0xff] %v5110_v18 }
 0x668   : > { %v4910_v7 = vpop.permute.xlu0 %4909  ;;  %v4900_v27 = vpop.permute.xlu1 %4899 }
 0x669   : > { %v5131_v23 = vsel %vm4687_vm8, %v10594_v22, %v4910_v7  ;;  %5227 = vst.msk [vmem:[#allocation3 + $0x2e0] sm:$0xff] %vm742_vm1, %v4910_v7  ;;  %v5116_v35 = vsel %vm4687_vm8, %v10560_v46, %v4900_v27  ;;  %5212 = vst.msk [vmem:[#allocation3 + $0x268] sm:$0xff] %vm742_vm1, %v4900_v27 }
 0x66a   : > { %5226 = vst [vmem:[#allocation3 + $0x2d8] sm:$0xff] %v5131_v23  ;;  %5211 = vst [vmem:[#allocation3 + $0x260] sm:$0xff] %v5116_v35 }
 0x66c   : > { %v4904_v53 = vpop.permute.xlu1 %4903 }
 0x66d   : > { %v5122_v1 = vsel %vm4687_vm8, %v10580_v48, %v4904_v53  ;;  %5218 = vst.msk [vmem:[#allocation3 + $0x298] sm:$0xff] %vm742_vm1, %v4904_v53 }
 0x66e   : > { %5217 = vst [vmem:[#allocation3 + $0x290] sm:$0xff] %v5122_v1 }
 0x670   : > { %v4908_v61 = vpop.permute.xlu1 %4907 }
 0x671   : > { %v5128_v20 = vsel %vm4687_vm8, %v10596_v41, %v4908_v61  ;;  %5224 = vst.msk [vmem:[#allocation3 + $0x2c8] sm:$0xff] %vm742_vm1, %v4908_v61 }
 0x672   : > { %5223 = vst [vmem:[#allocation3 + $0x2c0] sm:$0xff] %v5128_v20 }
 0x673   : > { %s5528_s29 = sshll.u32 %s6445_s15, 1  ;;  %s5529_s6 = sshll.u32 %s6449_s16, 5 }
 0x674   : > { %s5240_s8 = ssub.s32 7, %s5528_s29  ;;  %s5267_s25 = sshll.u32 %s6723_s22, 4  ;;  %s5268_s25 = int_to_ptr.vmem [resolvable:$true] %s5267_s25 }
 0x675   : > { %s5241_s26 = smul.u32 %s6449_s16, %s5240_s8  ;;  %s6479_s20 = smov 4096  }
 0x676   : > { %p11384_p8 = scmp.ne.s32.totalorder %s10944_s7, 0  ;;  %s6480_s28 = smov 65536  }
 0x677   : > { %s5242_s30 = sadd.s32 %s6445_s15, %s5241_s26  ;;  %s6481_s14 = smov 32  }
 0x678   : > { %5682 = sst [smem:[#allocation13]] (%p11384_p8), %s6479_s20  ;;  %s5530_s21 = sshll.u32 %s5242_s30, 6 }
 0x679   : > { %5683 = sst [smem:[#allocation13 + $0x1]] (%p11384_p8), %s6480_s28  ;;  %s5248_s5 = sadd.s32 %s5530_s21, %s5529_s6 }
 0x67a   : > { %s5531_s27 = sshll.u32 %s5248_s5, 7  ;;  %5684 = sst [smem:[#allocation13 + $0x2]] (%p11384_p8), %s6481_s14 }
 0x67b   : > { %s5250_s16 = scalar_lea.hbm %s10753_s2, %s5531_s27  ;;  %s6482_s17 = smov 128  }
 0x67c   : > { %5685 = sst [smem:[#allocation13 + $0x3]] (%p11384_p8), %s6482_s17  ;;  %s6483_s15 = smov 8  }
 0x67d   : > { %5686 = sst [smem:[#allocation13 + $0x4]] (%p11384_p8), %s6482_s17  ;;  %s6484_s22 = smov [#allocation12]  }
 0x67e   : > { %5687 = sst [smem:[#allocation13 + $0x5]] (%p11384_p8), %s6483_s15  ;;  %s6485_s24 = smov 0  }
 0x67f   : > { %5688 = dma.general (%p11384_p8), %s5268_s25, 8192, %s5250_s16, %s5232_s23, %s6484_s22, [#allocation13], %s6485_s24, 0  }
 0x680 PF: > { %s11385_s4 = sld [smem:[#allocation24_spill]]  ;;  %p5694_p7 = scmp.ge.s32.totalorder %s6461_s19, 2 }
 0x681   : > { %s5295_s0 = sand.u32 1, %s6433_s12  }
 0x682   : > { %s5296_s29 = scalar_lea.sflag [#allocation6], %s5295_s0 }
 0x686   : > { %p11386_p3 = scmp.ne.s32.totalorder %s11385_s4, 0 }
 0x688   : > { %p5691_p0 = pnand %p5694_p7, %p11386_p3 }
 0x68a   : > { %6416 = dma.done.wait (!%p5691_p0), %s5296_s29, 8192  }
 0x68b   : > { %6418 = vsyncadd (!%p5691_p0), %s5296_s29, 4294959104  ;;  %s21_s19 = sadd.s32 1, %s6461_s19   ;;  %s11387_s6 = sld [smem:[#allocation22_spill]] }
 0x68c   : > { %p18_p9 = scmp.ge.s32.totalorder %s21_s19, 18   ;;  %s11388_s7 = sld [smem:[#allocation18_spill]] }
 0x68d   : > { %s11389_s14 = sld [smem:[#allocation23_spill]]  ;;  %s11390_s15 = sld [smem:[#allocation19_spill]] }
 0x68e   : > { %s11391_s17 = sld [smem:[#allocation20_spill]]  ;;  %s11392_s23 = sld [smem:[#allocation21_spill]] }
 0x68f   : > { %s11393_s9 = smov %s6425_s10  ;;  %s11394_s10 = smov %s6429_s11 }
 0x690   : > { %s11396_s12 = smov %s6437_s13  ;;  %s11398_s16 = smov %s6457_s18 }
 0x691   : > { %s11395_s11 = smov %s11387_s6  ;;  %20 = sbr.rel (!%p18_p9) target bundleno = 13 (0xd), region = 100 }
 0x692   : > { %s11397_s13 = smov %s11388_s7 }
 0x694   : > { %s11399_s18 = smov %s11392_s23 }
 0x698   :  { %5301 = vsyncpa [#allocation5], 1 }
 0x699   :  { %5303 = vsyncpa [#allocation5 + $0x1], 1 }
 0x69a   :  { %5304 = vsyncpa [#allocation8], 1 }
 0x69b   :  { %5306 = vsyncpa [#allocation8 + $0x1], 1 }
 0x69c   :  { %5307 = vsyncpa [#allocation6], 1 }
 0x69d   :  { %5309 = vsyncpa [#allocation6 + $0x1], 1 }

</bundles_post_ra>
